<compile_context>
chip_gen: v6e
topology: v6e:2x2x1
jax: 0.10.0
libtpu: 0.0.40
codegen_flags: <defaults>
</compile_context>

<pallas_src>
import functools

import jax
import jax.numpy as jnp
from jax.experimental import pallas as pl
from jax.experimental.pallas import tpu as pltpu

POOL_OUT = 7  # roi_pool output_size (7, 7), same as the reference module


# ---------------------------- Pallas kernels ----------------------------

def _gemm_bias_act_kernel(w_ref, x_ref, b_ref, o_ref, *, relu):
    # (Cout, K) @ (K, TM) on the MXU, bf16 operands, f32 accumulate + epilogue.
    y = jnp.dot(w_ref[...], x_ref[...], preferred_element_type=jnp.float32)
    y = y + b_ref[...]                       # (Cout, 1) broadcast over lanes
    if relu:
        y = jnp.maximum(y, 0.0)
    o_ref[...] = y


def gemm_bias_act(w, x, b, *, relu):
    """w: (Cout, K) bf16, x: (K, M) bf16, b: (Cout, 1) f32 -> (Cout, M) f32."""
    Cout, K = w.shape
    M = x.shape[1]
    TM = 256 if M % 256 == 0 else M          # split columns across TCs on v7x
    grid = (M // TM,)
    return pl.pallas_call(
        functools.partial(_gemm_bias_act_kernel, relu=relu),
        out_shape=jax.ShapeDtypeStruct((Cout, M), jnp.float32),
        grid=grid,
        in_specs=[pl.BlockSpec((Cout, K), lambda j: (0, 0)),
                  pl.BlockSpec((K, TM), lambda j: (0, j)),
                  pl.BlockSpec((Cout, 1), lambda j: (0, 0))],
        out_specs=pl.BlockSpec((Cout, TM), lambda j: (0, j)),
        compiler_params=pltpu.CompilerParams(
            dimension_semantics=("parallel",)),
    )(w, x, b)


def _maxpool_kernel(x_ref, o_ref):
    # x: (4, C, M) window corners stacked; out: (C, M) lane-dense.
    o_ref[...] = jnp.maximum(jnp.maximum(x_ref[0], x_ref[1]),
                             jnp.maximum(x_ref[2], x_ref[3]))


def maxpool2x2_cf(x):
    """(C, N, H, W) -> (C, N, H//2, W//2), 2x2 window / stride 2."""
    C, N, H, W = x.shape
    Ho, Wo = H // 2, W // 2
    M = N * Ho * Wo
    corners = jnp.stack([
        x[:, :, 0::2, 0::2].reshape(C, M),
        x[:, :, 0::2, 1::2].reshape(C, M),
        x[:, :, 1::2, 0::2].reshape(C, M),
        x[:, :, 1::2, 1::2].reshape(C, M)], axis=0)       # (4, C, M)
    out = pl.pallas_call(
        _maxpool_kernel,
        out_shape=jax.ShapeDtypeStruct((C, M), jnp.float32),
        grid=(1,),
        in_specs=[pl.BlockSpec((4, C, M), lambda i: (0, 0, 0))],
        out_specs=pl.BlockSpec((C, M), lambda i: (0, 0)),
    )(corners)
    return out.reshape(C, N, Ho, Wo)


def _roi_tail_kernel(featx_ref, maskx_ref, seg_ref,
                     w1_ref, b1_ref, w2_ref, b2_ref, w3_ref, b3_ref, o_ref):
    """Fused: roi max-pool -> (flatten) -> fc1 -> fc2 -> fc3 -> per-image sum.

    featx : (HW, 1, 49*Cf) f32   feature value for flat-feature column j at hw
    maskx : (HW, Rt, 49*Cf) bf16 bin membership (0/1) for flat-feature col j
    seg   : (numImages, Rt) f32  ROI -> image assignment (segment sum matrix)
    out   : (numImages, numROIs) f32, written exactly once (narrow store once).
    """
    HW = maskx_ref.shape[0]
    Rt = maskx_ref.shape[1]
    P = maskx_ref.shape[2]

    # Running max over spatial positions with an additive mask (no 3-D
    # broadcast materialized, no select): mask==1 -> +0, mask==0 -> -1e30.
    pooled = jnp.full((Rt, P), -1e30, dtype=jnp.float32)
    for hw in range(HW):                                   # static unroll
        m = maskx_ref[hw].astype(jnp.float32)              # (Rt, P)
        pooled = jnp.maximum(pooled, featx_ref[hw] + (m - 1.0) * 1e30)
    # Empty bin -> 0 (torchvision roi_pool). Features are post-ReLU (>= 0), so
    # clamping at 0 is exact for non-empty bins and zeroes empty ones.
    flat = jnp.maximum(pooled, 0.0).astype(jnp.bfloat16)   # (Rt, 49*Cf)

    h = jnp.dot(flat, w1_ref[...], preferred_element_type=jnp.float32)
    h = jnp.maximum(h + b1_ref[...], 0.0).astype(jnp.bfloat16)
    h = jnp.dot(h, w2_ref[...], preferred_element_type=jnp.float32)
    h = jnp.maximum(h + b2_ref[...], 0.0).astype(jnp.bfloat16)
    y = jnp.dot(h, w3_ref[...], preferred_element_type=jnp.float32) + b3_ref[...]
    # torch.sum(torch.stack(fmriPieces), dim=0) per image, batched as a matmul.
    o_ref[...] = jnp.dot(seg_ref[...], y, preferred_element_type=jnp.float32)


def roi_tail(featx, maskx, seg, prep):
    n_img = seg.shape[0]
    num_rois = prep["w_fc3"].shape[1]
    full = lambda shp: pl.BlockSpec(shp, lambda i: (0,) * len(shp))
    return pl.pallas_call(
        _roi_tail_kernel,
        out_shape=jax.ShapeDtypeStruct((n_img, num_rois), jnp.float32),
        grid=(1,),
        in_specs=[full(featx.shape), full(maskx.shape), full(seg.shape),
                  full(prep["w_fc1"].shape), full(prep["b_fc1"].shape),
                  full(prep["w_fc2"].shape), full(prep["b_fc2"].shape),
                  full(prep["w_fc3"].shape), full(prep["b_fc3"].shape)],
        out_specs=full((n_img, num_rois)),
    )(featx, maskx, seg, prep["w_fc1"], prep["b_fc1"],
      prep["w_fc2"], prep["b_fc2"], prep["w_fc3"], prep["b_fc3"])


# ------------------------------ JAX glue ------------------------------

def conv3x3_relu_cf(x, wm, b):
    """3x3 conv, padding=1, stride=1, + ReLU, channels-first-flattened GEMM.

    x: (Cin, N, H, W) f32; wm: (Cout, Cin*9) bf16; b: (Cout, 1) f32.
    Returns (Cout, N, H, W) f32 -- already channel-first, no transpose needed.
    """
    Cin, N, H, W = x.shape
    Cout = wm.shape[0]
    xp = jnp.pad(x, ((0, 0), (0, 0), (1, 1), (1, 1)))
    cols = [xp[:, :, dy:dy + H, dx:dx + W] for dy in range(3) for dx in range(3)]
    patches = (jnp.stack(cols, axis=1)                      # (Cin, 9, N, H, W)
               .reshape(Cin * 9, N * H * W)
               .astype(jnp.bfloat16))                       # im2col, (Cin,ky,kx) rows
    y = gemm_bias_act(wm, patches, b, relu=True)            # (Cout, N*H*W) f32
    return y.reshape(Cout, N, H, W)


def get_mapped_boxes(xyxyn):
    """getMappedBoundingBox: normalized xyxy -> 7-grid cell coords."""
    sx = jnp.floor(xyxyn[:, 0] * 7.0)
    sy = jnp.floor(xyxyn[:, 1] * 7.0)
    ex = jnp.ceil(xyxyn[:, 2] * 7.0)
    ey = jnp.ceil(xyxyn[:, 3] * 7.0)
    return jnp.stack([sx, sy, ex, ey], axis=1)


def roi_pool_masks(boxes, H, W, out=POOL_OUT):
    """torchvision roi_pool (spatial_scale=1) bin masks: (R, out*out, H*W)."""
    x1 = jnp.round(boxes[:, 0])
    y1 = jnp.round(boxes[:, 1])
    x2 = jnp.round(boxes[:, 2])
    y2 = jnp.round(boxes[:, 3])
    roi_w = jnp.maximum(x2 - x1 + 1.0, 1.0)
    roi_h = jnp.maximum(y2 - y1 + 1.0, 1.0)
    bin_h = roi_h / out
    bin_w = roi_w / out
    g = jnp.arange(out, dtype=jnp.float32)
    hstart = jnp.clip(jnp.floor(g[None, :] * bin_h[:, None]) + y1[:, None], 0, H)
    hend = jnp.clip(jnp.ceil((g[None, :] + 1.0) * bin_h[:, None]) + y1[:, None], 0, H)
    wstart = jnp.clip(jnp.floor(g[None, :] * bin_w[:, None]) + x1[:, None], 0, W)
    wend = jnp.clip(jnp.ceil((g[None, :] + 1.0) * bin_w[:, None]) + x1[:, None], 0, W)
    ys = jnp.arange(H, dtype=jnp.float32)
    xs = jnp.arange(W, dtype=jnp.float32)
    my = (ys[None, None, :] >= hstart[:, :, None]) & (ys[None, None, :] < hend[:, :, None])
    mx = (xs[None, None, :] >= wstart[:, :, None]) & (xs[None, None, :] < wend[:, :, None])
    mask = my[:, :, None, :, None] & mx[:, None, :, None, :]   # (R,7,7,H,W)
    return mask.reshape(-1, out * out, H * W).astype(jnp.float32)


@jax.jit
def _forward_impl(img, boxes_tuple, prep):
    """Batched forward over all images/ROIs; returns (numKeptImages, numROIs)."""
    x = jnp.transpose(img, (1, 0, 2, 3))                     # (Cin, N, H, W)
    x = conv3x3_relu_cf(x, prep["w_c1"], prep["b_c1"])
    x = conv3x3_relu_cf(x, prep["w_c2"], prep["b_c2"])
    x = maxpool2x2_cf(x)
    x = conv3x3_relu_cf(x, prep["w_c3"], prep["b_c3"])       # (Cf, N, Hf, Wf)
    Cf, _, Hf, Wf = x.shape
    HW = Hf * Wf
    nbins = POOL_OUT * POOL_OUT

    # Mirrors the reference exactly: ops.roi_pool(convFeatures, [boundingBoxData])
    # assigns every box to batch index 0, so pooling always reads image 0's features.
    feat0 = x[:, 0].reshape(Cf, HW)                          # (Cf, HW)
    # Flat-feature-expanded views so the fused kernel needs no in-kernel reshape:
    # column j = bin*Cf + c  (matches the permuted fc1 weight rows).
    featx = jnp.tile(feat0.T, (1, nbins))[:, None, :]        # (HW, 1, nbins*Cf)

    masks_list, rs = [], []
    for b in boxes_tuple:
        boxes = get_mapped_boxes(b)
        masks_list.append(roi_pool_masks(boxes, Hf, Wf))     # (R, 49, HW)
        rs.append(b.shape[0])
    masks = jnp.concatenate(masks_list, axis=0)              # (Rt, 49, HW)
    rt = masks.shape[0]
    maskx = jnp.repeat(masks.transpose(2, 0, 1), Cf, axis=2).astype(jnp.bfloat16)

    seg_rows, off = [], 0                                    # ROI -> image map
    for r in rs:
        seg_rows.append(jnp.zeros((rt,), jnp.float32).at[off:off + r].set(1.0))
        off += r
    seg = jnp.stack(seg_rows, axis=0)                        # (numImages, Rt)

    return roi_tail(featx, maskx, seg, prep)                 # (numImages, numROIs)


def roi_vgg_yolo_forward(img, xyxyn_per_image, prep):
    """roiVGGYolo.forward: returns (stacked fMRIs, indices)."""
    kept = [b for b in xyxyn_per_image if b.shape[0] > 0]
    indices = list(range(len(kept)))
    fmris = _forward_impl(img, tuple(kept), prep)
    return fmris, indices


# ------------------------------ parameters ------------------------------

def init_params(key, c_feat, mlp_in, h1, h2, num_rois):
    ks = jax.random.split(key, 12)

    def nrm(k, shape, scale=0.05):
        return scale * jax.random.normal(k, shape, dtype=jnp.float32)

    return dict(
        w_c1=nrm(ks[0], (8, 3, 3, 3)), b_c1=nrm(ks[1], (8,)),
        w_c2=nrm(ks[2], (8, 8, 3, 3)), b_c2=nrm(ks[3], (8,)),
        w_c3=nrm(ks[4], (c_feat, 8, 3, 3)), b_c3=nrm(ks[5], (c_feat,)),
        w_fc1=nrm(ks[6], (mlp_in, h1)), b_fc1=nrm(ks[7], (h1,)),
        w_fc2=nrm(ks[8], (h1, h2)), b_fc2=nrm(ks[9], (h2,)),
        w_fc3=nrm(ks[10], (h2, num_rois)), b_fc3=nrm(ks[11], (num_rois,)),
    )


def prepare_params(p):
    """One-time layout/dtype prep: bf16 GEMM weights, conv weight flatten,
    fc1 row permutation (torch.flatten (C,7,7) order -> pooled (bin, c) order)."""
    prep = {}
    for i in (1, 2, 3):
        w, b = p[f"w_c{i}"], p[f"b_c{i}"]
        cout = w.shape[0]
        prep[f"w_c{i}"] = w.reshape(cout, -1).astype(jnp.bfloat16)
        prep[f"b_c{i}"] = b.reshape(cout, 1).astype(jnp.float32)
    nbins = POOL_OUT * POOL_OUT
    w1 = p["w_fc1"]
    cf, h1 = w1.shape[0] // nbins, w1.shape[1]
    prep["w_fc1"] = (w1.reshape(cf, nbins, h1).transpose(1, 0, 2)
                     .reshape(cf * nbins, h1).astype(jnp.bfloat16))
    prep["b_fc1"] = p["b_fc1"].reshape(1, -1).astype(jnp.float32)
    prep["w_fc2"] = p["w_fc2"].astype(jnp.bfloat16)
    prep["b_fc2"] = p["b_fc2"].reshape(1, -1).astype(jnp.float32)
    prep["w_fc3"] = p["w_fc3"].astype(jnp.bfloat16)
    prep["b_fc3"] = p["b_fc3"].reshape(1, -1).astype(jnp.float32)
    return prep


if __name__ == "__main__":
    key = jax.random.PRNGKey(0)
    k_img, k_par, k_b0, k_b1 = jax.random.split(key, 4)

    N, CIN, H, W = 2, 3, 16, 16
    C_FEAT = 16
    NUM_ROIS = 10
    MLP_IN = C_FEAT * POOL_OUT * POOL_OUT     # 784 (scaled analog of 25088)
    H1, H2 = 128, 64                          # scaled analog of 4096, 1024

    img = jax.random.normal(k_img, (N, CIN, H, W), dtype=jnp.float32)
    params = init_params(k_par, C_FEAT, MLP_IN, H1, H2, NUM_ROIS)
    prep = prepare_params(params)

    # TODO(synk): YOLOv8 .predict() + PIL.Image.open/tsfms preprocessing have no
    # Pallas equivalent; stand in deterministic synthetic normalized xyxy boxes.
    def synth_boxes(k, r):
        u = jax.random.uniform(k, (r, 4), dtype=jnp.float32)
        x1 = 0.5 * u[:, 0]
        y1 = 0.5 * u[:, 1]
        x2 = jnp.minimum(x1 + 0.2 + 0.3 * u[:, 2], 1.0)
        y2 = jnp.minimum(y1 + 0.2 + 0.3 * u[:, 3], 1.0)
        return jnp.stack([x1, y1, x2, y2], axis=1)

    boxes_per_image = [synth_boxes(k_b0, 3), synth_boxes(k_b1, 2)]

    fmris, indices = roi_vgg_yolo_forward(img, boxes_per_image, prep)
    fmris = jax.block_until_ready(fmris)
    assert fmris.shape == (2, NUM_ROIS), fmris.shape
    assert bool(jnp.all(jnp.isfinite(fmris)))
    assert indices == [0, 1], indices
    print("KERNEL_OK")
</pallas_src>

<mosaic_0001>
module attributes {stable_mosaic.version = 11 : i64} {
  func.func @_gemm_bias_act_kernel(%arg0: i32, %arg1: memref<8x27xbf16, #tpu.memory_space<vmem>>, %arg2: memref<27x256xbf16, #tpu.memory_space<vmem>>, %arg3: memref<8x1xf32, #tpu.memory_space<vmem>>, %arg4: memref<8x256xf32, #tpu.memory_space<vmem>>) attributes {dimension_semantics = [#tpu.dimension_semantics<parallel>], iteration_bounds = array<i64: 2>, scalar_prefetch = 0 : i64, scratch_operands = 0 : i64, tpu.core_type = #tpu.core_type<tc>, window_params = [{pipeline_mode = #tpu.pipeline_mode<synchronous>, transform_indices = @transform_0, window_bounds = array<i64: 8, 27>}, {transform_indices = @transform_1, window_bounds = array<i64: 27, 256>}, {pipeline_mode = #tpu.pipeline_mode<synchronous>, transform_indices = @transform_2, window_bounds = array<i64: 8, 1>}, {transform_indices = @transform_3, window_bounds = array<i64: 8, 256>}]} {
    %c0 = arith.constant 0 : index
    %c0_0 = arith.constant 0 : index
    %0 = vector.load %arg1[%c0, %c0_0] : memref<8x27xbf16, #tpu.memory_space<vmem>>, vector<8x27xbf16>
    %c0_1 = arith.constant 0 : index
    %c0_2 = arith.constant 0 : index
    %1 = vector.load %arg2[%c0_1, %c0_2] : memref<27x256xbf16, #tpu.memory_space<vmem>>, vector<27x256xbf16>
    %cst = arith.constant dense<0.000000e+00> : vector<8x256xf32>
    %2 = tpu.matmul %0, %1, %cst {dimension_numbers = #tpu.dot_dimension_numbers<[1], [0], [0], [1], [0, 0, 1, 1], [], []>} : vector<8x27xbf16>, vector<27x256xbf16>, vector<8x256xf32> -> vector<8x256xf32>
    %c0_3 = arith.constant 0 : index
    %c0_4 = arith.constant 0 : index
    %3 = vector.load %arg3[%c0_3, %c0_4] : memref<8x1xf32, #tpu.memory_space<vmem>>, vector<8x1xf32>
    %4 = vector.broadcast %3 : vector<8x1xf32> to vector<8x256xf32>
    %5 = arith.addf %2, %4 : vector<8x256xf32>
    %cst_5 = arith.constant 0.000000e+00 : f32
    %6 = vector.broadcast %cst_5 : f32 to vector<8x256xf32>
    %7 = arith.maximumf %5, %6 : vector<8x256xf32>
    %c0_6 = arith.constant 0 : index
    %c0_7 = arith.constant 0 : index
    %8 = vector.load %arg4[%c0_6, %c0_7] : memref<8x256xf32, #tpu.memory_space<vmem>>, vector<8x256xf32>
    tpu.vector_store %arg4[%c0_6, %c0_7], %7 {strides = array<i32>} : memref<8x256xf32, #tpu.memory_space<vmem>>, vector<8x256xf32>,
    return
  }
  func.func @transform_0(%arg0: i32) -> (i32, i32) {
    %c0_i32 = arith.constant 0 : i32
    %c0_i32_0 = arith.constant 0 : i32
    %c0_i32_1 = arith.constant 0 : i32
    return %c0_i32, %c0_i32_0 : i32, i32
  }
  func.func @transform_1(%arg0: i32) -> (i32, i32) {
    %c0_i32 = arith.constant 0 : i32
    %c0_i32_0 = arith.constant 0 : i32
    return %c0_i32, %arg0 : i32, i32
  }
  func.func @transform_2(%arg0: i32) -> (i32, i32) {
    %c0_i32 = arith.constant 0 : i32
    %c0_i32_0 = arith.constant 0 : i32
    %c0_i32_1 = arith.constant 0 : i32
    return %c0_i32, %c0_i32_0 : i32, i32
  }
  func.func @transform_3(%arg0: i32) -> (i32, i32) {
    %c0_i32 = arith.constant 0 : i32
    %c0_i32_0 = arith.constant 0 : i32
    return %c0_i32, %arg0 : i32, i32
  }
}

module attributes {stable_mosaic.version = 11 : i64} {
  func.func @_gemm_bias_act_kernel(%arg0: i32, %arg1: memref<8x72xbf16, #tpu.memory_space<vmem>>, %arg2: memref<72x256xbf16, #tpu.memory_space<vmem>>, %arg3: memref<8x1xf32, #tpu.memory_space<vmem>>, %arg4: memref<8x256xf32, #tpu.memory_space<vmem>>) attributes {dimension_semantics = [#tpu.dimension_semantics<parallel>], iteration_bounds = array<i64: 2>, scalar_prefetch = 0 : i64, scratch_operands = 0 : i64, tpu.core_type = #tpu.core_type<tc>, window_params = [{pipeline_mode = #tpu.pipeline_mode<synchronous>, transform_indices = @transform_0, window_bounds = array<i64: 8, 72>}, {transform_indices = @transform_1, window_bounds = array<i64: 72, 256>}, {pipeline_mode = #tpu.pipeline_mode<synchronous>, transform_indices = @transform_2, window_bounds = array<i64: 8, 1>}, {transform_indices = @transform_3, window_bounds = array<i64: 8, 256>}]} {
    %c0 = arith.constant 0 : index
    %c0_0 = arith.constant 0 : index
    %0 = vector.load %arg1[%c0, %c0_0] : memref<8x72xbf16, #tpu.memory_space<vmem>>, vector<8x72xbf16>
    %c0_1 = arith.constant 0 : index
    %c0_2 = arith.constant 0 : index
    %1 = vector.load %arg2[%c0_1, %c0_2] : memref<72x256xbf16, #tpu.memory_space<vmem>>, vector<72x256xbf16>
    %cst = arith.constant dense<0.000000e+00> : vector<8x256xf32>
    %2 = tpu.matmul %0, %1, %cst {dimension_numbers = #tpu.dot_dimension_numbers<[1], [0], [0], [1], [0, 0, 1, 1], [], []>} : vector<8x72xbf16>, vector<72x256xbf16>, vector<8x256xf32> -> vector<8x256xf32>
    %c0_3 = arith.constant 0 : index
    %c0_4 = arith.constant 0 : index
    %3 = vector.load %arg3[%c0_3, %c0_4] : memref<8x1xf32, #tpu.memory_space<vmem>>, vector<8x1xf32>
    %4 = vector.broadcast %3 : vector<8x1xf32> to vector<8x256xf32>
    %5 = arith.addf %2, %4 : vector<8x256xf32>
    %cst_5 = arith.constant 0.000000e+00 : f32
    %6 = vector.broadcast %cst_5 : f32 to vector<8x256xf32>
    %7 = arith.maximumf %5, %6 : vector<8x256xf32>
    %c0_6 = arith.constant 0 : index
    %c0_7 = arith.constant 0 : index
    %8 = vector.load %arg4[%c0_6, %c0_7] : memref<8x256xf32, #tpu.memory_space<vmem>>, vector<8x256xf32>
    tpu.vector_store %arg4[%c0_6, %c0_7], %7 {strides = array<i32>} : memref<8x256xf32, #tpu.memory_space<vmem>>, vector<8x256xf32>,
    return
  }
  func.func @transform_0(%arg0: i32) -> (i32, i32) {
    %c0_i32 = arith.constant 0 : i32
    %c0_i32_0 = arith.constant 0 : i32
    %c0_i32_1 = arith.constant 0 : i32
    return %c0_i32, %c0_i32_0 : i32, i32
  }
  func.func @transform_1(%arg0: i32) -> (i32, i32) {
    %c0_i32 = arith.constant 0 : i32
    %c0_i32_0 = arith.constant 0 : i32
    return %c0_i32, %arg0 : i32, i32
  }
  func.func @transform_2(%arg0: i32) -> (i32, i32) {
    %c0_i32 = arith.constant 0 : i32
    %c0_i32_0 = arith.constant 0 : i32
    %c0_i32_1 = arith.constant 0 : i32
    return %c0_i32, %c0_i32_0 : i32, i32
  }
  func.func @transform_3(%arg0: i32) -> (i32, i32) {
    %c0_i32 = arith.constant 0 : i32
    %c0_i32_0 = arith.constant 0 : i32
    return %c0_i32, %arg0 : i32, i32
  }
}

module attributes {stable_mosaic.version = 11 : i64} {
  func.func @_maxpool_kernel(%arg0: i32, %arg1: memref<4x8x128xf32, #tpu.memory_space<vmem>>, %arg2: memref<8x128xf32, #tpu.memory_space<vmem>>) attributes {dimension_semantics = [#tpu.dimension_semantics<arbitrary>], iteration_bounds = array<i64: 1>, scalar_prefetch = 0 : i64, scratch_operands = 0 : i64, tpu.core_type = #tpu.core_type<tc>, window_params = [{pipeline_mode = #tpu.pipeline_mode<synchronous>, transform_indices = @transform_0, window_bounds = array<i64: 4, 8, 128>}, {pipeline_mode = #tpu.pipeline_mode<synchronous>, transform_indices = @transform_1, window_bounds = array<i64: 8, 128>}]} {
    %c0 = arith.constant 0 : index
    %c0_0 = arith.constant 0 : index
    %c0_1 = arith.constant 0 : index
    %0 = vector.load %arg1[%c0, %c0_0, %c0_1] : memref<4x8x128xf32, #tpu.memory_space<vmem>>, vector<1x8x128xf32>
    %1 = vector.shape_cast %0 : vector<1x8x128xf32> to vector<8x128xf32>
    %c1 = arith.constant 1 : index
    %c0_2 = arith.constant 0 : index
    %c0_3 = arith.constant 0 : index
    %2 = vector.load %arg1[%c1, %c0_2, %c0_3] : memref<4x8x128xf32, #tpu.memory_space<vmem>>, vector<1x8x128xf32>
    %3 = vector.shape_cast %2 : vector<1x8x128xf32> to vector<8x128xf32>
    %4 = arith.maximumf %1, %3 : vector<8x128xf32>
    %c2 = arith.constant 2 : index
    %c0_4 = arith.constant 0 : index
    %c0_5 = arith.constant 0 : index
    %5 = vector.load %arg1[%c2, %c0_4, %c0_5] : memref<4x8x128xf32, #tpu.memory_space<vmem>>, vector<1x8x128xf32>
    %6 = vector.shape_cast %5 : vector<1x8x128xf32> to vector<8x128xf32>
    %c3 = arith.constant 3 : index
    %c0_6 = arith.constant 0 : index
    %c0_7 = arith.constant 0 : index
    %7 = vector.load %arg1[%c3, %c0_6, %c0_7] : memref<4x8x128xf32, #tpu.memory_space<vmem>>, vector<1x8x128xf32>
    %8 = vector.shape_cast %7 : vector<1x8x128xf32> to vector<8x128xf32>
    %9 = arith.maximumf %6, %8 : vector<8x128xf32>
    %10 = arith.maximumf %4, %9 : vector<8x128xf32>
    %c0_8 = arith.constant 0 : index
    %c0_9 = arith.constant 0 : index
    %11 = vector.load %arg2[%c0_8, %c0_9] : memref<8x128xf32, #tpu.memory_space<vmem>>, vector<8x128xf32>
    tpu.vector_store %arg2[%c0_8, %c0_9], %10 {strides = array<i32>} : memref<8x128xf32, #tpu.memory_space<vmem>>, vector<8x128xf32>,
    return
  }
  func.func @transform_0(%arg0: i32) -> (i32, i32, i32) {
    %c0_i32 = arith.constant 0 : i32
    %c0_i32_0 = arith.constant 0 : i32
    %c0_i32_1 = arith.constant 0 : i32
    %c0_i32_2 = arith.constant 0 : i32
    return %c0_i32, %c0_i32_0, %c0_i32_1 : i32, i32, i32
  }
  func.func @transform_1(%arg0: i32) -> (i32, i32) {
    %c0_i32 = arith.constant 0 : i32
    %c0_i32_0 = arith.constant 0 : i32
    %c0_i32_1 = arith.constant 0 : i32
    return %c0_i32, %c0_i32_0 : i32, i32
  }
}

module attributes {stable_mosaic.version = 11 : i64} {
  func.func @_gemm_bias_act_kernel(%arg0: i32, %arg1: memref<16x72xbf16, #tpu.memory_space<vmem>>, %arg2: memref<72x128xbf16, #tpu.memory_space<vmem>>, %arg3: memref<16x1xf32, #tpu.memory_space<vmem>>, %arg4: memref<16x128xf32, #tpu.memory_space<vmem>>) attributes {dimension_semantics = [#tpu.dimension_semantics<parallel>], iteration_bounds = array<i64: 1>, scalar_prefetch = 0 : i64, scratch_operands = 0 : i64, tpu.core_type = #tpu.core_type<tc>, window_params = [{pipeline_mode = #tpu.pipeline_mode<synchronous>, transform_indices = @transform_0, window_bounds = array<i64: 16, 72>}, {transform_indices = @transform_1, window_bounds = array<i64: 72, 128>}, {pipeline_mode = #tpu.pipeline_mode<synchronous>, transform_indices = @transform_2, window_bounds = array<i64: 16, 1>}, {transform_indices = @transform_3, window_bounds = array<i64: 16, 128>}]} {
    %c0 = arith.constant 0 : index
    %c0_0 = arith.constant 0 : index
    %0 = vector.load %arg1[%c0, %c0_0] : memref<16x72xbf16, #tpu.memory_space<vmem>>, vector<16x72xbf16>
    %c0_1 = arith.constant 0 : index
    %c0_2 = arith.constant 0 : index
    %1 = vector.load %arg2[%c0_1, %c0_2] : memref<72x128xbf16, #tpu.memory_space<vmem>>, vector<72x128xbf16>
    %cst = arith.constant dense<0.000000e+00> : vector<16x128xf32>
    %2 = tpu.matmul %0, %1, %cst {dimension_numbers = #tpu.dot_dimension_numbers<[1], [0], [0], [1], [0, 0, 1, 1], [], []>} : vector<16x72xbf16>, vector<72x128xbf16>, vector<16x128xf32> -> vector<16x128xf32>
    %c0_3 = arith.constant 0 : index
    %c0_4 = arith.constant 0 : index
    %3 = vector.load %arg3[%c0_3, %c0_4] : memref<16x1xf32, #tpu.memory_space<vmem>>, vector<16x1xf32>
    %4 = vector.broadcast %3 : vector<16x1xf32> to vector<16x128xf32>
    %5 = arith.addf %2, %4 : vector<16x128xf32>
    %cst_5 = arith.constant 0.000000e+00 : f32
    %6 = vector.broadcast %cst_5 : f32 to vector<16x128xf32>
    %7 = arith.maximumf %5, %6 : vector<16x128xf32>
    %c0_6 = arith.constant 0 : index
    %c0_7 = arith.constant 0 : index
    %8 = vector.load %arg4[%c0_6, %c0_7] : memref<16x128xf32, #tpu.memory_space<vmem>>, vector<16x128xf32>
    tpu.vector_store %arg4[%c0_6, %c0_7], %7 {strides = array<i32>} : memref<16x128xf32, #tpu.memory_space<vmem>>, vector<16x128xf32>,
    return
  }
  func.func @transform_0(%arg0: i32) -> (i32, i32) {
    %c0_i32 = arith.constant 0 : i32
    %c0_i32_0 = arith.constant 0 : i32
    %c0_i32_1 = arith.constant 0 : i32
    return %c0_i32, %c0_i32_0 : i32, i32
  }
  func.func @transform_1(%arg0: i32) -> (i32, i32) {
    %c0_i32 = arith.constant 0 : i32
    %c0_i32_0 = arith.constant 0 : i32
    return %c0_i32, %arg0 : i32, i32
  }
  func.func @transform_2(%arg0: i32) -> (i32, i32) {
    %c0_i32 = arith.constant 0 : i32
    %c0_i32_0 = arith.constant 0 : i32
    %c0_i32_1 = arith.constant 0 : i32
    return %c0_i32, %c0_i32_0 : i32, i32
  }
  func.func @transform_3(%arg0: i32) -> (i32, i32) {
    %c0_i32 = arith.constant 0 : i32
    %c0_i32_0 = arith.constant 0 : i32
    return %c0_i32, %arg0 : i32, i32
  }
}

module attributes {stable_mosaic.version = 11 : i64} {
  func.func @_roi_tail_kernel(%arg0: i32, %arg1: memref<64x1x784xf32, #tpu.memory_space<vmem>>, %arg2: memref<64x5x784xbf16, #tpu.memory_space<vmem>>, %arg3: memref<2x5xf32, #tpu.memory_space<vmem>>, %arg4: memref<784x128xbf16, #tpu.memory_space<vmem>>, %arg5: memref<1x128xf32, #tpu.memory_space<vmem>>, %arg6: memref<128x64xbf16, #tpu.memory_space<vmem>>, %arg7: memref<1x64xf32, #tpu.memory_space<vmem>>, %arg8: memref<64x10xbf16, #tpu.memory_space<vmem>>, %arg9: memref<1x10xf32, #tpu.memory_space<vmem>>, %arg10: memref<2x10xf32, #tpu.memory_space<vmem>>) attributes {dimension_semantics = [#tpu.dimension_semantics<arbitrary>], iteration_bounds = array<i64: 1>, scalar_prefetch = 0 : i64, scratch_operands = 0 : i64, tpu.core_type = #tpu.core_type<tc>, window_params = [{pipeline_mode = #tpu.pipeline_mode<synchronous>, transform_indices = @transform_0, window_bounds = array<i64: 64, 1, 784>}, {pipeline_mode = #tpu.pipeline_mode<synchronous>, transform_indices = @transform_1, window_bounds = array<i64: 64, 5, 784>}, {pipeline_mode = #tpu.pipeline_mode<synchronous>, transform_indices = @transform_2, window_bounds = array<i64: 2, 5>}, {pipeline_mode = #tpu.pipeline_mode<synchronous>, transform_indices = @transform_3, window_bounds = array<i64: 784, 128>}, {pipeline_mode = #tpu.pipeline_mode<synchronous>, transform_indices = @transform_4, window_bounds = array<i64: 1, 128>}, {pipeline_mode = #tpu.pipeline_mode<synchronous>, transform_indices = @transform_5, window_bounds = array<i64: 128, 64>}, {pipeline_mode = #tpu.pipeline_mode<synchronous>, transform_indices = @transform_6, window_bounds = array<i64: 1, 64>}, {pipeline_mode = #tpu.pipeline_mode<synchronous>, transform_indices = @transform_7, window_bounds = array<i64: 64, 10>}, {pipeline_mode = #tpu.pipeline_mode<synchronous>, transform_indices = @transform_8, window_bounds = array<i64: 1, 10>}, {pipeline_mode = #tpu.pipeline_mode<synchronous>, transform_indices = @transform_9, window_bounds = array<i64: 2, 10>}]} {
    %cst = arith.constant -1.000000e+30 : f32
    %0 = vector.broadcast %cst : f32 to vector<5x784xf32>
    %c0 = arith.constant 0 : index
    %c0_0 = arith.constant 0 : index
    %c0_1 = arith.constant 0 : index
    %1 = vector.load %arg2[%c0, %c0_0, %c0_1] : memref<64x5x784xbf16, #tpu.memory_space<vmem>>, vector<1x5x784xbf16>
    %2 = vector.shape_cast %1 : vector<1x5x784xbf16> to vector<5x784xbf16>
    %3 = arith.extf %2 : vector<5x784xbf16> to vector<5x784xf32>
    %c0_2 = arith.constant 0 : index
    %c0_3 = arith.constant 0 : index
    %c0_4 = arith.constant 0 : index
    %4 = vector.load %arg1[%c0_2, %c0_3, %c0_4] : memref<64x1x784xf32, #tpu.memory_space<vmem>>, vector<1x1x784xf32>
    %5 = vector.shape_cast %4 : vector<1x1x784xf32> to vector<1x784xf32>
    %cst_5 = arith.constant 1.000000e+00 : f32
    %6 = vector.broadcast %cst_5 : f32 to vector<5x784xf32>
    %7 = arith.subf %3, %6 : vector<5x784xf32>
    %cst_6 = arith.constant 1.000000e+30 : f32
    %8 = vector.broadcast %cst_6 : f32 to vector<5x784xf32>
    %9 = arith.mulf %7, %8 : vector<5x784xf32>
    %10 = vector.broadcast %5 : vector<1x784xf32> to vector<5x784xf32>
    %11 = arith.addf %10, %9 : vector<5x784xf32>
    %12 = arith.maximumf %0, %11 : vector<5x784xf32>
    %c1 = arith.constant 1 : index
    %c0_7 = arith.constant 0 : index
    %c0_8 = arith.constant 0 : index
    %13 = vector.load %arg2[%c1, %c0_7, %c0_8] : memref<64x5x784xbf16, #tpu.memory_space<vmem>>, vector<1x5x784xbf16>
    %14 = vector.shape_cast %13 : vector<1x5x784xbf16> to vector<5x784xbf16>
    %15 = arith.extf %14 : vector<5x784xbf16> to vector<5x784xf32>
    %c1_9 = arith.constant 1 : index
    %c0_10 = arith.constant 0 : index
    %c0_11 = arith.constant 0 : index
    %16 = vector.load %arg1[%c1_9, %c0_10, %c0_11] : memref<64x1x784xf32, #tpu.memory_space<vmem>>, vector<1x1x784xf32>
    %17 = vector.shape_cast %16 : vector<1x1x784xf32> to vector<1x784xf32>
    %cst_12 = arith.constant 1.000000e+00 : f32
    %18 = vector.broadcast %cst_12 : f32 to vector<5x784xf32>
    %19 = arith.subf %15, %18 : vector<5x784xf32>
    %cst_13 = arith.constant 1.000000e+30 : f32
    %20 = vector.broadcast %cst_13 : f32 to vector<5x784xf32>
    %21 = arith.mulf %19, %20 : vector<5x784xf32>
    %22 = vector.broadcast %17 : vector<1x784xf32> to vector<5x784xf32>
    %23 = arith.addf %22, %21 : vector<5x784xf32>
    %24 = arith.maximumf %12, %23 : vector<5x784xf32>
    %c2 = arith.constant 2 : index
    %c0_14 = arith.constant 0 : index
    %c0_15 = arith.constant 0 : index
    %25 = vector.load %arg2[%c2, %c0_14, %c0_15] : memref<64x5x784xbf16, #tpu.memory_space<vmem>>, vector<1x5x784xbf16>
    %26 = vector.shape_cast %25 : vector<1x5x784xbf16> to vector<5x784xbf16>
    %27 = arith.extf %26 : vector<5x784xbf16> to vector<5x784xf32>
    %c2_16 = arith.constant 2 : index
    %c0_17 = arith.constant 0 : index
    %c0_18 = arith.constant 0 : index
    %28 = vector.load %arg1[%c2_16, %c0_17, %c0_18] : memref<64x1x784xf32, #tpu.memory_space<vmem>>, vector<1x1x784xf32>
    %29 = vector.shape_cast %28 : vector<1x1x784xf32> to vector<1x784xf32>
    %cst_19 = arith.constant 1.000000e+00 : f32
    %30 = vector.broadcast %cst_19 : f32 to vector<5x784xf32>
    %31 = arith.subf %27, %30 : vector<5x784xf32>
    %cst_20 = arith.constant 1.000000e+30 : f32
    %32 = vector.broadcast %cst_20 : f32 to vector<5x784xf32>
    %33 = arith.mulf %31, %32 : vector<5x784xf32>
    %34 = vector.broadcast %29 : vector<1x784xf32> to vector<5x784xf32>
    %35 = arith.addf %34, %33 : vector<5x784xf32>
    %36 = arith.maximumf %24, %35 : vector<5x784xf32>
    %c3 = arith.constant 3 : index
    %c0_21 = arith.constant 0 : index
    %c0_22 = arith.constant 0 : index
    %37 = vector.load %arg2[%c3, %c0_21, %c0_22] : memref<64x5x784xbf16, #tpu.memory_space<vmem>>, vector<1x5x784xbf16>
    %38 = vector.shape_cast %37 : vector<1x5x784xbf16> to vector<5x784xbf16>
    %39 = arith.extf %38 : vector<5x784xbf16> to vector<5x784xf32>
    %c3_23 = arith.constant 3 : index
    %c0_24 = arith.constant 0 : index
    %c0_25 = arith.constant 0 : index
    %40 = vector.load %arg1[%c3_23, %c0_24, %c0_25] : memref<64x1x784xf32, #tpu.memory_space<vmem>>, vector<1x1x784xf32>
    %41 = vector.shape_cast %40 : vector<1x1x784xf32> to vector<1x784xf32>
    %cst_26 = arith.constant 1.000000e+00 : f32
    %42 = vector.broadcast %cst_26 : f32 to vector<5x784xf32>
    %43 = arith.subf %39, %42 : vector<5x784xf32>
    %cst_27 = arith.constant 1.000000e+30 : f32
    %44 = vector.broadcast %cst_27 : f32 to vector<5x784xf32>
    %45 = arith.mulf %43, %44 : vector<5x784xf32>
    %46 = vector.broadcast %41 : vector<1x784xf32> to vector<5x784xf32>
    %47 = arith.addf %46, %45 : vector<5x784xf32>
    %48 = arith.maximumf %36, %47 : vector<5x784xf32>
    %c4 = arith.constant 4 : index
    %c0_28 = arith.constant 0 : index
    %c0_29 = arith.constant 0 : index
    %49 = vector.load %arg2[%c4, %c0_28, %c0_29] : memref<64x5x784xbf16, #tpu.memory_space<vmem>>, vector<1x5x784xbf16>
    %50 = vector.shape_cast %49 : vector<1x5x784xbf16> to vector<5x784xbf16>
    %51 = arith.extf %50 : vector<5x784xbf16> to vector<5x784xf32>
    %c4_30 = arith.constant 4 : index
    %c0_31 = arith.constant 0 : index
    %c0_32 = arith.constant 0 : index
    %52 = vector.load %arg1[%c4_30, %c0_31, %c0_32] : memref<64x1x784xf32, #tpu.memory_space<vmem>>, vector<1x1x784xf32>
    %53 = vector.shape_cast %52 : vector<1x1x784xf32> to vector<1x784xf32>
    %cst_33 = arith.constant 1.000000e+00 : f32
    %54 = vector.broadcast %cst_33 : f32 to vector<5x784xf32>
    %55 = arith.subf %51, %54 : vector<5x784xf32>
    %cst_34 = arith.constant 1.000000e+30 : f32
    %56 = vector.broadcast %cst_34 : f32 to vector<5x784xf32>
    %57 = arith.mulf %55, %56 : vector<5x784xf32>
    %58 = vector.broadcast %53 : vector<1x784xf32> to vector<5x784xf32>
    %59 = arith.addf %58, %57 : vector<5x784xf32>
    %60 = arith.maximumf %48, %59 : vector<5x784xf32>
    %c5 = arith.constant 5 : index
    %c0_35 = arith.constant 0 : index
    %c0_36 = arith.constant 0 : index
    %61 = vector.load %arg2[%c5, %c0_35, %c0_36] : memref<64x5x784xbf16, #tpu.memory_space<vmem>>, vector<1x5x784xbf16>
    %62 = vector.shape_cast %61 : vector<1x5x784xbf16> to vector<5x784xbf16>
    %63 = arith.extf %62 : vector<5x784xbf16> to vector<5x784xf32>
    %c5_37 = arith.constant 5 : index
    %c0_38 = arith.constant 0 : index
    %c0_39 = arith.constant 0 : index
    %64 = vector.load %arg1[%c5_37, %c0_38, %c0_39] : memref<64x1x784xf32, #tpu.memory_space<vmem>>, vector<1x1x784xf32>
    %65 = vector.shape_cast %64 : vector<1x1x784xf32> to vector<1x784xf32>
    %cst_40 = arith.constant 1.000000e+00 : f32
    %66 = vector.broadcast %cst_40 : f32 to vector<5x784xf32>
    %67 = arith.subf %63, %66 : vector<5x784xf32>
    %cst_41 = arith.constant 1.000000e+30 : f32
    %68 = vector.broadcast %cst_41 : f32 to vector<5x784xf32>
    %69 = arith.mulf %67, %68 : vector<5x784xf32>
    %70 = vector.broadcast %65 : vector<1x784xf32> to vector<5x784xf32>
    %71 = arith.addf %70, %69 : vector<5x784xf32>
    %72 = arith.maximumf %60, %71 : vector<5x784xf32>
    %c6 = arith.constant 6 : index
    %c0_42 = arith.constant 0 : index
    %c0_43 = arith.constant 0 : index
    %73 = vector.load %arg2[%c6, %c0_42, %c0_43] : memref<64x5x784xbf16, #tpu.memory_space<vmem>>, vector<1x5x784xbf16>
    %74 = vector.shape_cast %73 : vector<1x5x784xbf16> to vector<5x784xbf16>
    %75 = arith.extf %74 : vector<5x784xbf16> to vector<5x784xf32>
    %c6_44 = arith.constant 6 : index
    %c0_45 = arith.constant 0 : index
    %c0_46 = arith.constant 0 : index
    %76 = vector.load %arg1[%c6_44, %c0_45, %c0_46] : memref<64x1x784xf32, #tpu.memory_space<vmem>>, vector<1x1x784xf32>
    %77 = vector.shape_cast %76 : vector<1x1x784xf32> to vector<1x784xf32>
    %cst_47 = arith.constant 1.000000e+00 : f32
    %78 = vector.broadcast %cst_47 : f32 to vector<5x784xf32>
    %79 = arith.subf %75, %78 : vector<5x784xf32>
    %cst_48 = arith.constant 1.000000e+30 : f32
    %80 = vector.broadcast %cst_48 : f32 to vector<5x784xf32>
    %81 = arith.mulf %79, %80 : vector<5x784xf32>
    %82 = vector.broadcast %77 : vector<1x784xf32> to vector<5x784xf32>
    %83 = arith.addf %82, %81 : vector<5x784xf32>
    %84 = arith.maximumf %72, %83 : vector<5x784xf32>
    %c7 = arith.constant 7 : index
    %c0_49 = arith.constant 0 : index
    %c0_50 = arith.constant 0 : index
    %85 = vector.load %arg2[%c7, %c0_49, %c0_50] : memref<64x5x784xbf16, #tpu.memory_space<vmem>>, vector<1x5x784xbf16>
    %86 = vector.shape_cast %85 : vector<1x5x784xbf16> to vector<5x784xbf16>
    %87 = arith.extf %86 : vector<5x784xbf16> to vector<5x784xf32>
    %c7_51 = arith.constant 7 : index
    %c0_52 = arith.constant 0 : index
    %c0_53 = arith.constant 0 : index
    %88 = vector.load %arg1[%c7_51, %c0_52, %c0_53] : memref<64x1x784xf32, #tpu.memory_space<vmem>>, vector<1x1x784xf32>
    %89 = vector.shape_cast %88 : vector<1x1x784xf32> to vector<1x784xf32>
    %cst_54 = arith.constant 1.000000e+00 : f32
    %90 = vector.broadcast %cst_54 : f32 to vector<5x784xf32>
    %91 = arith.subf %87, %90 : vector<5x784xf32>
    %cst_55 = arith.constant 1.000000e+30 : f32
    %92 = vector.broadcast %cst_55 : f32 to vector<5x784xf32>
    %93 = arith.mulf %91, %92 : vector<5x784xf32>
    %94 = vector.broadcast %89 : vector<1x784xf32> to vector<5x784xf32>
    %95 = arith.addf %94, %93 : vector<5x784xf32>
    %96 = arith.maximumf %84, %95 : vector<5x784xf32>
    %c8 = arith.constant 8 : index
    %c0_56 = arith.constant 0 : index
    %c0_57 = arith.constant 0 : index
    %97 = vector.load %arg2[%c8, %c0_56, %c0_57] : memref<64x5x784xbf16, #tpu.memory_space<vmem>>, vector<1x5x784xbf16>
    %98 = vector.shape_cast %97 : vector<1x5x784xbf16> to vector<5x784xbf16>
    %99 = arith.extf %98 : vector<5x784xbf16> to vector<5x784xf32>
    %c8_58 = arith.constant 8 : index
    %c0_59 = arith.constant 0 : index
    %c0_60 = arith.constant 0 : index
    %100 = vector.load %arg1[%c8_58, %c0_59, %c0_60] : memref<64x1x784xf32, #tpu.memory_space<vmem>>, vector<1x1x784xf32>
    %101 = vector.shape_cast %100 : vector<1x1x784xf32> to vector<1x784xf32>
    %cst_61 = arith.constant 1.000000e+00 : f32
    %102 = vector.broadcast %cst_61 : f32 to vector<5x784xf32>
    %103 = arith.subf %99, %102 : vector<5x784xf32>
    %cst_62 = arith.constant 1.000000e+30 : f32
    %104 = vector.broadcast %cst_62 : f32 to vector<5x784xf32>
    %105 = arith.mulf %103, %104 : vector<5x784xf32>
    %106 = vector.broadcast %101 : vector<1x784xf32> to vector<5x784xf32>
    %107 = arith.addf %106, %105 : vector<5x784xf32>
    %108 = arith.maximumf %96, %107 : vector<5x784xf32>
    %c9 = arith.constant 9 : index
    %c0_63 = arith.constant 0 : index
    %c0_64 = arith.constant 0 : index
    %109 = vector.load %arg2[%c9, %c0_63, %c0_64] : memref<64x5x784xbf16, #tpu.memory_space<vmem>>, vector<1x5x784xbf16>
    %110 = vector.shape_cast %109 : vector<1x5x784xbf16> to vector<5x784xbf16>
    %111 = arith.extf %110 : vector<5x784xbf16> to vector<5x784xf32>
    %c9_65 = arith.constant 9 : index
    %c0_66 = arith.constant 0 : index
    %c0_67 = arith.constant 0 : index
    %112 = vector.load %arg1[%c9_65, %c0_66, %c0_67] : memref<64x1x784xf32, #tpu.memory_space<vmem>>, vector<1x1x784xf32>
    %113 = vector.shape_cast %112 : vector<1x1x784xf32> to vector<1x784xf32>
    %cst_68 = arith.constant 1.000000e+00 : f32
    %114 = vector.broadcast %cst_68 : f32 to vector<5x784xf32>
    %115 = arith.subf %111, %114 : vector<5x784xf32>
    %cst_69 = arith.constant 1.000000e+30 : f32
    %116 = vector.broadcast %cst_69 : f32 to vector<5x784xf32>
    %117 = arith.mulf %115, %116 : vector<5x784xf32>
    %118 = vector.broadcast %113 : vector<1x784xf32> to vector<5x784xf32>
    %119 = arith.addf %118, %117 : vector<5x784xf32>
    %120 = arith.maximumf %108, %119 : vector<5x784xf32>
    %c10 = arith.constant 10 : index
    %c0_70 = arith.constant 0 : index
    %c0_71 = arith.constant 0 : index
    %121 = vector.load %arg2[%c10, %c0_70, %c0_71] : memref<64x5x784xbf16, #tpu.memory_space<vmem>>, vector<1x5x784xbf16>
    %122 = vector.shape_cast %121 : vector<1x5x784xbf16> to vector<5x784xbf16>
    %123 = arith.extf %122 : vector<5x784xbf16> to vector<5x784xf32>
    %c10_72 = arith.constant 10 : index
    %c0_73 = arith.constant 0 : index
    %c0_74 = arith.constant 0 : index
    %124 = vector.load %arg1[%c10_72, %c0_73, %c0_74] : memref<64x1x784xf32, #tpu.memory_space<vmem>>, vector<1x1x784xf32>
    %125 = vector.shape_cast %124 : vector<1x1x784xf32> to vector<1x784xf32>
    %cst_75 = arith.constant 1.000000e+00 : f32
    %126 = vector.broadcast %cst_75 : f32 to vector<5x784xf32>
    %127 = arith.subf %123, %126 : vector<5x784xf32>
    %cst_76 = arith.constant 1.000000e+30 : f32
    %128 = vector.broadcast %cst_76 : f32 to vector<5x784xf32>
    %129 = arith.mulf %127, %128 : vector<5x784xf32>
    %130 = vector.broadcast %125 : vector<1x784xf32> to vector<5x784xf32>
    %131 = arith.addf %130, %129 : vector<5x784xf32>
    %132 = arith.maximumf %120, %131 : vector<5x784xf32>
    %c11 = arith.constant 11 : index
    %c0_77 = arith.constant 0 : index
    %c0_78 = arith.constant 0 : index
    %133 = vector.load %arg2[%c11, %c0_77, %c0_78] : memref<64x5x784xbf16, #tpu.memory_space<vmem>>, vector<1x5x784xbf16>
    %134 = vector.shape_cast %133 : vector<1x5x784xbf16> to vector<5x784xbf16>
    %135 = arith.extf %134 : vector<5x784xbf16> to vector<5x784xf32>
    %c11_79 = arith.constant 11 : index
    %c0_80 = arith.constant 0 : index
    %c0_81 = arith.constant 0 : index
    %136 = vector.load %arg1[%c11_79, %c0_80, %c0_81] : memref<64x1x784xf32, #tpu.memory_space<vmem>>, vector<1x1x784xf32>
    %137 = vector.shape_cast %136 : vector<1x1x784xf32> to vector<1x784xf32>
    %cst_82 = arith.constant 1.000000e+00 : f32
    %138 = vector.broadcast %cst_82 : f32 to vector<5x784xf32>
    %139 = arith.subf %135, %138 : vector<5x784xf32>
    %cst_83 = arith.constant 1.000000e+30 : f32
    %140 = vector.broadcast %cst_83 : f32 to vector<5x784xf32>
    %141 = arith.mulf %139, %140 : vector<5x784xf32>
    %142 = vector.broadcast %137 : vector<1x784xf32> to vector<5x784xf32>
    %143 = arith.addf %142, %141 : vector<5x784xf32>
    %144 = arith.maximumf %132, %143 : vector<5x784xf32>
    %c12 = arith.constant 12 : index
    %c0_84 = arith.constant 0 : index
    %c0_85 = arith.constant 0 : index
    %145 = vector.load %arg2[%c12, %c0_84, %c0_85] : memref<64x5x784xbf16, #tpu.memory_space<vmem>>, vector<1x5x784xbf16>
    %146 = vector.shape_cast %145 : vector<1x5x784xbf16> to vector<5x784xbf16>
    %147 = arith.extf %146 : vector<5x784xbf16> to vector<5x784xf32>
    %c12_86 = arith.constant 12 : index
    %c0_87 = arith.constant 0 : index
    %c0_88 = arith.constant 0 : index
    %148 = vector.load %arg1[%c12_86, %c0_87, %c0_88] : memref<64x1x784xf32, #tpu.memory_space<vmem>>, vector<1x1x784xf32>
    %149 = vector.shape_cast %148 : vector<1x1x784xf32> to vector<1x784xf32>
    %cst_89 = arith.constant 1.000000e+00 : f32
    %150 = vector.broadcast %cst_89 : f32 to vector<5x784xf32>
    %151 = arith.subf %147, %150 : vector<5x784xf32>
    %cst_90 = arith.constant 1.000000e+30 : f32
    %152 = vector.broadcast %cst_90 : f32 to vector<5x784xf32>
    %153 = arith.mulf %151, %152 : vector<5x784xf32>
    %154 = vector.broadcast %149 : vector<1x784xf32> to vector<5x784xf32>
    %155 = arith.addf %154, %153 : vector<5x784xf32>
    %156 = arith.maximumf %144, %155 : vector<5x784xf32>
    %c13 = arith.constant 13 : index
    %c0_91 = arith.constant 0 : index
    %c0_92 = arith.constant 0 : index
    %157 = vector.load %arg2[%c13, %c0_91, %c0_92] : memref<64x5x784xbf16, #tpu.memory_space<vmem>>, vector<1x5x784xbf16>
    %158 = vector.shape_cast %157 : vector<1x5x784xbf16> to vector<5x784xbf16>
    %159 = arith.extf %158 : vector<5x784xbf16> to vector<5x784xf32>
    %c13_93 = arith.constant 13 : index
    %c0_94 = arith.constant 0 : index
    %c0_95 = arith.constant 0 : index
    %160 = vector.load %arg1[%c13_93, %c0_94, %c0_95] : memref<64x1x784xf32, #tpu.memory_space<vmem>>, vector<1x1x784xf32>
    %161 = vector.shape_cast %160 : vector<1x1x784xf32> to vector<1x784xf32>
    %cst_96 = arith.constant 1.000000e+00 : f32
    %162 = vector.broadcast %cst_96 : f32 to vector<5x784xf32>
    %163 = arith.subf %159, %162 : vector<5x784xf32>
    %cst_97 = arith.constant 1.000000e+30 : f32
    %164 = vector.broadcast %cst_97 : f32 to vector<5x784xf32>
    %165 = arith.mulf %163, %164 : vector<5x784xf32>
    %166 = vector.broadcast %161 : vector<1x784xf32> to vector<5x784xf32>
    %167 = arith.addf %166, %165 : vector<5x784xf32>
    %168 = arith.maximumf %156, %167 : vector<5x784xf32>
    %c14 = arith.constant 14 : index
    %c0_98 = arith.constant 0 : index
    %c0_99 = arith.constant 0 : index
    %169 = vector.load %arg2[%c14, %c0_98, %c0_99] : memref<64x5x784xbf16, #tpu.memory_space<vmem>>, vector<1x5x784xbf16>
    %170 = vector.shape_cast %169 : vector<1x5x784xbf16> to vector<5x784xbf16>
    %171 = arith.extf %170 : vector<5x784xbf16> to vector<5x784xf32>
    %c14_100 = arith.constant 14 : index
    %c0_101 = arith.constant 0 : index
    %c0_102 = arith.constant 0 : index
    %172 = vector.load %arg1[%c14_100, %c0_101, %c0_102] : memref<64x1x784xf32, #tpu.memory_space<vmem>>, vector<1x1x784xf32>
    %173 = vector.shape_cast %172 : vector<1x1x784xf32> to vector<1x784xf32>
    %cst_103 = arith.constant 1.000000e+00 : f32
    %174 = vector.broadcast %cst_103 : f32 to vector<5x784xf32>
    %175 = arith.subf %171, %174 : vector<5x784xf32>
    %cst_104 = arith.constant 1.000000e+30 : f32
    %176 = vector.broadcast %cst_104 : f32 to vector<5x784xf32>
    %177 = arith.mulf %175, %176 : vector<5x784xf32>
    %178 = vector.broadcast %173 : vector<1x784xf32> to vector<5x784xf32>
    %179 = arith.addf %178, %177 : vector<5x784xf32>
    %180 = arith.maximumf %168, %179 : vector<5x784xf32>
    %c15 = arith.constant 15 : index
    %c0_105 = arith.constant 0 : index
    %c0_106 = arith.constant 0 : index
    %181 = vector.load %arg2[%c15, %c0_105, %c0_106] : memref<64x5x784xbf16, #tpu.memory_space<vmem>>, vector<1x5x784xbf16>
    %182 = vector.shape_cast %181 : vector<1x5x784xbf16> to vector<5x784xbf16>
    %183 = arith.extf %182 : vector<5x784xbf16> to vector<5x784xf32>
    %c15_107 = arith.constant 15 : index
    %c0_108 = arith.constant 0 : index
    %c0_109 = arith.constant 0 : index
    %184 = vector.load %arg1[%c15_107, %c0_108, %c0_109] : memref<64x1x784xf32, #tpu.memory_space<vmem>>, vector<1x1x784xf32>
    %185 = vector.shape_cast %184 : vector<1x1x784xf32> to vector<1x784xf32>
    %cst_110 = arith.constant 1.000000e+00 : f32
    %186 = vector.broadcast %cst_110 : f32 to vector<5x784xf32>
    %187 = arith.subf %183, %186 : vector<5x784xf32>
    %cst_111 = arith.constant 1.000000e+30 : f32
    %188 = vector.broadcast %cst_111 : f32 to vector<5x784xf32>
    %189 = arith.mulf %187, %188 : vector<5x784xf32>
    %190 = vector.broadcast %185 : vector<1x784xf32> to vector<5x784xf32>
    %191 = arith.addf %190, %189 : vector<5x784xf32>
    %192 = arith.maximumf %180, %191 : vector<5x784xf32>
    %c16 = arith.constant 16 : index
    %c0_112 = arith.constant 0 : index
    %c0_113 = arith.constant 0 : index
    %193 = vector.load %arg2[%c16, %c0_112, %c0_113] : memref<64x5x784xbf16, #tpu.memory_space<vmem>>, vector<1x5x784xbf16>
    %194 = vector.shape_cast %193 : vector<1x5x784xbf16> to vector<5x784xbf16>
    %195 = arith.extf %194 : vector<5x784xbf16> to vector<5x784xf32>
    %c16_114 = arith.constant 16 : index
    %c0_115 = arith.constant 0 : index
    %c0_116 = arith.constant 0 : index
    %196 = vector.load %arg1[%c16_114, %c0_115, %c0_116] : memref<64x1x784xf32, #tpu.memory_space<vmem>>, vector<1x1x784xf32>
    %197 = vector.shape_cast %196 : vector<1x1x784xf32> to vector<1x784xf32>
    %cst_117 = arith.constant 1.000000e+00 : f32
    %198 = vector.broadcast %cst_117 : f32 to vector<5x784xf32>
    %199 = arith.subf %195, %198 : vector<5x784xf32>
    %cst_118 = arith.constant 1.000000e+30 : f32
    %200 = vector.broadcast %cst_118 : f32 to vector<5x784xf32>
    %201 = arith.mulf %199, %200 : vector<5x784xf32>
    %202 = vector.broadcast %197 : vector<1x784xf32> to vector<5x784xf32>
    %203 = arith.addf %202, %201 : vector<5x784xf32>
    %204 = arith.maximumf %192, %203 : vector<5x784xf32>
    %c17 = arith.constant 17 : index
    %c0_119 = arith.constant 0 : index
    %c0_120 = arith.constant 0 : index
    %205 = vector.load %arg2[%c17, %c0_119, %c0_120] : memref<64x5x784xbf16, #tpu.memory_space<vmem>>, vector<1x5x784xbf16>
    %206 = vector.shape_cast %205 : vector<1x5x784xbf16> to vector<5x784xbf16>
    %207 = arith.extf %206 : vector<5x784xbf16> to vector<5x784xf32>
    %c17_121 = arith.constant 17 : index
    %c0_122 = arith.constant 0 : index
    %c0_123 = arith.constant 0 : index
    %208 = vector.load %arg1[%c17_121, %c0_122, %c0_123] : memref<64x1x784xf32, #tpu.memory_space<vmem>>, vector<1x1x784xf32>
    %209 = vector.shape_cast %208 : vector<1x1x784xf32> to vector<1x784xf32>
    %cst_124 = arith.constant 1.000000e+00 : f32
    %210 = vector.broadcast %cst_124 : f32 to vector<5x784xf32>
    %211 = arith.subf %207, %210 : vector<5x784xf32>
    %cst_125 = arith.constant 1.000000e+30 : f32
    %212 = vector.broadcast %cst_125 : f32 to vector<5x784xf32>
    %213 = arith.mulf %211, %212 : vector<5x784xf32>
    %214 = vector.broadcast %209 : vector<1x784xf32> to vector<5x784xf32>
    %215 = arith.addf %214, %213 : vector<5x784xf32>
    %216 = arith.maximumf %204, %215 : vector<5x784xf32>
    %c18 = arith.constant 18 : index
    %c0_126 = arith.constant 0 : index
    %c0_127 = arith.constant 0 : index
    %217 = vector.load %arg2[%c18, %c0_126, %c0_127] : memref<64x5x784xbf16, #tpu.memory_space<vmem>>, vector<1x5x784xbf16>
    %218 = vector.shape_cast %217 : vector<1x5x784xbf16> to vector<5x784xbf16>
    %219 = arith.extf %218 : vector<5x784xbf16> to vector<5x784xf32>
    %c18_128 = arith.constant 18 : index
    %c0_129 = arith.constant 0 : index
    %c0_130 = arith.constant 0 : index
    %220 = vector.load %arg1[%c18_128, %c0_129, %c0_130] : memref<64x1x784xf32, #tpu.memory_space<vmem>>, vector<1x1x784xf32>
    %221 = vector.shape_cast %220 : vector<1x1x784xf32> to vector<1x784xf32>
    %cst_131 = arith.constant 1.000000e+00 : f32
    %222 = vector.broadcast %cst_131 : f32 to vector<5x784xf32>
    %223 = arith.subf %219, %222 : vector<5x784xf32>
    %cst_132 = arith.constant 1.000000e+30 : f32
    %224 = vector.broadcast %cst_132 : f32 to vector<5x784xf32>
    %225 = arith.mulf %223, %224 : vector<5x784xf32>
    %226 = vector.broadcast %221 : vector<1x784xf32> to vector<5x784xf32>
    %227 = arith.addf %226, %225 : vector<5x784xf32>
    %228 = arith.maximumf %216, %227 : vector<5x784xf32>
    %c19 = arith.constant 19 : index
    %c0_133 = arith.constant 0 : index
    %c0_134 = arith.constant 0 : index
    %229 = vector.load %arg2[%c19, %c0_133, %c0_134] : memref<64x5x784xbf16, #tpu.memory_space<vmem>>, vector<1x5x784xbf16>
    %230 = vector.shape_cast %229 : vector<1x5x784xbf16> to vector<5x784xbf16>
    %231 = arith.extf %230 : vector<5x784xbf16> to vector<5x784xf32>
    %c19_135 = arith.constant 19 : index
    %c0_136 = arith.constant 0 : index
    %c0_137 = arith.constant 0 : index
    %232 = vector.load %arg1[%c19_135, %c0_136, %c0_137] : memref<64x1x784xf32, #tpu.memory_space<vmem>>, vector<1x1x784xf32>
    %233 = vector.shape_cast %232 : vector<1x1x784xf32> to vector<1x784xf32>
    %cst_138 = arith.constant 1.000000e+00 : f32
    %234 = vector.broadcast %cst_138 : f32 to vector<5x784xf32>
    %235 = arith.subf %231, %234 : vector<5x784xf32>
    %cst_139 = arith.constant 1.000000e+30 : f32
    %236 = vector.broadcast %cst_139 : f32 to vector<5x784xf32>
    %237 = arith.mulf %235, %236 : vector<5x784xf32>
    %238 = vector.broadcast %233 : vector<1x784xf32> to vector<5x784xf32>
    %239 = arith.addf %238, %237 : vector<5x784xf32>
    %240 = arith.maximumf %228, %239 : vector<5x784xf32>
    %c20 = arith.constant 20 : index
    %c0_140 = arith.constant 0 : index
    %c0_141 = arith.constant 0 : index
    %241 = vector.load %arg2[%c20, %c0_140, %c0_141] : memref<64x5x784xbf16, #tpu.memory_space<vmem>>, vector<1x5x784xbf16>
    %242 = vector.shape_cast %241 : vector<1x5x784xbf16> to vector<5x784xbf16>
    %243 = arith.extf %242 : vector<5x784xbf16> to vector<5x784xf32>
    %c20_142 = arith.constant 20 : index
    %c0_143 = arith.constant 0 : index
    %c0_144 = arith.constant 0 : index
    %244 = vector.load %arg1[%c20_142, %c0_143, %c0_144] : memref<64x1x784xf32, #tpu.memory_space<vmem>>, vector<1x1x784xf32>
    %245 = vector.shape_cast %244 : vector<1x1x784xf32> to vector<1x784xf32>
    %cst_145 = arith.constant 1.000000e+00 : f32
    %246 = vector.broadcast %cst_145 : f32 to vector<5x784xf32>
    %247 = arith.subf %243, %246 : vector<5x784xf32>
    %cst_146 = arith.constant 1.000000e+30 : f32
    %248 = vector.broadcast %cst_146 : f32 to vector<5x784xf32>
    %249 = arith.mulf %247, %248 : vector<5x784xf32>
    %250 = vector.broadcast %245 : vector<1x784xf32> to vector<5x784xf32>
    %251 = arith.addf %250, %249 : vector<5x784xf32>
    %252 = arith.maximumf %240, %251 : vector<5x784xf32>
    %c21 = arith.constant 21 : index
    %c0_147 = arith.constant 0 : index
    %c0_148 = arith.constant 0 : index
    %253 = vector.load %arg2[%c21, %c0_147, %c0_148] : memref<64x5x784xbf16, #tpu.memory_space<vmem>>, vector<1x5x784xbf16>
    %254 = vector.shape_cast %253 : vector<1x5x784xbf16> to vector<5x784xbf16>
    %255 = arith.extf %254 : vector<5x784xbf16> to vector<5x784xf32>
    %c21_149 = arith.constant 21 : index
    %c0_150 = arith.constant 0 : index
    %c0_151 = arith.constant 0 : index
    %256 = vector.load %arg1[%c21_149, %c0_150, %c0_151] : memref<64x1x784xf32, #tpu.memory_space<vmem>>, vector<1x1x784xf32>
    %257 = vector.shape_cast %256 : vector<1x1x784xf32> to vector<1x784xf32>
    %cst_152 = arith.constant 1.000000e+00 : f32
    %258 = vector.broadcast %cst_152 : f32 to vector<5x784xf32>
    %259 = arith.subf %255, %258 : vector<5x784xf32>
    %cst_153 = arith.constant 1.000000e+30 : f32
    %260 = vector.broadcast %cst_153 : f32 to vector<5x784xf32>
    %261 = arith.mulf %259, %260 : vector<5x784xf32>
    %262 = vector.broadcast %257 : vector<1x784xf32> to vector<5x784xf32>
    %263 = arith.addf %262, %261 : vector<5x784xf32>
    %264 = arith.maximumf %252, %263 : vector<5x784xf32>
    %c22 = arith.constant 22 : index
    %c0_154 = arith.constant 0 : index
    %c0_155 = arith.constant 0 : index
    %265 = vector.load %arg2[%c22, %c0_154, %c0_155] : memref<64x5x784xbf16, #tpu.memory_space<vmem>>, vector<1x5x784xbf16>
    %266 = vector.shape_cast %265 : vector<1x5x784xbf16> to vector<5x784xbf16>
    %267 = arith.extf %266 : vector<5x784xbf16> to vector<5x784xf32>
    %c22_156 = arith.constant 22 : index
    %c0_157 = arith.constant 0 : index
    %c0_158 = arith.constant 0 : index
    %268 = vector.load %arg1[%c22_156, %c0_157, %c0_158] : memref<64x1x784xf32, #tpu.memory_space<vmem>>, vector<1x1x784xf32>
    %269 = vector.shape_cast %268 : vector<1x1x784xf32> to vector<1x784xf32>
    %cst_159 = arith.constant 1.000000e+00 : f32
    %270 = vector.broadcast %cst_159 : f32 to vector<5x784xf32>
    %271 = arith.subf %267, %270 : vector<5x784xf32>
    %cst_160 = arith.constant 1.000000e+30 : f32
    %272 = vector.broadcast %cst_160 : f32 to vector<5x784xf32>
    %273 = arith.mulf %271, %272 : vector<5x784xf32>
    %274 = vector.broadcast %269 : vector<1x784xf32> to vector<5x784xf32>
    %275 = arith.addf %274, %273 : vector<5x784xf32>
    %276 = arith.maximumf %264, %275 : vector<5x784xf32>
    %c23 = arith.constant 23 : index
    %c0_161 = arith.constant 0 : index
    %c0_162 = arith.constant 0 : index
    %277 = vector.load %arg2[%c23, %c0_161, %c0_162] : memref<64x5x784xbf16, #tpu.memory_space<vmem>>, vector<1x5x784xbf16>
    %278 = vector.shape_cast %277 : vector<1x5x784xbf16> to vector<5x784xbf16>
    %279 = arith.extf %278 : vector<5x784xbf16> to vector<5x784xf32>
    %c23_163 = arith.constant 23 : index
    %c0_164 = arith.constant 0 : index
    %c0_165 = arith.constant 0 : index
    %280 = vector.load %arg1[%c23_163, %c0_164, %c0_165] : memref<64x1x784xf32, #tpu.memory_space<vmem>>, vector<1x1x784xf32>
    %281 = vector.shape_cast %280 : vector<1x1x784xf32> to vector<1x784xf32>
    %cst_166 = arith.constant 1.000000e+00 : f32
    %282 = vector.broadcast %cst_166 : f32 to vector<5x784xf32>
    %283 = arith.subf %279, %282 : vector<5x784xf32>
    %cst_167 = arith.constant 1.000000e+30 : f32
    %284 = vector.broadcast %cst_167 : f32 to vector<5x784xf32>
    %285 = arith.mulf %283, %284 : vector<5x784xf32>
    %286 = vector.broadcast %281 : vector<1x784xf32> to vector<5x784xf32>
    %287 = arith.addf %286, %285 : vector<5x784xf32>
    %288 = arith.maximumf %276, %287 : vector<5x784xf32>
    %c24 = arith.constant 24 : index
    %c0_168 = arith.constant 0 : index
    %c0_169 = arith.constant 0 : index
    %289 = vector.load %arg2[%c24, %c0_168, %c0_169] : memref<64x5x784xbf16, #tpu.memory_space<vmem>>, vector<1x5x784xbf16>
    %290 = vector.shape_cast %289 : vector<1x5x784xbf16> to vector<5x784xbf16>
    %291 = arith.extf %290 : vector<5x784xbf16> to vector<5x784xf32>
    %c24_170 = arith.constant 24 : index
    %c0_171 = arith.constant 0 : index
    %c0_172 = arith.constant 0 : index
    %292 = vector.load %arg1[%c24_170, %c0_171, %c0_172] : memref<64x1x784xf32, #tpu.memory_space<vmem>>, vector<1x1x784xf32>
    %293 = vector.shape_cast %292 : vector<1x1x784xf32> to vector<1x784xf32>
    %cst_173 = arith.constant 1.000000e+00 : f32
    %294 = vector.broadcast %cst_173 : f32 to vector<5x784xf32>
    %295 = arith.subf %291, %294 : vector<5x784xf32>
    %cst_174 = arith.constant 1.000000e+30 : f32
    %296 = vector.broadcast %cst_174 : f32 to vector<5x784xf32>
    %297 = arith.mulf %295, %296 : vector<5x784xf32>
    %298 = vector.broadcast %293 : vector<1x784xf32> to vector<5x784xf32>
    %299 = arith.addf %298, %297 : vector<5x784xf32>
    %300 = arith.maximumf %288, %299 : vector<5x784xf32>
    %c25 = arith.constant 25 : index
    %c0_175 = arith.constant 0 : index
    %c0_176 = arith.constant 0 : index
    %301 = vector.load %arg2[%c25, %c0_175, %c0_176] : memref<64x5x784xbf16, #tpu.memory_space<vmem>>, vector<1x5x784xbf16>
    %302 = vector.shape_cast %301 : vector<1x5x784xbf16> to vector<5x784xbf16>
    %303 = arith.extf %302 : vector<5x784xbf16> to vector<5x784xf32>
    %c25_177 = arith.constant 25 : index
    %c0_178 = arith.constant 0 : index
    %c0_179 = arith.constant 0 : index
    %304 = vector.load %arg1[%c25_177, %c0_178, %c0_179] : memref<64x1x784xf32, #tpu.memory_space<vmem>>, vector<1x1x784xf32>
    %305 = vector.shape_cast %304 : vector<1x1x784xf32> to vector<1x784xf32>
    %cst_180 = arith.constant 1.000000e+00 : f32
    %306 = vector.broadcast %cst_180 : f32 to vector<5x784xf32>
    %307 = arith.subf %303, %306 : vector<5x784xf32>
    %cst_181 = arith.constant 1.000000e+30 : f32
    %308 = vector.broadcast %cst_181 : f32 to vector<5x784xf32>
    %309 = arith.mulf %307, %308 : vector<5x784xf32>
    %310 = vector.broadcast %305 : vector<1x784xf32> to vector<5x784xf32>
    %311 = arith.addf %310, %309 : vector<5x784xf32>
    %312 = arith.maximumf %300, %311 : vector<5x784xf32>
    %c26 = arith.constant 26 : index
    %c0_182 = arith.constant 0 : index
    %c0_183 = arith.constant 0 : index
    %313 = vector.load %arg2[%c26, %c0_182, %c0_183] : memref<64x5x784xbf16, #tpu.memory_space<vmem>>, vector<1x5x784xbf16>
    %314 = vector.shape_cast %313 : vector<1x5x784xbf16> to vector<5x784xbf16>
    %315 = arith.extf %314 : vector<5x784xbf16> to vector<5x784xf32>
    %c26_184 = arith.constant 26 : index
    %c0_185 = arith.constant 0 : index
    %c0_186 = arith.constant 0 : index
    %316 = vector.load %arg1[%c26_184, %c0_185, %c0_186] : memref<64x1x784xf32, #tpu.memory_space<vmem>>, vector<1x1x784xf32>
    %317 = vector.shape_cast %316 : vector<1x1x784xf32> to vector<1x784xf32>
    %cst_187 = arith.constant 1.000000e+00 : f32
    %318 = vector.broadcast %cst_187 : f32 to vector<5x784xf32>
    %319 = arith.subf %315, %318 : vector<5x784xf32>
    %cst_188 = arith.constant 1.000000e+30 : f32
    %320 = vector.broadcast %cst_188 : f32 to vector<5x784xf32>
    %321 = arith.mulf %319, %320 : vector<5x784xf32>
    %322 = vector.broadcast %317 : vector<1x784xf32> to vector<5x784xf32>
    %323 = arith.addf %322, %321 : vector<5x784xf32>
    %324 = arith.maximumf %312, %323 : vector<5x784xf32>
    %c27 = arith.constant 27 : index
    %c0_189 = arith.constant 0 : index
    %c0_190 = arith.constant 0 : index
    %325 = vector.load %arg2[%c27, %c0_189, %c0_190] : memref<64x5x784xbf16, #tpu.memory_space<vmem>>, vector<1x5x784xbf16>
    %326 = vector.shape_cast %325 : vector<1x5x784xbf16> to vector<5x784xbf16>
    %327 = arith.extf %326 : vector<5x784xbf16> to vector<5x784xf32>
    %c27_191 = arith.constant 27 : index
    %c0_192 = arith.constant 0 : index
    %c0_193 = arith.constant 0 : index
    %328 = vector.load %arg1[%c27_191, %c0_192, %c0_193] : memref<64x1x784xf32, #tpu.memory_space<vmem>>, vector<1x1x784xf32>
    %329 = vector.shape_cast %328 : vector<1x1x784xf32> to vector<1x784xf32>
    %cst_194 = arith.constant 1.000000e+00 : f32
    %330 = vector.broadcast %cst_194 : f32 to vector<5x784xf32>
    %331 = arith.subf %327, %330 : vector<5x784xf32>
    %cst_195 = arith.constant 1.000000e+30 : f32
    %332 = vector.broadcast %cst_195 : f32 to vector<5x784xf32>
    %333 = arith.mulf %331, %332 : vector<5x784xf32>
    %334 = vector.broadcast %329 : vector<1x784xf32> to vector<5x784xf32>
    %335 = arith.addf %334, %333 : vector<5x784xf32>
    %336 = arith.maximumf %324, %335 : vector<5x784xf32>
    %c28 = arith.constant 28 : index
    %c0_196 = arith.constant 0 : index
    %c0_197 = arith.constant 0 : index
    %337 = vector.load %arg2[%c28, %c0_196, %c0_197] : memref<64x5x784xbf16, #tpu.memory_space<vmem>>, vector<1x5x784xbf16>
    %338 = vector.shape_cast %337 : vector<1x5x784xbf16> to vector<5x784xbf16>
    %339 = arith.extf %338 : vector<5x784xbf16> to vector<5x784xf32>
    %c28_198 = arith.constant 28 : index
    %c0_199 = arith.constant 0 : index
    %c0_200 = arith.constant 0 : index
    %340 = vector.load %arg1[%c28_198, %c0_199, %c0_200] : memref<64x1x784xf32, #tpu.memory_space<vmem>>, vector<1x1x784xf32>
    %341 = vector.shape_cast %340 : vector<1x1x784xf32> to vector<1x784xf32>
    %cst_201 = arith.constant 1.000000e+00 : f32
    %342 = vector.broadcast %cst_201 : f32 to vector<5x784xf32>
    %343 = arith.subf %339, %342 : vector<5x784xf32>
    %cst_202 = arith.constant 1.000000e+30 : f32
    %344 = vector.broadcast %cst_202 : f32 to vector<5x784xf32>
    %345 = arith.mulf %343, %344 : vector<5x784xf32>
    %346 = vector.broadcast %341 : vector<1x784xf32> to vector<5x784xf32>
    %347 = arith.addf %346, %345 : vector<5x784xf32>
    %348 = arith.maximumf %336, %347 : vector<5x784xf32>
    %c29 = arith.constant 29 : index
    %c0_203 = arith.constant 0 : index
    %c0_204 = arith.constant 0 : index
    %349 = vector.load %arg2[%c29, %c0_203, %c0_204] : memref<64x5x784xbf16, #tpu.memory_space<vmem>>, vector<1x5x784xbf16>
    %350 = vector.shape_cast %349 : vector<1x5x784xbf16> to vector<5x784xbf16>
    %351 = arith.extf %350 : vector<5x784xbf16> to vector<5x784xf32>
    %c29_205 = arith.constant 29 : index
    %c0_206 = arith.constant 0 : index
    %c0_207 = arith.constant 0 : index
    %352 = vector.load %arg1[%c29_205, %c0_206, %c0_207] : memref<64x1x784xf32, #tpu.memory_space<vmem>>, vector<1x1x784xf32>
    %353 = vector.shape_cast %352 : vector<1x1x784xf32> to vector<1x784xf32>
    %cst_208 = arith.constant 1.000000e+00 : f32
    %354 = vector.broadcast %cst_208 : f32 to vector<5x784xf32>
    %355 = arith.subf %351, %354 : vector<5x784xf32>
    %cst_209 = arith.constant 1.000000e+30 : f32
    %356 = vector.broadcast %cst_209 : f32 to vector<5x784xf32>
    %357 = arith.mulf %355, %356 : vector<5x784xf32>
    %358 = vector.broadcast %353 : vector<1x784xf32> to vector<5x784xf32>
    %359 = arith.addf %358, %357 : vector<5x784xf32>
    %360 = arith.maximumf %348, %359 : vector<5x784xf32>
    %c30 = arith.constant 30 : index
    %c0_210 = arith.constant 0 : index
    %c0_211 = arith.constant 0 : index
    %361 = vector.load %arg2[%c30, %c0_210, %c0_211] : memref<64x5x784xbf16, #tpu.memory_space<vmem>>, vector<1x5x784xbf16>
    %362 = vector.shape_cast %361 : vector<1x5x784xbf16> to vector<5x784xbf16>
    %363 = arith.extf %362 : vector<5x784xbf16> to vector<5x784xf32>
    %c30_212 = arith.constant 30 : index
    %c0_213 = arith.constant 0 : index
    %c0_214 = arith.constant 0 : index
    %364 = vector.load %arg1[%c30_212, %c0_213, %c0_214] : memref<64x1x784xf32, #tpu.memory_space<vmem>>, vector<1x1x784xf32>
    %365 = vector.shape_cast %364 : vector<1x1x784xf32> to vector<1x784xf32>
    %cst_215 = arith.constant 1.000000e+00 : f32
    %366 = vector.broadcast %cst_215 : f32 to vector<5x784xf32>
    %367 = arith.subf %363, %366 : vector<5x784xf32>
    %cst_216 = arith.constant 1.000000e+30 : f32
    %368 = vector.broadcast %cst_216 : f32 to vector<5x784xf32>
    %369 = arith.mulf %367, %368 : vector<5x784xf32>
    %370 = vector.broadcast %365 : vector<1x784xf32> to vector<5x784xf32>
    %371 = arith.addf %370, %369 : vector<5x784xf32>
    %372 = arith.maximumf %360, %371 : vector<5x784xf32>
    %c31 = arith.constant 31 : index
    %c0_217 = arith.constant 0 : index
    %c0_218 = arith.constant 0 : index
    %373 = vector.load %arg2[%c31, %c0_217, %c0_218] : memref<64x5x784xbf16, #tpu.memory_space<vmem>>, vector<1x5x784xbf16>
    %374 = vector.shape_cast %373 : vector<1x5x784xbf16> to vector<5x784xbf16>
    %375 = arith.extf %374 : vector<5x784xbf16> to vector<5x784xf32>
    %c31_219 = arith.constant 31 : index
    %c0_220 = arith.constant 0 : index
    %c0_221 = arith.constant 0 : index
    %376 = vector.load %arg1[%c31_219, %c0_220, %c0_221] : memref<64x1x784xf32, #tpu.memory_space<vmem>>, vector<1x1x784xf32>
    %377 = vector.shape_cast %376 : vector<1x1x784xf32> to vector<1x784xf32>
    %cst_222 = arith.constant 1.000000e+00 : f32
    %378 = vector.broadcast %cst_222 : f32 to vector<5x784xf32>
    %379 = arith.subf %375, %378 : vector<5x784xf32>
    %cst_223 = arith.constant 1.000000e+30 : f32
    %380 = vector.broadcast %cst_223 : f32 to vector<5x784xf32>
    %381 = arith.mulf %379, %380 : vector<5x784xf32>
    %382 = vector.broadcast %377 : vector<1x784xf32> to vector<5x784xf32>
    %383 = arith.addf %382, %381 : vector<5x784xf32>
    %384 = arith.maximumf %372, %383 : vector<5x784xf32>
    %c32 = arith.constant 32 : index
    %c0_224 = arith.constant 0 : index
    %c0_225 = arith.constant 0 : index
    %385 = vector.load %arg2[%c32, %c0_224, %c0_225] : memref<64x5x784xbf16, #tpu.memory_space<vmem>>, vector<1x5x784xbf16>
    %386 = vector.shape_cast %385 : vector<1x5x784xbf16> to vector<5x784xbf16>
    %387 = arith.extf %386 : vector<5x784xbf16> to vector<5x784xf32>
    %c32_226 = arith.constant 32 : index
    %c0_227 = arith.constant 0 : index
    %c0_228 = arith.constant 0 : index
    %388 = vector.load %arg1[%c32_226, %c0_227, %c0_228] : memref<64x1x784xf32, #tpu.memory_space<vmem>>, vector<1x1x784xf32>
    %389 = vector.shape_cast %388 : vector<1x1x784xf32> to vector<1x784xf32>
    %cst_229 = arith.constant 1.000000e+00 : f32
    %390 = vector.broadcast %cst_229 : f32 to vector<5x784xf32>
    %391 = arith.subf %387, %390 : vector<5x784xf32>
    %cst_230 = arith.constant 1.000000e+30 : f32
    %392 = vector.broadcast %cst_230 : f32 to vector<5x784xf32>
    %393 = arith.mulf %391, %392 : vector<5x784xf32>
    %394 = vector.broadcast %389 : vector<1x784xf32> to vector<5x784xf32>
    %395 = arith.addf %394, %393 : vector<5x784xf32>
    %396 = arith.maximumf %384, %395 : vector<5x784xf32>
    %c33 = arith.constant 33 : index
    %c0_231 = arith.constant 0 : index
    %c0_232 = arith.constant 0 : index
    %397 = vector.load %arg2[%c33, %c0_231, %c0_232] : memref<64x5x784xbf16, #tpu.memory_space<vmem>>, vector<1x5x784xbf16>
    %398 = vector.shape_cast %397 : vector<1x5x784xbf16> to vector<5x784xbf16>
    %399 = arith.extf %398 : vector<5x784xbf16> to vector<5x784xf32>
    %c33_233 = arith.constant 33 : index
    %c0_234 = arith.constant 0 : index
    %c0_235 = arith.constant 0 : index
    %400 = vector.load %arg1[%c33_233, %c0_234, %c0_235] : memref<64x1x784xf32, #tpu.memory_space<vmem>>, vector<1x1x784xf32>
    %401 = vector.shape_cast %400 : vector<1x1x784xf32> to vector<1x784xf32>
    %cst_236 = arith.constant 1.000000e+00 : f32
    %402 = vector.broadcast %cst_236 : f32 to vector<5x784xf32>
    %403 = arith.subf %399, %402 : vector<5x784xf32>
    %cst_237 = arith.constant 1.000000e+30 : f32
    %404 = vector.broadcast %cst_237 : f32 to vector<5x784xf32>
    %405 = arith.mulf %403, %404 : vector<5x784xf32>
    %406 = vector.broadcast %401 : vector<1x784xf32> to vector<5x784xf32>
    %407 = arith.addf %406, %405 : vector<5x784xf32>
    %408 = arith.maximumf %396, %407 : vector<5x784xf32>
    %c34 = arith.constant 34 : index
    %c0_238 = arith.constant 0 : index
    %c0_239 = arith.constant 0 : index
    %409 = vector.load %arg2[%c34, %c0_238, %c0_239] : memref<64x5x784xbf16, #tpu.memory_space<vmem>>, vector<1x5x784xbf16>
    %410 = vector.shape_cast %409 : vector<1x5x784xbf16> to vector<5x784xbf16>
    %411 = arith.extf %410 : vector<5x784xbf16> to vector<5x784xf32>
    %c34_240 = arith.constant 34 : index
    %c0_241 = arith.constant 0 : index
    %c0_242 = arith.constant 0 : index
    %412 = vector.load %arg1[%c34_240, %c0_241, %c0_242] : memref<64x1x784xf32, #tpu.memory_space<vmem>>, vector<1x1x784xf32>
    %413 = vector.shape_cast %412 : vector<1x1x784xf32> to vector<1x784xf32>
    %cst_243 = arith.constant 1.000000e+00 : f32
    %414 = vector.broadcast %cst_243 : f32 to vector<5x784xf32>
    %415 = arith.subf %411, %414 : vector<5x784xf32>
    %cst_244 = arith.constant 1.000000e+30 : f32
    %416 = vector.broadcast %cst_244 : f32 to vector<5x784xf32>
    %417 = arith.mulf %415, %416 : vector<5x784xf32>
    %418 = vector.broadcast %413 : vector<1x784xf32> to vector<5x784xf32>
    %419 = arith.addf %418, %417 : vector<5x784xf32>
    %420 = arith.maximumf %408, %419 : vector<5x784xf32>
    %c35 = arith.constant 35 : index
    %c0_245 = arith.constant 0 : index
    %c0_246 = arith.constant 0 : index
    %421 = vector.load %arg2[%c35, %c0_245, %c0_246] : memref<64x5x784xbf16, #tpu.memory_space<vmem>>, vector<1x5x784xbf16>
    %422 = vector.shape_cast %421 : vector<1x5x784xbf16> to vector<5x784xbf16>
    %423 = arith.extf %422 : vector<5x784xbf16> to vector<5x784xf32>
    %c35_247 = arith.constant 35 : index
    %c0_248 = arith.constant 0 : index
    %c0_249 = arith.constant 0 : index
    %424 = vector.load %arg1[%c35_247, %c0_248, %c0_249] : memref<64x1x784xf32, #tpu.memory_space<vmem>>, vector<1x1x784xf32>
    %425 = vector.shape_cast %424 : vector<1x1x784xf32> to vector<1x784xf32>
    %cst_250 = arith.constant 1.000000e+00 : f32
    %426 = vector.broadcast %cst_250 : f32 to vector<5x784xf32>
    %427 = arith.subf %423, %426 : vector<5x784xf32>
    %cst_251 = arith.constant 1.000000e+30 : f32
    %428 = vector.broadcast %cst_251 : f32 to vector<5x784xf32>
    %429 = arith.mulf %427, %428 : vector<5x784xf32>
    %430 = vector.broadcast %425 : vector<1x784xf32> to vector<5x784xf32>
    %431 = arith.addf %430, %429 : vector<5x784xf32>
    %432 = arith.maximumf %420, %431 : vector<5x784xf32>
    %c36 = arith.constant 36 : index
    %c0_252 = arith.constant 0 : index
    %c0_253 = arith.constant 0 : index
    %433 = vector.load %arg2[%c36, %c0_252, %c0_253] : memref<64x5x784xbf16, #tpu.memory_space<vmem>>, vector<1x5x784xbf16>
    %434 = vector.shape_cast %433 : vector<1x5x784xbf16> to vector<5x784xbf16>
    %435 = arith.extf %434 : vector<5x784xbf16> to vector<5x784xf32>
    %c36_254 = arith.constant 36 : index
    %c0_255 = arith.constant 0 : index
    %c0_256 = arith.constant 0 : index
    %436 = vector.load %arg1[%c36_254, %c0_255, %c0_256] : memref<64x1x784xf32, #tpu.memory_space<vmem>>, vector<1x1x784xf32>
    %437 = vector.shape_cast %436 : vector<1x1x784xf32> to vector<1x784xf32>
    %cst_257 = arith.constant 1.000000e+00 : f32
    %438 = vector.broadcast %cst_257 : f32 to vector<5x784xf32>
    %439 = arith.subf %435, %438 : vector<5x784xf32>
    %cst_258 = arith.constant 1.000000e+30 : f32
    %440 = vector.broadcast %cst_258 : f32 to vector<5x784xf32>
    %441 = arith.mulf %439, %440 : vector<5x784xf32>
    %442 = vector.broadcast %437 : vector<1x784xf32> to vector<5x784xf32>
    %443 = arith.addf %442, %441 : vector<5x784xf32>
    %444 = arith.maximumf %432, %443 : vector<5x784xf32>
    %c37 = arith.constant 37 : index
    %c0_259 = arith.constant 0 : index
    %c0_260 = arith.constant 0 : index
    %445 = vector.load %arg2[%c37, %c0_259, %c0_260] : memref<64x5x784xbf16, #tpu.memory_space<vmem>>, vector<1x5x784xbf16>
    %446 = vector.shape_cast %445 : vector<1x5x784xbf16> to vector<5x784xbf16>
    %447 = arith.extf %446 : vector<5x784xbf16> to vector<5x784xf32>
    %c37_261 = arith.constant 37 : index
    %c0_262 = arith.constant 0 : index
    %c0_263 = arith.constant 0 : index
    %448 = vector.load %arg1[%c37_261, %c0_262, %c0_263] : memref<64x1x784xf32, #tpu.memory_space<vmem>>, vector<1x1x784xf32>
    %449 = vector.shape_cast %448 : vector<1x1x784xf32> to vector<1x784xf32>
    %cst_264 = arith.constant 1.000000e+00 : f32
    %450 = vector.broadcast %cst_264 : f32 to vector<5x784xf32>
    %451 = arith.subf %447, %450 : vector<5x784xf32>
    %cst_265 = arith.constant 1.000000e+30 : f32
    %452 = vector.broadcast %cst_265 : f32 to vector<5x784xf32>
    %453 = arith.mulf %451, %452 : vector<5x784xf32>
    %454 = vector.broadcast %449 : vector<1x784xf32> to vector<5x784xf32>
    %455 = arith.addf %454, %453 : vector<5x784xf32>
    %456 = arith.maximumf %444, %455 : vector<5x784xf32>
    %c38 = arith.constant 38 : index
    %c0_266 = arith.constant 0 : index
    %c0_267 = arith.constant 0 : index
    %457 = vector.load %arg2[%c38, %c0_266, %c0_267] : memref<64x5x784xbf16, #tpu.memory_space<vmem>>, vector<1x5x784xbf16>
    %458 = vector.shape_cast %457 : vector<1x5x784xbf16> to vector<5x784xbf16>
    %459 = arith.extf %458 : vector<5x784xbf16> to vector<5x784xf32>
    %c38_268 = arith.constant 38 : index
    %c0_269 = arith.constant 0 : index
    %c0_270 = arith.constant 0 : index
    %460 = vector.load %arg1[%c38_268, %c0_269, %c0_270] : memref<64x1x784xf32, #tpu.memory_space<vmem>>, vector<1x1x784xf32>
    %461 = vector.shape_cast %460 : vector<1x1x784xf32> to vector<1x784xf32>
    %cst_271 = arith.constant 1.000000e+00 : f32
    %462 = vector.broadcast %cst_271 : f32 to vector<5x784xf32>
    %463 = arith.subf %459, %462 : vector<5x784xf32>
    %cst_272 = arith.constant 1.000000e+30 : f32
    %464 = vector.broadcast %cst_272 : f32 to vector<5x784xf32>
    %465 = arith.mulf %463, %464 : vector<5x784xf32>
    %466 = vector.broadcast %461 : vector<1x784xf32> to vector<5x784xf32>
    %467 = arith.addf %466, %465 : vector<5x784xf32>
    %468 = arith.maximumf %456, %467 : vector<5x784xf32>
    %c39 = arith.constant 39 : index
    %c0_273 = arith.constant 0 : index
    %c0_274 = arith.constant 0 : index
    %469 = vector.load %arg2[%c39, %c0_273, %c0_274] : memref<64x5x784xbf16, #tpu.memory_space<vmem>>, vector<1x5x784xbf16>
    %470 = vector.shape_cast %469 : vector<1x5x784xbf16> to vector<5x784xbf16>
    %471 = arith.extf %470 : vector<5x784xbf16> to vector<5x784xf32>
    %c39_275 = arith.constant 39 : index
    %c0_276 = arith.constant 0 : index
    %c0_277 = arith.constant 0 : index
    %472 = vector.load %arg1[%c39_275, %c0_276, %c0_277] : memref<64x1x784xf32, #tpu.memory_space<vmem>>, vector<1x1x784xf32>
    %473 = vector.shape_cast %472 : vector<1x1x784xf32> to vector<1x784xf32>
    %cst_278 = arith.constant 1.000000e+00 : f32
    %474 = vector.broadcast %cst_278 : f32 to vector<5x784xf32>
    %475 = arith.subf %471, %474 : vector<5x784xf32>
    %cst_279 = arith.constant 1.000000e+30 : f32
    %476 = vector.broadcast %cst_279 : f32 to vector<5x784xf32>
    %477 = arith.mulf %475, %476 : vector<5x784xf32>
    %478 = vector.broadcast %473 : vector<1x784xf32> to vector<5x784xf32>
    %479 = arith.addf %478, %477 : vector<5x784xf32>
    %480 = arith.maximumf %468, %479 : vector<5x784xf32>
    %c40 = arith.constant 40 : index
    %c0_280 = arith.constant 0 : index
    %c0_281 = arith.constant 0 : index
    %481 = vector.load %arg2[%c40, %c0_280, %c0_281] : memref<64x5x784xbf16, #tpu.memory_space<vmem>>, vector<1x5x784xbf16>
    %482 = vector.shape_cast %481 : vector<1x5x784xbf16> to vector<5x784xbf16>
    %483 = arith.extf %482 : vector<5x784xbf16> to vector<5x784xf32>
    %c40_282 = arith.constant 40 : index
    %c0_283 = arith.constant 0 : index
    %c0_284 = arith.constant 0 : index
    %484 = vector.load %arg1[%c40_282, %c0_283, %c0_284] : memref<64x1x784xf32, #tpu.memory_space<vmem>>, vector<1x1x784xf32>
    %485 = vector.shape_cast %484 : vector<1x1x784xf32> to vector<1x784xf32>
    %cst_285 = arith.constant 1.000000e+00 : f32
    %486 = vector.broadcast %cst_285 : f32 to vector<5x784xf32>
    %487 = arith.subf %483, %486 : vector<5x784xf32>
    %cst_286 = arith.constant 1.000000e+30 : f32
    %488 = vector.broadcast %cst_286 : f32 to vector<5x784xf32>
    %489 = arith.mulf %487, %488 : vector<5x784xf32>
    %490 = vector.broadcast %485 : vector<1x784xf32> to vector<5x784xf32>
    %491 = arith.addf %490, %489 : vector<5x784xf32>
    %492 = arith.maximumf %480, %491 : vector<5x784xf32>
    %c41 = arith.constant 41 : index
    %c0_287 = arith.constant 0 : index
    %c0_288 = arith.constant 0 : index
    %493 = vector.load %arg2[%c41, %c0_287, %c0_288] : memref<64x5x784xbf16, #tpu.memory_space<vmem>>, vector<1x5x784xbf16>
    %494 = vector.shape_cast %493 : vector<1x5x784xbf16> to vector<5x784xbf16>
    %495 = arith.extf %494 : vector<5x784xbf16> to vector<5x784xf32>
    %c41_289 = arith.constant 41 : index
    %c0_290 = arith.constant 0 : index
    %c0_291 = arith.constant 0 : index
    %496 = vector.load %arg1[%c41_289, %c0_290, %c0_291] : memref<64x1x784xf32, #tpu.memory_space<vmem>>, vector<1x1x784xf32>
    %497 = vector.shape_cast %496 : vector<1x1x784xf32> to vector<1x784xf32>
    %cst_292 = arith.constant 1.000000e+00 : f32
    %498 = vector.broadcast %cst_292 : f32 to vector<5x784xf32>
    %499 = arith.subf %495, %498 : vector<5x784xf32>
    %cst_293 = arith.constant 1.000000e+30 : f32
    %500 = vector.broadcast %cst_293 : f32 to vector<5x784xf32>
    %501 = arith.mulf %499, %500 : vector<5x784xf32>
    %502 = vector.broadcast %497 : vector<1x784xf32> to vector<5x784xf32>
    %503 = arith.addf %502, %501 : vector<5x784xf32>
    %504 = arith.maximumf %492, %503 : vector<5x784xf32>
    %c42 = arith.constant 42 : index
    %c0_294 = arith.constant 0 : index
    %c0_295 = arith.constant 0 : index
    %505 = vector.load %arg2[%c42, %c0_294, %c0_295] : memref<64x5x784xbf16, #tpu.memory_space<vmem>>, vector<1x5x784xbf16>
    %506 = vector.shape_cast %505 : vector<1x5x784xbf16> to vector<5x784xbf16>
    %507 = arith.extf %506 : vector<5x784xbf16> to vector<5x784xf32>
    %c42_296 = arith.constant 42 : index
    %c0_297 = arith.constant 0 : index
    %c0_298 = arith.constant 0 : index
    %508 = vector.load %arg1[%c42_296, %c0_297, %c0_298] : memref<64x1x784xf32, #tpu.memory_space<vmem>>, vector<1x1x784xf32>
    %509 = vector.shape_cast %508 : vector<1x1x784xf32> to vector<1x784xf32>
    %cst_299 = arith.constant 1.000000e+00 : f32
    %510 = vector.broadcast %cst_299 : f32 to vector<5x784xf32>
    %511 = arith.subf %507, %510 : vector<5x784xf32>
    %cst_300 = arith.constant 1.000000e+30 : f32
    %512 = vector.broadcast %cst_300 : f32 to vector<5x784xf32>
    %513 = arith.mulf %511, %512 : vector<5x784xf32>
    %514 = vector.broadcast %509 : vector<1x784xf32> to vector<5x784xf32>
    %515 = arith.addf %514, %513 : vector<5x784xf32>
    %516 = arith.maximumf %504, %515 : vector<5x784xf32>
    %c43 = arith.constant 43 : index
    %c0_301 = arith.constant 0 : index
    %c0_302 = arith.constant 0 : index
    %517 = vector.load %arg2[%c43, %c0_301, %c0_302] : memref<64x5x784xbf16, #tpu.memory_space<vmem>>, vector<1x5x784xbf16>
    %518 = vector.shape_cast %517 : vector<1x5x784xbf16> to vector<5x784xbf16>
    %519 = arith.extf %518 : vector<5x784xbf16> to vector<5x784xf32>
    %c43_303 = arith.constant 43 : index
    %c0_304 = arith.constant 0 : index
    %c0_305 = arith.constant 0 : index
    %520 = vector.load %arg1[%c43_303, %c0_304, %c0_305] : memref<64x1x784xf32, #tpu.memory_space<vmem>>, vector<1x1x784xf32>
    %521 = vector.shape_cast %520 : vector<1x1x784xf32> to vector<1x784xf32>
    %cst_306 = arith.constant 1.000000e+00 : f32
    %522 = vector.broadcast %cst_306 : f32 to vector<5x784xf32>
    %523 = arith.subf %519, %522 : vector<5x784xf32>
    %cst_307 = arith.constant 1.000000e+30 : f32
    %524 = vector.broadcast %cst_307 : f32 to vector<5x784xf32>
    %525 = arith.mulf %523, %524 : vector<5x784xf32>
    %526 = vector.broadcast %521 : vector<1x784xf32> to vector<5x784xf32>
    %527 = arith.addf %526, %525 : vector<5x784xf32>
    %528 = arith.maximumf %516, %527 : vector<5x784xf32>
    %c44 = arith.constant 44 : index
    %c0_308 = arith.constant 0 : index
    %c0_309 = arith.constant 0 : index
    %529 = vector.load %arg2[%c44, %c0_308, %c0_309] : memref<64x5x784xbf16, #tpu.memory_space<vmem>>, vector<1x5x784xbf16>
    %530 = vector.shape_cast %529 : vector<1x5x784xbf16> to vector<5x784xbf16>
    %531 = arith.extf %530 : vector<5x784xbf16> to vector<5x784xf32>
    %c44_310 = arith.constant 44 : index
    %c0_311 = arith.constant 0 : index
    %c0_312 = arith.constant 0 : index
    %532 = vector.load %arg1[%c44_310, %c0_311, %c0_312] : memref<64x1x784xf32, #tpu.memory_space<vmem>>, vector<1x1x784xf32>
    %533 = vector.shape_cast %532 : vector<1x1x784xf32> to vector<1x784xf32>
    %cst_313 = arith.constant 1.000000e+00 : f32
    %534 = vector.broadcast %cst_313 : f32 to vector<5x784xf32>
    %535 = arith.subf %531, %534 : vector<5x784xf32>
    %cst_314 = arith.constant 1.000000e+30 : f32
    %536 = vector.broadcast %cst_314 : f32 to vector<5x784xf32>
    %537 = arith.mulf %535, %536 : vector<5x784xf32>
    %538 = vector.broadcast %533 : vector<1x784xf32> to vector<5x784xf32>
    %539 = arith.addf %538, %537 : vector<5x784xf32>
    %540 = arith.maximumf %528, %539 : vector<5x784xf32>
    %c45 = arith.constant 45 : index
    %c0_315 = arith.constant 0 : index
    %c0_316 = arith.constant 0 : index
    %541 = vector.load %arg2[%c45, %c0_315, %c0_316] : memref<64x5x784xbf16, #tpu.memory_space<vmem>>, vector<1x5x784xbf16>
    %542 = vector.shape_cast %541 : vector<1x5x784xbf16> to vector<5x784xbf16>
    %543 = arith.extf %542 : vector<5x784xbf16> to vector<5x784xf32>
    %c45_317 = arith.constant 45 : index
    %c0_318 = arith.constant 0 : index
    %c0_319 = arith.constant 0 : index
    %544 = vector.load %arg1[%c45_317, %c0_318, %c0_319] : memref<64x1x784xf32, #tpu.memory_space<vmem>>, vector<1x1x784xf32>
    %545 = vector.shape_cast %544 : vector<1x1x784xf32> to vector<1x784xf32>
    %cst_320 = arith.constant 1.000000e+00 : f32
    %546 = vector.broadcast %cst_320 : f32 to vector<5x784xf32>
    %547 = arith.subf %543, %546 : vector<5x784xf32>
    %cst_321 = arith.constant 1.000000e+30 : f32
    %548 = vector.broadcast %cst_321 : f32 to vector<5x784xf32>
    %549 = arith.mulf %547, %548 : vector<5x784xf32>
    %550 = vector.broadcast %545 : vector<1x784xf32> to vector<5x784xf32>
    %551 = arith.addf %550, %549 : vector<5x784xf32>
    %552 = arith.maximumf %540, %551 : vector<5x784xf32>
    %c46 = arith.constant 46 : index
    %c0_322 = arith.constant 0 : index
    %c0_323 = arith.constant 0 : index
    %553 = vector.load %arg2[%c46, %c0_322, %c0_323] : memref<64x5x784xbf16, #tpu.memory_space<vmem>>, vector<1x5x784xbf16>
    %554 = vector.shape_cast %553 : vector<1x5x784xbf16> to vector<5x784xbf16>
    %555 = arith.extf %554 : vector<5x784xbf16> to vector<5x784xf32>
    %c46_324 = arith.constant 46 : index
    %c0_325 = arith.constant 0 : index
    %c0_326 = arith.constant 0 : index
    %556 = vector.load %arg1[%c46_324, %c0_325, %c0_326] : memref<64x1x784xf32, #tpu.memory_space<vmem>>, vector<1x1x784xf32>
    %557 = vector.shape_cast %556 : vector<1x1x784xf32> to vector<1x784xf32>
    %cst_327 = arith.constant 1.000000e+00 : f32
    %558 = vector.broadcast %cst_327 : f32 to vector<5x784xf32>
    %559 = arith.subf %555, %558 : vector<5x784xf32>
    %cst_328 = arith.constant 1.000000e+30 : f32
    %560 = vector.broadcast %cst_328 : f32 to vector<5x784xf32>
    %561 = arith.mulf %559, %560 : vector<5x784xf32>
    %562 = vector.broadcast %557 : vector<1x784xf32> to vector<5x784xf32>
    %563 = arith.addf %562, %561 : vector<5x784xf32>
    %564 = arith.maximumf %552, %563 : vector<5x784xf32>
    %c47 = arith.constant 47 : index
    %c0_329 = arith.constant 0 : index
    %c0_330 = arith.constant 0 : index
    %565 = vector.load %arg2[%c47, %c0_329, %c0_330] : memref<64x5x784xbf16, #tpu.memory_space<vmem>>, vector<1x5x784xbf16>
    %566 = vector.shape_cast %565 : vector<1x5x784xbf16> to vector<5x784xbf16>
    %567 = arith.extf %566 : vector<5x784xbf16> to vector<5x784xf32>
    %c47_331 = arith.constant 47 : index
    %c0_332 = arith.constant 0 : index
    %c0_333 = arith.constant 0 : index
    %568 = vector.load %arg1[%c47_331, %c0_332, %c0_333] : memref<64x1x784xf32, #tpu.memory_space<vmem>>, vector<1x1x784xf32>
    %569 = vector.shape_cast %568 : vector<1x1x784xf32> to vector<1x784xf32>
    %cst_334 = arith.constant 1.000000e+00 : f32
    %570 = vector.broadcast %cst_334 : f32 to vector<5x784xf32>
    %571 = arith.subf %567, %570 : vector<5x784xf32>
    %cst_335 = arith.constant 1.000000e+30 : f32
    %572 = vector.broadcast %cst_335 : f32 to vector<5x784xf32>
    %573 = arith.mulf %571, %572 : vector<5x784xf32>
    %574 = vector.broadcast %569 : vector<1x784xf32> to vector<5x784xf32>
    %575 = arith.addf %574, %573 : vector<5x784xf32>
    %576 = arith.maximumf %564, %575 : vector<5x784xf32>
    %c48 = arith.constant 48 : index
    %c0_336 = arith.constant 0 : index
    %c0_337 = arith.constant 0 : index
    %577 = vector.load %arg2[%c48, %c0_336, %c0_337] : memref<64x5x784xbf16, #tpu.memory_space<vmem>>, vector<1x5x784xbf16>
    %578 = vector.shape_cast %577 : vector<1x5x784xbf16> to vector<5x784xbf16>
    %579 = arith.extf %578 : vector<5x784xbf16> to vector<5x784xf32>
    %c48_338 = arith.constant 48 : index
    %c0_339 = arith.constant 0 : index
    %c0_340 = arith.constant 0 : index
    %580 = vector.load %arg1[%c48_338, %c0_339, %c0_340] : memref<64x1x784xf32, #tpu.memory_space<vmem>>, vector<1x1x784xf32>
    %581 = vector.shape_cast %580 : vector<1x1x784xf32> to vector<1x784xf32>
    %cst_341 = arith.constant 1.000000e+00 : f32
    %582 = vector.broadcast %cst_341 : f32 to vector<5x784xf32>
    %583 = arith.subf %579, %582 : vector<5x784xf32>
    %cst_342 = arith.constant 1.000000e+30 : f32
    %584 = vector.broadcast %cst_342 : f32 to vector<5x784xf32>
    %585 = arith.mulf %583, %584 : vector<5x784xf32>
    %586 = vector.broadcast %581 : vector<1x784xf32> to vector<5x784xf32>
    %587 = arith.addf %586, %585 : vector<5x784xf32>
    %588 = arith.maximumf %576, %587 : vector<5x784xf32>
    %c49 = arith.constant 49 : index
    %c0_343 = arith.constant 0 : index
    %c0_344 = arith.constant 0 : index
    %589 = vector.load %arg2[%c49, %c0_343, %c0_344] : memref<64x5x784xbf16, #tpu.memory_space<vmem>>, vector<1x5x784xbf16>
    %590 = vector.shape_cast %589 : vector<1x5x784xbf16> to vector<5x784xbf16>
    %591 = arith.extf %590 : vector<5x784xbf16> to vector<5x784xf32>
    %c49_345 = arith.constant 49 : index
    %c0_346 = arith.constant 0 : index
    %c0_347 = arith.constant 0 : index
    %592 = vector.load %arg1[%c49_345, %c0_346, %c0_347] : memref<64x1x784xf32, #tpu.memory_space<vmem>>, vector<1x1x784xf32>
    %593 = vector.shape_cast %592 : vector<1x1x784xf32> to vector<1x784xf32>
    %cst_348 = arith.constant 1.000000e+00 : f32
    %594 = vector.broadcast %cst_348 : f32 to vector<5x784xf32>
    %595 = arith.subf %591, %594 : vector<5x784xf32>
    %cst_349 = arith.constant 1.000000e+30 : f32
    %596 = vector.broadcast %cst_349 : f32 to vector<5x784xf32>
    %597 = arith.mulf %595, %596 : vector<5x784xf32>
    %598 = vector.broadcast %593 : vector<1x784xf32> to vector<5x784xf32>
    %599 = arith.addf %598, %597 : vector<5x784xf32>
    %600 = arith.maximumf %588, %599 : vector<5x784xf32>
    %c50 = arith.constant 50 : index
    %c0_350 = arith.constant 0 : index
    %c0_351 = arith.constant 0 : index
    %601 = vector.load %arg2[%c50, %c0_350, %c0_351] : memref<64x5x784xbf16, #tpu.memory_space<vmem>>, vector<1x5x784xbf16>
    %602 = vector.shape_cast %601 : vector<1x5x784xbf16> to vector<5x784xbf16>
    %603 = arith.extf %602 : vector<5x784xbf16> to vector<5x784xf32>
    %c50_352 = arith.constant 50 : index
    %c0_353 = arith.constant 0 : index
    %c0_354 = arith.constant 0 : index
    %604 = vector.load %arg1[%c50_352, %c0_353, %c0_354] : memref<64x1x784xf32, #tpu.memory_space<vmem>>, vector<1x1x784xf32>
    %605 = vector.shape_cast %604 : vector<1x1x784xf32> to vector<1x784xf32>
    %cst_355 = arith.constant 1.000000e+00 : f32
    %606 = vector.broadcast %cst_355 : f32 to vector<5x784xf32>
    %607 = arith.subf %603, %606 : vector<5x784xf32>
    %cst_356 = arith.constant 1.000000e+30 : f32
    %608 = vector.broadcast %cst_356 : f32 to vector<5x784xf32>
    %609 = arith.mulf %607, %608 : vector<5x784xf32>
    %610 = vector.broadcast %605 : vector<1x784xf32> to vector<5x784xf32>
    %611 = arith.addf %610, %609 : vector<5x784xf32>
    %612 = arith.maximumf %600, %611 : vector<5x784xf32>
    %c51 = arith.constant 51 : index
    %c0_357 = arith.constant 0 : index
    %c0_358 = arith.constant 0 : index
    %613 = vector.load %arg2[%c51, %c0_357, %c0_358] : memref<64x5x784xbf16, #tpu.memory_space<vmem>>, vector<1x5x784xbf16>
    %614 = vector.shape_cast %613 : vector<1x5x784xbf16> to vector<5x784xbf16>
    %615 = arith.extf %614 : vector<5x784xbf16> to vector<5x784xf32>
    %c51_359 = arith.constant 51 : index
    %c0_360 = arith.constant 0 : index
    %c0_361 = arith.constant 0 : index
    %616 = vector.load %arg1[%c51_359, %c0_360, %c0_361] : memref<64x1x784xf32, #tpu.memory_space<vmem>>, vector<1x1x784xf32>
    %617 = vector.shape_cast %616 : vector<1x1x784xf32> to vector<1x784xf32>
    %cst_362 = arith.constant 1.000000e+00 : f32
    %618 = vector.broadcast %cst_362 : f32 to vector<5x784xf32>
    %619 = arith.subf %615, %618 : vector<5x784xf32>
    %cst_363 = arith.constant 1.000000e+30 : f32
    %620 = vector.broadcast %cst_363 : f32 to vector<5x784xf32>
    %621 = arith.mulf %619, %620 : vector<5x784xf32>
    %622 = vector.broadcast %617 : vector<1x784xf32> to vector<5x784xf32>
    %623 = arith.addf %622, %621 : vector<5x784xf32>
    %624 = arith.maximumf %612, %623 : vector<5x784xf32>
    %c52 = arith.constant 52 : index
    %c0_364 = arith.constant 0 : index
    %c0_365 = arith.constant 0 : index
    %625 = vector.load %arg2[%c52, %c0_364, %c0_365] : memref<64x5x784xbf16, #tpu.memory_space<vmem>>, vector<1x5x784xbf16>
    %626 = vector.shape_cast %625 : vector<1x5x784xbf16> to vector<5x784xbf16>
    %627 = arith.extf %626 : vector<5x784xbf16> to vector<5x784xf32>
    %c52_366 = arith.constant 52 : index
    %c0_367 = arith.constant 0 : index
    %c0_368 = arith.constant 0 : index
    %628 = vector.load %arg1[%c52_366, %c0_367, %c0_368] : memref<64x1x784xf32, #tpu.memory_space<vmem>>, vector<1x1x784xf32>
    %629 = vector.shape_cast %628 : vector<1x1x784xf32> to vector<1x784xf32>
    %cst_369 = arith.constant 1.000000e+00 : f32
    %630 = vector.broadcast %cst_369 : f32 to vector<5x784xf32>
    %631 = arith.subf %627, %630 : vector<5x784xf32>
    %cst_370 = arith.constant 1.000000e+30 : f32
    %632 = vector.broadcast %cst_370 : f32 to vector<5x784xf32>
    %633 = arith.mulf %631, %632 : vector<5x784xf32>
    %634 = vector.broadcast %629 : vector<1x784xf32> to vector<5x784xf32>
    %635 = arith.addf %634, %633 : vector<5x784xf32>
    %636 = arith.maximumf %624, %635 : vector<5x784xf32>
    %c53 = arith.constant 53 : index
    %c0_371 = arith.constant 0 : index
    %c0_372 = arith.constant 0 : index
    %637 = vector.load %arg2[%c53, %c0_371, %c0_372] : memref<64x5x784xbf16, #tpu.memory_space<vmem>>, vector<1x5x784xbf16>
    %638 = vector.shape_cast %637 : vector<1x5x784xbf16> to vector<5x784xbf16>
    %639 = arith.extf %638 : vector<5x784xbf16> to vector<5x784xf32>
    %c53_373 = arith.constant 53 : index
    %c0_374 = arith.constant 0 : index
    %c0_375 = arith.constant 0 : index
    %640 = vector.load %arg1[%c53_373, %c0_374, %c0_375] : memref<64x1x784xf32, #tpu.memory_space<vmem>>, vector<1x1x784xf32>
    %641 = vector.shape_cast %640 : vector<1x1x784xf32> to vector<1x784xf32>
    %cst_376 = arith.constant 1.000000e+00 : f32
    %642 = vector.broadcast %cst_376 : f32 to vector<5x784xf32>
    %643 = arith.subf %639, %642 : vector<5x784xf32>
    %cst_377 = arith.constant 1.000000e+30 : f32
    %644 = vector.broadcast %cst_377 : f32 to vector<5x784xf32>
    %645 = arith.mulf %643, %644 : vector<5x784xf32>
    %646 = vector.broadcast %641 : vector<1x784xf32> to vector<5x784xf32>
    %647 = arith.addf %646, %645 : vector<5x784xf32>
    %648 = arith.maximumf %636, %647 : vector<5x784xf32>
    %c54 = arith.constant 54 : index
    %c0_378 = arith.constant 0 : index
    %c0_379 = arith.constant 0 : index
    %649 = vector.load %arg2[%c54, %c0_378, %c0_379] : memref<64x5x784xbf16, #tpu.memory_space<vmem>>, vector<1x5x784xbf16>
    %650 = vector.shape_cast %649 : vector<1x5x784xbf16> to vector<5x784xbf16>
    %651 = arith.extf %650 : vector<5x784xbf16> to vector<5x784xf32>
    %c54_380 = arith.constant 54 : index
    %c0_381 = arith.constant 0 : index
    %c0_382 = arith.constant 0 : index
    %652 = vector.load %arg1[%c54_380, %c0_381, %c0_382] : memref<64x1x784xf32, #tpu.memory_space<vmem>>, vector<1x1x784xf32>
    %653 = vector.shape_cast %652 : vector<1x1x784xf32> to vector<1x784xf32>
    %cst_383 = arith.constant 1.000000e+00 : f32
    %654 = vector.broadcast %cst_383 : f32 to vector<5x784xf32>
    %655 = arith.subf %651, %654 : vector<5x784xf32>
    %cst_384 = arith.constant 1.000000e+30 : f32
    %656 = vector.broadcast %cst_384 : f32 to vector<5x784xf32>
    %657 = arith.mulf %655, %656 : vector<5x784xf32>
    %658 = vector.broadcast %653 : vector<1x784xf32> to vector<5x784xf32>
    %659 = arith.addf %658, %657 : vector<5x784xf32>
    %660 = arith.maximumf %648, %659 : vector<5x784xf32>
    %c55 = arith.constant 55 : index
    %c0_385 = arith.constant 0 : index
    %c0_386 = arith.constant 0 : index
    %661 = vector.load %arg2[%c55, %c0_385, %c0_386] : memref<64x5x784xbf16, #tpu.memory_space<vmem>>, vector<1x5x784xbf16>
    %662 = vector.shape_cast %661 : vector<1x5x784xbf16> to vector<5x784xbf16>
    %663 = arith.extf %662 : vector<5x784xbf16> to vector<5x784xf32>
    %c55_387 = arith.constant 55 : index
    %c0_388 = arith.constant 0 : index
    %c0_389 = arith.constant 0 : index
    %664 = vector.load %arg1[%c55_387, %c0_388, %c0_389] : memref<64x1x784xf32, #tpu.memory_space<vmem>>, vector<1x1x784xf32>
    %665 = vector.shape_cast %664 : vector<1x1x784xf32> to vector<1x784xf32>
    %cst_390 = arith.constant 1.000000e+00 : f32
    %666 = vector.broadcast %cst_390 : f32 to vector<5x784xf32>
    %667 = arith.subf %663, %666 : vector<5x784xf32>
    %cst_391 = arith.constant 1.000000e+30 : f32
    %668 = vector.broadcast %cst_391 : f32 to vector<5x784xf32>
    %669 = arith.mulf %667, %668 : vector<5x784xf32>
    %670 = vector.broadcast %665 : vector<1x784xf32> to vector<5x784xf32>
    %671 = arith.addf %670, %669 : vector<5x784xf32>
    %672 = arith.maximumf %660, %671 : vector<5x784xf32>
    %c56 = arith.constant 56 : index
    %c0_392 = arith.constant 0 : index
    %c0_393 = arith.constant 0 : index
    %673 = vector.load %arg2[%c56, %c0_392, %c0_393] : memref<64x5x784xbf16, #tpu.memory_space<vmem>>, vector<1x5x784xbf16>
    %674 = vector.shape_cast %673 : vector<1x5x784xbf16> to vector<5x784xbf16>
    %675 = arith.extf %674 : vector<5x784xbf16> to vector<5x784xf32>
    %c56_394 = arith.constant 56 : index
    %c0_395 = arith.constant 0 : index
    %c0_396 = arith.constant 0 : index
    %676 = vector.load %arg1[%c56_394, %c0_395, %c0_396] : memref<64x1x784xf32, #tpu.memory_space<vmem>>, vector<1x1x784xf32>
    %677 = vector.shape_cast %676 : vector<1x1x784xf32> to vector<1x784xf32>
    %cst_397 = arith.constant 1.000000e+00 : f32
    %678 = vector.broadcast %cst_397 : f32 to vector<5x784xf32>
    %679 = arith.subf %675, %678 : vector<5x784xf32>
    %cst_398 = arith.constant 1.000000e+30 : f32
    %680 = vector.broadcast %cst_398 : f32 to vector<5x784xf32>
    %681 = arith.mulf %679, %680 : vector<5x784xf32>
    %682 = vector.broadcast %677 : vector<1x784xf32> to vector<5x784xf32>
    %683 = arith.addf %682, %681 : vector<5x784xf32>
    %684 = arith.maximumf %672, %683 : vector<5x784xf32>
    %c57 = arith.constant 57 : index
    %c0_399 = arith.constant 0 : index
    %c0_400 = arith.constant 0 : index
    %685 = vector.load %arg2[%c57, %c0_399, %c0_400] : memref<64x5x784xbf16, #tpu.memory_space<vmem>>, vector<1x5x784xbf16>
    %686 = vector.shape_cast %685 : vector<1x5x784xbf16> to vector<5x784xbf16>
    %687 = arith.extf %686 : vector<5x784xbf16> to vector<5x784xf32>
    %c57_401 = arith.constant 57 : index
    %c0_402 = arith.constant 0 : index
    %c0_403 = arith.constant 0 : index
    %688 = vector.load %arg1[%c57_401, %c0_402, %c0_403] : memref<64x1x784xf32, #tpu.memory_space<vmem>>, vector<1x1x784xf32>
    %689 = vector.shape_cast %688 : vector<1x1x784xf32> to vector<1x784xf32>
    %cst_404 = arith.constant 1.000000e+00 : f32
    %690 = vector.broadcast %cst_404 : f32 to vector<5x784xf32>
    %691 = arith.subf %687, %690 : vector<5x784xf32>
    %cst_405 = arith.constant 1.000000e+30 : f32
    %692 = vector.broadcast %cst_405 : f32 to vector<5x784xf32>
    %693 = arith.mulf %691, %692 : vector<5x784xf32>
    %694 = vector.broadcast %689 : vector<1x784xf32> to vector<5x784xf32>
    %695 = arith.addf %694, %693 : vector<5x784xf32>
    %696 = arith.maximumf %684, %695 : vector<5x784xf32>
    %c58 = arith.constant 58 : index
    %c0_406 = arith.constant 0 : index
    %c0_407 = arith.constant 0 : index
    %697 = vector.load %arg2[%c58, %c0_406, %c0_407] : memref<64x5x784xbf16, #tpu.memory_space<vmem>>, vector<1x5x784xbf16>
    %698 = vector.shape_cast %697 : vector<1x5x784xbf16> to vector<5x784xbf16>
    %699 = arith.extf %698 : vector<5x784xbf16> to vector<5x784xf32>
    %c58_408 = arith.constant 58 : index
    %c0_409 = arith.constant 0 : index
    %c0_410 = arith.constant 0 : index
    %700 = vector.load %arg1[%c58_408, %c0_409, %c0_410] : memref<64x1x784xf32, #tpu.memory_space<vmem>>, vector<1x1x784xf32>
    %701 = vector.shape_cast %700 : vector<1x1x784xf32> to vector<1x784xf32>
    %cst_411 = arith.constant 1.000000e+00 : f32
    %702 = vector.broadcast %cst_411 : f32 to vector<5x784xf32>
    %703 = arith.subf %699, %702 : vector<5x784xf32>
    %cst_412 = arith.constant 1.000000e+30 : f32
    %704 = vector.broadcast %cst_412 : f32 to vector<5x784xf32>
    %705 = arith.mulf %703, %704 : vector<5x784xf32>
    %706 = vector.broadcast %701 : vector<1x784xf32> to vector<5x784xf32>
    %707 = arith.addf %706, %705 : vector<5x784xf32>
    %708 = arith.maximumf %696, %707 : vector<5x784xf32>
    %c59 = arith.constant 59 : index
    %c0_413 = arith.constant 0 : index
    %c0_414 = arith.constant 0 : index
    %709 = vector.load %arg2[%c59, %c0_413, %c0_414] : memref<64x5x784xbf16, #tpu.memory_space<vmem>>, vector<1x5x784xbf16>
    %710 = vector.shape_cast %709 : vector<1x5x784xbf16> to vector<5x784xbf16>
    %711 = arith.extf %710 : vector<5x784xbf16> to vector<5x784xf32>
    %c59_415 = arith.constant 59 : index
    %c0_416 = arith.constant 0 : index
    %c0_417 = arith.constant 0 : index
    %712 = vector.load %arg1[%c59_415, %c0_416, %c0_417] : memref<64x1x784xf32, #tpu.memory_space<vmem>>, vector<1x1x784xf32>
    %713 = vector.shape_cast %712 : vector<1x1x784xf32> to vector<1x784xf32>
    %cst_418 = arith.constant 1.000000e+00 : f32
    %714 = vector.broadcast %cst_418 : f32 to vector<5x784xf32>
    %715 = arith.subf %711, %714 : vector<5x784xf32>
    %cst_419 = arith.constant 1.000000e+30 : f32
    %716 = vector.broadcast %cst_419 : f32 to vector<5x784xf32>
    %717 = arith.mulf %715, %716 : vector<5x784xf32>
    %718 = vector.broadcast %713 : vector<1x784xf32> to vector<5x784xf32>
    %719 = arith.addf %718, %717 : vector<5x784xf32>
    %720 = arith.maximumf %708, %719 : vector<5x784xf32>
    %c60 = arith.constant 60 : index
    %c0_420 = arith.constant 0 : index
    %c0_421 = arith.constant 0 : index
    %721 = vector.load %arg2[%c60, %c0_420, %c0_421] : memref<64x5x784xbf16, #tpu.memory_space<vmem>>, vector<1x5x784xbf16>
    %722 = vector.shape_cast %721 : vector<1x5x784xbf16> to vector<5x784xbf16>
    %723 = arith.extf %722 : vector<5x784xbf16> to vector<5x784xf32>
    %c60_422 = arith.constant 60 : index
    %c0_423 = arith.constant 0 : index
    %c0_424 = arith.constant 0 : index
    %724 = vector.load %arg1[%c60_422, %c0_423, %c0_424] : memref<64x1x784xf32, #tpu.memory_space<vmem>>, vector<1x1x784xf32>
    %725 = vector.shape_cast %724 : vector<1x1x784xf32> to vector<1x784xf32>
    %cst_425 = arith.constant 1.000000e+00 : f32
    %726 = vector.broadcast %cst_425 : f32 to vector<5x784xf32>
    %727 = arith.subf %723, %726 : vector<5x784xf32>
    %cst_426 = arith.constant 1.000000e+30 : f32
    %728 = vector.broadcast %cst_426 : f32 to vector<5x784xf32>
    %729 = arith.mulf %727, %728 : vector<5x784xf32>
    %730 = vector.broadcast %725 : vector<1x784xf32> to vector<5x784xf32>
    %731 = arith.addf %730, %729 : vector<5x784xf32>
    %732 = arith.maximumf %720, %731 : vector<5x784xf32>
    %c61 = arith.constant 61 : index
    %c0_427 = arith.constant 0 : index
    %c0_428 = arith.constant 0 : index
    %733 = vector.load %arg2[%c61, %c0_427, %c0_428] : memref<64x5x784xbf16, #tpu.memory_space<vmem>>, vector<1x5x784xbf16>
    %734 = vector.shape_cast %733 : vector<1x5x784xbf16> to vector<5x784xbf16>
    %735 = arith.extf %734 : vector<5x784xbf16> to vector<5x784xf32>
    %c61_429 = arith.constant 61 : index
    %c0_430 = arith.constant 0 : index
    %c0_431 = arith.constant 0 : index
    %736 = vector.load %arg1[%c61_429, %c0_430, %c0_431] : memref<64x1x784xf32, #tpu.memory_space<vmem>>, vector<1x1x784xf32>
    %737 = vector.shape_cast %736 : vector<1x1x784xf32> to vector<1x784xf32>
    %cst_432 = arith.constant 1.000000e+00 : f32
    %738 = vector.broadcast %cst_432 : f32 to vector<5x784xf32>
    %739 = arith.subf %735, %738 : vector<5x784xf32>
    %cst_433 = arith.constant 1.000000e+30 : f32
    %740 = vector.broadcast %cst_433 : f32 to vector<5x784xf32>
    %741 = arith.mulf %739, %740 : vector<5x784xf32>
    %742 = vector.broadcast %737 : vector<1x784xf32> to vector<5x784xf32>
    %743 = arith.addf %742, %741 : vector<5x784xf32>
    %744 = arith.maximumf %732, %743 : vector<5x784xf32>
    %c62 = arith.constant 62 : index
    %c0_434 = arith.constant 0 : index
    %c0_435 = arith.constant 0 : index
    %745 = vector.load %arg2[%c62, %c0_434, %c0_435] : memref<64x5x784xbf16, #tpu.memory_space<vmem>>, vector<1x5x784xbf16>
    %746 = vector.shape_cast %745 : vector<1x5x784xbf16> to vector<5x784xbf16>
    %747 = arith.extf %746 : vector<5x784xbf16> to vector<5x784xf32>
    %c62_436 = arith.constant 62 : index
    %c0_437 = arith.constant 0 : index
    %c0_438 = arith.constant 0 : index
    %748 = vector.load %arg1[%c62_436, %c0_437, %c0_438] : memref<64x1x784xf32, #tpu.memory_space<vmem>>, vector<1x1x784xf32>
    %749 = vector.shape_cast %748 : vector<1x1x784xf32> to vector<1x784xf32>
    %cst_439 = arith.constant 1.000000e+00 : f32
    %750 = vector.broadcast %cst_439 : f32 to vector<5x784xf32>
    %751 = arith.subf %747, %750 : vector<5x784xf32>
    %cst_440 = arith.constant 1.000000e+30 : f32
    %752 = vector.broadcast %cst_440 : f32 to vector<5x784xf32>
    %753 = arith.mulf %751, %752 : vector<5x784xf32>
    %754 = vector.broadcast %749 : vector<1x784xf32> to vector<5x784xf32>
    %755 = arith.addf %754, %753 : vector<5x784xf32>
    %756 = arith.maximumf %744, %755 : vector<5x784xf32>
    %c63 = arith.constant 63 : index
    %c0_441 = arith.constant 0 : index
    %c0_442 = arith.constant 0 : index
    %757 = vector.load %arg2[%c63, %c0_441, %c0_442] : memref<64x5x784xbf16, #tpu.memory_space<vmem>>, vector<1x5x784xbf16>
    %758 = vector.shape_cast %757 : vector<1x5x784xbf16> to vector<5x784xbf16>
    %759 = arith.extf %758 : vector<5x784xbf16> to vector<5x784xf32>
    %c63_443 = arith.constant 63 : index
    %c0_444 = arith.constant 0 : index
    %c0_445 = arith.constant 0 : index
    %760 = vector.load %arg1[%c63_443, %c0_444, %c0_445] : memref<64x1x784xf32, #tpu.memory_space<vmem>>, vector<1x1x784xf32>
    %761 = vector.shape_cast %760 : vector<1x1x784xf32> to vector<1x784xf32>
    %cst_446 = arith.constant 1.000000e+00 : f32
    %762 = vector.broadcast %cst_446 : f32 to vector<5x784xf32>
    %763 = arith.subf %759, %762 : vector<5x784xf32>
    %cst_447 = arith.constant 1.000000e+30 : f32
    %764 = vector.broadcast %cst_447 : f32 to vector<5x784xf32>
    %765 = arith.mulf %763, %764 : vector<5x784xf32>
    %766 = vector.broadcast %761 : vector<1x784xf32> to vector<5x784xf32>
    %767 = arith.addf %766, %765 : vector<5x784xf32>
    %768 = arith.maximumf %756, %767 : vector<5x784xf32>
    %cst_448 = arith.constant 0.000000e+00 : f32
    %769 = vector.broadcast %cst_448 : f32 to vector<5x784xf32>
    %770 = arith.maximumf %768, %769 : vector<5x784xf32>
    %771 = arith.truncf %770 : vector<5x784xf32> to vector<5x784xbf16>
    %c0_449 = arith.constant 0 : index
    %c0_450 = arith.constant 0 : index
    %772 = vector.load %arg4[%c0_449, %c0_450] : memref<784x128xbf16, #tpu.memory_space<vmem>>, vector<784x128xbf16>
    %cst_451 = arith.constant dense<0.000000e+00> : vector<5x128xf32>
    %773 = tpu.matmul %771, %772, %cst_451 {dimension_numbers = #tpu.dot_dimension_numbers<[1], [0], [0], [1], [0, 0, 1, 1], [], []>} : vector<5x784xbf16>, vector<784x128xbf16>, vector<5x128xf32> -> vector<5x128xf32>
    %c0_452 = arith.constant 0 : index
    %c0_453 = arith.constant 0 : index
    %774 = vector.load %arg5[%c0_452, %c0_453] : memref<1x128xf32, #tpu.memory_space<vmem>>, vector<1x128xf32>
    %775 = vector.broadcast %774 : vector<1x128xf32> to vector<5x128xf32>
    %776 = arith.addf %773, %775 : vector<5x128xf32>
    %cst_454 = arith.constant 0.000000e+00 : f32
    %777 = vector.broadcast %cst_454 : f32 to vector<5x128xf32>
    %778 = arith.maximumf %776, %777 : vector<5x128xf32>
    %779 = arith.truncf %778 : vector<5x128xf32> to vector<5x128xbf16>
    %c0_455 = arith.constant 0 : index
    %c0_456 = arith.constant 0 : index
    %780 = vector.load %arg6[%c0_455, %c0_456] : memref<128x64xbf16, #tpu.memory_space<vmem>>, vector<128x64xbf16>
    %cst_457 = arith.constant dense<0.000000e+00> : vector<5x64xf32>
    %781 = tpu.matmul %779, %780, %cst_457 {dimension_numbers = #tpu.dot_dimension_numbers<[1], [0], [0], [1], [0, 0, 1, 1], [], []>} : vector<5x128xbf16>, vector<128x64xbf16>, vector<5x64xf32> -> vector<5x64xf32>
    %c0_458 = arith.constant 0 : index
    %c0_459 = arith.constant 0 : index
    %782 = vector.load %arg7[%c0_458, %c0_459] : memref<1x64xf32, #tpu.memory_space<vmem>>, vector<1x64xf32>
    %783 = vector.broadcast %782 : vector<1x64xf32> to vector<5x64xf32>
    %784 = arith.addf %781, %783 : vector<5x64xf32>
    %cst_460 = arith.constant 0.000000e+00 : f32
    %785 = vector.broadcast %cst_460 : f32 to vector<5x64xf32>
    %786 = arith.maximumf %784, %785 : vector<5x64xf32>
    %787 = arith.truncf %786 : vector<5x64xf32> to vector<5x64xbf16>
    %c0_461 = arith.constant 0 : index
    %c0_462 = arith.constant 0 : index
    %788 = vector.load %arg8[%c0_461, %c0_462] : memref<64x10xbf16, #tpu.memory_space<vmem>>, vector<64x10xbf16>
    %cst_463 = arith.constant dense<0.000000e+00> : vector<5x10xf32>
    %789 = tpu.matmul %787, %788, %cst_463 {dimension_numbers = #tpu.dot_dimension_numbers<[1], [0], [0], [1], [0, 0, 1, 1], [], []>} : vector<5x64xbf16>, vector<64x10xbf16>, vector<5x10xf32> -> vector<5x10xf32>
    %c0_464 = arith.constant 0 : index
    %c0_465 = arith.constant 0 : index
    %790 = vector.load %arg9[%c0_464, %c0_465] : memref<1x10xf32, #tpu.memory_space<vmem>>, vector<1x10xf32>
    %791 = vector.broadcast %790 : vector<1x10xf32> to vector<5x10xf32>
    %792 = arith.addf %789, %791 : vector<5x10xf32>
    %c0_466 = arith.constant 0 : index
    %c0_467 = arith.constant 0 : index
    %793 = vector.load %arg3[%c0_466, %c0_467] : memref<2x5xf32, #tpu.memory_space<vmem>>, vector<2x5xf32>
    %cst_468 = arith.constant dense<0.000000e+00> : vector<2x10xf32>
    %794 = tpu.matmul %793, %792, %cst_468 {dimension_numbers = #tpu.dot_dimension_numbers<[1], [0], [0], [1], [0, 0, 1, 1], [], []>} : vector<2x5xf32>, vector<5x10xf32>, vector<2x10xf32> -> vector<2x10xf32>
    %c0_469 = arith.constant 0 : index
    %c0_470 = arith.constant 0 : index
    %795 = vector.load %arg10[%c0_469, %c0_470] : memref<2x10xf32, #tpu.memory_space<vmem>>, vector<2x10xf32>
    tpu.vector_store %arg10[%c0_469, %c0_470], %794 {strides = array<i32>} : memref<2x10xf32, #tpu.memory_space<vmem>>, vector<2x10xf32>,
    return
  }
  func.func @transform_0(%arg0: i32) -> (i32, i32, i32) {
    %c0_i32 = arith.constant 0 : i32
    %c0_i32_0 = arith.constant 0 : i32
    %c0_i32_1 = arith.constant 0 : i32
    %c0_i32_2 = arith.constant 0 : i32
    return %c0_i32, %c0_i32_0, %c0_i32_1 : i32, i32, i32
  }
  func.func @transform_1(%arg0: i32) -> (i32, i32, i32) {
    %c0_i32 = arith.constant 0 : i32
    %c0_i32_0 = arith.constant 0 : i32
    %c0_i32_1 = arith.constant 0 : i32
    %c0_i32_2 = arith.constant 0 : i32
    return %c0_i32, %c0_i32_0, %c0_i32_1 : i32, i32, i32
  }
  func.func @transform_2(%arg0: i32) -> (i32, i32) {
    %c0_i32 = arith.constant 0 : i32
    %c0_i32_0 = arith.constant 0 : i32
    %c0_i32_1 = arith.constant 0 : i32
    return %c0_i32, %c0_i32_0 : i32, i32
  }
  func.func @transform_3(%arg0: i32) -> (i32, i32) {
    %c0_i32 = arith.constant 0 : i32
    %c0_i32_0 = arith.constant 0 : i32
    %c0_i32_1 = arith.constant 0 : i32
    return %c0_i32, %c0_i32_0 : i32, i32
  }
  func.func @transform_4(%arg0: i32) -> (i32, i32) {
    %c0_i32 = arith.constant 0 : i32
    %c0_i32_0 = arith.constant 0 : i32
    %c0_i32_1 = arith.constant 0 : i32
    return %c0_i32, %c0_i32_0 : i32, i32
  }
  func.func @transform_5(%arg0: i32) -> (i32, i32) {
    %c0_i32 = arith.constant 0 : i32
    %c0_i32_0 = arith.constant 0 : i32
    %c0_i32_1 = arith.constant 0 : i32
    return %c0_i32, %c0_i32_0 : i32, i32
  }
  func.func @transform_6(%arg0: i32) -> (i32, i32) {
    %c0_i32 = arith.constant 0 : i32
    %c0_i32_0 = arith.constant 0 : i32
    %c0_i32_1 = arith.constant 0 : i32
    return %c0_i32, %c0_i32_0 : i32, i32
  }
  func.func @transform_7(%arg0: i32) -> (i32, i32) {
    %c0_i32 = arith.constant 0 : i32
    %c0_i32_0 = arith.constant 0 : i32
    %c0_i32_1 = arith.constant 0 : i32
    return %c0_i32, %c0_i32_0 : i32, i32
  }
  func.func @transform_8(%arg0: i32) -> (i32, i32) {
    %c0_i32 = arith.constant 0 : i32
    %c0_i32_0 = arith.constant 0 : i32
    %c0_i32_1 = arith.constant 0 : i32
    return %c0_i32, %c0_i32_0 : i32, i32
  }
  func.func @transform_9(%arg0: i32) -> (i32, i32) {
    %c0_i32 = arith.constant 0 : i32
    %c0_i32_0 = arith.constant 0 : i32
    %c0_i32_1 = arith.constant 0 : i32
    return %c0_i32, %c0_i32_0 : i32, i32
  }
}

</mosaic_0001>

<bundles_post_ra>
// kernel: _forward_impl.5
= control target key start
LH: loop header
LB: loop body
LE: loop exit
PB: predicated region body
PF: predicated region fallthrough
CT: control target
= control target key end

     0   :  { %s470_s12 = smov 0   ;;  %s472_s13 = smov 0   ;;  %s528_s0 = inlined_call_operand.vmem [shape: bf16[8,27], index: 0, kind: input, shape index: {}]   ;;  %s529_s1 = inlined_call_operand.vmem [shape: bf16[27,512], index: 1, kind: input, shape index: {}]   ;;  %s530_s2 = inlined_call_operand.vmem [shape: f32[8,1], index: 2, kind: input, shape index: {}]   ;;  %s531_s3 = inlined_call_operand.vmem [shape: f32[8,512], index: 3, kind: output, shape index: {}]  }
   0x1   :  { %s474_s14 = smov 0  }
   0x2 LB: > { %s372_s15 = sadd.s32 4294967295, %s446_s14   ;;  %s487_s16 = sadd.s32 1, %s446_s14   ;;  %s446_s14 = sphi %s474_s14, %s534_s14   ;;  %s442_s13 = sphi %s472_s13, %s533_s13   ;;  %s438_s12 = sphi %s470_s12, %s532_s12  }
   0x3   : > { %s38_s17 = ssub.s32 %s446_s14, %s487_s16  ;;  %s41_s18 = sadd.s32 1, %s442_s13 }
   0x4   : > { %p39_p0 = scmp.eq.s32.totalorder %s38_s17, 0  ;;  %p48_p1 = scmp.ne.s32.totalorder %s442_s13, %s438_s12 }
   0x5   : > { %p49_p2 = scmp.eq.s32.totalorder %s446_s14, 0  ;;  %p375_p4 = scmp.ge.s32.totalorder %s446_s14, 2 }
   0x6   : > { %s496_s19 = scalar_select %p39_p0, %s442_s13, %s41_s18  }
   0x7   : > { %p50_p3 = por %p49_p2, %p48_p1  ;;  %127 = sbr.rel (%p375_p4) target bundleno = 18 (0x12), region = 24 }
   0xc   : > { %130 = sbr.rel (!%p50_p3) target bundleno = 18 (0x12), region = 28  ;;  %s132_s20 = sand.u32 (%p50_p3), 1, %s442_s13  }
   0xd   : > { %s390_s21 = sshll.u32 (%p50_p3), %s446_s14, 3  ;;  %s376_s22 = sshll.u32 (%p50_p3), %s132_s20, 5 }
   0xe   : > { %s137_s25 = scalar_lea.vmem (%p50_p3), %s529_s1, %s390_s21  ;;  %s134_s26 = scalar_lea.vmem (%p50_p3), [#allocation2], %s376_s22 }
   0xf   : > { %v172_v0 = vld [vmem:[%s137_s25] sm:$0xff] (%p50_p3)  ;;  %v174_v1 = vld [vmem:[%s137_s25 + $0x10] sm:$0xff] (%p50_p3) }
  0x10   : > { %v176_v2 = vld [vmem:[%s137_s25 + $0x20] sm:$0xff] (%p50_p3)  ;;  %173 = vst [vmem:[%s134_s26] sm:$0xff] (%p50_p3), %v172_v0  ;;  %175 = vst [vmem:[%s134_s26 + $0x8] sm:$0xff] (%p50_p3), %v174_v1  ;;  %v178_v3 = vld [vmem:[%s137_s25 + $0x30] sm:$0xff] (%p50_p3) }
  0x11   : > { %177 = vst [vmem:[%s134_s26 + $0x10] sm:$0xff] %v176_v2  ;;  %179 = vst [vmem:[%s134_s26 + $0x18] sm:$0xff] %v178_v3 }
  0x12 PF: > { %p379_p5 = scmp.ge.s32.totalorder %s446_s14, 1  ;;  %p184_p6 = scmp.lt.s32.totalorder %s446_s14, 3 }
  0x14   : > { %p185_p7 = pnand %p379_p5, %p184_p6 }
  0x15   : > { %s191_s27 = sand.u32 (!%p185_p7), 1, %s438_s12   ;;  %s381_s7 = sshll.u32 (!%p185_p7), %s372_s15, 1 }
  0x16   : > { %188 = sbr.rel (%p185_p7) target bundleno = 240 (0xf0), region = 66  ;;  %s380_s30 = sshll.u32 (!%p185_p7), %s191_s27, 5 }
  0x17   : > { %s193_s4 = scalar_lea.vmem (!%p185_p7), [#allocation2], %s380_s30  ;;  %p216_p8 = scmp.lt.s32.totalorder (!%p185_p7), %s381_s7, 3 }
  0x1b   : > { %vm255_vm0 = vcmask 1044480   ;;  %vm256_vm1 = vcmask 1045504   ;;  %v227_v4 = vld [vmem:[%s530_s2] sm:$0xff]  ;;  %v448_v5 = vmov 65535   ;;  %v449_v7 = vmov 0   ;;  %s536_s7 = smov (!%p216_p8, %s381_s7), 3 }
  0x1c   : > { %v257_v6 = vsel %vm255_vm0, 4294967295, %v448_v5  ;;  %297 = vmatprep.mubr.bf16.mxu0 %v449_v7  ;;  %417 = vset.pattern.permute.xlu0 %v449_v7  ;;  %v418_v9 = vld [vmem:[%s193_s4 + $0x14] ss:$8 sps:$4 sm:$0x3f]   ;;  %v421_v12 = vld [vmem:[%s193_s4 + $0x4] ss:$8 sps:$4 sm:$0xff]  }
  0x1d   : > { %v258_v8 = vsel %vm256_vm1, %v257_v6, 0  ;;  %230 = vperm.xlu0 %417, %v227_v4   ;;  %v420_v10 = vld [vmem:[%s193_s4 + $0x10] ss:$8 sps:$4 sm:$0x3f]   ;;  %v423_v14 = vld [vmem:[%s193_s4] ss:$8 sps:$4 sm:$0xff]  }
  0x1e   : > { %v263_v11 = vand.u32 %v418_v9, %v258_v8  ;;  %v260_v13 = vand.u32 %v420_v10, %v258_v8  ;;  %v222_v15 = vld [vmem:[%s528_s0] sm:$0xf]  ;;  %vm251_vm2 = vcmask 220160   ;;  %s382_s8 = sshll.u32 %s536_s7, 3 }
  0x1f   : > { %s219_s11 = scalar_lea.vmem %s531_s3, %s382_s8 }
  0x20   : > { %277 = vmatprep.subr.bf16.mxu0 %v263_v11 }
  0x21   : > { %278 = vmatpush1.bf16.msra.mxu0 %v260_v13 }
  0x22   : > { %279 = vmatprep.subr.bf16.mxu0 %v421_v12 }
  0x25   : > { %280 = vmatpush1.bf16.msra.mxu0 %v423_v14 }
  0x28   : > { %387 = vmatmul.mubr.msk.bf16.vlgmr.msra.gmra.mxu0 %vm251_vm2, %v222_v15 }
  0x98   : > { %v231_v16 = vpop.permute.xlu0 %230 }
  0xe8   : > { %v299_v17 = vpop.f32.mrf.mxu0 }
  0xe9   : > { %v300_v18 = vadd.f32 %v299_v17, %v231_v16 }
  0xea   : > { %v301_v19 = vpop.f32.mrf.mxu0 }
  0xeb   : > { %v306_v20 = vmax.f32 %v300_v18, 0.0  ;;  %v302_v21 = vadd.f32 %v301_v19, %v231_v16 }
  0xec   : > { %v303_v22 = vpop.f32.mrf.mxu0 }
  0xed   : > { %308 = vst [vmem:[%s219_s11] sm:$0xff] %v306_v20  ;;  %v307_v23 = vmax.f32 %v302_v21, 0.0 }
  0xee   : > { %v304_v24 = vpop.f32.mrf.mxu0 }
  0xef   : > { %309 = vst [vmem:[%s219_s11 + $0x8] sm:$0xff] %v307_v23 }
  0xf0 PF: > { %p10_p9 = scmp.ge.s32.totalorder %s487_s16, 4   ;;  %s532_s12 = smov %s442_s13 }
  0xf1   : > { %s533_s13 = smov %s496_s19  ;;  %s534_s14 = smov %s487_s16 }
  0xf2   :  { %12 = sbr.rel (!%p10_p9) target bundleno = 2 (0x2), region = 105 }

// kernel: _forward_impl.6
= control target key start
LH: loop header
LB: loop body
LE: loop exit
PB: predicated region body
PF: predicated region fallthrough
CT: control target
= control target key end

     0   :  { %s532_s12 = smov 0   ;;  %s534_s13 = smov 0   ;;  %s590_s0 = inlined_call_operand.vmem [shape: bf16[8,72], index: 0, kind: input, shape index: {}]   ;;  %s591_s1 = inlined_call_operand.vmem [shape: bf16[72,512], index: 1, kind: input, shape index: {}]   ;;  %s592_s2 = inlined_call_operand.vmem [shape: f32[8,1], index: 2, kind: input, shape index: {}]   ;;  %s593_s3 = inlined_call_operand.vmem [shape: f32[8,512], index: 3, kind: output, shape index: {}]  }
   0x1   :  { %s536_s14 = smov 0  }
   0x2 LB: > { %s421_s15 = sadd.s32 4294967295, %s509_s14   ;;  %s549_s16 = sadd.s32 1, %s509_s14   ;;  %s509_s14 = sphi %s536_s14, %s596_s14   ;;  %s505_s13 = sphi %s534_s13, %s595_s13   ;;  %s501_s12 = sphi %s532_s12, %s594_s12  }
   0x3   : > { %s38_s17 = ssub.s32 %s509_s14, %s549_s16  ;;  %s41_s18 = sadd.s32 1, %s505_s13 }
   0x4   : > { %p39_p0 = scmp.eq.s32.totalorder %s38_s17, 0  ;;  %p48_p1 = scmp.ne.s32.totalorder %s505_s13, %s501_s12 }
   0x5   : > { %p49_p2 = scmp.eq.s32.totalorder %s509_s14, 0  ;;  %p424_p4 = scmp.ge.s32.totalorder %s509_s14, 2 }
   0x6   : > { %s558_s19 = scalar_select %p39_p0, %s505_s13, %s41_s18  }
   0x7   : > { %p50_p3 = por %p49_p2, %p48_p1  ;;  %127 = sbr.rel (%p424_p4) target bundleno = 21 (0x15), region = 24 }
   0xc   : > { %130 = sbr.rel (!%p50_p3) target bundleno = 21 (0x15), region = 28  ;;  %s132_s20 = sand.u32 (%p50_p3), 1, %s505_s13  }
   0xd   : > { %s444_s21 = sshll.u32 (%p50_p3), %s509_s14, 3  ;;  %s445_s22 = smul.u32 (%p50_p3), 72, %s132_s20 }
   0xe   : > { %s137_s25 = scalar_lea.vmem (%p50_p3), %s591_s1, %s444_s21 }
   0xf   : > { %v182_v0 = vld [vmem:[%s137_s25] sm:$0xff] (%p50_p3)  ;;  %v184_v1 = vld [vmem:[%s137_s25 + $0x10] sm:$0xff] (%p50_p3)  ;;  %s134_s26 = scalar_lea.vmem (%p50_p3), [#allocation2], %s445_s22 }
  0x10   : > { %v186_v2 = vld [vmem:[%s137_s25 + $0x20] sm:$0xff] (%p50_p3)  ;;  %v188_v3 = vld [vmem:[%s137_s25 + $0x30] sm:$0xff] (%p50_p3)  ;;  %183 = vst [vmem:[%s134_s26] sm:$0xff] (%p50_p3), %v182_v0  ;;  %185 = vst [vmem:[%s134_s26 + $0x8] sm:$0xff] (%p50_p3), %v184_v1 }
  0x11   : > { %v190_v4 = vld [vmem:[%s137_s25 + $0x40] sm:$0xff]  ;;  %v192_v5 = vld [vmem:[%s137_s25 + $0x50] sm:$0xff]  ;;  %187 = vst [vmem:[%s134_s26 + $0x10] sm:$0xff] %v186_v2  ;;  %189 = vst [vmem:[%s134_s26 + $0x18] sm:$0xff] %v188_v3 }
  0x12   : > { %191 = vst [vmem:[%s134_s26 + $0x20] sm:$0xff] %v190_v4  ;;  %193 = vst [vmem:[%s134_s26 + $0x28] sm:$0xff] %v192_v5  ;;  %v194_v6 = vld [vmem:[%s137_s25 + $0x60] sm:$0xff]  ;;  %v196_v7 = vld [vmem:[%s137_s25 + $0x70] sm:$0xff] }
  0x13   : > { %v198_v8 = vld [vmem:[%s137_s25 + $0x80] sm:$0xff]  ;;  %195 = vst [vmem:[%s134_s26 + $0x30] sm:$0xff] %v194_v6  ;;  %197 = vst [vmem:[%s134_s26 + $0x38] sm:$0xff] %v196_v7 }
  0x14   : > { %199 = vst [vmem:[%s134_s26 + $0x40] sm:$0xff] %v198_v8 }
  0x15 PF: > { %p427_p5 = scmp.ge.s32.totalorder %s509_s14, 1  ;;  %p204_p6 = scmp.lt.s32.totalorder %s509_s14, 3 }
  0x17   : > { %p205_p7 = pnand %p427_p5, %p204_p6 }
  0x18   : > { %s211_s27 = sand.u32 (!%p205_p7), 1, %s501_s12   ;;  %s428_s7 = sshll.u32 (!%p205_p7), %s421_s15, 1 }
  0x19   : > { %208 = sbr.rel (%p205_p7) target bundleno = 254 (0xfe), region = 66  ;;  %p236_p8 = scmp.lt.s32.totalorder (!%p205_p7), %s428_s7, 3 }
  0x1a   : > { %s446_s28 = smul.u32 (!%p205_p7), 72, %s211_s27 }
  0x1c   : > { %s213_s4 = scalar_lea.vmem (!%p205_p7), [#allocation2], %s446_s28 }
  0x1e   : > { %v511_v9 = vmov 0   ;;  %v252_v10 = vld [vmem:[%s592_s2] sm:$0xff]  ;;  %vm307_vm0 = vcmask 1043456   ;;  %vm303_vm1 = vcmask 588800   ;;  %s598_s7 = smov (!%p236_p8, %s428_s7), 3 }
  0x1f   : > { %346 = vmatprep.mubr.bf16.mxu0 %v511_v9  ;;  %472 = vset.pattern.permute.xlu0 %v511_v9  ;;  %v251_v11 = vld [vmem:[%s213_s4 + $0x40] sm:$0xff]  ;;  %v475_v14 = vld [vmem:[%s213_s4 + $0x34] ss:$8 sps:$4 sm:$0xff]   ;;  %v477_v16 = vld [vmem:[%s213_s4 + $0x30] ss:$8 sps:$4 sm:$0xff]   ;;  %s429_s8 = sshll.u32 %s598_s7, 3 }
  0x20   : > { %255 = vperm.xlu0 %472, %v252_v10   ;;  %v439_v12 = vcombine.high %v251_v11, %v251_v11  ;;  %v438_v13 = vcombine.low %v251_v11, %v251_v11  ;;  %v478_v17 = vld [vmem:[%s213_s4 + $0x24] ss:$8 sps:$4 sm:$0xff]   ;;  %v480_v18 = vld [vmem:[%s213_s4 + $0x20] ss:$8 sps:$4 sm:$0xff]   ;;  %v481_v19 = vld [vmem:[%s213_s4 + $0x14] ss:$8 sps:$4 sm:$0xff]   ;;  %s239_s11 = scalar_lea.vmem %s593_s3, %s429_s8 }
  0x21   : > { %v483_v20 = vld [vmem:[%s213_s4 + $0x10] ss:$8 sps:$4 sm:$0xff]   ;;  %v484_v21 = vld [vmem:[%s213_s4 + $0x4] ss:$8 sps:$4 sm:$0xff]   ;;  %v486_v22 = vld [vmem:[%s213_s4] ss:$8 sps:$4 sm:$0xff]  }
  0x22   : > { %440 = vmatprep.subr.msk.bf16.mxu0 %vm307_vm0, %v439_v12  ;;  %v309_v15 = vsel %vm307_vm0, %v438_v13, 0  ;;  %v242_v23 = vld [vmem:[%s590_s0] sm:$0xf] }
  0x23   : > { %321 = vmatpush1.bf16.msra.mxu0 %v309_v15 }
  0x24   : > { %322 = vmatprep.subr.bf16.mxu0 %v475_v14 }
  0x27   : > { %323 = vmatpush1.bf16.msra.mxu0 %v477_v16 }
  0x28   : > { %324 = vmatprep.subr.bf16.mxu0 %v478_v17 }
  0x2b   : > { %325 = vmatpush1.bf16.msra.mxu0 %v480_v18 }
  0x2c   : > { %326 = vmatprep.subr.bf16.mxu0 %v481_v19 }
  0x2f   : > { %327 = vmatpush1.bf16.msra.mxu0 %v483_v20 }
  0x30   : > { %328 = vmatprep.subr.bf16.mxu0 %v484_v21 }
  0x33   : > { %329 = vmatpush1.bf16.msra.mxu0 %v486_v22 }
  0x36   : > { %441 = vmatmul.mubr.msk.bf16.vlgmr.msra.gmra.mxu0 %vm303_vm1, %v242_v23 }
  0x9b   : > { %v256_v24 = vpop.permute.xlu0 %255 }
  0xf6   : > { %v348_v25 = vpop.f32.mrf.mxu0 }
  0xf7   : > { %v349_v26 = vadd.f32 %v348_v25, %v256_v24 }
  0xf8   : > { %v350_v27 = vpop.f32.mrf.mxu0 }
  0xf9   : > { %v355_v28 = vmax.f32 %v349_v26, 0.0  ;;  %v351_v29 = vadd.f32 %v350_v27, %v256_v24 }
  0xfa   : > { %v352_v30 = vpop.f32.mrf.mxu0 }
  0xfb   : > { %357 = vst [vmem:[%s239_s11] sm:$0xff] %v355_v28  ;;  %v356_v31 = vmax.f32 %v351_v29, 0.0 }
  0xfc   : > { %v353_v32 = vpop.f32.mrf.mxu0 }
  0xfd   : > { %358 = vst [vmem:[%s239_s11 + $0x8] sm:$0xff] %v356_v31 }
  0xfe PF: > { %p10_p9 = scmp.ge.s32.totalorder %s549_s16, 4   ;;  %s594_s12 = smov %s505_s13 }
  0xff   : > { %s595_s13 = smov %s558_s19  ;;  %s596_s14 = smov %s549_s16 }
 0x100   :  { %12 = sbr.rel (!%p10_p9) target bundleno = 2 (0x2), region = 105 }

// kernel: _forward_impl.7
= control target key start
LH: loop header
LB: loop body
LE: loop exit
PB: predicated region body
PF: predicated region fallthrough
CT: control target
= control target key end

     0   :  { %s51_s0 = inlined_call_operand.vmem [shape: f32[4,8,128], index: 0, kind: input, shape index: {}]   ;;  %s52_s1 = inlined_call_operand.vmem [shape: f32[8,128], index: 1, kind: output, shape index: {}]  }
   0x1   :  { %v8_v0 = vld [vmem:[%s51_s0] sm:$0xff]  ;;  %v23_v1 = vld [vmem:[%s51_s0 + $0x8] sm:$0xff]  ;;  %v24_v2 = vld [vmem:[%s51_s0 + $0x10] sm:$0xff] }
   0x2   :  { %v11_v3 = vmax.f32 %v8_v0, %v23_v1  ;;  %v25_v4 = vld [vmem:[%s51_s0 + $0x18] sm:$0xff] }
   0x3   :  { %v16_v5 = vmax.f32 %v24_v2, %v25_v4 }
   0x5   :  { %v17_v6 = vmax.f32 %v11_v3, %v16_v5 }
   0x7   :  { %18 = vst [vmem:[%s52_s1] sm:$0xff] %v17_v6 }

// kernel: _forward_impl.8
= control target key start
LH: loop header
LB: loop body
LE: loop exit
PB: predicated region body
PF: predicated region fallthrough
CT: control target
= control target key end

     0   :  { %vm74_vm0 = vcmask 1043456   ;;  %v164_v0 = vmov 0.0   ;;  %vm165_vm1 = vmmov 0   ;;  %v166_v3 = vmov 0   ;;  %s217_s1 = inlined_call_operand.vmem [shape: bf16[72,128], index: 1, kind: input, shape index: {}]   ;;  %s218_s2 = inlined_call_operand.vmem [shape: f32[16,1], index: 2, kind: input, shape index: {}]   ;;  %s219_s0 = inlined_call_operand.vmem [shape: bf16[16,72], index: 0, kind: input, shape index: {}]   ;;  %s220_s3 = inlined_call_operand.vmem [shape: f32[16,128], index: 3, kind: output, shape index: {}]  }
   0x1   :  { %140 = vmatprep.subr.bf16.mxu0 %v164_v0  ;;  %v158_v1 = vld [vmem:[%s217_s1 + $0x20] ss:$0 sps:$4 sm:$0xff]   ;;  %150 = vmatprep.mubr.msk.bf16.mxu0 %vm165_vm1, %v164_v0  ;;  %v159_v4 = vld [vmem:[%s217_s1 + $0x18] sm:$0xff]   ;;  %v160_v6 = vld [vmem:[%s217_s1 + $0x10] sm:$0xff]   ;;  %vm70_vm2 = vcmask 588800  }
   0x2   :  { %v76_v2 = vsel %vm74_vm0, %v158_v1, 0  ;;  %157 = vset.pattern.permute.xlu0 %v166_v3  ;;  %v26_v5 = vld [vmem:[%s218_s2] sm:$0xff]  ;;  %v27_v7 = vld [vmem:[%s218_s2 + $0x8] sm:$0xff] }
   0x3   :  { %141 = vmatpush3.bf16.msra.mxu0 %v76_v2  ;;  %30 = vperm.xlu0 %157, %v26_v5   ;;  %v161_v8 = vld [vmem:[%s217_s1 + $0x8] sm:$0xff]   ;;  %v162_v9 = vld [vmem:[%s217_s1] sm:$0xff]  }
   0x4   :  { %142 = vmatprep.subr.bf16.mxu0 %v164_v0  ;;  %v163_v10 = vld [vmem:[%s219_s0] sm:$0xff]  }
   0x7   :  { %143 = vmatpush3.bf16.msra.mxu0 %v159_v4  ;;  %35 = vperm.xlu0 %157, %v27_v7  }
   0x8   :  { %144 = vmatprep.subr.bf16.mxu0 %v164_v0 }
   0xb   :  { %145 = vmatpush3.bf16.msra.mxu0 %v160_v6 }
   0xc   :  { %146 = vmatprep.subr.bf16.mxu0 %v164_v0 }
   0xf   :  { %147 = vmatpush3.bf16.msra.mxu0 %v161_v8 }
  0x10   :  { %148 = vmatprep.subr.bf16.mxu0 %v164_v0 }
  0x13   :  { %149 = vmatpush3.bf16.msra.mxu0 %v162_v9 }
  0x16   :  { %151 = vmatmul.mubr.msk.bf16.vlgmr.msra.gmra.mxu0 %vm70_vm2, %v163_v10 }
  0x7e   :  { %v31_v11 = vpop.permute.xlu0 %30 }
  0x82   :  { %v36_v16 = vpop.permute.xlu0 %35 }
  0xd6   :  { %v112_v12 = vpop.f32.mrf.mxu0 }
  0xd7   :  { %v113_v13 = vadd.f32 %v112_v12, %v31_v11 }
  0xd8   :  { %v152_v14 = vpop.f32.mrf.mxu0 }
  0xd9   :  { %v119_v15 = vmax.f32 %v113_v13, 0.0 }
  0xda   :  { %v115_v17 = vpop.f32.mrf.mxu0 }
  0xdb   :  { %121 = vst [vmem:[%s220_s3] sm:$0xff] %v119_v15  ;;  %v116_v18 = vadd.f32 %v115_v17, %v36_v16 }
  0xdc   :  { %v153_v19 = vpop.f32.mrf.mxu0 }
  0xdd   :  { %v120_v20 = vmax.f32 %v116_v18, 0.0 }
  0xdf   :  { %122 = vst [vmem:[%s220_s3 + $0x8] sm:$0xff] %v120_v20 }

// kernel: _forward_impl.9
= control target key start
LH: loop header
LB: loop body
LE: loop exit
PB: predicated region body
PF: predicated region fallthrough
CT: control target
= control target key end

     0   :  { %v61_v23 = vlaneseq  ;;  %s11286_s0 = inlined_call_operand.vmem [shape: f32[64,1,784], index: 0, kind: input, shape index: {}]   ;;  %s11287_s1 = inlined_call_operand.vmem [shape: bf16[64,5,784], index: 1, kind: input, shape index: {}]   ;;  %s11288_s2 = inlined_call_operand.vmem [shape: f32[2,5], index: 2, kind: input, shape index: {}]   ;;  %s11289_s3 = inlined_call_operand.vmem [shape: bf16[784,128], index: 3, kind: input, shape index: {}]   ;;  %s11290_s4 = inlined_call_operand.vmem [shape: f32[1,128], index: 4, kind: input, shape index: {}]   ;;  %s11291_s5 = inlined_call_operand.vmem [shape: bf16[128,64], index: 5, kind: input, shape index: {}]   ;;  %s11292_s6 = inlined_call_operand.vmem [shape: f32[1,64], index: 6, kind: input, shape index: {}]   ;;  %s11293_s7 = inlined_call_operand.vmem [shape: bf16[64,10], index: 7, kind: input, shape index: {}]   ;;  %s11294_s8 = inlined_call_operand.vmem [shape: f32[1,10], index: 8, kind: input, shape index: {}]   ;;  %s11295_s9 = inlined_call_operand.hbm [shape: f32[2,10], index: 9, kind: output, shape index: {}]  }
   0x1   :  { %v6855_v0 = vld [vmem:[%s11289_s3 + $0x78] sm:$0xff]   ;;  %v6858_v3 = vld [vmem:[%s11289_s3 + $0x70] sm:$0xff]   ;;  %v6862_v7 = vld [vmem:[%s11289_s3 + $0x68] sm:$0xff]  }
   0x2   :  { %v6856_v1 = vld [vmem:[%s11289_s3 + $0x38] sm:$0xff]   ;;  %6725 = vmatprep.subr.bf16.mxu0 %v6855_v0  ;;  %v6860_v5 = vld [vmem:[%s11289_s3 + $0x30] sm:$0xff]   ;;  %v6864_v9 = vld [vmem:[%s11289_s3 + $0x28] sm:$0xff]   ;;  %v7264_v28 = vshrl.u32 %v61_v23, 7 }
   0x3   :  { %v6857_v2 = vld [vmem:[%s11289_s3 + $0xf8] sm:$0xff]   ;;  %6726 = vmatpush3.bf16.msra.mxu0 %v6856_v1  ;;  %v6861_v6 = vld [vmem:[%s11289_s3 + $0xf0] sm:$0xff]   ;;  %v6865_v10 = vld [vmem:[%s11289_s3 + $0xe8] sm:$0xff]  }
   0x4   :  { %6747 = vmatprep.subr.bf16.mxu1 %v6857_v2  ;;  %v6859_v4 = vld [vmem:[%s11289_s3 + $0xb8] sm:$0xff]   ;;  %6727 = vmatprep.subr.bf16.mxu0 %v6858_v3  ;;  %v6863_v8 = vld [vmem:[%s11289_s3 + $0xb0] sm:$0xff]   ;;  %v6866_v11 = vld [vmem:[%s11289_s3 + $0x60] sm:$0xff]   ;;  %11450 = vst [vmem:[#allocation5_spill] sm:$0xff] %v7264_v28  ;;  %v7279_v33 = vsub.s32 1, %v7264_v28  ;;  %v7303_v47 = vsub.s32 0, %v7264_v28 }
   0x5   :  { %6748 = vmatpush3.bf16.msra.mxu1 %v6859_v4  ;;  %v6867_v12 = vld [vmem:[%s11289_s3 + $0xa8] sm:$0xff]   ;;  %v6868_v13 = vld [vmem:[%s11289_s3 + $0x20] sm:$0xff]   ;;  %v6870_v15 = vld [vmem:[%s11289_s3 + $0x58] sm:$0xff]  }
   0x6   :  { %6749 = vmatprep.subr.bf16.mxu1 %v6861_v6  ;;  %v6869_v14 = vld [vmem:[%s11289_s3 + $0xe0] sm:$0xff]   ;;  %v6872_v17 = vld [vmem:[%s11289_s3 + $0x18] sm:$0xff]   ;;  %v6874_v19 = vld [vmem:[%s11289_s3 + $0x50] sm:$0xff]  }
   0x7   :  { %6728 = vmatpush3.bf16.msra.mxu0 %v6860_v5  ;;  %v6871_v16 = vld [vmem:[%s11289_s3 + $0xa0] sm:$0xff]   ;;  %v6873_v18 = vld [vmem:[%s11289_s3 + $0xd8] sm:$0xff]   ;;  %v6876_v21 = vld [vmem:[%s11289_s3 + $0x10] sm:$0xff]  }
   0x8   :  { %6729 = vmatprep.subr.bf16.mxu0 %v6862_v7  ;;  %v6875_v20 = vld [vmem:[%s11289_s3 + $0x98] sm:$0xff]   ;;  %v6877_v22 = vld [vmem:[%s11289_s3 + $0xd0] sm:$0xff]   ;;  %v6878_v24 = vld [vmem:[%s11289_s3 + $0x48] sm:$0xff]  }
   0x9   :  { %6750 = vmatpush3.bf16.msra.mxu1 %v6863_v8  ;;  %v6879_v25 = vld [vmem:[%s11289_s3 + $0x90] sm:$0xff]   ;;  %v6880_v26 = vld [vmem:[%s11289_s3 + $0x8] sm:$0xff]   ;;  %v6882_v29 = vld [vmem:[%s11289_s3 + $0x40] sm:$0xff]  }
   0xa   :  { %6751 = vmatprep.subr.bf16.mxu1 %v6865_v10  ;;  %v6881_v27 = vld [vmem:[%s11289_s3 + $0xc8] sm:$0xff]   ;;  %v6884_v31 = vld [vmem:[%s11289_s3] sm:$0xff]   ;;  %v5913_v41 = vld [vmem:[%s11287_s1 + $0x38] sm:$0x77] }
   0xb   :  { %6730 = vmatpush3.bf16.msra.mxu0 %v6864_v9  ;;  %v6883_v30 = vld [vmem:[%s11289_s3 + $0x88] sm:$0xff]   ;;  %v6885_v32 = vld [vmem:[%s11289_s3 + $0xc0] sm:$0xff]   ;;  %v193_v43 = vunpack.c.l.bf16 %v5913_v41  ;;  %v194_v44 = vunpack.c.h.bf16 %v5913_v41  ;;  %v5925_v46 = vld [vmem:[%s11287_s1 + $0x54] sm:$0x77] }
   0xc   :  { %6731 = vmatprep.subr.bf16.mxu0 %v6866_v11  ;;  %v34_v34 = vld [vmem:[%s11287_s1] sm:$0x77]  ;;  %v5905_v40 = vld [vmem:[%s11286_s0 + $0x7] sm:$0x7f]  ;;  %v5917_v45 = vld [vmem:[%s11286_s0 + $0xe] sm:$0x7f]  ;;  %v271_v57 = vunpack.c.l.bf16 %v5925_v46  ;;  %v272_v62 = vunpack.c.h.bf16 %v5925_v46 }
   0xd   :  { %6752 = vmatpush3.bf16.msra.mxu1 %v6867_v12  ;;  %v45_v35 = vld [vmem:[%s11286_s0] sm:$0x7f]  ;;  %v38_v37 = vunpack.c.l.bf16 %v34_v34  ;;  %v39_v38 = vunpack.c.h.bf16 %v34_v34  ;;  %v146_v51 = vrot.slane %v5905_v40, %v7279_v33  ;;  %v5929_v52 = vld [vmem:[%s11286_s0 + $0x15] sm:$0x7f]  ;;  %v5919_v56 = vadd.f32 -1.0, %v194_v44 }
   0xe   :  { %6753 = vmatprep.subr.bf16.mxu1 %v6869_v14  ;;  %v5901_v36 = vld [vmem:[%s11287_s1 + $0x1c] sm:$0x77]  ;;  %v68_v50 = vrot.slane %v45_v35, %v7279_v33  ;;  %v5937_v53 = vld [vmem:[%s11287_s1 + $0x70] sm:$0x77]  ;;  %v7320_v60 = vadd.f32 -1.0, %v193_v43  ;;  %v224_v61 = vrot.slane %v5917_v45, %v7279_v33  ;;  %v7326_v5 = vadd.f32 -1.0, %v271_v57 }
   0xf   :  { %6732 = vmatpush3.bf16.msra.mxu0 %v6868_v13  ;;  %v115_v39 = vunpack.c.l.bf16 %v5901_v36  ;;  %v116_v42 = vunpack.c.h.bf16 %v5901_v36  ;;  %v7305_v48 = vadd.f32 -1.0, %v38_v37  ;;  %v5895_v49 = vadd.f32 -1.0, %v39_v38  ;;  %v5941_v58 = vld [vmem:[%s11286_s0 + $0x1c] sm:$0x7f]  ;;  %v5949_v63 = vld [vmem:[%s11287_s1 + $0x8c] sm:$0x77] }
  0x10   :  { %6733 = vmatprep.subr.bf16.mxu0 %v6870_v15  ;;  %v210_v1 = vmul.f32 1e+30, %v5919_v56  ;;  %v349_v2 = vunpack.c.l.bf16 %v5937_v53  ;;  %v350_v3 = vunpack.c.h.bf16 %v5937_v53  ;;  %v5931_v6 = vadd.f32 -1.0, %v272_v62  ;;  %v5961_v8 = vld [vmem:[%s11287_s1 + $0xa8] sm:$0x77] }
  0x11   :  { %6754 = vmatpush3.bf16.msra.mxu1 %v6871_v16  ;;  %v7315_v54 = vadd.f32 -1.0, %v115_v39  ;;  %v5907_v55 = vadd.f32 -1.0, %v116_v42  ;;  %v54_v59 = vmul.f32 1e+30, %v5895_v49  ;;  %v302_v7 = vrot.slane %v5929_v52, %v7279_v33  ;;  %v5953_v13 = vld [vmem:[%s11286_s0 + $0x23] sm:$0x7f] }
  0x12   :  { %6755 = vmatprep.subr.bf16.mxu1 %v6873_v18  ;;  %v5943_v10 = vadd.f32 -1.0, %v350_v3  ;;  %v380_v11 = vrot.slane %v5941_v58, %v7279_v33  ;;  %v427_v12 = vunpack.c.l.bf16 %v5949_v63  ;;  %v5965_v14 = vld [vmem:[%s11286_s0 + $0x2a] sm:$0x7f]  ;;  %v253_v16 = vadd.f32 %v224_v61, %v210_v1  ;;  %v5977_v36 = vld [vmem:[%s11286_s0 + $0x31] sm:$0x7f]  ;;  %v6887_v49 = vld [vmem:[%s11289_s3 + $0x178] sm:$0xff]  }
  0x13   :  { %6734 = vmatpush3.bf16.msra.mxu0 %v6872_v17  ;;  %v132_v0 = vmul.f32 1e+30, %v5907_v55  ;;  %v97_v4 = vadd.f32 %v68_v50, %v54_v59  ;;  %v288_v17 = vmul.f32 1e+30, %v5931_v6  ;;  %v428_v18 = vunpack.c.h.bf16 %v5949_v63  ;;  %v5989_v41 = vld [vmem:[%s11286_s0 + $0x38] sm:$0x7f] }
  0x14   :  { %6735 = vmatprep.subr.bf16.mxu0 %v6874_v19  ;;  %v5973_v19 = vld [vmem:[%s11287_s1 + $0xc4] sm:$0x77]  ;;  %v506_v23 = vunpack.c.h.bf16 %v5961_v8  ;;  %v536_v34 = vrot.slane %v5965_v14, %v7279_v33  ;;  %v5997_v42 = vld [vmem:[%s11287_s1 + $0xfc] sm:$0x77]  ;;  %v614_v53 = vrot.slane %v5977_v36, %v7279_v33  ;;  %v692_v58 = vrot.slane %v5989_v41, %v7279_v33  ;;  %v6021_v3 = vld [vmem:[%s11287_s1 + $0x134] sm:$0x77] }
  0x15   :  { %6756 = vmatpush3.bf16.msra.mxu1 %v6875_v20  ;;  %v175_v9 = vadd.f32 %v146_v51, %v132_v0  ;;  %v104_v15 = vmax.f32 %v97_v4, -1e+30  ;;  %v7342_v20 = vadd.f32 -1.0, %v349_v2  ;;  %v583_v35 = vunpack.c.l.bf16 %v5973_v19  ;;  %v6009_v55 = vld [vmem:[%s11287_s1 + $0x118] sm:$0x77] }
  0x16   :  { %6757 = vmatprep.subr.bf16.mxu1 %v6877_v22  ;;  %v505_v22 = vunpack.c.l.bf16 %v5961_v8  ;;  %v584_v40 = vunpack.c.h.bf16 %v5973_v19  ;;  %v739_v59 = vunpack.c.l.bf16 %v5997_v42  ;;  %v6001_v61 = vld [vmem:[%s11286_s0 + $0x3f] sm:$0x7f]  ;;  %v740_v1 = vunpack.c.h.bf16 %v5997_v42  ;;  %v6013_v2 = vld [vmem:[%s11286_s0 + $0x46] sm:$0x7f] }
  0x17   :  { %6736 = vmatpush3.bf16.msra.mxu0 %v6876_v21  ;;  %v366_v21 = vmul.f32 1e+30, %v5943_v10  ;;  %v7372_v56 = vadd.f32 -1.0, %v583_v35  ;;  %v818_v8 = vunpack.c.h.bf16 %v6009_v55  ;;  %v6049_v42 = vld [vmem:[%s11286_s0 + $0x5b] sm:$0x7f] }
  0x18   :  { %6737 = vmatprep.subr.bf16.mxu0 %v6878_v24  ;;  %v182_v24 = vmax.f32 %v104_v15, %v175_v9  ;;  %v7363_v43 = vadd.f32 -1.0, %v505_v22  ;;  %v5979_v52 = vadd.f32 -1.0, %v584_v40  ;;  %v7390_v14 = vadd.f32 -1.0, %v739_v59 }
  0x19   :  { %6758 = vmatpush3.bf16.msra.mxu1 %v6879_v25  ;;  %v331_v25 = vadd.f32 %v302_v7, %v288_v17  ;;  %v409_v38 = vadd.f32 %v380_v11, %v366_v21  ;;  %v817_v7 = vunpack.c.l.bf16 %v6009_v55  ;;  %v6003_v11 = vadd.f32 -1.0, %v740_v1 }
  0x1a   :  { %6759 = vmatprep.subr.bf16.mxu1 %v6881_v27  ;;  %v458_v27 = vrot.slane %v5953_v13, %v7279_v33  ;;  %v260_v37 = vmax.f32 %v182_v24, %v253_v16  ;;  %v600_v0 = vmul.f32 1e+30, %v5979_v52  ;;  %v6033_v13 = vld [vmem:[%s11287_s1 + $0x150] sm:$0x77]  ;;  %v6015_v15 = vadd.f32 -1.0, %v818_v8 }
  0x1b   :  { %6738 = vmatpush3.bf16.msra.mxu0 %v6880_v26  ;;  %v5955_v26 = vadd.f32 -1.0, %v428_v18  ;;  %v848_v16 = vrot.slane %v6013_v2, %v7279_v33  ;;  %v895_v17 = vunpack.c.l.bf16 %v6021_v3  ;;  %v6025_v18 = vld [vmem:[%s11286_s0 + $0x4d] sm:$0x7f]  ;;  %v756_v22 = vmul.f32 1e+30, %v6003_v11 }
  0x1c   :  { %6739 = vmatprep.subr.bf16.mxu0 %v6882_v29  ;;  %v5985_v29 = vld [vmem:[%s11287_s1 + $0xe0] sm:$0x77]  ;;  %v338_v50 = vmax.f32 %v260_v37, %v331_v25  ;;  %v643_v10 = vadd.f32 %v614_v53, %v600_v0  ;;  %v6037_v24 = vld [vmem:[%s11286_s0 + $0x54] sm:$0x7f]  ;;  %v6045_v25 = vld [vmem:[%s11287_s1 + $0x16c] sm:$0x77]  ;;  %v926_v36 = vrot.slane %v6025_v18, %v7279_v33 }
  0x1d   :  { %6760 = vmatpush3.bf16.msra.mxu1 %v6883_v30  ;;  %v6886_v30 = vld [vmem:[%s11289_s3 + $0x80] sm:$0xff]   ;;  %v444_v39 = vmul.f32 1e+30, %v5955_v26  ;;  %v661_v45 = vunpack.c.l.bf16 %v5985_v29  ;;  %v662_v46 = vunpack.c.h.bf16 %v5985_v29  ;;  %v7402_v26 = vadd.f32 -1.0, %v817_v7  ;;  %v6057_v37 = vld [vmem:[%s11287_s1 + $0x188] sm:$0x77] }
  0x1e   :  { %6761 = vmatprep.subr.bf16.mxu1 %v6885_v32  ;;  %v5967_v32 = vadd.f32 -1.0, %v506_v23  ;;  %v416_v62 = vmax.f32 %v338_v50, %v409_v38  ;;  %v896_v23 = vunpack.c.h.bf16 %v6021_v3  ;;  %v973_v29 = vunpack.c.l.bf16 %v6033_v13  ;;  %v6061_v50 = vld [vmem:[%s11286_s0 + $0x62] sm:$0x7f]  ;;  %v6085_v11 = vld [vmem:[%s11286_s0 + $0x70] sm:$0x7f] }
  0x1f   :  { %6740 = vmatpush3.bf16.msra.mxu0 %v6884_v31  ;;  %v7351_v31 = vadd.f32 -1.0, %v427_v12  ;;  %v487_v51 = vadd.f32 %v458_v27, %v444_v39  ;;  %v5991_v57 = vadd.f32 -1.0, %v662_v46  ;;  %v7384_v4 = vadd.f32 -1.0, %v661_v45 }
  0x20   :  { %v522_v44 = vmul.f32 1e+30, %v5967_v32  ;;  %6769 = vmatprep.subr.bf16.mxu0 %v6887_v49  ;;  %v770_v12 = vrot.slane %v6001_v61, %v7279_v33  ;;  %v834_v27 = vmul.f32 1e+30, %v6015_v15  ;;  %v6027_v35 = vadd.f32 -1.0, %v896_v23 }
  0x21   :  { %6762 = vmatpush3.bf16.msra.mxu1 %v6886_v30  ;;  %v678_v6 = vmul.f32 1e+30, %v5991_v57  ;;  %v494_v9 = vmax.f32 %v416_v62, %v487_v51  ;;  %v974_v30 = vunpack.c.h.bf16 %v6033_v13  ;;  %v7408_v38 = vadd.f32 -1.0, %v895_v17  ;;  %v6069_v51 = vld [vmem:[%s11287_s1 + $0x1a4] sm:$0x77] }
  0x22   :  { %v565_v63 = vadd.f32 %v536_v34, %v522_v44  ;;  %v799_v34 = vadd.f32 %v770_v12, %v756_v22  ;;  %v1004_v40 = vrot.slane %v6037_v24, %v7279_v33  ;;  %v1051_v41 = vunpack.c.l.bf16 %v6045_v25  ;;  %v6093_v12 = vld [vmem:[%s11287_s1 + $0x1dc] sm:$0x77] }
  0x23   :  { %v721_v21 = vadd.f32 %v692_v58, %v678_v6  ;;  %v6039_v39 = vadd.f32 -1.0, %v974_v30  ;;  %v877_v45 = vadd.f32 %v848_v16, %v834_v27  ;;  %v912_v46 = vmul.f32 1e+30, %v6027_v35  ;;  %v6073_v6 = vld [vmem:[%s11286_s0 + $0x69] sm:$0x7f] }
  0x24   :  { %v572_v19 = vmax.f32 %v494_v9, %v565_v63  ;;  %v1052_v49 = vunpack.c.h.bf16 %v6045_v25  ;;  %v7420_v52 = vadd.f32 -1.0, %v973_v29  ;;  %v1129_v55 = vunpack.c.l.bf16 %v6057_v37  ;;  %v6081_v63 = vld [vmem:[%s11287_s1 + $0x1c0] sm:$0x77]  ;;  %v6105_v23 = vld [vmem:[%s11287_s1 + $0x1f8] sm:$0x77] }
  0x25   :  { %v990_v53 = vmul.f32 1e+30, %v6039_v39  ;;  %v1130_v57 = vunpack.c.h.bf16 %v6057_v37  ;;  %v955_v59 = vadd.f32 %v926_v36, %v912_v46  ;;  %v1082_v62 = vrot.slane %v6049_v42, %v7279_v33  ;;  %v6097_v30 = vld [vmem:[%s11286_s0 + $0x77] sm:$0x7f]  ;;  %v6109_v37 = vld [vmem:[%s11286_s0 + $0x7e] sm:$0x7f] }
  0x26   :  { %v650_v32 = vmax.f32 %v572_v19, %v643_v10  ;;  %v6051_v61 = vadd.f32 -1.0, %v1052_v49  ;;  %v7426_v0 = vadd.f32 -1.0, %v1051_v41  ;;  %v1160_v2 = vrot.slane %v6061_v50, %v7279_v33  ;;  %v6117_v39 = vld [vmem:[%s11287_s1 + $0x214] sm:$0x77] }
  0x27   :  { %v6063_v1 = vadd.f32 -1.0, %v1130_v57  ;;  %v1207_v3 = vunpack.c.l.bf16 %v6069_v51  ;;  %v1033_v8 = vadd.f32 %v1004_v40, %v990_v53  ;;  %v1208_v10 = vunpack.c.h.bf16 %v6069_v51  ;;  %v6129_v51 = vld [vmem:[%s11287_s1 + $0x230] sm:$0x77] }
  0x28   :  { %v728_v44 = vmax.f32 %v650_v32, %v721_v21  ;;  %v1068_v9 = vmul.f32 1e+30, %v6051_v61  ;;  %v7438_v13 = vadd.f32 -1.0, %v1129_v55  ;;  %v1285_v16 = vunpack.c.l.bf16 %v6081_v63 }
  0x29   :  { %v1146_v15 = vmul.f32 1e+30, %v6063_v1  ;;  %v1286_v17 = vunpack.c.h.bf16 %v6081_v63  ;;  %v6075_v21 = vadd.f32 -1.0, %v1208_v10  ;;  %v1238_v22 = vrot.slane %v6073_v6, %v7279_v33 }
  0x2a   :  { %v806_v58 = vmax.f32 %v728_v44, %v799_v34  ;;  %v1111_v19 = vadd.f32 %v1082_v62, %v1068_v9  ;;  %v7444_v24 = vadd.f32 -1.0, %v1207_v3  ;;  %v1316_v27 = vrot.slane %v6085_v11, %v7279_v33  ;;  %v6141_v3 = vld [vmem:[%s11287_s1 + $0x24c] sm:$0x77] }
  0x2b   :  { %v6087_v25 = vadd.f32 -1.0, %v1286_v17  ;;  %v1363_v29 = vunpack.c.l.bf16 %v6093_v12  ;;  %v1189_v34 = vadd.f32 %v1160_v2, %v1146_v15  ;;  %v1224_v35 = vmul.f32 1e+30, %v6075_v21  ;;  %v6133_v2 = vld [vmem:[%s11286_s0 + $0x8c] sm:$0x7f] }
  0x2c   :  { %v884_v7 = vmax.f32 %v806_v58, %v877_v45  ;;  %v1364_v36 = vunpack.c.h.bf16 %v6093_v12  ;;  %v7456_v40 = vadd.f32 -1.0, %v1285_v16  ;;  %v1441_v42 = vunpack.c.l.bf16 %v6105_v23  ;;  %v6153_v16 = vld [vmem:[%s11287_s1 + $0x268] sm:$0x77] }
  0x2d   :  { %v1302_v41 = vmul.f32 1e+30, %v6087_v25  ;;  %v1442_v44 = vunpack.c.h.bf16 %v6105_v23  ;;  %v1267_v46 = vadd.f32 %v1238_v22, %v1224_v35  ;;  %v1394_v50 = vrot.slane %v6097_v30, %v7279_v33  ;;  %v6145_v22 = vld [vmem:[%s11286_s0 + $0x93] sm:$0x7f]  ;;  %v6157_v30 = vld [vmem:[%s11286_s0 + $0x9a] sm:$0x7f] }
  0x2e   :  { %v962_v18 = vmax.f32 %v884_v7, %v955_v59  ;;  %v6099_v49 = vadd.f32 -1.0, %v1364_v36  ;;  %v7462_v53 = vadd.f32 -1.0, %v1363_v29  ;;  %v1472_v57 = vrot.slane %v6109_v37, %v7279_v33  ;;  %v6121_v59 = vld [vmem:[%s11286_s0 + $0x85] sm:$0x7f] }
  0x2f   :  { %v6111_v55 = vadd.f32 -1.0, %v1442_v44  ;;  %v1519_v58 = vunpack.c.l.bf16 %v6117_v39  ;;  %v1345_v62 = vadd.f32 %v1316_v27, %v1302_v41  ;;  %v1520_v1 = vunpack.c.h.bf16 %v6117_v39 }
  0x30   :  { %v1040_v32 = vmax.f32 %v962_v18, %v1033_v8  ;;  %v1380_v63 = vmul.f32 1e+30, %v6099_v49  ;;  %v7474_v6 = vadd.f32 -1.0, %v1441_v42  ;;  %v1597_v8 = vunpack.c.l.bf16 %v6129_v51 }
  0x31   :  { %v1458_v7 = vmul.f32 1e+30, %v6111_v55  ;;  %v1598_v9 = vunpack.c.h.bf16 %v6129_v51  ;;  %v6123_v12 = vadd.f32 -1.0, %v1520_v1  ;;  %v1550_v15 = vrot.slane %v6121_v59, %v7279_v33  ;;  %v6169_v55 = vld [vmem:[%s11286_s0 + $0xa1] sm:$0x7f] }
  0x32   :  { %v1118_v45 = vmax.f32 %v1040_v32, %v1111_v19  ;;  %v1423_v11 = vadd.f32 %v1394_v50, %v1380_v63  ;;  %v7480_v17 = vadd.f32 -1.0, %v1519_v58  ;;  %v1628_v19 = vrot.slane %v6133_v2, %v7279_v33  ;;  %v6165_v32 = vld [vmem:[%s11287_s1 + $0x284] sm:$0x77]  ;;  %v6189_v63 = vld [vmem:[%s11287_s1 + $0x2bc] sm:$0x77] }
  0x33   :  { %v6135_v18 = vadd.f32 -1.0, %v1598_v9  ;;  %v1675_v21 = vunpack.c.l.bf16 %v6141_v3  ;;  %v1501_v25 = vadd.f32 %v1472_v57, %v1458_v7  ;;  %v1536_v27 = vmul.f32 1e+30, %v6123_v12  ;;  %v6201_v12 = vld [vmem:[%s11287_s1 + $0x2d8] sm:$0x77] }
  0x34   :  { %v1196_v61 = vmax.f32 %v1118_v45, %v1189_v34  ;;  %v1676_v29 = vunpack.c.h.bf16 %v6141_v3  ;;  %v7492_v34 = vadd.f32 -1.0, %v1597_v8  ;;  %v1753_v36 = vunpack.c.l.bf16 %v6153_v16  ;;  %v6177_v45 = vld [vmem:[%s11287_s1 + $0x2a0] sm:$0x77] }
  0x35   :  { %v1614_v35 = vmul.f32 1e+30, %v6135_v18  ;;  %v1754_v37 = vunpack.c.h.bf16 %v6153_v16  ;;  %v1579_v41 = vadd.f32 %v1550_v15, %v1536_v27  ;;  %v1706_v44 = vrot.slane %v6145_v22, %v7279_v33 }
  0x36   :  { %v1274_v10 = vmax.f32 %v1196_v61, %v1267_v46  ;;  %v6147_v42 = vadd.f32 -1.0, %v1676_v29  ;;  %v7498_v46 = vadd.f32 -1.0, %v1675_v21  ;;  %v1784_v50 = vrot.slane %v6157_v30, %v7279_v33  ;;  %v6193_v21 = vld [vmem:[%s11286_s0 + $0xaf] sm:$0x7f]  ;;  %v6205_v29 = vld [vmem:[%s11286_s0 + $0xb6] sm:$0x7f] }
  0x37   :  { %v6159_v49 = vadd.f32 -1.0, %v1754_v37  ;;  %v1831_v51 = vunpack.c.l.bf16 %v6165_v32  ;;  %v1657_v58 = vadd.f32 %v1628_v19, %v1614_v35  ;;  %v1832_v61 = vunpack.c.h.bf16 %v6165_v32  ;;  %v6213_v30 = vld [vmem:[%s11287_s1 + $0x2f4] sm:$0x77] }
  0x38   :  { %v1352_v23 = vmax.f32 %v1274_v10, %v1345_v62  ;;  %v1692_v59 = vmul.f32 1e+30, %v6147_v42  ;;  %v6181_v62 = vld [vmem:[%s11286_s0 + $0xa8] sm:$0x7f]  ;;  %v7510_v1 = vadd.f32 -1.0, %v1753_v36  ;;  %v1909_v3 = vunpack.c.l.bf16 %v6177_v45 }
  0x39   :  { %v1770_v2 = vmul.f32 1e+30, %v6159_v49  ;;  %v1910_v7 = vunpack.c.h.bf16 %v6177_v45  ;;  %v6171_v10 = vadd.f32 -1.0, %v1832_v61  ;;  %v7516_v15 = vadd.f32 -1.0, %v1831_v51  ;;  %v6225_v45 = vld [vmem:[%s11287_s1 + $0x310] sm:$0x77] }
  0x3a   :  { %v1430_v39 = vmax.f32 %v1352_v23, %v1423_v11  ;;  %v1735_v9 = vadd.f32 %v1706_v44, %v1692_v59  ;;  %v1862_v11 = vrot.slane %v6169_v55, %v7279_v33  ;;  %v1940_v18 = vrot.slane %v6181_v62, %v7279_v33 }
  0x3b   :  { %v6183_v16 = vadd.f32 -1.0, %v1910_v7  ;;  %v1987_v19 = vunpack.c.l.bf16 %v6189_v63  ;;  %v1813_v23 = vadd.f32 %v1784_v50, %v1770_v2  ;;  %v1988_v27 = vunpack.c.h.bf16 %v6189_v63  ;;  %v6229_v63 = vld [vmem:[%s11286_s0 + $0xc4] sm:$0x7f]  ;;  %v6237_v2 = vld [vmem:[%s11287_s1 + $0x32c] sm:$0x77] }
  0x3c   :  { %v1508_v57 = vmax.f32 %v1430_v39, %v1501_v25  ;;  %v1848_v25 = vmul.f32 1e+30, %v6171_v10  ;;  %v7528_v32 = vadd.f32 -1.0, %v1909_v3  ;;  %v2065_v36 = vunpack.c.l.bf16 %v6201_v12 }
  0x3d   :  { %v1926_v35 = vmul.f32 1e+30, %v6183_v16  ;;  %v2066_v37 = vunpack.c.h.bf16 %v6201_v12  ;;  %v6195_v42 = vadd.f32 -1.0, %v1988_v27  ;;  %v2018_v44 = vrot.slane %v6193_v21, %v7279_v33 }
  0x3e   :  { %v1586_v8 = vmax.f32 %v1508_v57, %v1579_v41  ;;  %v1891_v41 = vadd.f32 %v1862_v11, %v1848_v25  ;;  %v7534_v49 = vadd.f32 -1.0, %v1987_v19  ;;  %v2096_v51 = vrot.slane %v6205_v29, %v7279_v33  ;;  %v6217_v57 = vld [vmem:[%s11286_s0 + $0xbd] sm:$0x7f]  ;;  %v6241_v25 = vld [vmem:[%s11286_s0 + $0xcb] sm:$0x7f] }
  0x3f   :  { %v6207_v50 = vadd.f32 -1.0, %v2066_v37  ;;  %v2143_v55 = vunpack.c.l.bf16 %v6213_v30  ;;  %v1969_v59 = vadd.f32 %v1940_v18, %v1926_v35  ;;  %v2004_v61 = vmul.f32 1e+30, %v6195_v42  ;;  %v6249_v18 = vld [vmem:[%s11287_s1 + $0x348] sm:$0x77] }
  0x40   :  { %v1664_v22 = vmax.f32 %v1586_v8, %v1657_v58  ;;  %v2144_v62 = vunpack.c.h.bf16 %v6213_v30  ;;  %v7546_v3 = vadd.f32 -1.0, %v2065_v36  ;;  %v2221_v8 = vunpack.c.l.bf16 %v6225_v45  ;;  %v6253_v36 = vld [vmem:[%s11286_s0 + $0xd2] sm:$0x7f]  ;;  %v6261_v37 = vld [vmem:[%s11287_s1 + $0x364] sm:$0x77] }
  0x41   :  { %v2082_v7 = vmul.f32 1e+30, %v6207_v50  ;;  %v2047_v11 = vadd.f32 %v2018_v44, %v2004_v61  ;;  %v2174_v16 = vrot.slane %v6217_v57, %v7279_v33  ;;  %v7552_v19 = vadd.f32 -1.0, %v2143_v55  ;;  %v6273_v57 = vld [vmem:[%s11287_s1 + $0x380] sm:$0x77] }
  0x42   :  { %v1742_v39 = vmax.f32 %v1664_v22, %v1735_v9  ;;  %v2222_v9 = vunpack.c.h.bf16 %v6225_v45  ;;  %v6219_v12 = vadd.f32 -1.0, %v2144_v62  ;;  %v2252_v22 = vrot.slane %v6229_v63, %v7279_v33  ;;  %v7576_v63 = vld [vmem:[%s11286_s0 + $0xd9] sm:$0x7f] }
  0x43   :  { %v2125_v29 = vadd.f32 %v2096_v51, %v2082_v7  ;;  %v2300_v35 = vunpack.c.h.bf16 %v6237_v2  ;;  %v2377_v42 = vunpack.c.l.bf16 %v6249_v18  ;;  %v2378_v44 = vunpack.c.h.bf16 %v6249_v18  ;;  %11451 = vst [vmem:[#allocation6_spill] sm:$0xff] %v7576_v63 }
  0x44   :  { %v1820_v58 = vmax.f32 %v1742_v39, %v1813_v23  ;;  %v6231_v21 = vadd.f32 -1.0, %v2222_v9  ;;  %v2299_v23 = vunpack.c.l.bf16 %v6237_v2  ;;  %v2160_v30 = vmul.f32 1e+30, %v6219_v12 }
  0x45   :  { %v7564_v39 = vadd.f32 -1.0, %v2221_v8  ;;  %v6243_v55 = vadd.f32 -1.0, %v2300_v35  ;;  %v2330_v51 = vrot.slane %v6241_v25, %v7279_v33  ;;  %v2408_v61 = vrot.slane %v6253_v36, %v7279_v33 }
  0x46   :  { %v1898_v10 = vmax.f32 %v1820_v58, %v1891_v41  ;;  %v2238_v41 = vmul.f32 1e+30, %v6231_v21  ;;  %v2203_v50 = vadd.f32 %v2174_v16, %v2160_v30  ;;  %v7570_v58 = vadd.f32 -1.0, %v2299_v23 }
  0x47   :  { %v2455_v62 = vunpack.c.l.bf16 %v6261_v37  ;;  %v2316_v8 = vmul.f32 1e+30, %v6243_v55  ;;  %v2456_v9 = vunpack.c.h.bf16 %v6261_v37  ;;  %v7586_v12 = vadd.f32 -1.0, %v2377_v42  ;;  %v7605_v55 = vld [vmem:[%s11286_s0 + $0xee] sm:$0x7f] }
  0x48   :  { %v1976_v27 = vmax.f32 %v1898_v10, %v1969_v59  ;;  %v6255_v59 = vadd.f32 -1.0, %v2378_v44  ;;  %v2281_v7 = vadd.f32 %v2252_v22, %v2238_v41  ;;  %v7581_v10 = vld [vmem:[%s11286_s0 + $0xe0] sm:$0x7f]  ;;  %v2533_v18 = vunpack.c.l.bf16 %v6273_v57  ;;  %v7600_v41 = vld [vmem:[%s11286_s0 + $0xe7] sm:$0x7f]  ;;  %11454 = vst [vmem:[#allocation9_spill] sm:$0xff] %v7605_v55 }
  0x49   :  { %11452 = vst [vmem:[#allocation7_spill] sm:$0xff] %v7581_v10  ;;  %v2534_v21 = vunpack.c.h.bf16 %v6273_v57  ;;  %v2359_v25 = vadd.f32 %v2330_v51, %v2316_v8  ;;  %v2486_v22 = vrot.slane %v7576_v63, %v7279_v33  ;;  %v7593_v30 = vadd.f32 -1.0, %v2455_v62  ;;  %11453 = vst [vmem:[#allocation8_spill] sm:$0xff] %v7600_v41  ;;  %v6309_v51 = vld [vmem:[%s11287_s1 + $0x3d4] sm:$0x77] }
  0x4a   :  { %v2054_v45 = vmax.f32 %v1976_v27, %v2047_v11  ;;  %v6285_v11 = vld [vmem:[%s11287_s1 + $0x39c] sm:$0x77]  ;;  %v2394_v16 = vmul.f32 1e+30, %v6255_v59  ;;  %v6267_v27 = vadd.f32 -1.0, %v2456_v9  ;;  %v2564_v36 = vrot.slane %v7581_v10, %v7279_v33 }
  0x4b   :  { %v6279_v35 = vadd.f32 -1.0, %v2534_v21  ;;  %v2611_v37 = vunpack.c.l.bf16 %v6285_v11  ;;  %v7610_v57 = vadd.f32 -1.0, %v2533_v18  ;;  %v2720_v18 = vrot.slane %v7605_v55, %v7279_v33 }
  0x4c   :  { %v2132_v2 = vmax.f32 %v2054_v45, %v2125_v29  ;;  %v6297_v29 = vld [vmem:[%s11287_s1 + $0x3b8] sm:$0x77]  ;;  %v2437_v44 = vadd.f32 %v2408_v61, %v2394_v16  ;;  %v2472_v45 = vmul.f32 1e+30, %v6267_v27  ;;  %v2642_v61 = vrot.slane %v7600_v41, %v7279_v33 }
  0x4d   :  { %11455 = vst [vmem:[#allocation10_spill] sm:$0xff] %v7610_v57  ;;  %v2550_v59 = vmul.f32 1e+30, %v6279_v35  ;;  %v2689_v62 = vunpack.c.l.bf16 %v6297_v29  ;;  %v7617_v16 = vadd.f32 -1.0, %v2611_v37  ;;  %v2768_v35 = vunpack.c.h.bf16 %v6309_v51  ;;  %v6333_v37 = vld [vmem:[%s11287_s1 + $0x40c] sm:$0x77] }
  0x4e   :  { %v2210_v23 = vmax.f32 %v2132_v2, %v2203_v50  ;;  %v2612_v50 = vunpack.c.h.bf16 %v6285_v11  ;;  %v2690_v2 = vunpack.c.h.bf16 %v6297_v29  ;;  %v2515_v9 = vadd.f32 %v2486_v22, %v2472_v45  ;;  %v6321_v11 = vld [vmem:[%s11287_s1 + $0x3f0] sm:$0x77] }
  0x4f   :  { %11456 = vst [vmem:[#allocation11_spill] sm:$0xff] %v7617_v16  ;;  %v2593_v22 = vadd.f32 %v2564_v36, %v2550_v59  ;;  %v7634_v45 = vadd.f32 -1.0, %v2689_v62  ;;  %v2846_v28 = vunpack.c.h.bf16 %v6321_v11  ;;  %v6345_v59 = vld [vmem:[%s11287_s1 + $0x428] sm:$0x77] }
  0x50   :  { %v2288_v42 = vmax.f32 %v2210_v23, %v2281_v7  ;;  %v6291_v7 = vadd.f32 -1.0, %v2612_v50  ;;  %v6303_v21 = vadd.f32 -1.0, %v2690_v2  ;;  %v2767_v23 = vunpack.c.l.bf16 %v6309_v51  ;;  %v7641_v51 = vld [vmem:[%s11286_s0 + $0x103] sm:$0x7f] }
  0x51   :  { %11459 = vst [vmem:[#allocation14_spill] sm:$0xff] %v7634_v45  ;;  %v2845_v2 = vunpack.c.l.bf16 %v6321_v11  ;;  %11460 = vst [vmem:[#allocation15_spill] sm:$0xff] %v7641_v51  ;;  %v6357_v11 = vld [vmem:[%s11287_s1 + $0x444] sm:$0x77]  ;;  %v2954_v10 = vrot.slane %v7641_v51, %v7279_v33 }
  0x52   :  { %v2366_v8 = vmax.f32 %v2288_v42, %v2359_v25  ;;  %v7624_v25 = vld [vmem:[%s11286_s0 + $0xf5] sm:$0x7f]  ;;  %v2628_v29 = vmul.f32 1e+30, %v6291_v7  ;;  %v7629_v42 = vld [vmem:[%s11286_s0 + $0xfc] sm:$0x7f]  ;;  %v2923_v7 = vunpack.c.l.bf16 %v6333_v37 }
  0x53   :  { %11457 = vst [vmem:[#allocation12_spill] sm:$0xff] %v7624_v25  ;;  %11458 = vst [vmem:[#allocation13_spill] sm:$0xff] %v7629_v42  ;;  %v2706_v50 = vmul.f32 1e+30, %v6303_v21  ;;  %v2798_v36 = vrot.slane %v7624_v25, %v7279_v33  ;;  %v7646_v62 = vadd.f32 -1.0, %v2767_v23  ;;  %v7661_v23 = vadd.f32 -1.0, %v2845_v2 }
  0x54   :  { %v2444_v27 = vmax.f32 %v2366_v8, %v2437_v44  ;;  %v2671_v41 = vadd.f32 %v2642_v61, %v2628_v29  ;;  %v6315_v44 = vadd.f32 -1.0, %v2768_v35  ;;  %v6327_v8 = vadd.f32 -1.0, %v2846_v28  ;;  %v7653_v61 = vld [vmem:[%s11286_s0 + $0x10a] sm:$0x7f]  ;;  %v6369_v28 = vld [vmem:[%s11287_s1 + $0x460] sm:$0x77] }
  0x55   :  { %11461 = vst [vmem:[#allocation16_spill] sm:$0xff] %v7646_v62  ;;  %11462 = vst [vmem:[#allocation17_spill] sm:$0xff] %v7653_v61  ;;  %v2924_v35 = vunpack.c.h.bf16 %v6333_v37  ;;  %v3001_v25 = vunpack.c.l.bf16 %v6345_v59  ;;  %v3002_v62 = vunpack.c.h.bf16 %v6345_v59  ;;  %v7665_v57 = vadd.f32 -1.0, %v2923_v7  ;;  %v7672_v37 = vld [vmem:[%s11286_s0 + $0x111] sm:$0x7f] }
  0x56   :  { %v2522_v55 = vmax.f32 %v2444_v27, %v2515_v9  ;;  %v2876_v9 = vrot.slane %v7629_v42, %v7279_v33  ;;  %v2749_v27 = vadd.f32 %v2720_v18, %v2706_v50  ;;  %v2784_v29 = vmul.f32 1e+30, %v6315_v44  ;;  %11464 = vst [vmem:[#allocation19_spill] sm:$0xff] %v7672_v37  ;;  %v6381_v59 = vld [vmem:[%s11287_s1 + $0x47c] sm:$0x77] }
  0x57   :  { %v2862_v42 = vmul.f32 1e+30, %v6327_v8  ;;  %v6339_v63 = vadd.f32 -1.0, %v2924_v35  ;;  %11463 = vst [vmem:[#allocation18_spill] sm:$0xff] %v7665_v57  ;;  %v3032_v18 = vrot.slane %v7653_v61, %v7279_v33  ;;  %v3080_v44 = vunpack.c.h.bf16 %v6357_v11 }
  0x58   :  { %v2600_v21 = vmax.f32 %v2522_v55, %v2593_v22  ;;  %v2827_v16 = vadd.f32 %v2798_v36, %v2784_v29  ;;  %v6351_v55 = vadd.f32 -1.0, %v3002_v62  ;;  %v3079_v22 = vunpack.c.l.bf16 %v6357_v11  ;;  %v7677_v36 = vld [vmem:[%s11286_s0 + $0x118] sm:$0x7f] }
  0x59   :  { %v2905_v2 = vadd.f32 %v2876_v9, %v2862_v42  ;;  %11465 = vst [vmem:[#allocation20_spill] sm:$0xff] %v7677_v36  ;;  %v7682_v62 = vadd.f32 -1.0, %v3001_v25  ;;  %v3157_v7 = vunpack.c.l.bf16 %v6369_v28  ;;  %v6393_v42 = vld [vmem:[%s11287_s1 + $0x498] sm:$0x77]  ;;  %v3188_v25 = vrot.slane %v7677_v36, %v7279_v33 }
  0x5a   :  { %v2678_v45 = vmax.f32 %v2600_v21, %v2671_v41  ;;  %v2940_v41 = vmul.f32 1e+30, %v6339_v63  ;;  %v3018_v8 = vmul.f32 1e+30, %v6351_v55  ;;  %v3158_v21 = vunpack.c.h.bf16 %v6369_v28 }
  0x5b   :  { %11466 = vst [vmem:[#allocation21_spill] sm:$0xff] %v7682_v62  ;;  %v3110_v63 = vrot.slane %v7672_v37, %v7279_v33  ;;  %v7689_v9 = vadd.f32 -1.0, %v3079_v22  ;;  %v6405_v22 = vld [vmem:[%s11287_s1 + $0x4b4] sm:$0x77]  ;;  %v3313_v36 = vunpack.c.l.bf16 %v6393_v42  ;;  %v3314_v37 = vunpack.c.h.bf16 %v6393_v42 }
  0x5c   :  { %v2756_v50 = vmax.f32 %v2678_v45, %v2749_v27  ;;  %v2983_v35 = vadd.f32 %v2954_v10, %v2940_v41  ;;  %v6363_v45 = vadd.f32 -1.0, %v3080_v44  ;;  %v6375_v11 = vadd.f32 -1.0, %v3158_v21  ;;  %v7701_v41 = vld [vmem:[%s11286_s0 + $0x126] sm:$0x7f] }
  0x5d   :  { %11467 = vst [vmem:[#allocation22_spill] sm:$0xff] %v7689_v9  ;;  %v3235_v27 = vunpack.c.l.bf16 %v6381_v59  ;;  %v3061_v28 = vadd.f32 %v3032_v18, %v3018_v8  ;;  %11469 = vst [vmem:[#allocation24_spill] sm:$0xff] %v7701_v41  ;;  %v7706_v44 = vadd.f32 -1.0, %v3157_v7  ;;  %v7711_v18 = vld [vmem:[%s11286_s0 + $0x12d] sm:$0x7f]  ;;  %v7730_v9 = vadd.f32 -1.0, %v3313_v36 }
  0x5e   :  { %v2834_v29 = vmax.f32 %v2756_v50, %v2827_v16  ;;  %v7696_v16 = vld [vmem:[%s11286_s0 + $0x11f] sm:$0x7f]  ;;  %v3096_v55 = vmul.f32 1e+30, %v6363_v45  ;;  %v3236_v50 = vunpack.c.h.bf16 %v6381_v59  ;;  %v3174_v21 = vmul.f32 1e+30, %v6375_v11 }
  0x5f   :  { %11468 = vst [vmem:[#allocation23_spill] sm:$0xff] %v7696_v16  ;;  %11470 = vst [vmem:[#allocation25_spill] sm:$0xff] %v7706_v44  ;;  %v6417_v45 = vld [vmem:[%s11287_s1 + $0x4d0] sm:$0x77]  ;;  %v7723_v42 = vadd.f32 -1.0, %v3235_v27  ;;  %v6399_v11 = vadd.f32 -1.0, %v3314_v37  ;;  %v3392_v44 = vunpack.c.h.bf16 %v6405_v22 }
  0x60   :  { %v2912_v10 = vmax.f32 %v2834_v29, %v2905_v2  ;;  %11471 = vst [vmem:[#allocation26_spill] sm:$0xff] %v7711_v18  ;;  %v3139_v59 = vadd.f32 %v3110_v63, %v3096_v55  ;;  %v6387_v8 = vadd.f32 -1.0, %v3236_v50  ;;  %v3266_v29 = vrot.slane %v7696_v16, %v7279_v33  ;;  %v7721_v7 = vld [vmem:[%s11286_s0 + $0x134] sm:$0x7f]  ;;  %11474 = vst [vmem:[#allocation29_spill] sm:$0xff] %v7730_v9 }
  0x61   :  { %11472 = vst [vmem:[#allocation27_spill] sm:$0xff] %v7721_v7  ;;  %11473 = vst [vmem:[#allocation28_spill] sm:$0xff] %v7723_v42  ;;  %v3391_v63 = vunpack.c.l.bf16 %v6405_v22  ;;  %v3217_v50 = vadd.f32 %v3188_v25, %v3174_v21  ;;  %v3330_v61 = vmul.f32 1e+30, %v6399_v11  ;;  %v3469_v62 = vunpack.c.l.bf16 %v6417_v45  ;;  %v7735_v37 = vld [vmem:[%s11286_s0 + $0x13b] sm:$0x7f] }
  0x62   :  { %v2990_v2 = vmax.f32 %v2912_v10, %v2983_v35  ;;  %v3344_v35 = vrot.slane %v7701_v41, %v7279_v33  ;;  %v6429_v10 = vld [vmem:[%s11287_s1 + $0x4ec] sm:$0x77]  ;;  %v3252_v16 = vmul.f32 1e+30, %v6387_v8  ;;  %v3470_v51 = vunpack.c.h.bf16 %v6417_v45  ;;  %11475 = vst [vmem:[#allocation30_spill] sm:$0xff] %v7735_v37 }
  0x63   :  { %v6441_v27 = vld [vmem:[%s11287_s1 + $0x508] sm:$0x77]  ;;  %v3422_v25 = vrot.slane %v7711_v18, %v7279_v33  ;;  %v7747_v22 = vadd.f32 -1.0, %v3391_v63  ;;  %v3547_v8 = vunpack.c.l.bf16 %v6429_v10  ;;  %v3548_v45 = vunpack.c.h.bf16 %v6429_v10  ;;  %v6465_v63 = vld [vmem:[%s11287_s1 + $0x540] sm:$0x77] }
  0x64   :  { %v3068_v55 = vmax.f32 %v2990_v2, %v3061_v28  ;;  %v3295_v42 = vadd.f32 %v3266_v29, %v3252_v16  ;;  %v6411_v28 = vadd.f32 -1.0, %v3392_v44  ;;  %v7745_v36 = vld [vmem:[%s11286_s0 + $0x142] sm:$0x7f]  ;;  %v6423_v21 = vadd.f32 -1.0, %v3470_v51  ;;  %v7759_v51 = vld [vmem:[%s11286_s0 + $0x149] sm:$0x7f] }
  0x65   :  { %11476 = vst [vmem:[#allocation31_spill] sm:$0xff] %v7745_v36  ;;  %11477 = vst [vmem:[#allocation32_spill] sm:$0xff] %v7747_v22  ;;  %v3500_v2 = vrot.slane %v7721_v7, %v7279_v33  ;;  %v6453_v16 = vld [vmem:[%s11287_s1 + $0x524] sm:$0x77]  ;;  %v7754_v11 = vadd.f32 -1.0, %v3469_v62  ;;  %v3625_v18 = vunpack.c.l.bf16 %v6441_v27  ;;  %v3626_v9 = vunpack.c.h.bf16 %v6441_v27 }
  0x66   :  { %v3146_v41 = vmax.f32 %v3068_v55, %v3139_v59  ;;  %v3373_v59 = vadd.f32 %v3344_v35, %v3330_v61  ;;  %v3408_v29 = vmul.f32 1e+30, %v6411_v28  ;;  %v3486_v55 = vmul.f32 1e+30, %v6423_v21  ;;  %11479 = vst [vmem:[#allocation34_spill] sm:$0xff] %v7759_v51 }
  0x67   :  { %11478 = vst [vmem:[#allocation33_spill] sm:$0xff] %v7754_v11  ;;  %v3578_v61 = vrot.slane %v7735_v37, %v7279_v33  ;;  %v7769_v62 = vld [vmem:[%s11286_s0 + $0x150] sm:$0x7f]  ;;  %v7771_v35 = vadd.f32 -1.0, %v3547_v8  ;;  %v6447_v10 = vadd.f32 -1.0, %v3626_v9  ;;  %v3703_v27 = vunpack.c.l.bf16 %v6453_v16 }
  0x68   :  { %v3224_v44 = vmax.f32 %v3146_v41, %v3217_v50  ;;  %v3451_v22 = vadd.f32 %v3422_v25, %v3408_v29  ;;  %v6435_v41 = vadd.f32 -1.0, %v3548_v45  ;;  %11480 = vst [vmem:[#allocation35_spill] sm:$0xff] %v7769_v62  ;;  %v3656_v50 = vrot.slane %v7745_v36, %v7279_v33  ;;  %v6489_v29 = vld [vmem:[%s11287_s1 + $0x578] sm:$0x77] }
  0x69   :  { %11481 = vst [vmem:[#allocation36_spill] sm:$0xff] %v7771_v35  ;;  %v3529_v25 = vadd.f32 %v3500_v2, %v3486_v55  ;;  %v7781_v45 = vadd.f32 -1.0, %v3625_v18  ;;  %v3642_v8 = vmul.f32 1e+30, %v6447_v10  ;;  %v3781_v9 = vunpack.c.l.bf16 %v6465_v63  ;;  %v7786_v36 = vld [vmem:[%s11286_s0 + $0x157] sm:$0x7f] }
  0x6a   :  { %v3302_v7 = vmax.f32 %v3224_v44, %v3295_v42  ;;  %v6477_v42 = vld [vmem:[%s11287_s1 + $0x55c] sm:$0x77]  ;;  %v3564_v21 = vmul.f32 1e+30, %v6435_v41  ;;  %v3704_v44 = vunpack.c.h.bf16 %v6453_v16  ;;  %v3782_v37 = vunpack.c.h.bf16 %v6465_v63  ;;  %11483 = vst [vmem:[#allocation38_spill] sm:$0xff] %v7786_v36 }
  0x6b   :  { %11482 = vst [vmem:[#allocation37_spill] sm:$0xff] %v7781_v45  ;;  %v3734_v2 = vrot.slane %v7759_v51, %v7279_v33  ;;  %v7793_v16 = vld [vmem:[%s11286_s0 + $0x15e] sm:$0x7f]  ;;  %v6501_v18 = vld [vmem:[%s11287_s1 + $0x594] sm:$0x77]  ;;  %v3859_v63 = vunpack.c.l.bf16 %v6477_v42  ;;  %v3937_v45 = vunpack.c.l.bf16 %v6489_v29  ;;  %v3938_v57 = vunpack.c.h.bf16 %v6489_v29 }
  0x6c   :  { %v3380_v28 = vmax.f32 %v3302_v7, %v3373_v59  ;;  %v3607_v11 = vadd.f32 %v3578_v61, %v3564_v21  ;;  %v6459_v7 = vadd.f32 -1.0, %v3704_v44  ;;  %11484 = vst [vmem:[#allocation39_spill] sm:$0xff] %v7793_v16  ;;  %v7798_v59 = vadd.f32 -1.0, %v3703_v27  ;;  %v6513_v21 = vld [vmem:[%s11287_s1 + $0x5b0] sm:$0x77] }
  0x6d   :  { %v6471_v55 = vadd.f32 -1.0, %v3782_v37  ;;  %v3685_v61 = vadd.f32 %v3656_v50, %v3642_v8  ;;  %v7805_v44 = vadd.f32 -1.0, %v3781_v9  ;;  %v7810_v37 = vld [vmem:[%s11286_s0 + $0x165] sm:$0x7f]  ;;  %v3890_v50 = vrot.slane %v7786_v36, %v7279_v33 }
  0x6e   :  { %v3458_v35 = vmax.f32 %v3380_v28, %v3451_v22  ;;  %11485 = vst [vmem:[#allocation40_spill] sm:$0xff] %v7798_v59  ;;  %v3812_v22 = vrot.slane %v7769_v62, %v7279_v33  ;;  %v3720_v10 = vmul.f32 1e+30, %v6459_v7  ;;  %v3860_v28 = vunpack.c.h.bf16 %v6477_v42  ;;  %11487 = vst [vmem:[#allocation42_spill] sm:$0xff] %v7810_v37  ;;  %v7817_v42 = vld [vmem:[%s11286_s0 + $0x16c] sm:$0x7f] }
  0x6f   :  { %11486 = vst [vmem:[#allocation41_spill] sm:$0xff] %v7805_v44  ;;  %v3798_v51 = vmul.f32 1e+30, %v6471_v55  ;;  %11488 = vst [vmem:[#allocation43_spill] sm:$0xff] %v7817_v42  ;;  %v7822_v29 = vadd.f32 -1.0, %v3859_v63  ;;  %v6495_v8 = vadd.f32 -1.0, %v3938_v57  ;;  %v4015_v9 = vunpack.c.l.bf16 %v6501_v18 }
  0x70   :  { %v3536_v41 = vmax.f32 %v3458_v35, %v3529_v25  ;;  %v3763_v62 = vadd.f32 %v3734_v2, %v3720_v10  ;;  %v6483_v35 = vadd.f32 -1.0, %v3860_v28  ;;  %v6525_v25 = vld [vmem:[%s11287_s1 + $0x5cc] sm:$0x77]  ;;  %v7826_v10 = vadd.f32 -1.0, %v3937_v45  ;;  %v7831_v59 = vld [vmem:[%s11286_s0 + $0x173] sm:$0x7f] }
  0x71   :  { %11489 = vst [vmem:[#allocation44_spill] sm:$0xff] %v7822_v29  ;;  %v3841_v2 = vadd.f32 %v3812_v22, %v3798_v51  ;;  %v3954_v28 = vmul.f32 1e+30, %v6495_v8  ;;  %v4093_v36 = vunpack.c.l.bf16 %v6513_v21  ;;  %v4094_v44 = vunpack.c.h.bf16 %v6513_v21  ;;  %11491 = vst [vmem:[#allocation46_spill] sm:$0xff] %v7831_v59  ;;  %v6537_v57 = vld [vmem:[%s11287_s1 + $0x5e8] sm:$0x77] }
  0x72   :  { %v3614_v27 = vmax.f32 %v3536_v41, %v3607_v11  ;;  %v3968_v11 = vrot.slane %v7793_v16, %v7279_v33  ;;  %v3876_v55 = vmul.f32 1e+30, %v6483_v35  ;;  %v4016_v41 = vunpack.c.h.bf16 %v6501_v18  ;;  %11490 = vst [vmem:[#allocation45_spill] sm:$0xff] %v7826_v10  ;;  %v7841_v45 = vld [vmem:[%s11286_s0 + $0x17a] sm:$0x7f] }
  0x73   :  { %v4046_v51 = vrot.slane %v7810_v37, %v7279_v33  ;;  %11492 = vst [vmem:[#allocation47_spill] sm:$0xff] %v7841_v45  ;;  %v7843_v18 = vadd.f32 -1.0, %v4015_v9  ;;  %v6519_v22 = vadd.f32 -1.0, %v4094_v44  ;;  %v4124_v21 = vrot.slane %v7817_v42, %v7279_v33  ;;  %v7855_v44 = vld [vmem:[%s11286_s0 + $0x181] sm:$0x7f] }
  0x74   :  { %v3692_v7 = vmax.f32 %v3614_v27, %v3685_v61  ;;  %v3919_v16 = vadd.f32 %v3890_v50, %v3876_v55  ;;  %v6507_v61 = vadd.f32 -1.0, %v4016_v41  ;;  %v4171_v27 = vunpack.c.l.bf16 %v6525_v25  ;;  %11495 = vst [vmem:[#allocation50_spill] sm:$0xff] %v7855_v44  ;;  %v6561_v9 = vld [vmem:[%s11287_s1 + $0x620] sm:$0x77] }
  0x75   :  { %11493 = vst [vmem:[#allocation48_spill] sm:$0xff] %v7843_v18  ;;  %v3997_v50 = vadd.f32 %v3968_v11, %v3954_v28  ;;  %v7850_v55 = vadd.f32 -1.0, %v4093_v36  ;;  %v4110_v41 = vmul.f32 1e+30, %v6519_v22  ;;  %v4249_v37 = vunpack.c.l.bf16 %v6537_v57  ;;  %v7865_v36 = vld [vmem:[%s11286_s0 + $0x188] sm:$0x7f] }
  0x76   :  { %v3770_v63 = vmax.f32 %v3692_v7, %v3763_v62  ;;  %v6549_v62 = vld [vmem:[%s11287_s1 + $0x604] sm:$0x77]  ;;  %v4032_v8 = vmul.f32 1e+30, %v6507_v61  ;;  %v4172_v7 = vunpack.c.h.bf16 %v6525_v25  ;;  %v4250_v10 = vunpack.c.h.bf16 %v6537_v57  ;;  %11496 = vst [vmem:[#allocation51_spill] sm:$0xff] %v7865_v36 }
  0x77   :  { %11494 = vst [vmem:[#allocation49_spill] sm:$0xff] %v7850_v55  ;;  %v4202_v25 = vrot.slane %v7831_v59, %v7279_v33  ;;  %v7867_v11 = vadd.f32 -1.0, %v4171_v27  ;;  %v4280_v57 = vrot.slane %v7841_v45, %v7279_v33  ;;  %v4406_v59 = vunpack.c.h.bf16 %v6561_v9  ;;  %v7882_v45 = vld [vmem:[%s11286_s0 + $0x18f] sm:$0x7f] }
  0x78   :  { %v3848_v35 = vmax.f32 %v3770_v63, %v3841_v2  ;;  %v4075_v18 = vadd.f32 %v4046_v51, %v4032_v8  ;;  %v6531_v2 = vadd.f32 -1.0, %v4172_v7  ;;  %v6543_v28 = vadd.f32 -1.0, %v4250_v10  ;;  %v6585_v8 = vld [vmem:[%s11287_s1 + $0x658] sm:$0x77]  ;;  %11499 = vst [vmem:[#allocation54_spill] sm:$0xff] %v7882_v45 }
  0x79   :  { %11497 = vst [vmem:[#allocation52_spill] sm:$0xff] %v7867_v11  ;;  %v4327_v63 = vunpack.c.l.bf16 %v6549_v62  ;;  %v4153_v51 = vadd.f32 %v4124_v21, %v4110_v41  ;;  %v7877_v7 = vadd.f32 -1.0, %v4249_v37  ;;  %v4405_v10 = vunpack.c.l.bf16 %v6561_v9  ;;  %v6597_v37 = vld [vmem:[%s11287_s1 + $0x674] sm:$0x77] }
  0x7a   :  { %v3926_v42 = vmax.f32 %v3848_v35, %v3919_v16  ;;  %v6573_v16 = vld [vmem:[%s11287_s1 + $0x63c] sm:$0x77]  ;;  %v4188_v22 = vmul.f32 1e+30, %v6531_v2  ;;  %v4328_v35 = vunpack.c.h.bf16 %v6549_v62  ;;  %v4266_v27 = vmul.f32 1e+30, %v6543_v28 }
  0x7b   :  { %11498 = vst [vmem:[#allocation53_spill] sm:$0xff] %v7877_v7  ;;  %v4358_v21 = vrot.slane %v7855_v44, %v7279_v33  ;;  %v7889_v62 = vld [vmem:[%s11286_s0 + $0x196] sm:$0x7f]  ;;  %v6567_v41 = vadd.f32 -1.0, %v4406_v59  ;;  %v4483_v9 = vunpack.c.l.bf16 %v6573_v16  ;;  %v4561_v7 = vunpack.c.l.bf16 %v6585_v8  ;;  %v7906_v59 = vld [vmem:[%s11286_s0 + $0x19d] sm:$0x7f] }
  0x7c   :  { %v4004_v61 = vmax.f32 %v3926_v42, %v3997_v50  ;;  %v4231_v55 = vadd.f32 %v4202_v25, %v4188_v22  ;;  %v6555_v42 = vadd.f32 -1.0, %v4328_v35  ;;  %11500 = vst [vmem:[#allocation55_spill] sm:$0xff] %v7889_v62  ;;  %v7894_v50 = vadd.f32 -1.0, %v4327_v63  ;;  %v6609_v22 = vld [vmem:[%s11287_s1 + $0x690] sm:$0x77]  ;;  %11502 = vst [vmem:[#allocation57_spill] sm:$0xff] %v7906_v59 }
  0x7d   :  { %v4309_v25 = vadd.f32 %v4280_v57, %v4266_v27  ;;  %v7901_v35 = vadd.f32 -1.0, %v4405_v10  ;;  %v4422_v44 = vmul.f32 1e+30, %v6567_v41  ;;  %v4562_v29 = vunpack.c.h.bf16 %v6585_v8 }
  0x7e   :  { %v4082_v11 = vmax.f32 %v4004_v61, %v4075_v18  ;;  %v4436_v18 = vrot.slane %v7865_v36, %v7279_v33  ;;  %v4344_v28 = vmul.f32 1e+30, %v6555_v42  ;;  %v4484_v61 = vunpack.c.h.bf16 %v6573_v16  ;;  %v7913_v16 = vld [vmem:[%s11286_s0 + $0x1a4] sm:$0x7f] }
  0x7f   :  { %11501 = vst [vmem:[#allocation56_spill] sm:$0xff] %v7901_v35  ;;  %v4514_v57 = vrot.slane %v7882_v45, %v7279_v33  ;;  %11503 = vst [vmem:[#allocation58_spill] sm:$0xff] %v7913_v16  ;;  %v7918_v8 = vadd.f32 -1.0, %v4483_v9  ;;  %v6591_v27 = vadd.f32 -1.0, %v4562_v29  ;;  %v4639_v10 = vunpack.c.l.bf16 %v6597_v37  ;;  %v7932_v29 = vld [vmem:[%s11287_s1 + $0x6c8] sm:$0x77] }
  0x80   :  { %v4160_v2 = vmax.f32 %v4082_v11, %v4153_v51  ;;  %v4387_v36 = vadd.f32 %v4358_v21, %v4344_v28  ;;  %v6579_v11 = vadd.f32 -1.0, %v4484_v61  ;;  %v6621_v51 = vld [vmem:[%s11287_s1 + $0x6ac] sm:$0x77]  ;;  %v4465_v21 = vadd.f32 %v4436_v18, %v4422_v44 }
  0x81   :  { %11504 = vst [vmem:[#allocation59_spill] sm:$0xff] %v7918_v8  ;;  %v7925_v28 = vld [vmem:[%s11286_s0 + $0x1ab] sm:$0x7f]  ;;  %v7927_v61 = vadd.f32 -1.0, %v4561_v7  ;;  %v4578_v45 = vmul.f32 1e+30, %v6591_v27  ;;  %v4717_v35 = vunpack.c.l.bf16 %v6609_v22  ;;  %v4718_v9 = vunpack.c.h.bf16 %v6609_v22 }
  0x82   :  { %v4238_v63 = vmax.f32 %v4160_v2, %v4231_v55  ;;  %v4592_v55 = vrot.slane %v7889_v62, %v7279_v33  ;;  %v4500_v41 = vmul.f32 1e+30, %v6579_v11  ;;  %v4640_v2 = vunpack.c.h.bf16 %v6597_v37  ;;  %11505 = vst [vmem:[#allocation60_spill] sm:$0xff] %v7925_v28  ;;  %v7939_v18 = vld [vmem:[%s11286_s0 + $0x1b2] sm:$0x7f] }
  0x83   :  { %11506 = vst [vmem:[#allocation61_spill] sm:$0xff] %v7927_v61  ;;  %v4670_v37 = vrot.slane %v7906_v59, %v7279_v33  ;;  %v7941_v7 = vadd.f32 -1.0, %v4639_v10  ;;  %v4748_v22 = vrot.slane %v7913_v16, %v7279_v33  ;;  %v4795_v11 = vunpack.c.l.bf16 %v6621_v51  ;;  %v7958_v16 = vld [vmem:[%s11286_s0 + $0x1b9] sm:$0x7f] }
  0x84   :  { %v4316_v42 = vmax.f32 %v4238_v63, %v4309_v25  ;;  %v4543_v25 = vadd.f32 %v4514_v57, %v4500_v41  ;;  %v6603_v44 = vadd.f32 -1.0, %v4640_v2  ;;  %v6615_v63 = vadd.f32 -1.0, %v4718_v9 }
  0x85   :  { %11507 = vst [vmem:[#allocation62_spill] sm:$0xff] %v7941_v7  ;;  %v4621_v27 = vadd.f32 %v4592_v55, %v4578_v45  ;;  %v4796_v41 = vunpack.c.h.bf16 %v6621_v51  ;;  %v7950_v2 = vadd.f32 -1.0, %v4717_v35  ;;  %v4826_v10 = vrot.slane %v7925_v28, %v7279_v33 }
  0x86   :  { %v4394_v62 = vmax.f32 %v4316_v42, %v4387_v36  ;;  %v7948_v36 = vld [vmem:[%s11287_s1 + $0x6e4] sm:$0x77]  ;;  %v4656_v42 = vmul.f32 1e+30, %v6603_v44  ;;  %v4734_v59 = vmul.f32 1e+30, %v6615_v63  ;;  %v4874_v9 = vunpack.c.h.bf16 %v7932_v29 }
  0x87   :  { %11508 = vst [vmem:[#allocation63_spill] sm:$0xff] %v7950_v2  ;;  %v7960_v8 = vadd.f32 -1.0, %v4795_v11  ;;  %v6627_v45 = vadd.f32 -1.0, %v4796_v41  ;;  %v4873_v35 = vunpack.c.l.bf16 %v7932_v29  ;;  %v4904_v55 = vrot.slane %v7939_v18, %v7279_v33 }
  0x88   :  { %v4472_v57 = vmax.f32 %v4394_v62, %v4465_v21  ;;  %v4699_v61 = vadd.f32 %v4670_v37, %v4656_v42  ;;  %v4777_v62 = vadd.f32 %v4748_v22, %v4734_v59  ;;  %v6639_v51 = vadd.f32 -1.0, %v4874_v9 }
  0x89   :  { %v4812_v44 = vmul.f32 1e+30, %v6627_v45  ;;  %v4951_v63 = vunpack.c.l.bf16 %v7948_v36  ;;  %v4952_v28 = vunpack.c.h.bf16 %v7948_v36 }
  0x8a   :  { %v4550_v7 = vmax.f32 %v4472_v57, %v4543_v25 }
  0x8c   :  { %v4628_v21 = vmax.f32 %v4550_v7, %v4621_v27 }
  0x8d   :  { %14 = vsyncpa [#allocation3], 0  ;;  %v4890_v2 = vmul.f32 1e+30, %v6639_v51  ;;  %v4982_v25 = vrot.slane %v7958_v16, %v7279_v33  ;;  %v53_v37 = vmul.f32 1e+30, %v7305_v48  ;;  %v4855_v22 = vadd.f32 %v4826_v10, %v4812_v44 }
  0x8e   :  { %v7973_v59 = vld [vmem:[%s11286_s0] sm:$0x7f]  ;;  %v4706_v7 = vmax.f32 %v4628_v21, %v4699_v61  ;;  %v6651_v11 = vadd.f32 -1.0, %v4952_v28  ;;  %v131_v36 = vmul.f32 1e+30, %v7315_v54  ;;  %vm7131_vm0 = vmmov 0  }
  0x8f   :  { %v64_v29 = vrot.slane %v7973_v59, %v7303_v47  ;;  %v4933_v57 = vadd.f32 %v4904_v55, %v4890_v2  ;;  %v7981_v33 = vld [vmem:[%s11286_s0 + $0x7] sm:$0x7f]  ;;  %v209_v42 = vmul.f32 1e+30, %v7320_v60  ;;  %v7989_v28 = vld [vmem:[%s11286_s0 + $0xe] sm:$0x7f] }
  0x90   :  { %v142_v48 = vrot.slane %v7981_v33, %v7303_v47  ;;  %v4784_v41 = vmax.f32 %v4706_v7, %v4777_v62  ;;  %v4968_v9 = vmul.f32 1e+30, %v6651_v11  ;;  %v220_v54 = vrot.slane %v7989_v28, %v7303_v47  ;;  %v7997_v45 = vld [vmem:[%s11286_s0 + $0x15] sm:$0x7f]  ;;  %v8005_v44 = vld [vmem:[%s11286_s0 + $0x1c] sm:$0x7f] }
  0x91   :  { %v96_v27 = vadd.f32 %v64_v29, %v53_v37  ;;  %v287_v61 = vmul.f32 1e+30, %v7326_v5  ;;  %v298_v60 = vrot.slane %v7997_v45, %v7303_v47  ;;  %v365_v62 = vmul.f32 1e+30, %v7342_v20  ;;  %v8013_v11 = vld [vmem:[%s11286_s0 + $0x23] sm:$0x7f] }
  0x92   :  { %v174_v10 = vadd.f32 %v142_v48, %v131_v36  ;;  %v4862_v51 = vmax.f32 %v4784_v41, %v4855_v22  ;;  %v5011_v55 = vadd.f32 %v4982_v25, %v4968_v9  ;;  %v252_v21 = vadd.f32 %v220_v54, %v209_v42 }
  0x93   :  { %v103_v2 = vmax.f32 %v96_v27, -1e+30  ;;  %v376_v5 = vrot.slane %v8005_v44, %v7303_v47  ;;  %v330_v29 = vadd.f32 %v298_v60, %v287_v61  ;;  %v443_v7 = vmul.f32 1e+30, %v7351_v31  ;;  %v8023_v27 = vld [vmem:[%s11286_s0 + $0x2a] sm:$0x7f] }
  0x94   :  { %v454_v20 = vrot.slane %v8013_v11, %v7303_v47  ;;  %v8017_v25 = vadd.f32 -1.0, %v4873_v35  ;;  %v4940_v22 = vmax.f32 %v4862_v51, %v4933_v57  ;;  %v521_v36 = vmul.f32 1e+30, %v7363_v43  ;;  %v8031_v35 = vld [vmem:[%s11286_s0 + $0x31] sm:$0x7f] }
  0x95   :  { %v181_v37 = vmax.f32 %v103_v2, %v174_v10  ;;  %v532_v31 = vrot.slane %v8023_v27, %v7303_v47  ;;  %v408_v42 = vadd.f32 %v376_v5, %v365_v62  ;;  %v599_v41 = vmul.f32 1e+30, %v7372_v56  ;;  %v8041_v61 = vld [vmem:[%s11286_s0 + $0x38] sm:$0x7f] }
  0x96   :  { %v610_v43 = vrot.slane %v8031_v35, %v7303_v47  ;;  %v8035_v57 = vadd.f32 -1.0, %v4951_v63  ;;  %v5018_v9 = vmax.f32 %v4940_v22, %v5011_v55  ;;  %v677_v54 = vmul.f32 1e+30, %v7384_v4  ;;  %v8049_v63 = vld [vmem:[%s11286_s0 + $0x3f] sm:$0x7f] }
  0x97   :  { %v259_v48 = vmax.f32 %v181_v37, %v252_v21  ;;  %v688_v56 = vrot.slane %v8041_v61, %v7303_v47  ;;  %v486_v10 = vadd.f32 %v454_v20, %v443_v7  ;;  %v755_v60 = vmul.f32 1e+30, %v7390_v14  ;;  %v8057_v21 = vld [vmem:[%s11286_s0 + $0x46] sm:$0x7f]  ;;  %v8065_v7 = vld [vmem:[%s11286_s0 + $0x4d] sm:$0x7f] }
  0x98   :  { %v766_v4 = vrot.slane %v8049_v63, %v7303_v47  ;;  %v5025_v62 = vmax.f32 %v5018_v9, 0.0  ;;  %v564_v51 = vadd.f32 %v532_v31, %v521_v36  ;;  %v833_v55 = vmul.f32 1e+30, %v7402_v26  ;;  %v8073_v31 = vld [vmem:[%s11286_s0 + $0x54] sm:$0x7f] }
  0x99   :  { %v337_v2 = vmax.f32 %v259_v48, %v330_v29  ;;  %v844_v14 = vrot.slane %v8057_v21, %v7303_v47  ;;  %v642_v37 = vadd.f32 %v610_v43, %v599_v41  ;;  %v911_v29 = vmul.f32 1e+30, %v7408_v38  ;;  %11509 = vst [vmem:[#allocation64_spill] sm:$0xff] %v8073_v31  ;;  %v8081_v43 = vld [vmem:[%s11286_s0 + $0x5b] sm:$0x7f] }
  0x9a   :  { %v922_v26 = vrot.slane %v8065_v7, %v7303_v47  ;;  %v5032_v20 = vpack.c.bf16 %v5025_v62, %v5025_v62  ;;  %v720_v22 = vadd.f32 %v688_v56, %v677_v54  ;;  %v989_v36 = vmul.f32 1e+30, %v7420_v52  ;;  %11510 = vst [vmem:[#allocation65_spill] sm:$0xff] %v8081_v43  ;;  %v8089_v56 = vld [vmem:[%s11286_s0 + $0x62] sm:$0x7f] }
  0x9b   :  { %v415_v5 = vmax.f32 %v337_v2, %v408_v42  ;;  %v1000_v38 = vrot.slane %v8073_v31, %v7303_v47  ;;  %v798_v42 = vadd.f32 %v766_v4, %v755_v60  ;;  %v1067_v41 = vmul.f32 1e+30, %v7426_v0  ;;  %11511 = vst [vmem:[#allocation66_spill] sm:$0xff] %v8089_v56  ;;  %v8097_v4 = vld [vmem:[%s11286_s0 + $0x69] sm:$0x7f] }
  0x9c   :  { %v1078_v52 = vrot.slane %v8081_v43, %v7303_v47  ;;  %5473 = vmatprep.mubr.bf16.mxu0 %v5032_v20  ;;  %v876_v9 = vadd.f32 %v844_v14, %v833_v55  ;;  %v1145_v54 = vmul.f32 1e+30, %v7438_v13  ;;  %v1156_v0 = vrot.slane %v8089_v56, %v7303_v47  ;;  %11512 = vst [vmem:[#allocation67_spill] sm:$0xff] %v8097_v4  ;;  %v8107_v14 = vld [vmem:[%s11286_s0 + $0x70] sm:$0x7f] }
  0x9d   :  { %v493_v48 = vmax.f32 %v415_v5, %v486_v10  ;;  %v1223_v2 = vmul.f32 1e+30, %v7444_v24  ;;  %v954_v60 = vadd.f32 %v922_v26, %v911_v29  ;;  %v1234_v13 = vrot.slane %v8097_v4, %v7303_v47  ;;  %11513 = vst [vmem:[#allocation68_spill] sm:$0xff] %v8107_v14  ;;  %v8115_v5 = vld [vmem:[%s11286_s0 + $0x77] sm:$0x7f] }
  0x9e   :  { %v1301_v62 = vmul.f32 1e+30, %v7456_v40  ;;  %v8102_v55 = vadd.f32 %v1000_v38, %v989_v36  ;;  %v1312_v24 = vrot.slane %v8107_v14, %v7303_v47  ;;  %11514 = vst [vmem:[#allocation69_spill] sm:$0xff] %v8115_v5  ;;  %v1390_v40 = vrot.slane %v8115_v5, %v7303_v47  ;;  %v8123_v36 = vld [vmem:[%s11286_s0 + $0x7e] sm:$0x7f] }
  0x9f   :  { %v571_v10 = vmax.f32 %v493_v48, %v564_v51  ;;  %v1379_v51 = vmul.f32 1e+30, %v7462_v53  ;;  %v1110_v26 = vadd.f32 %v1078_v52, %v1067_v41  ;;  %v1457_v20 = vmul.f32 1e+30, %v7474_v6  ;;  %11515 = vst [vmem:[#allocation70_spill] sm:$0xff] %v8123_v36 }
  0xa0   :  { %v1468_v53 = vrot.slane %v8123_v36, %v7303_v47  ;;  %v8127_v38 = vadd.f32 %v1156_v0, %v1145_v54  ;;  %v8129_v48 = vadd.f32 %v1234_v13, %v1223_v2  ;;  %v1535_v14 = vmul.f32 1e+30, %v7480_v17  ;;  %v8145_v54 = vld [vmem:[%s11286_s0 + $0x8c] sm:$0x7f] }
  0xa1   :  { %v649_v29 = vmax.f32 %v571_v10, %v642_v37  ;;  %v8135_v37 = vld [vmem:[%s11286_s0 + $0x85] sm:$0x7f]  ;;  %v8139_v52 = vadd.f32 %v1312_v24, %v1301_v62  ;;  %v1613_v10 = vmul.f32 1e+30, %v7492_v34  ;;  %11517 = vst [vmem:[#allocation72_spill] sm:$0xff] %v8145_v54  ;;  %v1624_v17 = vrot.slane %v8145_v54, %v7303_v47 }
  0xa2   :  { %11516 = vst [vmem:[#allocation71_spill] sm:$0xff] %v8135_v37  ;;  %v1546_v6 = vrot.slane %v8135_v37, %v7303_v47  ;;  %v8149_v0 = vadd.f32 %v1390_v40, %v1379_v51  ;;  %v1691_v2 = vmul.f32 1e+30, %v7498_v46  ;;  %v1769_v13 = vmul.f32 1e+30, %v7510_v1 }
  0xa3   :  { %v727_v41 = vmax.f32 %v649_v29, %v720_v22  ;;  %v8155_v22 = vld [vmem:[%s11286_s0 + $0x93] sm:$0x7f]  ;;  %v8160_v24 = vadd.f32 %v1468_v53, %v1457_v20  ;;  %v8165_v51 = vld [vmem:[%s11286_s0 + $0x9a] sm:$0x7f]  ;;  %v1847_v40 = vmul.f32 1e+30, %v7516_v15  ;;  %v8187_v53 = vadd.f32 %v1624_v17, %v1613_v10 }
  0xa4   :  { %11518 = vst [vmem:[#allocation73_spill] sm:$0xff] %v8155_v22  ;;  %v1702_v34 = vrot.slane %v8155_v22, %v7303_v47  ;;  %11519 = vst [vmem:[#allocation74_spill] sm:$0xff] %v8165_v51  ;;  %v1780_v46 = vrot.slane %v8165_v51, %v7303_v47  ;;  %v8170_v29 = vadd.f32 %v1546_v6, %v1535_v14  ;;  %v8175_v22 = vld [vmem:[%s11286_s0 + $0xa1] sm:$0x7f]  ;;  %v8183_v20 = vld [vmem:[%s11286_s0 + $0xa8] sm:$0x7f] }
  0xa5   :  { %v805_v62 = vmax.f32 %v727_v41, %v798_v42  ;;  %11520 = vst [vmem:[#allocation75_spill] sm:$0xff] %v8175_v22  ;;  %v1858_v1 = vrot.slane %v8175_v22, %v7303_v47  ;;  %v1925_v42 = vmul.f32 1e+30, %v7528_v32  ;;  %11521 = vst [vmem:[#allocation76_spill] sm:$0xff] %v8183_v20  ;;  %v1936_v15 = vrot.slane %v8183_v20, %v7303_v47  ;;  %v8193_v41 = vld [vmem:[%s11286_s0 + $0xaf] sm:$0x7f] }
  0xa6   :  { %v2003_v6 = vmul.f32 1e+30, %v7534_v49  ;;  %11522 = vst [vmem:[#allocation77_spill] sm:$0xff] %v8193_v41  ;;  %v2014_v32 = vrot.slane %v8193_v41, %v7303_v47  ;;  %v8197_v22 = vadd.f32 %v1702_v34, %v1691_v2  ;;  %v8199_v51 = vadd.f32 %v1780_v46, %v1769_v13  ;;  %v8215_v2 = vld [vmem:[%s11286_s0 + $0xbd] sm:$0x7f] }
  0xa7   :  { %v883_v14 = vmax.f32 %v805_v62, %v876_v9  ;;  %v2081_v54 = vmul.f32 1e+30, %v7546_v3  ;;  %v8205_v9 = vld [vmem:[%s11286_s0 + $0xb6] sm:$0x7f]  ;;  %v8209_v17 = vadd.f32 %v1858_v1, %v1847_v40  ;;  %v2159_v62 = vmul.f32 1e+30, %v7552_v19 }
  0xa8   :  { %11523 = vst [vmem:[#allocation78_spill] sm:$0xff] %v8205_v9  ;;  %v2092_v49 = vrot.slane %v8205_v9, %v7303_v47  ;;  %11524 = vst [vmem:[#allocation79_spill] sm:$0xff] %v8215_v2  ;;  %v2170_v3 = vrot.slane %v8215_v2, %v7303_v47  ;;  %v8219_v34 = vadd.f32 %v1936_v15, %v1925_v42  ;;  %v2237_v13 = vmul.f32 1e+30, %v7564_v39  ;;  %v8238_v39 = vld [vmem:[%s11286_s0 + $0xcb] sm:$0x7f] }
  0xa9   :  { %v961_v10 = vmax.f32 %v883_v14, %v954_v60  ;;  %v8225_v60 = vld [vmem:[%s11286_s0 + $0xc4] sm:$0x7f]  ;;  %v2315_v46 = vmul.f32 1e+30, %v7570_v58  ;;  %v8231_v1 = vadd.f32 %v2014_v32, %v2003_v6  ;;  %11526 = vst [vmem:[#allocation81_spill] sm:$0xff] %v8238_v39  ;;  %v2326_v42 = vrot.slane %v8238_v39, %v7303_v47  ;;  %v11530_v39 = vld [vmem:[#allocation11_spill] sm:$0xff] }
  0xaa   :  { %11525 = vst [vmem:[#allocation80_spill] sm:$0xff] %v8225_v60  ;;  %v2248_v19 = vrot.slane %v8225_v60, %v7303_v47  ;;  %v8233_v14 = vadd.f32 %v2092_v49, %v2081_v54  ;;  %v8242_v15 = vadd.f32 %v2170_v3, %v2159_v62  ;;  %v8247_v58 = vmul.f32 1e+30, %v7586_v12  ;;  %v11527_v49 = vld [vmem:[#allocation10_spill] sm:$0xff]  ;;  %v11528_v62 = vld [vmem:[#allocation7_spill] sm:$0xff]  ;;  %v11531_v9 = vld [vmem:[#allocation8_spill] sm:$0xff] }
  0xab   :  { %v1039_v40 = vmax.f32 %v961_v10, %v8102_v55  ;;  %v8252_v55 = vld [vmem:[%s11286_s0 + $0xd2] sm:$0x7f]  ;;  %v8257_v32 = vmul.f32 1e+30, %v7593_v30  ;;  %v2549_v10 = vmul.f32 1e+30, %v11527_v49  ;;  %v2560_v3 = vrot.slane %v11528_v62, %v7303_v47 }
  0xac   :  { %v8244_v2 = vadd.f32 %v2248_v19, %v2237_v13  ;;  %v8262_v13 = vadd.f32 %v2326_v42, %v2315_v46  ;;  %v11529_v12 = vld [vmem:[#allocation6_spill] sm:$0xff]  ;;  %v2627_v60 = vmul.f32 1e+30, %v11530_v39  ;;  %v2638_v41 = vrot.slane %v11531_v9, %v7303_v47  ;;  %v11533_v49 = vld [vmem:[#allocation9_spill] sm:$0xff]  ;;  %v11534_v46 = vld [vmem:[#allocation16_spill] sm:$0xff] }
  0xad   :  { %v1117_v6 = vmax.f32 %v1039_v40, %v1110_v26  ;;  %v8270_v40 = vadd.f32 %v2560_v3, %v2549_v10  ;;  %v11532_v30 = vld [vmem:[#allocation14_spill] sm:$0xff]  ;;  %v2716_v20 = vrot.slane %v11533_v49, %v7303_v47  ;;  %v2783_v42 = vmul.f32 1e+30, %v11534_v46  ;;  %v11535_v19 = vld [vmem:[#allocation12_spill] sm:$0xff]  ;;  %v11539_v49 = vld [vmem:[#allocation21_spill] sm:$0xff] }
  0xae   :  { %v2705_v54 = vmul.f32 1e+30, %v11532_v30  ;;  %v8275_v62 = vadd.f32 %v2638_v41, %v2627_v60  ;;  %v2794_v37 = vrot.slane %v11535_v19, %v7303_v47  ;;  %v2861_v39 = vmul.f32 1e+30, %v7661_v23  ;;  %v11537_v10 = vld [vmem:[#allocation18_spill] sm:$0xff]  ;;  %v11538_v41 = vld [vmem:[#allocation15_spill] sm:$0xff] }
  0xaf   :  { %v1195_v26 = vmax.f32 %v1117_v6, %v8127_v38  ;;  %v11536_v38 = vld [vmem:[#allocation13_spill] sm:$0xff]  ;;  %v2939_v3 = vmul.f32 1e+30, %v11537_v10  ;;  %v2950_v60 = vrot.slane %v11538_v41, %v7303_v47  ;;  %v3017_v46 = vmul.f32 1e+30, %v11539_v49  ;;  %v11544_v49 = vld [vmem:[#allocation20_spill] sm:$0xff] }
  0xb0   :  { %v8282_v36 = vadd.f32 %v2716_v20, %v2705_v54  ;;  %v2872_v6 = vrot.slane %v11536_v38, %v7303_v47  ;;  %v8287_v30 = vadd.f32 %v2794_v37, %v2783_v42  ;;  %v11540_v19 = vld [vmem:[#allocation17_spill] sm:$0xff]  ;;  %v11541_v20 = vld [vmem:[#allocation22_spill] sm:$0xff]  ;;  %v3184_v4 = vrot.slane %v11544_v49, %v7303_v47 }
  0xb1   :  { %v1273_v9 = vmax.f32 %v1195_v26, %v8129_v48  ;;  %v3028_v5 = vrot.slane %v11540_v19, %v7303_v47  ;;  %v3095_v54 = vmul.f32 1e+30, %v11541_v20  ;;  %v11542_v26 = vld [vmem:[#allocation19_spill] sm:$0xff]  ;;  %v8300_v10 = vadd.f32 %v2950_v60, %v2939_v3  ;;  %v11543_v42 = vld [vmem:[#allocation25_spill] sm:$0xff] }
  0xb2   :  { %v8295_v48 = vadd.f32 %v2872_v6, %v2861_v39  ;;  %v3106_v38 = vrot.slane %v11542_v26, %v7303_v47  ;;  %v3173_v41 = vmul.f32 1e+30, %v11543_v42  ;;  %v11547_v3 = vld [vmem:[#allocation29_spill] sm:$0xff]  ;;  %v11549_v26 = vld [vmem:[#allocation32_spill] sm:$0xff]  ;;  %vm5437_vm1 = vcmask 130048  }
  0xb3   :  { %v1351_v23 = vmax.f32 %v1273_v9, %v8139_v52  ;;  %v8302_v37 = vadd.f32 %v3028_v5, %v3017_v46  ;;  %v11545_v52 = vld [vmem:[#allocation28_spill] sm:$0xff]  ;;  %v11546_v9 = vld [vmem:[#allocation23_spill] sm:$0xff]  ;;  %v3329_v60 = vmul.f32 1e+30, %v11547_v3  ;;  %v3407_v42 = vmul.f32 1e+30, %v11549_v26 }
  0xb4   :  { %v8308_v56 = vadd.f32 %v3106_v38, %v3095_v54  ;;  %v3251_v39 = vmul.f32 1e+30, %v11545_v52  ;;  %v3262_v6 = vrot.slane %v11546_v9, %v7303_v47  ;;  %v8313_v20 = vadd.f32 %v3184_v4, %v3173_v41  ;;  %v11548_v5 = vld [vmem:[#allocation24_spill] sm:$0xff]  ;;  %v11552_v54 = vld [vmem:[#allocation33_spill] sm:$0xff]  ;;  %v11554_v4 = vld [vmem:[#allocation27_spill] sm:$0xff] }
  0xb5   :  { %v1429_v19 = vmax.f32 %v1351_v23, %v8149_v0  ;;  %v3340_v46 = vrot.slane %v11548_v5, %v7303_v47  ;;  %v11551_v0 = vld [vmem:[#allocation26_spill] sm:$0xff]  ;;  %v3485_v38 = vmul.f32 1e+30, %v11552_v54  ;;  %v3496_v41 = vrot.slane %v11554_v4, %v7303_v47  ;;  %v11555_v9 = vld [vmem:[#allocation36_spill] sm:$0xff] }
  0xb6   :  { %v8320_v43 = vadd.f32 %v3262_v6, %v3251_v39  ;;  %v3418_v23 = vrot.slane %v11551_v0, %v7303_v47  ;;  %v3563_v3 = vmul.f32 1e+30, %v11555_v9  ;;  %v11556_v5 = vld [vmem:[#allocation30_spill] sm:$0xff]  ;;  %v11558_v6 = vld [vmem:[#allocation31_spill] sm:$0xff]  ;;  %vm5755_vm2 = vcmask 523264  }
  0xb7   :  { %v1507_v49 = vmax.f32 %v1429_v19, %v8160_v24  ;;  %v8325_v52 = vadd.f32 %v3340_v46, %v3329_v60  ;;  %v3574_v31 = vrot.slane %v11556_v5, %v7303_v47  ;;  %v11557_v19 = vld [vmem:[#allocation37_spill] sm:$0xff]  ;;  %v3652_v0 = vrot.slane %v11558_v6, %v7303_v47  ;;  %v11560_v46 = vld [vmem:[#allocation40_spill] sm:$0xff]  ;;  %v11561_v9 = vld [vmem:[#allocation34_spill] sm:$0xff] }
  0xb8   :  { %11550 = vst [vmem:[#allocation10_spill] sm:$0xff] %v8320_v43  ;;  %v8333_v24 = vadd.f32 %v3418_v23, %v3407_v42  ;;  %v3641_v39 = vmul.f32 1e+30, %v11557_v19  ;;  %v8338_v54 = vadd.f32 %v3496_v41, %v3485_v38  ;;  %v3719_v4 = vmul.f32 1e+30, %v11560_v46  ;;  %v11565_v38 = vld [vmem:[#allocation44_spill] sm:$0xff] }
  0xb9   :  { %11553 = vst [vmem:[#allocation7_spill] sm:$0xff] %v8325_v52  ;;  %v1585_v26 = vmax.f32 %v1507_v49, %v8170_v29  ;;  %v8340_v60 = vadd.f32 %v3574_v31, %v3563_v3  ;;  %v3730_v52 = vrot.slane %v11561_v9, %v7303_v47  ;;  %v11562_v29 = vld [vmem:[#allocation41_spill] sm:$0xff]  ;;  %v11563_v49 = vld [vmem:[#allocation35_spill] sm:$0xff]  ;;  %v3875_v41 = vmul.f32 1e+30, %v11565_v38  ;;  %v11566_v31 = vld [vmem:[#allocation38_spill] sm:$0xff] }
  0xba   :  { %v8346_v43 = vadd.f32 %v3652_v0, %v3641_v39  ;;  %v3797_v42 = vmul.f32 1e+30, %v11562_v29  ;;  %v3808_v23 = vrot.slane %v11563_v49, %v7303_v47  ;;  %v3886_v3 = vrot.slane %v11566_v31, %v7303_v47  ;;  %v11567_v6 = vld [vmem:[#allocation45_spill] sm:$0xff]  ;;  %v11570_v39 = vld [vmem:[#allocation48_spill] sm:$0xff]  ;;  %v11574_v31 = vld [vmem:[#allocation43_spill] sm:$0xff] }
  0xbb   :  { %11559 = vst [vmem:[#allocation6_spill] sm:$0xff] %v8340_v60  ;;  %v1663_v5 = vmax.f32 %v1585_v26, %v8187_v53  ;;  %v8351_v19 = vadd.f32 %v3730_v52, %v3719_v4  ;;  %v3953_v46 = vmul.f32 1e+30, %v11567_v6  ;;  %v11569_v53 = vld [vmem:[#allocation39_spill] sm:$0xff]  ;;  %v4031_v0 = vmul.f32 1e+30, %v11570_v39 }
  0xbc   :  { %v8358_v60 = vadd.f32 %v3808_v23, %v3797_v42  ;;  %v3964_v26 = vrot.slane %v11569_v53, %v7303_v47  ;;  %v8363_v29 = vadd.f32 %v3886_v3, %v3875_v41  ;;  %v11572_v52 = vld [vmem:[#allocation42_spill] sm:$0xff]  ;;  %v11573_v49 = vld [vmem:[#allocation49_spill] sm:$0xff]  ;;  %vm5804_vm3 = vcmask 1044480  }
  0xbd   :  { %11564 = vst [vmem:[#allocation11_spill] sm:$0xff] %v8351_v19  ;;  %v1741_v9 = vmax.f32 %v1663_v5, %v8197_v22  ;;  %v4042_v4 = vrot.slane %v11572_v52, %v7303_v47  ;;  %v4109_v38 = vmul.f32 1e+30, %v11573_v49  ;;  %v4120_v19 = vrot.slane %v11574_v31, %v7303_v47  ;;  %v11575_v5 = vld [vmem:[#allocation52_spill] sm:$0xff]  ;;  %v11576_v23 = vld [vmem:[#allocation46_spill] sm:$0xff]  ;;  %v11577_v3 = vld [vmem:[#allocation53_spill] sm:$0xff] }
  0xbe   :  { %11568 = vst [vmem:[#allocation8_spill] sm:$0xff] %v8358_v60  ;;  %11571 = vst [vmem:[#allocation14_spill] sm:$0xff] %v8363_v29  ;;  %v8371_v22 = vadd.f32 %v3964_v26, %v3953_v46  ;;  %v4187_v42 = vmul.f32 1e+30, %v11575_v5  ;;  %v4198_v53 = vrot.slane %v11576_v23, %v7303_v47  ;;  %v4265_v52 = vmul.f32 1e+30, %v11577_v3 }
  0xbf   :  { %v1819_v6 = vmax.f32 %v1741_v9, %v8199_v51  ;;  %v8376_v39 = vadd.f32 %v4042_v4, %v4031_v0  ;;  %v8378_v41 = vadd.f32 %v4120_v19, %v4109_v38  ;;  %v11578_v49 = vld [vmem:[#allocation47_spill] sm:$0xff]  ;;  %v4343_v51 = vmul.f32 1e+30, %v7894_v50  ;;  %v11579_v46 = vld [vmem:[#allocation50_spill] sm:$0xff]  ;;  %v11581_v0 = vld [vmem:[#allocation56_spill] sm:$0xff] }
  0xc0   :  { %v4276_v29 = vrot.slane %v11578_v49, %v7303_v47  ;;  %v8384_v60 = vadd.f32 %v4198_v53, %v4187_v42  ;;  %v4354_v9 = vrot.slane %v11579_v46, %v7303_v47  ;;  %v4421_v4 = vmul.f32 1e+30, %v11581_v0  ;;  %v11582_v19 = vld [vmem:[#allocation51_spill] sm:$0xff]  ;;  %v11585_v50 = vld [vmem:[#allocation61_spill] sm:$0xff]  ;;  %v11587_v46 = vld [vmem:[#allocation62_spill] sm:$0xff] }
  0xc1   :  { %v1897_v31 = vmax.f32 %v1819_v6, %v8209_v17  ;;  %v4432_v38 = vrot.slane %v11582_v19, %v7303_v47  ;;  %v11583_v5 = vld [vmem:[#allocation59_spill] sm:$0xff]  ;;  %v11584_v17 = vld [vmem:[#allocation54_spill] sm:$0xff]  ;;  %v4577_v42 = vmul.f32 1e+30, %v11585_v50  ;;  %v4655_v0 = vmul.f32 1e+30, %v11587_v46 }
  0xc2   :  { %v8389_v26 = vadd.f32 %v4276_v29, %v4265_v52  ;;  %v4499_v23 = vmul.f32 1e+30, %v11583_v5  ;;  %v8396_v49 = vadd.f32 %v4354_v9, %v4343_v51  ;;  %v4510_v6 = vrot.slane %v11584_v17, %v7303_v47  ;;  %v11586_v29 = vld [vmem:[#allocation55_spill] sm:$0xff]  ;;  %v11588_v19 = vld [vmem:[#allocation57_spill] sm:$0xff]  ;;  %v11590_v9 = vld [vmem:[#allocation58_spill] sm:$0xff] }
  0xc3   :  { %v1975_v3 = vmax.f32 %v1897_v31, %v8219_v34  ;;  %v8401_v53 = vadd.f32 %v4432_v38, %v4421_v4  ;;  %v4588_v52 = vrot.slane %v11586_v29, %v7303_v47  ;;  %v11589_v31 = vld [vmem:[#allocation63_spill] sm:$0xff]  ;;  %v4744_v17 = vrot.slane %v11590_v9, %v7303_v47  ;;  %v35_v4 = vld [vmem:[%s11287_s1 + $0x8] sm:$0x77]  ;;  %v11591_v46 = vld [vmem:[#allocation60_spill] sm:$0xff] }
  0xc4   :  { %11580 = vst [vmem:[#allocation9_spill] sm:$0xff] %v8389_v26  ;;  %v4666_v26 = vrot.slane %v11588_v19, %v7303_v47  ;;  %v8409_v34 = vadd.f32 %v4510_v6, %v4499_v23  ;;  %v4733_v51 = vmul.f32 1e+30, %v11589_v31  ;;  %v4811_v29 = vmul.f32 1e+30, %v7960_v8  ;;  %v11592_v31 = vld [vmem:[#allocation5_spill] sm:$0xff] }
  0xc5   :  { %v2053_v5 = vmax.f32 %v1975_v3, %v8231_v1  ;;  %v8417_v38 = vadd.f32 %v4588_v52, %v4577_v42  ;;  %v4822_v1 = vrot.slane %v11591_v46, %v7303_v47  ;;  %v4889_v6 = vmul.f32 1e+30, %v8017_v25  ;;  %v5902_v42 = vld [vmem:[%s11287_s1 + $0x24] sm:$0x77] }
  0xc6   :  { %v8419_v50 = vadd.f32 %v4666_v26, %v4655_v0  ;;  %v8425_v3 = vadd.f32 %v4744_v17, %v4733_v51  ;;  %v4900_v19 = vrot.slane %v7939_v18, %v7303_v47  ;;  %v4967_v8 = vmul.f32 1e+30, %v8035_v57  ;;  %v5914_v18 = vld [vmem:[%s11287_s1 + $0x40] sm:$0x77] }
  0xc7   :  { %v2131_v23 = vmax.f32 %v2053_v5, %v8233_v14  ;;  %v8433_v26 = vadd.f32 %v4822_v1, %v4811_v29  ;;  %v4978_v52 = vrot.slane %v7958_v16, %v7303_v47  ;;  %v40_v0 = vunpack.c.l.bf16 %v35_v4 }
  0xc8   :  { %v8439_v5 = vadd.f32 %v4900_v19, %v4889_v6  ;;  %v41_v25 = vunpack.c.h.bf16 %v35_v4  ;;  %v8442_v51 = vsub.s32 3, %v11592_v31  ;;  %v11593_v57 = vrot.slane %v8252_v55, %v7303_v47  ;;  %v5926_v6 = vld [vmem:[%s11287_s1 + $0x5c] sm:$0x77] }
  0xc9   :  { %v2209_v14 = vmax.f32 %v2131_v23, %v8242_v15  ;;  %v8451_v17 = vadd.f32 %v4978_v52, %v4967_v8  ;;  %v117_v16 = vunpack.c.l.bf16 %v5902_v42  ;;  %v118_v29 = vunpack.c.h.bf16 %v5902_v42 }
  0xca   :  { %v2436_v9 = vadd.f32 %v11593_v57, %v8247_v58  ;;  %v11594_v4 = vrot.slane %v11529_v12, %v7303_v47  ;;  %v5897_v1 = vadd.f32 -1.0, %v41_v25  ;;  %v76_v23 = vrot.slane %v7973_v59, %v8442_v51  ;;  %v5938_v57 = vld [vmem:[%s11287_s1 + $0x78] sm:$0x77] }
  0xcb   :  { %v2287_v15 = vmax.f32 %v2209_v14, %v8244_v2  ;;  %v5909_v58 = vadd.f32 -1.0, %v118_v29  ;;  %v154_v19 = vrot.slane %v7981_v33, %v8442_v51  ;;  %v195_v42 = vunpack.c.l.bf16 %v5914_v18 }
  0xcc   :  { %v2514_v46 = vadd.f32 %v11594_v4, %v8257_v32  ;;  %v196_v8 = vunpack.c.h.bf16 %v5914_v18  ;;  %v8466_v52 = vadd.f32 -1.0, %v40_v0  ;;  %v56_v47 = vmul.f32 1e+30, %v5897_v1  ;;  %v5950_v0 = vld [vmem:[%s11287_s1 + $0x94] sm:$0x77] }
  0xcd   :  { %v2365_v2 = vmax.f32 %v2287_v15, %v8262_v13  ;;  %v8468_v32 = vadd.f32 -1.0, %v117_v16  ;;  %v134_v12 = vmul.f32 1e+30, %v5909_v58  ;;  %v232_v59 = vrot.slane %v7989_v28, %v8442_v51 }
  0xce   :  { %v5921_v14 = vadd.f32 -1.0, %v196_v8  ;;  %v274_v25 = vunpack.c.h.bf16 %v5926_v6  ;;  %v99_v29 = vadd.f32 %v76_v23, %v56_v47  ;;  %v8475_v18 = vadd.f32 -1.0, %v195_v42 }
  0xcf   :  { %11595 = vst [vmem:[#allocation16_spill] sm:$0xff] %v8468_v32  ;;  %v2443_v33 = vmax.f32 %v2365_v2, %v2436_v9  ;;  %v273_v13 = vunpack.c.l.bf16 %v5926_v6  ;;  %v177_v16 = vadd.f32 %v154_v19, %v134_v12  ;;  %v310_v28 = vrot.slane %v7997_v45, %v8442_v51  ;;  %v5962_v9 = vld [vmem:[%s11287_s1 + $0xb0] sm:$0x77] }
  0xd0   :  { %v212_v15 = vmul.f32 1e+30, %v5921_v14  ;;  %v5933_v4 = vadd.f32 -1.0, %v274_v25  ;;  %v106_v58 = vmax.f32 %v99_v29, -1e+30  ;;  %v351_v8 = vunpack.c.l.bf16 %v5938_v57 }
  0xd1   :  { %v2521_v1 = vmax.f32 %v2443_v33, %v2514_v46  ;;  %v352_v32 = vunpack.c.h.bf16 %v5938_v57  ;;  %v388_v42 = vrot.slane %v8005_v44, %v8442_v51  ;;  %v429_v2 = vunpack.c.l.bf16 %v5950_v0  ;;  %v5974_v44 = vld [vmem:[%s11287_s1 + $0xcc] sm:$0x77] }
  0xd2   :  { %v255_v23 = vadd.f32 %v232_v59, %v212_v15  ;;  %v290_v6 = vmul.f32 1e+30, %v5933_v4  ;;  %v184_v47 = vmax.f32 %v106_v58, %v177_v16  ;;  %v430_v14 = vunpack.c.h.bf16 %v5950_v0 }
  0xd3   :  { %v2599_v19 = vmax.f32 %v2521_v1, %v8270_v40  ;;  %v5945_v12 = vadd.f32 -1.0, %v352_v32  ;;  %v8488_v45 = vadd.f32 -1.0, %v273_v13  ;;  %v466_v25 = vrot.slane %v8013_v11, %v8442_v51  ;;  %v5986_v11 = vld [vmem:[%s11287_s1 + $0xe8] sm:$0x77] }
  0xd4   :  { %v333_v46 = vadd.f32 %v310_v28, %v290_v6  ;;  %v507_v57 = vunpack.c.l.bf16 %v5962_v9  ;;  %v262_v59 = vmax.f32 %v184_v47, %v255_v23  ;;  %v5957_v15 = vadd.f32 -1.0, %v430_v14 }
  0xd5   :  { %v2677_v33 = vmax.f32 %v2599_v19, %v8275_v62  ;;  %v368_v29 = vmul.f32 1e+30, %v5945_v12  ;;  %v8496_v40 = vadd.f32 -1.0, %v351_v8  ;;  %v8498_v32 = vadd.f32 -1.0, %v429_v2 }
  0xd6   :  { %v508_v13 = vunpack.c.h.bf16 %v5962_v9  ;;  %v8500_v0 = vadd.f32 -1.0, %v507_v57  ;;  %v340_v16 = vmax.f32 %v262_v59, %v333_v46  ;;  %v446_v28 = vmul.f32 1e+30, %v5957_v15  ;;  %v5998_v9 = vld [vmem:[%s11287_s1 + $0x104] sm:$0x77] }
  0xd7   :  { %v2755_v62 = vmax.f32 %v2677_v33, %v8282_v36  ;;  %v411_v4 = vadd.f32 %v388_v42, %v368_v29  ;;  %v544_v58 = vrot.slane %v8023_v27, %v8442_v51  ;;  %v585_v8 = vunpack.c.l.bf16 %v5974_v44 }
  0xd8   :  { %v5969_v1 = vadd.f32 -1.0, %v508_v13  ;;  %v586_v23 = vunpack.c.h.bf16 %v5974_v44  ;;  %v489_v19 = vadd.f32 %v466_v25, %v446_v28  ;;  %v663_v47 = vunpack.c.l.bf16 %v5986_v11  ;;  %v6010_v25 = vld [vmem:[%s11287_s1 + $0x120] sm:$0x77] }
  0xd9   :  { %v2833_v6 = vmax.f32 %v2755_v62, %v8287_v30  ;;  %v418_v2 = vmax.f32 %v340_v16, %v411_v4  ;;  %v622_v42 = vrot.slane %v8031_v35, %v8442_v51  ;;  %v664_v14 = vunpack.c.h.bf16 %v5986_v11  ;;  %v6022_v4 = vld [vmem:[%s11287_s1 + $0x13c] sm:$0x77] }
  0xda   :  { %v524_v12 = vmul.f32 1e+30, %v5969_v1  ;;  %v5981_v36 = vadd.f32 -1.0, %v586_v23  ;;  %v700_v57 = vrot.slane %v8041_v61, %v8442_v51  ;;  %v741_v33 = vunpack.c.l.bf16 %v5998_v9 }
  0xdb   :  { %v2911_v46 = vmax.f32 %v2833_v6, %v8295_v48  ;;  %v496_v27 = vmax.f32 %v418_v2, %v489_v19  ;;  %v5993_v15 = vadd.f32 -1.0, %v664_v14  ;;  %v742_v30 = vunpack.c.h.bf16 %v5998_v9 }
  0xdc   :  { %v567_v59 = vadd.f32 %v544_v58, %v524_v12  ;;  %v602_v29 = vmul.f32 1e+30, %v5981_v36  ;;  %v8521_v13 = vadd.f32 -1.0, %v585_v8  ;;  %v8523_v35 = vadd.f32 -1.0, %v663_v47  ;;  %v6034_v8 = vld [vmem:[%s11287_s1 + $0x158] sm:$0x77] }
  0xdd   :  { %v2989_v44 = vmax.f32 %v2911_v46, %v8300_v10  ;;  %v778_v48 = vrot.slane %v8049_v63, %v8442_v51  ;;  %v680_v62 = vmul.f32 1e+30, %v5993_v15  ;;  %v6005_v16 = vadd.f32 -1.0, %v742_v30 }
  0xde   :  { %v574_v11 = vmax.f32 %v496_v27, %v567_v59  ;;  %v645_v61 = vadd.f32 %v622_v42, %v602_v29  ;;  %v8531_v1 = vadd.f32 -1.0, %v741_v33  ;;  %v819_v10 = vunpack.c.l.bf16 %v6010_v25  ;;  %v11596_v29 = vld [vmem:[#allocation64_spill] sm:$0xff] }
  0xdf   :  { %v3067_v28 = vmax.f32 %v2989_v44, %v8302_v37  ;;  %v820_v58 = vunpack.c.h.bf16 %v6010_v25  ;;  %v723_v63 = vadd.f32 %v700_v57, %v680_v62  ;;  %v758_v9 = vmul.f32 1e+30, %v6005_v16  ;;  %v6046_v37 = vld [vmem:[%s11287_s1 + $0x174] sm:$0x77]  ;;  %v11597_v25 = vld [vmem:[#allocation10_spill] sm:$0xff] }
  0xe0   :  { %v652_v23 = vmax.f32 %v574_v11, %v645_v61  ;;  %v856_v6 = vrot.slane %v8057_v21, %v8442_v51  ;;  %v897_v47 = vunpack.c.l.bf16 %v6022_v4  ;;  %v898_v12 = vunpack.c.h.bf16 %v6022_v4 }
  0xe1   :  { %v3145_v2 = vmax.f32 %v3067_v28, %v8308_v56  ;;  %v6017_v19 = vadd.f32 -1.0, %v820_v58  ;;  %v801_v42 = vadd.f32 %v778_v48, %v758_v9  ;;  %v934_v14 = vrot.slane %v8065_v7, %v8442_v51  ;;  %v6058_v7 = vld [vmem:[%s11287_s1 + $0x190] sm:$0x77] }
  0xe2   :  { %v730_v36 = vmax.f32 %v652_v23, %v723_v63  ;;  %v975_v46 = vunpack.c.l.bf16 %v6034_v8  ;;  %v6029_v33 = vadd.f32 -1.0, %v898_v12  ;;  %v976_v21 = vunpack.c.h.bf16 %v6034_v8  ;;  %v6070_v28 = vld [vmem:[%s11287_s1 + $0x1ac] sm:$0x77] }
  0xe3   :  { %v3223_v27 = vmax.f32 %v3145_v2, %v8313_v20  ;;  %v836_v57 = vmul.f32 1e+30, %v6017_v19  ;;  %v8545_v56 = vadd.f32 -1.0, %v819_v10  ;;  %v1012_v15 = vrot.slane %v11596_v29, %v8442_v51  ;;  %v11598_v10 = vld [vmem:[#allocation7_spill] sm:$0xff]  ;;  %v6082_v12 = vld [vmem:[%s11287_s1 + $0x1c8] sm:$0x77] }
  0xe4   :  { %v808_v59 = vmax.f32 %v730_v36, %v801_v42  ;;  %v1053_v30 = vunpack.c.l.bf16 %v6046_v37  ;;  %v914_v48 = vmul.f32 1e+30, %v6029_v33  ;;  %v6041_v61 = vadd.f32 -1.0, %v976_v21 }
  0xe5   :  { %v3301_v44 = vmax.f32 %v3223_v27, %v11597_v25  ;;  %v879_v11 = vadd.f32 %v856_v6, %v836_v57  ;;  %v8553_v20 = vadd.f32 -1.0, %v897_v47  ;;  %v8555_v62 = vadd.f32 -1.0, %v975_v46  ;;  %v11599_v6 = vld [vmem:[#allocation65_spill] sm:$0xff] }
  0xe6   :  { %v1054_v16 = vunpack.c.h.bf16 %v6046_v37  ;;  %v8557_v4 = vadd.f32 -1.0, %v1053_v30  ;;  %v957_v23 = vadd.f32 %v934_v14, %v914_v48  ;;  %v992_v63 = vmul.f32 1e+30, %v6041_v61  ;;  %v11600_v14 = vld [vmem:[#allocation66_spill] sm:$0xff]  ;;  %v11601_v30 = vld [vmem:[#allocation67_spill] sm:$0xff] }
  0xe7   :  { %v3379_v58 = vmax.f32 %v3301_v44, %v11598_v10  ;;  %v886_v8 = vmax.f32 %v808_v59, %v879_v11  ;;  %v1090_v2 = vrot.slane %v11599_v6, %v8442_v51  ;;  %v1131_v19 = vunpack.c.l.bf16 %v6058_v7  ;;  %v6106_v6 = vld [vmem:[%s11287_s1 + $0x200] sm:$0x77] }
  0xe8   :  { %v6053_v9 = vadd.f32 -1.0, %v1054_v16  ;;  %v1132_v47 = vunpack.c.h.bf16 %v6058_v7  ;;  %v1035_v42 = vadd.f32 %v1012_v15, %v992_v63  ;;  %v1209_v46 = vunpack.c.l.bf16 %v6070_v28  ;;  %v6094_v15 = vld [vmem:[%s11287_s1 + $0x1e4] sm:$0x77] }
  0xe9   :  { %v3457_v37 = vmax.f32 %v3379_v58, %v8333_v24  ;;  %v964_v36 = vmax.f32 %v886_v8, %v957_v23  ;;  %v1168_v33 = vrot.slane %v11600_v14, %v8442_v51  ;;  %v1210_v21 = vunpack.c.h.bf16 %v6070_v28  ;;  %v11602_v7 = vld [vmem:[#allocation6_spill] sm:$0xff]  ;;  %v11605_v14 = vld [vmem:[#allocation11_spill] sm:$0xff] }
  0xea   :  { %v1070_v27 = vmul.f32 1e+30, %v6053_v9  ;;  %v6065_v57 = vadd.f32 -1.0, %v1132_v47  ;;  %v1246_v25 = vrot.slane %v11601_v30, %v8442_v51  ;;  %v1287_v44 = vunpack.c.l.bf16 %v6082_v12 }
  0xeb   :  { %v3535_v59 = vmax.f32 %v3457_v37, %v8338_v54  ;;  %v1042_v29 = vmax.f32 %v964_v36, %v1035_v42  ;;  %v6077_v61 = vadd.f32 -1.0, %v1210_v21  ;;  %v1288_v24 = vunpack.c.h.bf16 %v6082_v12  ;;  %v11603_v54 = vld [vmem:[#allocation68_spill] sm:$0xff] }
  0xec   :  { %v1113_v11 = vadd.f32 %v1090_v2, %v1070_v27  ;;  %v1148_v48 = vmul.f32 1e+30, %v6065_v57  ;;  %v8578_v10 = vadd.f32 -1.0, %v1131_v19  ;;  %v8580_v28 = vadd.f32 -1.0, %v1209_v46  ;;  %v6118_v37 = vld [vmem:[%s11287_s1 + $0x21c] sm:$0x77] }
  0xed   :  { %v3613_v16 = vmax.f32 %v3535_v59, %v11602_v7  ;;  %v1324_v58 = vrot.slane %v11603_v54, %v8442_v51  ;;  %v1226_v63 = vmul.f32 1e+30, %v6077_v61  ;;  %v6089_v9 = vadd.f32 -1.0, %v1288_v24  ;;  %v11604_v27 = vld [vmem:[#allocation69_spill] sm:$0xff] }
  0xee   :  { %v1120_v8 = vmax.f32 %v1042_v29, %v1113_v11  ;;  %v1191_v23 = vadd.f32 %v1168_v33, %v1148_v48  ;;  %v8588_v47 = vadd.f32 -1.0, %v1287_v44  ;;  %v1365_v12 = vunpack.c.l.bf16 %v6094_v15  ;;  %v11606_v11 = vld [vmem:[#allocation70_spill] sm:$0xff] }
  0xef   :  { %v3691_v2 = vmax.f32 %v3613_v16, %v8346_v43  ;;  %v1366_v19 = vunpack.c.h.bf16 %v6094_v15  ;;  %v1269_v42 = vadd.f32 %v1246_v25, %v1226_v63  ;;  %v1304_v46 = vmul.f32 1e+30, %v6089_v9  ;;  %v6130_v43 = vld [vmem:[%s11287_s1 + $0x238] sm:$0x77] }
  0xf0   :  { %v1198_v36 = vmax.f32 %v1120_v8, %v1191_v23  ;;  %v1402_v57 = vrot.slane %v11604_v27, %v8442_v51  ;;  %v1443_v59 = vunpack.c.l.bf16 %v6106_v6  ;;  %v1444_v29 = vunpack.c.h.bf16 %v6106_v6  ;;  %v11607_v25 = vld [vmem:[#allocation8_spill] sm:$0xff]  ;;  %v11608_v23 = vld [vmem:[#allocation71_spill] sm:$0xff]  ;;  %v11609_v6 = vld [vmem:[#allocation14_spill] sm:$0xff] }
  0xf1   :  { %v3769_v33 = vmax.f32 %v3691_v2, %v11605_v14  ;;  %v6101_v21 = vadd.f32 -1.0, %v1366_v19  ;;  %v1347_v44 = vadd.f32 %v1324_v58, %v1304_v46  ;;  %v1480_v48 = vrot.slane %v11606_v11, %v8442_v51  ;;  %v6154_v14 = vld [vmem:[%s11287_s1 + $0x270] sm:$0x77] }
  0xf2   :  { %v1276_v30 = vmax.f32 %v1198_v36, %v1269_v42  ;;  %v1521_v61 = vunpack.c.l.bf16 %v6118_v37  ;;  %v6113_v7 = vadd.f32 -1.0, %v1444_v29  ;;  %v1522_v16 = vunpack.c.h.bf16 %v6118_v37  ;;  %v6142_v42 = vld [vmem:[%s11287_s1 + $0x254] sm:$0x77] }
  0xf3   :  { %v3847_v24 = vmax.f32 %v3769_v33, %v11607_v25  ;;  %v1382_v15 = vmul.f32 1e+30, %v6101_v21  ;;  %v8602_v8 = vadd.f32 -1.0, %v1365_v12  ;;  %v1558_v63 = vrot.slane %v11608_v23, %v8442_v51 }
  0xf4   :  { %v1354_v54 = vmax.f32 %v1276_v30, %v1347_v44  ;;  %v1599_v9 = vunpack.c.l.bf16 %v6130_v43  ;;  %v1460_v58 = vmul.f32 1e+30, %v6113_v7  ;;  %v6125_v36 = vadd.f32 -1.0, %v1522_v16  ;;  %v11610_v44 = vld [vmem:[#allocation72_spill] sm:$0xff] }
  0xf5   :  { %v3925_v2 = vmax.f32 %v3847_v24, %v11609_v6  ;;  %v1425_v19 = vadd.f32 %v1402_v57, %v1382_v15  ;;  %v8610_v46 = vadd.f32 -1.0, %v1443_v59  ;;  %v8612_v27 = vadd.f32 -1.0, %v1521_v61 }
  0xf6   :  { %v1600_v37 = vunpack.c.h.bf16 %v6130_v43  ;;  %v8614_v12 = vadd.f32 -1.0, %v1599_v9  ;;  %v1503_v21 = vadd.f32 %v1480_v48, %v1460_v58  ;;  %v1538_v29 = vmul.f32 1e+30, %v6125_v36  ;;  %v6166_v43 = vld [vmem:[%s11287_s1 + $0x28c] sm:$0x77]  ;;  %v11611_v48 = vld [vmem:[#allocation73_spill] sm:$0xff] }
  0xf7   :  { %v4003_v33 = vmax.f32 %v3925_v2, %v8371_v22  ;;  %v1432_v57 = vmax.f32 %v1354_v54, %v1425_v19  ;;  %v1636_v11 = vrot.slane %v11610_v44, %v8442_v51  ;;  %v1677_v59 = vunpack.c.l.bf16 %v6142_v42  ;;  %v11612_v2 = vld [vmem:[#allocation74_spill] sm:$0xff] }
  0xf8   :  { %v6137_v30 = vadd.f32 -1.0, %v1600_v37  ;;  %v1678_v25 = vunpack.c.h.bf16 %v6142_v42  ;;  %v1581_v15 = vadd.f32 %v1558_v63, %v1538_v29  ;;  %v1755_v7 = vunpack.c.l.bf16 %v6154_v14  ;;  %v6178_v63 = vld [vmem:[%s11287_s1 + $0x2a8] sm:$0x77] }
  0xf9   :  { %v4081_v61 = vmax.f32 %v4003_v33, %v8376_v39  ;;  %v1510_v24 = vmax.f32 %v1432_v57, %v1503_v21  ;;  %v1714_v54 = vrot.slane %v11611_v48, %v8442_v51  ;;  %v1756_v23 = vunpack.c.h.bf16 %v6154_v14  ;;  %v11615_v48 = vld [vmem:[#allocation76_spill] sm:$0xff] }
  0xfa   :  { %v1616_v16 = vmul.f32 1e+30, %v6137_v30  ;;  %v6149_v22 = vadd.f32 -1.0, %v1678_v25  ;;  %v1792_v19 = vrot.slane %v11612_v2, %v8442_v51  ;;  %v1833_v58 = vunpack.c.l.bf16 %v6166_v43  ;;  %v6190_v25 = vld [vmem:[%s11287_s1 + $0x2c4] sm:$0x77] }
  0xfb   :  { %v4159_v9 = vmax.f32 %v4081_v61, %v8378_v41  ;;  %v1588_v6 = vmax.f32 %v1510_v24, %v1581_v15  ;;  %v6161_v37 = vadd.f32 -1.0, %v1756_v23  ;;  %v1834_v39 = vunpack.c.h.bf16 %v6166_v43  ;;  %v11613_v41 = vld [vmem:[#allocation75_spill] sm:$0xff]  ;;  %v11614_v43 = vld [vmem:[#allocation9_spill] sm:$0xff] }
  0xfc   :  { %v1659_v36 = vadd.f32 %v1636_v11, %v1616_v16  ;;  %v1694_v42 = vmul.f32 1e+30, %v6149_v22  ;;  %v8635_v57 = vadd.f32 -1.0, %v1677_v59  ;;  %v8637_v14 = vadd.f32 -1.0, %v1755_v7  ;;  %v6202_v15 = vld [vmem:[%s11287_s1 + $0x2e0] sm:$0x77] }
  0xfd   :  { %v4237_v33 = vmax.f32 %v4159_v9, %v8384_v60  ;;  %v1870_v21 = vrot.slane %v11613_v41, %v8442_v51  ;;  %v1772_v44 = vmul.f32 1e+30, %v6161_v37  ;;  %v6173_v11 = vadd.f32 -1.0, %v1834_v39  ;;  %v11616_v37 = vld [vmem:[#allocation77_spill] sm:$0xff] }
  0xfe   :  { %v1666_v29 = vmax.f32 %v1588_v6, %v1659_v36  ;;  %v1737_v30 = vadd.f32 %v1714_v54, %v1694_v42  ;;  %v8645_v24 = vadd.f32 -1.0, %v1833_v58  ;;  %v1911_v60 = vunpack.c.l.bf16 %v6178_v63  ;;  %v6214_v58 = vld [vmem:[%s11287_s1 + $0x2fc] sm:$0x77] }
  0xff   :  { %v4315_v61 = vmax.f32 %v4237_v33, %v11614_v43  ;;  %v1912_v59 = vunpack.c.h.bf16 %v6178_v63  ;;  %v1815_v16 = vadd.f32 %v1792_v19, %v1772_v44  ;;  %v1850_v22 = vmul.f32 1e+30, %v6173_v11  ;;  %v11617_v44 = vld [vmem:[#allocation78_spill] sm:$0xff] }
 0x100   :  { %v1744_v7 = vmax.f32 %v1666_v29, %v1737_v30  ;;  %v1948_v54 = vrot.slane %v11615_v48, %v8442_v51  ;;  %v1989_v6 = vunpack.c.l.bf16 %v6190_v25  ;;  %v1990_v2 = vunpack.c.h.bf16 %v6190_v25 }
 0x101   :  { %v4393_v23 = vmax.f32 %v4315_v61, %v8396_v49  ;;  %v6185_v9 = vadd.f32 -1.0, %v1912_v59  ;;  %v1893_v42 = vadd.f32 %v1870_v21, %v1850_v22  ;;  %v2026_v39 = vrot.slane %v11616_v37, %v8442_v51  ;;  %v6238_v22 = vld [vmem:[%s11287_s1 + $0x334] sm:$0x77] }
 0x102   :  { %v1822_v36 = vmax.f32 %v1744_v7, %v1815_v16  ;;  %v2067_v63 = vunpack.c.l.bf16 %v6202_v15  ;;  %v6197_v41 = vadd.f32 -1.0, %v1990_v2  ;;  %v2068_v29 = vunpack.c.h.bf16 %v6202_v15  ;;  %v6226_v7 = vld [vmem:[%s11287_s1 + $0x318] sm:$0x77] }
 0x103   :  { %v4471_v19 = vmax.f32 %v4393_v23, %v8401_v53  ;;  %v1928_v33 = vmul.f32 1e+30, %v6185_v9  ;;  %v8659_v49 = vadd.f32 -1.0, %v1911_v60  ;;  %v2104_v11 = vrot.slane %v11617_v44, %v8442_v51  ;;  %v11618_v2 = vld [vmem:[#allocation79_spill] sm:$0xff] }
 0x104   :  { %v1900_v30 = vmax.f32 %v1822_v36, %v1893_v42  ;;  %v2145_v25 = vunpack.c.l.bf16 %v6214_v58  ;;  %v2006_v21 = vmul.f32 1e+30, %v6197_v41  ;;  %v6209_v59 = vadd.f32 -1.0, %v2068_v29 }
 0x105   :  { %v4549_v43 = vmax.f32 %v4471_v19, %v8409_v34  ;;  %v1971_v61 = vadd.f32 %v1948_v54, %v1928_v33  ;;  %v8667_v53 = vadd.f32 -1.0, %v1989_v6  ;;  %v8669_v16 = vadd.f32 -1.0, %v2067_v63 }
 0x106   :  { %v2146_v15 = vunpack.c.h.bf16 %v6214_v58  ;;  %v8671_v60 = vadd.f32 -1.0, %v2145_v25  ;;  %v2049_v54 = vadd.f32 %v2026_v39, %v2006_v21  ;;  %v2084_v23 = vmul.f32 1e+30, %v6209_v59  ;;  %v6250_v58 = vld [vmem:[%s11287_s1 + $0x350] sm:$0x77]  ;;  %v11619_v39 = vld [vmem:[#allocation80_spill] sm:$0xff] }
 0x107   :  { %v4627_v34 = vmax.f32 %v4549_v43, %v8417_v38  ;;  %v1978_v48 = vmax.f32 %v1900_v30, %v1971_v61  ;;  %v2182_v36 = vrot.slane %v11618_v2, %v8442_v51  ;;  %v2223_v6 = vunpack.c.l.bf16 %v6226_v7  ;;  %v11620_v43 = vld [vmem:[#allocation81_spill] sm:$0xff] }
 0x108   :  { %v6221_v9 = vadd.f32 -1.0, %v2146_v15  ;;  %v2224_v42 = vunpack.c.h.bf16 %v6226_v7  ;;  %v2127_v19 = vadd.f32 %v2104_v11, %v2084_v23  ;;  %v2301_v33 = vunpack.c.l.bf16 %v6238_v22  ;;  %v6262_v11 = vld [vmem:[%s11287_s1 + $0x36c] sm:$0x77] }
 0x109   :  { %v4705_v37 = vmax.f32 %v4627_v34, %v8419_v50  ;;  %v2056_v63 = vmax.f32 %v1978_v48, %v2049_v54  ;;  %v2260_v29 = vrot.slane %v11619_v39, %v8442_v51  ;;  %v2302_v30 = vunpack.c.h.bf16 %v6238_v22  ;;  %v6274_v54 = vld [vmem:[%s11287_s1 + $0x388] sm:$0x77]  ;;  %v8711_v39 = vld [vmem:[%s11286_s0 + $0xd9] sm:$0x7f] }
 0x10a   :  { %v2162_v41 = vmul.f32 1e+30, %v6221_v9  ;;  %v6233_v38 = vadd.f32 -1.0, %v2224_v42  ;;  %v2338_v61 = vrot.slane %v11620_v43, %v8442_v51  ;;  %v2379_v21 = vunpack.c.l.bf16 %v6250_v58 }
 0x10b   :  { %v4783_v44 = vmax.f32 %v4705_v37, %v8425_v3  ;;  %v2134_v25 = vmax.f32 %v2056_v63, %v2127_v19  ;;  %v6245_v15 = vadd.f32 -1.0, %v2302_v30  ;;  %v2380_v50 = vunpack.c.h.bf16 %v6250_v58  ;;  %v6286_v37 = vld [vmem:[%s11287_s1 + $0x3a4] sm:$0x77] }
 0x10c   :  { %v2205_v59 = vadd.f32 %v2182_v36, %v2162_v41  ;;  %v2240_v7 = vmul.f32 1e+30, %v6233_v38  ;;  %v8692_v48 = vadd.f32 -1.0, %v2223_v6  ;;  %v8694_v22 = vadd.f32 -1.0, %v2301_v33 }
 0x10d   :  { %v4861_v34 = vmax.f32 %v4783_v44, %v8433_v26  ;;  %v2416_v3 = vrot.slane %v8252_v55, %v8442_v51  ;;  %v2318_v2 = vmul.f32 1e+30, %v6245_v15  ;;  %v6257_v36 = vadd.f32 -1.0, %v2380_v50  ;;  %v6298_v15 = vld [vmem:[%s11287_s1 + $0x3c0] sm:$0x77]  ;;  %v6888_v50 = vld [vmem:[%s11289_s3 + $0x138] sm:$0xff]  }
 0x10e   :  { %v2212_v23 = vmax.f32 %v2134_v25, %v2205_v59  ;;  %v2283_v9 = vadd.f32 %v2260_v29, %v2240_v7  ;;  %v8702_v58 = vadd.f32 -1.0, %v2379_v21  ;;  %v2457_v26 = vunpack.c.l.bf16 %v6262_v11  ;;  %v8718_v25 = vld [vmem:[%s11286_s0 + $0xe0] sm:$0x7f] }
 0x10f   :  { %v4939_v42 = vmax.f32 %v4861_v34, %v8439_v5  ;;  %v2458_v6 = vunpack.c.h.bf16 %v6262_v11  ;;  %v2361_v55 = vadd.f32 %v2338_v61, %v2318_v2  ;;  %v2396_v19 = vmul.f32 1e+30, %v6257_v36 }
 0x110   :  { %v2290_v63 = vmax.f32 %v2212_v23, %v2283_v9  ;;  %v2535_v33 = vunpack.c.l.bf16 %v6274_v54  ;;  %v2494_v5 = vrot.slane %v8711_v39, %v8442_v51  ;;  %v2536_v29 = vunpack.c.h.bf16 %v6274_v54  ;;  %v8735_v54 = vld [vmem:[%s11286_s0 + $0xe7] sm:$0x7f]  ;;  %v6310_v9 = vld [vmem:[%s11287_s1 + $0x3dc] sm:$0x77] }
 0x111   :  { %v5017_v41 = vmax.f32 %v4939_v42, %v8451_v17  ;;  %v6269_v38 = vadd.f32 -1.0, %v2458_v6  ;;  %v2439_v44 = vadd.f32 %v2416_v3, %v2396_v19  ;;  %v2572_v17 = vrot.slane %v8718_v25, %v8442_v51  ;;  %v8750_v19 = vld [vmem:[%s11286_s0 + $0xee] sm:$0x7f] }
 0x112   :  { %v2368_v30 = vmax.f32 %v2290_v63, %v2361_v55  ;;  %v2613_v43 = vunpack.c.l.bf16 %v6286_v37  ;;  %v6281_v59 = vadd.f32 -1.0, %v2536_v29  ;;  %v2614_v7 = vunpack.c.h.bf16 %v6286_v37 }
 0x113   :  { %v5024_v61 = vmax.f32 %v5017_v41, 0.0  ;;  %v2474_v21 = vmul.f32 1e+30, %v6269_v38  ;;  %v8728_v34 = vadd.f32 -1.0, %v2457_v26  ;;  %v8730_v3 = vadd.f32 -1.0, %v2535_v33 }
 0x114   :  { %v2446_v11 = vmax.f32 %v2368_v30, %v2439_v44  ;;  %v2650_v23 = vrot.slane %v8735_v54, %v8442_v51  ;;  %v2552_v42 = vmul.f32 1e+30, %v6281_v59  ;;  %v6293_v6 = vadd.f32 -1.0, %v2614_v7  ;;  %v6322_v26 = vld [vmem:[%s11287_s1 + $0x3f8] sm:$0x77] }
 0x115   :  { %v5031_v2 = vpack.c.bf16 %v5024_v61, %v5024_v61  ;;  %v2517_v36 = vadd.f32 %v2494_v5, %v2474_v21  ;;  %v8745_v37 = vadd.f32 -1.0, %v2613_v43  ;;  %v2691_v63 = vunpack.c.l.bf16 %v6298_v15  ;;  %v6334_v30 = vld [vmem:[%s11287_s1 + $0x414] sm:$0x77] }
 0x116   :  { %v2692_v55 = vunpack.c.h.bf16 %v6298_v15  ;;  %v2728_v33 = vrot.slane %v8750_v19, %v8442_v51  ;;  %v2595_v38 = vadd.f32 %v2572_v17, %v2552_v42  ;;  %v2630_v5 = vmul.f32 1e+30, %v6293_v6  ;;  %v8760_v61 = vld [vmem:[%s11286_s0 + $0xf5] sm:$0x7f] }
 0x117   :  { %5474 = vmatmul.mubr.bf16.vlgmr.msra.gmra.mxu0 %v5031_v2  ;;  %v2524_v41 = vmax.f32 %v2446_v11, %v2517_v36  ;;  %v2770_v29 = vunpack.c.h.bf16 %v6310_v9  ;;  %v2769_v43 = vunpack.c.l.bf16 %v6310_v9  ;;  %11621 = vst [vmem:[#allocation12_spill] sm:$0xff] %v8760_v61  ;;  %v2806_v21 = vrot.slane %v8760_v61, %v8442_v51  ;;  %v6346_v6 = vld [vmem:[%s11287_s1 + $0x430] sm:$0x77] }
 0x118   :  { %6770 = vmatpush3.bf16.msra.mxu0 %v6888_v50  ;;  %v6305_v44 = vadd.f32 -1.0, %v2692_v55  ;;  %v2847_v59 = vunpack.c.l.bf16 %v6322_v26  ;;  %v2673_v17 = vadd.f32 %v2650_v23, %v2630_v5  ;;  %v2848_v11 = vunpack.c.h.bf16 %v6322_v26  ;;  %v8769_v50 = vld [vmem:[%s11286_s0 + $0xfc] sm:$0x7f] }
 0x119   :  { %v2602_v7 = vmax.f32 %v2524_v41, %v2595_v38  ;;  %v6317_v15 = vadd.f32 -1.0, %v2770_v29  ;;  %v8764_v2 = vadd.f32 -1.0, %v2691_v63  ;;  %11622 = vst [vmem:[#allocation13_spill] sm:$0xff] %v8769_v50  ;;  %v2884_v9 = vrot.slane %v8769_v50, %v8442_v51  ;;  %v8783_v29 = vld [vmem:[%s11286_s0 + $0x103] sm:$0x7f] }
 0x11a   :  { %v2708_v36 = vmul.f32 1e+30, %v6305_v44  ;;  %v2925_v42 = vunpack.c.l.bf16 %v6334_v30  ;;  %v6329_v41 = vadd.f32 -1.0, %v2848_v11  ;;  %v2926_v26 = vunpack.c.h.bf16 %v6334_v30  ;;  %11625 = vst [vmem:[#allocation21_spill] sm:$0xff] %v8783_v29 }
 0x11b   :  { %v2680_v55 = vmax.f32 %v2602_v7, %v2673_v17  ;;  %v2786_v23 = vmul.f32 1e+30, %v6317_v15  ;;  %v8776_v38 = vadd.f32 -1.0, %v2769_v43  ;;  %v8778_v5 = vadd.f32 -1.0, %v2847_v59  ;;  %v6358_v7 = vld [vmem:[%s11287_s1 + $0x44c] sm:$0x77] }
 0x11c   :  { %v2751_v63 = vadd.f32 %v2728_v33, %v2708_v36  ;;  %v2962_v44 = vrot.slane %v8783_v29, %v8442_v51  ;;  %v2864_v15 = vmul.f32 1e+30, %v6329_v41  ;;  %v6341_v30 = vadd.f32 -1.0, %v2926_v26  ;;  %v6370_v43 = vld [vmem:[%s11287_s1 + $0x468] sm:$0x77] }
 0x11d   :  { %11623 = vst [vmem:[#allocation18_spill] sm:$0xff] %v8776_v38  ;;  %11624 = vst [vmem:[#allocation15_spill] sm:$0xff] %v8778_v5  ;;  %v2829_v17 = vadd.f32 %v2806_v21, %v2786_v23  ;;  %v3004_v33 = vunpack.c.h.bf16 %v6346_v6  ;;  %v8793_v11 = vadd.f32 -1.0, %v2925_v42  ;;  %v3003_v36 = vunpack.c.l.bf16 %v6346_v6  ;;  %v8798_v29 = vld [vmem:[%s11286_s0 + $0x10a] sm:$0x7f] }
 0x11e   :  { %v2758_v59 = vmax.f32 %v2680_v55, %v2751_v63  ;;  %11627 = vst [vmem:[#allocation22_spill] sm:$0xff] %v8798_v29  ;;  %v3040_v50 = vrot.slane %v8798_v29, %v8442_v51  ;;  %v2907_v21 = vadd.f32 %v2884_v9, %v2864_v15  ;;  %v2942_v23 = vmul.f32 1e+30, %v6341_v30  ;;  %v6382_v5 = vld [vmem:[%s11287_s1 + $0x484] sm:$0x77] }
 0x11f   :  { %11626 = vst [vmem:[#allocation17_spill] sm:$0xff] %v8793_v11  ;;  %v6353_v41 = vadd.f32 -1.0, %v3004_v33  ;;  %v3082_v26 = vunpack.c.h.bf16 %v6358_v7  ;;  %v3081_v42 = vunpack.c.l.bf16 %v6358_v7  ;;  %v8808_v6 = vld [vmem:[%s11286_s0 + $0x111] sm:$0x7f]  ;;  %v3159_v11 = vunpack.c.l.bf16 %v6370_v43  ;;  %v8817_v7 = vld [vmem:[%s11286_s0 + $0x118] sm:$0x7f] }
 0x120   :  { %v2836_v55 = vmax.f32 %v2758_v59, %v2829_v17  ;;  %11628 = vst [vmem:[#allocation19_spill] sm:$0xff] %v8808_v6  ;;  %v3118_v63 = vrot.slane %v8808_v6, %v8442_v51  ;;  %v2985_v29 = vadd.f32 %v2962_v44, %v2942_v23  ;;  %v3160_v30 = vunpack.c.h.bf16 %v6370_v43  ;;  %11630 = vst [vmem:[#allocation20_spill] sm:$0xff] %v8817_v7  ;;  %v6394_v6 = vld [vmem:[%s11287_s1 + $0x4a0] sm:$0x77] }
 0x121   :  { %v3020_v9 = vmul.f32 1e+30, %v6353_v41  ;;  %v6365_v15 = vadd.f32 -1.0, %v3082_v26  ;;  %v8812_v61 = vadd.f32 -1.0, %v3003_v36  ;;  %v3196_v17 = vrot.slane %v8817_v7, %v8442_v51 }
 0x122   :  { %v2914_v33 = vmax.f32 %v2836_v55, %v2907_v21  ;;  %v3237_v59 = vunpack.c.l.bf16 %v6382_v5  ;;  %v6377_v41 = vadd.f32 -1.0, %v3160_v30  ;;  %v3238_v43 = vunpack.c.h.bf16 %v6382_v5  ;;  %v8831_v55 = vld [vmem:[%s11286_s0 + $0x11f] sm:$0x7f] }
 0x123   :  { %11629 = vst [vmem:[#allocation25_spill] sm:$0xff] %v8812_v61  ;;  %v3063_v44 = vadd.f32 %v3040_v50, %v3020_v9  ;;  %v3098_v23 = vmul.f32 1e+30, %v6365_v15  ;;  %v8824_v36 = vadd.f32 -1.0, %v3081_v42  ;;  %v8826_v26 = vadd.f32 -1.0, %v3159_v11  ;;  %11633 = vst [vmem:[#allocation29_spill] sm:$0xff] %v8831_v55 }
 0x124   :  { %v2992_v21 = vmax.f32 %v2914_v33, %v2985_v29  ;;  %v3274_v7 = vrot.slane %v8831_v55, %v8442_v51  ;;  %v6406_v50 = vld [vmem:[%s11287_s1 + $0x4bc] sm:$0x77]  ;;  %v3176_v15 = vmul.f32 1e+30, %v6377_v41  ;;  %v6389_v5 = vadd.f32 -1.0, %v3238_v43 }
 0x125   :  { %11631 = vst [vmem:[#allocation28_spill] sm:$0xff] %v8824_v36  ;;  %11632 = vst [vmem:[#allocation23_spill] sm:$0xff] %v8826_v26  ;;  %v3141_v9 = vadd.f32 %v3118_v63, %v3098_v23  ;;  %v3316_v29 = vunpack.c.h.bf16 %v6394_v6  ;;  %v6418_v11 = vld [vmem:[%s11287_s1 + $0x4d8] sm:$0x77]  ;;  %v8841_v30 = vadd.f32 -1.0, %v3237_v59  ;;  %v3315_v33 = vunpack.c.l.bf16 %v6394_v6 }
 0x126   :  { %v3070_v42 = vmax.f32 %v2992_v21, %v3063_v44  ;;  %v8846_v55 = vld [vmem:[%s11286_s0 + $0x126] sm:$0x7f]  ;;  %v3219_v63 = vadd.f32 %v3196_v17, %v3176_v15  ;;  %v3254_v23 = vmul.f32 1e+30, %v6389_v5  ;;  %v3394_v43 = vunpack.c.h.bf16 %v6406_v50  ;;  %v6430_v36 = vld [vmem:[%s11287_s1 + $0x4f4] sm:$0x77] }
 0x127   :  { %11634 = vst [vmem:[#allocation24_spill] sm:$0xff] %v8841_v30  ;;  %11635 = vst [vmem:[#allocation32_spill] sm:$0xff] %v8846_v55  ;;  %v3352_v26 = vrot.slane %v8846_v55, %v8442_v51  ;;  %v6401_v41 = vadd.f32 -1.0, %v3316_v29  ;;  %v3393_v59 = vunpack.c.l.bf16 %v6406_v50  ;;  %v8856_v6 = vld [vmem:[%s11286_s0 + $0x12d] sm:$0x7f]  ;;  %v3471_v30 = vunpack.c.l.bf16 %v6418_v11 }
 0x128   :  { %v3148_v44 = vmax.f32 %v3070_v42, %v3141_v9  ;;  %11636 = vst [vmem:[#allocation26_spill] sm:$0xff] %v8856_v6  ;;  %v3430_v21 = vrot.slane %v8856_v6, %v8442_v51  ;;  %v3297_v55 = vadd.f32 %v3274_v7, %v3254_v23  ;;  %v6413_v15 = vadd.f32 -1.0, %v3394_v43  ;;  %v8865_v50 = vld [vmem:[%s11286_s0 + $0x134] sm:$0x7f] }
 0x129   :  { %v3332_v17 = vmul.f32 1e+30, %v6401_v41  ;;  %v3472_v5 = vunpack.c.h.bf16 %v6418_v11  ;;  %v8860_v61 = vadd.f32 -1.0, %v3315_v33  ;;  %11638 = vst [vmem:[#allocation27_spill] sm:$0xff] %v8865_v50  ;;  %v3508_v9 = vrot.slane %v8865_v50, %v8442_v51  ;;  %v6442_v6 = vld [vmem:[%s11287_s1 + $0x510] sm:$0x77] }
 0x12a   :  { %v3226_v29 = vmax.f32 %v3148_v44, %v3219_v63  ;;  %v3549_v42 = vunpack.c.l.bf16 %v6430_v36  ;;  %v3410_v23 = vmul.f32 1e+30, %v6413_v15  ;;  %v3550_v11 = vunpack.c.h.bf16 %v6430_v36  ;;  %v8879_v44 = vld [vmem:[%s11286_s0 + $0x13b] sm:$0x7f] }
 0x12b   :  { %11637 = vst [vmem:[#allocation33_spill] sm:$0xff] %v8860_v61  ;;  %v3375_v7 = vadd.f32 %v3352_v26, %v3332_v17  ;;  %v6425_v41 = vadd.f32 -1.0, %v3472_v5  ;;  %v8872_v33 = vadd.f32 -1.0, %v3393_v59  ;;  %v8874_v43 = vadd.f32 -1.0, %v3471_v30  ;;  %11641 = vst [vmem:[#allocation37_spill] sm:$0xff] %v8879_v44 }
 0x12c   :  { %v3304_v63 = vmax.f32 %v3226_v29, %v3297_v55  ;;  %v3586_v50 = vrot.slane %v8879_v44, %v8442_v51  ;;  %v6454_v26 = vld [vmem:[%s11287_s1 + $0x52c] sm:$0x77]  ;;  %v3453_v17 = vadd.f32 %v3430_v21, %v3410_v23  ;;  %v6437_v36 = vadd.f32 -1.0, %v3550_v11  ;;  %v8894_v44 = vld [vmem:[%s11286_s0 + $0x142] sm:$0x7f] }
 0x12d   :  { %11639 = vst [vmem:[#allocation36_spill] sm:$0xff] %v8872_v33  ;;  %11640 = vst [vmem:[#allocation30_spill] sm:$0xff] %v8874_v43  ;;  %v3488_v15 = vmul.f32 1e+30, %v6425_v41  ;;  %v3628_v55 = vunpack.c.h.bf16 %v6442_v6  ;;  %v6466_v30 = vld [vmem:[%s11287_s1 + $0x548] sm:$0x77]  ;;  %v3627_v29 = vunpack.c.l.bf16 %v6442_v6  ;;  %v3664_v43 = vrot.slane %v8894_v44, %v8442_v51 }
 0x12e   :  { %v3382_v59 = vmax.f32 %v3304_v63, %v3375_v7  ;;  %v8889_v5 = vadd.f32 -1.0, %v3549_v42  ;;  %11643 = vst [vmem:[#allocation40_spill] sm:$0xff] %v8894_v44  ;;  %v3566_v23 = vmul.f32 1e+30, %v6437_v36  ;;  %v3706_v11 = vunpack.c.h.bf16 %v6454_v26  ;;  %v6478_v33 = vld [vmem:[%s11287_s1 + $0x564] sm:$0x77] }
 0x12f   :  { %v3531_v21 = vadd.f32 %v3508_v9, %v3488_v15  ;;  %v6449_v41 = vadd.f32 -1.0, %v3628_v55  ;;  %v3705_v42 = vunpack.c.l.bf16 %v6454_v26  ;;  %v8904_v6 = vld [vmem:[%s11286_s0 + $0x149] sm:$0x7f]  ;;  %v3784_v36 = vunpack.c.h.bf16 %v6466_v30  ;;  %v8913_v26 = vld [vmem:[%s11286_s0 + $0x150] sm:$0x7f] }
 0x130   :  { %11642 = vst [vmem:[#allocation31_spill] sm:$0xff] %v8889_v5  ;;  %v3460_v7 = vmax.f32 %v3382_v59, %v3453_v17  ;;  %11644 = vst [vmem:[#allocation34_spill] sm:$0xff] %v8904_v6  ;;  %v3742_v63 = vrot.slane %v8904_v6, %v8442_v51  ;;  %v3783_v5 = vunpack.c.l.bf16 %v6466_v30  ;;  %v3609_v44 = vadd.f32 %v3586_v50, %v3566_v23  ;;  %v6490_v6 = vld [vmem:[%s11287_s1 + $0x580] sm:$0x77] }
 0x131   :  { %v3644_v9 = vmul.f32 1e+30, %v6449_v41  ;;  %v6461_v15 = vadd.f32 -1.0, %v3706_v11  ;;  %v8908_v61 = vadd.f32 -1.0, %v3627_v29  ;;  %11646 = vst [vmem:[#allocation35_spill] sm:$0xff] %v8913_v26  ;;  %v3820_v17 = vrot.slane %v8913_v26, %v8442_v51 }
 0x132   :  { %v3538_v55 = vmax.f32 %v3460_v7, %v3531_v21  ;;  %v3861_v59 = vunpack.c.l.bf16 %v6478_v33  ;;  %v6473_v41 = vadd.f32 -1.0, %v3784_v36  ;;  %v3862_v30 = vunpack.c.h.bf16 %v6478_v33  ;;  %v8927_v7 = vld [vmem:[%s11286_s0 + $0x157] sm:$0x7f] }
 0x133   :  { %11645 = vst [vmem:[#allocation41_spill] sm:$0xff] %v8908_v61  ;;  %v3687_v50 = vadd.f32 %v3664_v43, %v3644_v9  ;;  %v3722_v23 = vmul.f32 1e+30, %v6461_v15  ;;  %v8920_v29 = vadd.f32 -1.0, %v3705_v42  ;;  %v8922_v11 = vadd.f32 -1.0, %v3783_v5  ;;  %11649 = vst [vmem:[#allocation45_spill] sm:$0xff] %v8927_v7 }
 0x134   :  { %v3616_v21 = vmax.f32 %v3538_v55, %v3609_v44  ;;  %v3898_v26 = vrot.slane %v8927_v7, %v8442_v51  ;;  %v6502_v43 = vld [vmem:[%s11287_s1 + $0x59c] sm:$0x77]  ;;  %v3800_v15 = vmul.f32 1e+30, %v6473_v41  ;;  %v6485_v33 = vadd.f32 -1.0, %v3862_v30 }
 0x135   :  { %11647 = vst [vmem:[#allocation44_spill] sm:$0xff] %v8920_v29  ;;  %11648 = vst [vmem:[#allocation38_spill] sm:$0xff] %v8922_v11  ;;  %v3765_v9 = vadd.f32 %v3742_v63, %v3722_v23  ;;  %v3940_v44 = vunpack.c.h.bf16 %v6490_v6  ;;  %v6514_v5 = vld [vmem:[%s11287_s1 + $0x5b8] sm:$0x77]  ;;  %v8937_v36 = vadd.f32 -1.0, %v3861_v59  ;;  %v3939_v55 = vunpack.c.l.bf16 %v6490_v6 }
 0x136   :  { %v3694_v42 = vmax.f32 %v3616_v21, %v3687_v50  ;;  %v8942_v7 = vld [vmem:[%s11286_s0 + $0x15e] sm:$0x7f]  ;;  %v3843_v63 = vadd.f32 %v3820_v17, %v3800_v15  ;;  %v3878_v23 = vmul.f32 1e+30, %v6485_v33  ;;  %v4018_v30 = vunpack.c.h.bf16 %v6502_v43  ;;  %v6526_v29 = vld [vmem:[%s11287_s1 + $0x5d4] sm:$0x77] }
 0x137   :  { %11650 = vst [vmem:[#allocation39_spill] sm:$0xff] %v8937_v36  ;;  %11651 = vst [vmem:[#allocation48_spill] sm:$0xff] %v8942_v7  ;;  %v3976_v11 = vrot.slane %v8942_v7, %v8442_v51  ;;  %v6497_v41 = vadd.f32 -1.0, %v3940_v44  ;;  %v4017_v59 = vunpack.c.l.bf16 %v6502_v43  ;;  %v8952_v6 = vld [vmem:[%s11286_s0 + $0x165] sm:$0x7f]  ;;  %v4095_v36 = vunpack.c.l.bf16 %v6514_v5 }
 0x138   :  { %v3772_v50 = vmax.f32 %v3694_v42, %v3765_v9  ;;  %11652 = vst [vmem:[#allocation42_spill] sm:$0xff] %v8952_v6  ;;  %v4054_v21 = vrot.slane %v8952_v6, %v8442_v51  ;;  %v3921_v7 = vadd.f32 %v3898_v26, %v3878_v23  ;;  %v6509_v15 = vadd.f32 -1.0, %v4018_v30  ;;  %v8961_v43 = vld [vmem:[%s11286_s0 + $0x16c] sm:$0x7f] }
 0x139   :  { %v3956_v17 = vmul.f32 1e+30, %v6497_v41  ;;  %v4096_v33 = vunpack.c.h.bf16 %v6514_v5  ;;  %v8956_v61 = vadd.f32 -1.0, %v3939_v55  ;;  %11654 = vst [vmem:[#allocation43_spill] sm:$0xff] %v8961_v43  ;;  %v4132_v9 = vrot.slane %v8961_v43, %v8442_v51  ;;  %v6538_v6 = vld [vmem:[%s11287_s1 + $0x5f0] sm:$0x77] }
 0x13a   :  { %v3850_v44 = vmax.f32 %v3772_v50, %v3843_v63  ;;  %v4173_v42 = vunpack.c.l.bf16 %v6526_v29  ;;  %v4034_v23 = vmul.f32 1e+30, %v6509_v15  ;;  %v4174_v5 = vunpack.c.h.bf16 %v6526_v29  ;;  %v8975_v50 = vld [vmem:[%s11286_s0 + $0x173] sm:$0x7f] }
 0x13b   :  { %11653 = vst [vmem:[#allocation49_spill] sm:$0xff] %v8956_v61  ;;  %v3999_v26 = vadd.f32 %v3976_v11, %v3956_v17  ;;  %v6521_v41 = vadd.f32 -1.0, %v4096_v33  ;;  %v8968_v55 = vadd.f32 -1.0, %v4017_v59  ;;  %v8970_v30 = vadd.f32 -1.0, %v4095_v36  ;;  %11657 = vst [vmem:[#allocation53_spill] sm:$0xff] %v8975_v50 }
 0x13c   :  { %v3928_v63 = vmax.f32 %v3850_v44, %v3921_v7  ;;  %v4210_v43 = vrot.slane %v8975_v50, %v8442_v51  ;;  %v6550_v11 = vld [vmem:[%s11287_s1 + $0x60c] sm:$0x77]  ;;  %v4077_v17 = vadd.f32 %v4054_v21, %v4034_v23  ;;  %v6533_v29 = vadd.f32 -1.0, %v4174_v5  ;;  %v8990_v50 = vld [vmem:[%s11286_s0 + $0x17a] sm:$0x7f] }
 0x13d   :  { %11655 = vst [vmem:[#allocation52_spill] sm:$0xff] %v8968_v55  ;;  %11656 = vst [vmem:[#allocation46_spill] sm:$0xff] %v8970_v30  ;;  %v4112_v15 = vmul.f32 1e+30, %v6521_v41  ;;  %v4252_v7 = vunpack.c.h.bf16 %v6538_v6  ;;  %v6562_v36 = vld [vmem:[%s11287_s1 + $0x628] sm:$0x77]  ;;  %v4251_v44 = vunpack.c.l.bf16 %v6538_v6  ;;  %v4288_v30 = vrot.slane %v8990_v50, %v8442_v51 }
 0x13e   :  { %v4006_v59 = vmax.f32 %v3928_v63, %v3999_v26  ;;  %v8985_v33 = vadd.f32 -1.0, %v4173_v42  ;;  %11659 = vst [vmem:[#allocation50_spill] sm:$0xff] %v8990_v50  ;;  %v4190_v23 = vmul.f32 1e+30, %v6533_v29  ;;  %v4330_v5 = vunpack.c.h.bf16 %v6550_v11  ;;  %v6574_v55 = vld [vmem:[%s11287_s1 + $0x644] sm:$0x77] }
 0x13f   :  { %v4155_v21 = vadd.f32 %v4132_v9, %v4112_v15  ;;  %v6545_v41 = vadd.f32 -1.0, %v4252_v7  ;;  %v4329_v42 = vunpack.c.l.bf16 %v6550_v11  ;;  %v9000_v6 = vld [vmem:[%s11286_s0 + $0x181] sm:$0x7f]  ;;  %v4408_v29 = vunpack.c.h.bf16 %v6562_v36  ;;  %v9009_v11 = vld [vmem:[%s11286_s0 + $0x188] sm:$0x7f] }
 0x140   :  { %11658 = vst [vmem:[#allocation47_spill] sm:$0xff] %v8985_v33  ;;  %v4084_v26 = vmax.f32 %v4006_v59, %v4077_v17  ;;  %11660 = vst [vmem:[#allocation56_spill] sm:$0xff] %v9000_v6  ;;  %v4366_v63 = vrot.slane %v9000_v6, %v8442_v51  ;;  %v4407_v33 = vunpack.c.l.bf16 %v6562_v36  ;;  %v4233_v50 = vadd.f32 %v4210_v43, %v4190_v23  ;;  %v6586_v6 = vld [vmem:[%s11287_s1 + $0x660] sm:$0x77] }
 0x141   :  { %v4268_v9 = vmul.f32 1e+30, %v6545_v41  ;;  %v6557_v15 = vadd.f32 -1.0, %v4330_v5  ;;  %v9004_v61 = vadd.f32 -1.0, %v4251_v44  ;;  %11662 = vst [vmem:[#allocation59_spill] sm:$0xff] %v9009_v11  ;;  %v4444_v17 = vrot.slane %v9009_v11, %v8442_v51 }
 0x142   :  { %v4162_v7 = vmax.f32 %v4084_v26, %v4155_v21  ;;  %v4485_v59 = vunpack.c.l.bf16 %v6574_v55  ;;  %v6569_v41 = vadd.f32 -1.0, %v4408_v29  ;;  %v4486_v36 = vunpack.c.h.bf16 %v6574_v55  ;;  %v9023_v26 = vld [vmem:[%s11286_s0 + $0x18f] sm:$0x7f] }
 0x143   :  { %11661 = vst [vmem:[#allocation51_spill] sm:$0xff] %v9004_v61  ;;  %v4311_v43 = vadd.f32 %v4288_v30, %v4268_v9  ;;  %v4346_v23 = vmul.f32 1e+30, %v6557_v15  ;;  %v9016_v44 = vadd.f32 -1.0, %v4329_v42  ;;  %v9018_v5 = vadd.f32 -1.0, %v4407_v33  ;;  %11665 = vst [vmem:[#allocation55_spill] sm:$0xff] %v9023_v26 }
 0x144   :  { %v4240_v21 = vmax.f32 %v4162_v7, %v4233_v50  ;;  %v4522_v11 = vrot.slane %v9023_v26, %v8442_v51  ;;  %v6598_v30 = vld [vmem:[%s11287_s1 + $0x67c] sm:$0x77]  ;;  %v4424_v15 = vmul.f32 1e+30, %v6569_v41  ;;  %v6581_v55 = vadd.f32 -1.0, %v4486_v36 }
 0x145   :  { %11663 = vst [vmem:[#allocation54_spill] sm:$0xff] %v9016_v44  ;;  %11664 = vst [vmem:[#allocation61_spill] sm:$0xff] %v9018_v5  ;;  %v4389_v9 = vadd.f32 %v4366_v63, %v4346_v23  ;;  %v4564_v50 = vunpack.c.h.bf16 %v6586_v6  ;;  %v6610_v33 = vld [vmem:[%s11287_s1 + $0x698] sm:$0x77]  ;;  %v9033_v29 = vadd.f32 -1.0, %v4485_v59  ;;  %v4563_v7 = vunpack.c.l.bf16 %v6586_v6 }
 0x146   :  { %v4318_v42 = vmax.f32 %v4240_v21, %v4311_v43  ;;  %v9038_v26 = vld [vmem:[%s11286_s0 + $0x196] sm:$0x7f]  ;;  %v4467_v63 = vadd.f32 %v4444_v17, %v4424_v15  ;;  %v4502_v23 = vmul.f32 1e+30, %v6581_v55  ;;  %v4642_v36 = vunpack.c.h.bf16 %v6598_v30  ;;  %v9048_v6 = vld [vmem:[%s11286_s0 + $0x19d] sm:$0x7f] }
 0x147   :  { %11666 = vst [vmem:[#allocation62_spill] sm:$0xff] %v9033_v29  ;;  %11667 = vst [vmem:[#allocation57_spill] sm:$0xff] %v9038_v26  ;;  %v4600_v5 = vrot.slane %v9038_v26, %v8442_v51  ;;  %v6593_v41 = vadd.f32 -1.0, %v4564_v50  ;;  %v6622_v44 = vld [vmem:[%s11287_s1 + $0x6b4] sm:$0x77]  ;;  %v4641_v59 = vunpack.c.l.bf16 %v6598_v30  ;;  %v4678_v21 = vrot.slane %v9048_v6, %v8442_v51 }
 0x148   :  { %v4396_v43 = vmax.f32 %v4318_v42, %v4389_v9  ;;  %11668 = vst [vmem:[#allocation63_spill] sm:$0xff] %v9048_v6  ;;  %v4719_v29 = vunpack.c.l.bf16 %v6610_v33  ;;  %v4545_v26 = vadd.f32 %v4522_v11, %v4502_v23  ;;  %v6605_v15 = vadd.f32 -1.0, %v4642_v36  ;;  %v9057_v30 = vld [vmem:[%s11286_s0 + $0x1a4] sm:$0x7f]  ;;  %v6634_v6 = vld [vmem:[%s11287_s1 + $0x6d0] sm:$0x77] }
 0x149   :  { %v4580_v17 = vmul.f32 1e+30, %v6593_v41  ;;  %v4720_v55 = vunpack.c.h.bf16 %v6610_v33  ;;  %v9052_v61 = vadd.f32 -1.0, %v4563_v7  ;;  %11670 = vst [vmem:[#allocation60_spill] sm:$0xff] %v9057_v30  ;;  %v4756_v9 = vrot.slane %v9057_v30, %v8442_v51 }
 0x14a   :  { %v4474_v50 = vmax.f32 %v4396_v43, %v4467_v63  ;;  %v4797_v42 = vunpack.c.l.bf16 %v6622_v44  ;;  %v4658_v23 = vmul.f32 1e+30, %v6605_v15  ;;  %v4798_v33 = vunpack.c.h.bf16 %v6622_v44  ;;  %v9071_v43 = vld [vmem:[%s11286_s0 + $0x1ab] sm:$0x7f] }
 0x14b   :  { %11669 = vst [vmem:[#allocation58_spill] sm:$0xff] %v9052_v61  ;;  %v4623_v11 = vadd.f32 %v4600_v5, %v4580_v17  ;;  %v6617_v41 = vadd.f32 -1.0, %v4720_v55  ;;  %v9064_v7 = vadd.f32 -1.0, %v4641_v59  ;;  %v9066_v36 = vadd.f32 -1.0, %v4719_v29  ;;  %11673 = vst [vmem:[#allocation7_spill] sm:$0xff] %v9071_v43 }
 0x14c   :  { %v4552_v63 = vmax.f32 %v4474_v50, %v4545_v26  ;;  %v4834_v30 = vrot.slane %v9071_v43, %v8442_v51  ;;  %v6646_v5 = vld [vmem:[%s11287_s1 + $0x6ec] sm:$0x77]  ;;  %v4701_v17 = vadd.f32 %v4678_v21, %v4658_v23  ;;  %v6629_v44 = vadd.f32 -1.0, %v4798_v33 }
 0x14d   :  { %11671 = vst [vmem:[#allocation64_spill] sm:$0xff] %v9064_v7  ;;  %11672 = vst [vmem:[#allocation10_spill] sm:$0xff] %v9066_v36  ;;  %v4736_v15 = vmul.f32 1e+30, %v6617_v41  ;;  %v4876_v26 = vunpack.c.h.bf16 %v6634_v6  ;;  %v9078_v55 = vadd.f32 -1.0, %v4797_v42  ;;  %v4875_v29 = vunpack.c.l.bf16 %v6634_v6 }
 0x14e   :  { %v4630_v59 = vmax.f32 %v4552_v63, %v4623_v11  ;;  %v9083_v50 = vld [vmem:[%s11286_s0 + $0x1b2] sm:$0x7f]  ;;  %v4814_v7 = vmul.f32 1e+30, %v6629_v44  ;;  %v4954_v38 = vunpack.c.h.bf16 %v6646_v5  ;;  %v4953_v23 = vunpack.c.l.bf16 %v6646_v5  ;;  %v9090_v42 = vld [vmem:[%s11286_s0 + $0x1b9] sm:$0x7f] }
 0x14f   :  { %11674 = vst [vmem:[#allocation65_spill] sm:$0xff] %v9083_v50  ;;  %v4912_v43 = vrot.slane %v9083_v50, %v8442_v51  ;;  %v4779_v36 = vadd.f32 %v4756_v9, %v4736_v15  ;;  %v6641_v61 = vadd.f32 -1.0, %v4876_v26  ;;  %v4990_v6 = vrot.slane %v9090_v42, %v8442_v51  ;;  %v11675_v44 = vld [vmem:[#allocation16_spill] sm:$0xff] }
 0x150   :  { %v4708_v21 = vmax.f32 %v4630_v59, %v4701_v17  ;;  %v55_v11 = vmul.f32 1e+30, %v8466_v52  ;;  %v4857_v41 = vadd.f32 %v4834_v30, %v4814_v7  ;;  %v6653_v63 = vadd.f32 -1.0, %v4954_v38  ;;  %v9104_v51 = vld [vmem:[%s11286_s0] sm:$0x7f] }
 0x151   :  { %v4892_v33 = vmul.f32 1e+30, %v6641_v61  ;;  %v9096_v9 = vsub.s32 2, %v11592_v31  ;;  %v133_v17 = vmul.f32 1e+30, %v11675_v44  ;;  %11676 = vst [vmem:[#allocation66_spill] sm:$0xff] %v9104_v51 }
 0x152   :  { %v4786_v15 = vmax.f32 %v4708_v21, %v4779_v36  ;;  %v211_v5 = vmul.f32 1e+30, %v8475_v18  ;;  %v289_v26 = vmul.f32 1e+30, %v8488_v45  ;;  %v4970_v50 = vmul.f32 1e+30, %v6653_v63 }
 0x153   :  { %v4935_v59 = vadd.f32 %v4912_v43, %v4892_v33  ;;  %v72_v52 = vrot.slane %v9104_v51, %v9096_v9  ;;  %v9111_v61 = vld [vmem:[%s11286_s0 + $0x7] sm:$0x7f]  ;;  %v9118_v45 = vld [vmem:[%s11286_s0 + $0xe] sm:$0x7f]  ;;  %v9125_v7 = vld [vmem:[%s11286_s0 + $0x15] sm:$0x7f] }
 0x154   :  { %11677 = vst [vmem:[#allocation67_spill] sm:$0xff] %v9111_v61  ;;  %v150_v18 = vrot.slane %v9111_v61, %v9096_v9  ;;  %v4864_v38 = vmax.f32 %v4786_v15, %v4857_v41  ;;  %11678 = vst [vmem:[#allocation6_spill] sm:$0xff] %v9118_v45  ;;  %v228_v30 = vrot.slane %v9118_v45, %v9096_v9  ;;  %v367_v43 = vmul.f32 1e+30, %v8496_v40  ;;  %v9133_v63 = vld [vmem:[%s11286_s0 + $0x1c] sm:$0x7f] }
 0x155   :  { %11679 = vst [vmem:[#allocation68_spill] sm:$0xff] %v9125_v7  ;;  %v306_v36 = vrot.slane %v9125_v7, %v9096_v9  ;;  %v5013_v21 = vadd.f32 %v4990_v6, %v4970_v50  ;;  %v98_v41 = vadd.f32 %v72_v52, %v55_v11  ;;  %v384_v15 = vrot.slane %v9133_v63, %v9096_v9  ;;  %v9145_v50 = vld [vmem:[%s11286_s0 + $0x23] sm:$0x7f] }
 0x156   :  { %v176_v33 = vadd.f32 %v150_v18, %v133_v17  ;;  %v9137_v44 = vadd.f32 -1.0, %v4875_v29  ;;  %v4942_v45 = vmax.f32 %v4864_v38, %v4935_v59  ;;  %v9139_v61 = vadd.f32 -1.0, %v4953_v23  ;;  %v9153_v23 = vld [vmem:[%s11286_s0 + $0x2a] sm:$0x7f]  ;;  %v9161_v38 = vld [vmem:[%s11286_s0 + $0x31] sm:$0x7f] }
 0x157   :  { %v445_v7 = vmul.f32 1e+30, %v8498_v32  ;;  %v105_v51 = vmax.f32 %v98_v41, -1e+30  ;;  %v254_v40 = vadd.f32 %v228_v30, %v211_v5  ;;  %v462_v6 = vrot.slane %v9145_v50, %v9096_v9  ;;  %v9169_v30 = vld [vmem:[%s11286_s0 + $0x38] sm:$0x7f] }
 0x158   :  { %v523_v11 = vmul.f32 1e+30, %v8500_v0  ;;  %v5020_v17 = vmax.f32 %v4942_v45, %v5013_v21  ;;  %v332_v29 = vadd.f32 %v306_v36, %v289_v26  ;;  %v410_v52 = vadd.f32 %v384_v15, %v367_v43 }
 0x159   :  { %v540_v32 = vrot.slane %v9153_v23, %v9096_v9  ;;  %v183_v5 = vmax.f32 %v105_v51, %v176_v33  ;;  %v488_v59 = vadd.f32 %v462_v6, %v445_v7  ;;  %v601_v18 = vmul.f32 1e+30, %v8521_v13  ;;  %v6889_v7 = vld [vmem:[%s11289_s3 + $0x170] sm:$0xff]   ;;  %v6891_v33 = vld [vmem:[%s11289_s3 + $0x168] sm:$0xff]  }
 0x15a   :  { %v618_v0 = vrot.slane %v9161_v38, %v9096_v9  ;;  %v5027_v26 = vmax.f32 %v5020_v17, 0.0  ;;  %v679_v45 = vmul.f32 1e+30, %v8523_v35  ;;  %v696_v51 = vrot.slane %v9169_v30, %v9096_v9  ;;  %v9182_v35 = vld [vmem:[%s11286_s0 + $0x3f] sm:$0x7f]  ;;  %6771 = vmatprep.subr.bf16.mxu0 %v6889_v7 }
 0x15b   :  { %v757_v13 = vmul.f32 1e+30, %v8531_v1  ;;  %v261_v36 = vmax.f32 %v183_v5, %v254_v40  ;;  %v9177_v43 = vadd.f32 %v540_v32, %v523_v11  ;;  %11680 = vst [vmem:[#allocation69_spill] sm:$0xff] %v9182_v35  ;;  %v774_v21 = vrot.slane %v9182_v35, %v9096_v9  ;;  %v6890_v1 = vld [vmem:[%s11289_s3 + $0x130] sm:$0xff]   ;;  %v9196_v40 = vld [vmem:[%s11286_s0 + $0x46] sm:$0x7f] }
 0x15c   :  { %v835_v41 = vmul.f32 1e+30, %v8545_v56  ;;  %v5034_v15 = vpack.c.bf16 %v5027_v26, %v5027_v26  ;;  %11681 = vst [vmem:[#allocation11_spill] sm:$0xff] %v9196_v40  ;;  %v852_v6 = vrot.slane %v9196_v40, %v9096_v9  ;;  %v913_v11 = vmul.f32 1e+30, %v8553_v20  ;;  %6772 = vmatpush3.bf16.msra.mxu0 %v6890_v1  ;;  %v6892_v40 = vld [vmem:[%s11289_s3 + $0x128] sm:$0xff]  }
 0x15d   :  { %v9204_v56 = vld [vmem:[%s11286_s0 + $0x4d] sm:$0x7f]  ;;  %v339_v32 = vmax.f32 %v261_v36, %v332_v29  ;;  %v644_v5 = vadd.f32 %v618_v0, %v601_v18  ;;  %v991_v26 = vmul.f32 1e+30, %v8555_v62  ;;  %v9212_v35 = vld [vmem:[%s11286_s0 + $0x54] sm:$0x7f]  ;;  %v9221_v29 = vadd.f32 %v774_v21, %v757_v13  ;;  %6773 = vmatprep.subr.bf16.mxu0 %v6891_v33 }
 0x15e   :  { %11682 = vst [vmem:[#allocation70_spill] sm:$0xff] %v9204_v56  ;;  %v930_v17 = vrot.slane %v9204_v56, %v9096_v9  ;;  %v1008_v20 = vrot.slane %v9212_v35, %v9096_v9  ;;  %5513 = vmatprep.mubr.bf16.mxu1 %v5034_v15  ;;  %v9219_v56 = vadd.f32 %v696_v51, %v679_v45  ;;  %v1069_v62 = vmul.f32 1e+30, %v8557_v4  ;;  %v9227_v18 = vld [vmem:[%s11286_s0 + $0x5b] sm:$0x7f] }
 0x15f   :  { %v1086_v0 = vrot.slane %v9227_v18, %v9096_v9  ;;  %v6893_v7 = vld [vmem:[%s11289_s3 + $0x160] sm:$0xff]   ;;  %v417_v36 = vmax.f32 %v339_v32, %v410_v52  ;;  %v9234_v45 = vadd.f32 %v852_v6, %v835_v41  ;;  %v1147_v51 = vmul.f32 1e+30, %v8578_v10  ;;  %v9250_v52 = vld [vmem:[%s11286_s0 + $0x69] sm:$0x7f] }
 0x160   :  { %v9240_v4 = vld [vmem:[%s11286_s0 + $0x62] sm:$0x7f]  ;;  %v9244_v21 = vadd.f32 %v930_v17, %v913_v11  ;;  %v1225_v1 = vmul.f32 1e+30, %v8580_v28  ;;  %v1242_v10 = vrot.slane %v9250_v52, %v9096_v9  ;;  %v1303_v41 = vmul.f32 1e+30, %v8588_v47  ;;  %6774 = vmatpush3.bf16.msra.mxu0 %v6892_v40 }
 0x161   :  { %v1164_v13 = vrot.slane %v9240_v4, %v9096_v9  ;;  %v495_v33 = vmax.f32 %v417_v36, %v488_v59  ;;  %v9255_v15 = vadd.f32 %v1008_v20, %v991_v26  ;;  %v9260_v6 = vld [vmem:[%s11286_s0 + $0x70] sm:$0x7f]  ;;  %v1381_v11 = vmul.f32 1e+30, %v8602_v8  ;;  %v6894_v17 = vld [vmem:[%s11289_s3 + $0x120] sm:$0xff]   ;;  %6775 = vmatprep.subr.bf16.mxu0 %v6893_v7  ;;  %v6895_v20 = vld [vmem:[%s11289_s3 + $0x158] sm:$0xff]  }
 0x162   :  { %11683 = vst [vmem:[#allocation8_spill] sm:$0xff] %v9260_v6  ;;  %v1320_v28 = vrot.slane %v9260_v6, %v9096_v9  ;;  %v9268_v32 = vadd.f32 %v1086_v0, %v1069_v62  ;;  %v9273_v47 = vld [vmem:[%s11286_s0 + $0x77] sm:$0x7f]  ;;  %v1459_v26 = vmul.f32 1e+30, %v8610_v46  ;;  %vm5800_vm4 = vcmask 39936  }
 0x163   :  { %11684 = vst [vmem:[#allocation71_spill] sm:$0xff] %v9273_v47  ;;  %v1398_v59 = vrot.slane %v9273_v47, %v9096_v9  ;;  %v9281_v8 = vld [vmem:[%s11286_s0 + $0x7e] sm:$0x7f]  ;;  %v573_v62 = vmax.f32 %v495_v33, %v9177_v43  ;;  %v9289_v0 = vadd.f32 %v1164_v13, %v1147_v51  ;;  %v1537_v36 = vmul.f32 1e+30, %v8612_v27 }
 0x164   :  { %11685 = vst [vmem:[#allocation14_spill] sm:$0xff] %v9281_v8  ;;  %v1476_v40 = vrot.slane %v9281_v8, %v9096_v9  ;;  %v9295_v46 = vld [vmem:[%s11286_s0 + $0x85] sm:$0x7f]  ;;  %v9299_v8 = vadd.f32 %v1242_v10, %v1225_v1  ;;  %v9301_v7 = vadd.f32 %v1320_v28, %v1303_v41  ;;  %v1615_v6 = vmul.f32 1e+30, %v8614_v12  ;;  %6776 = vmatpush3.bf16.msra.mxu0 %v6894_v17  ;;  %v6896_v10 = vld [vmem:[%s11289_s3 + $0x118] sm:$0xff]  }
 0x165   :  { %11686 = vst [vmem:[#allocation72_spill] sm:$0xff] %v9295_v46  ;;  %v1554_v47 = vrot.slane %v9295_v46, %v9096_v9  ;;  %v9307_v43 = vld [vmem:[%s11286_s0 + $0x8c] sm:$0x7f]  ;;  %v651_v51 = vmax.f32 %v573_v62, %v644_v5  ;;  %v9311_v13 = vadd.f32 %v1398_v59, %v1381_v11  ;;  %v1693_v33 = vmul.f32 1e+30, %v8635_v57  ;;  %6777 = vmatprep.subr.bf16.mxu0 %v6895_v20 }
 0x166   :  { %11687 = vst [vmem:[#allocation73_spill] sm:$0xff] %v9307_v43  ;;  %v1632_v27 = vrot.slane %v9307_v43, %v9096_v9  ;;  %v9317_v1 = vld [vmem:[%s11286_s0 + $0x93] sm:$0x7f]  ;;  %v9324_v41 = vadd.f32 %v1476_v40, %v1459_v26  ;;  %v1771_v5 = vmul.f32 1e+30, %v8637_v14  ;;  %vm5878_vm5 = vcmask 74752  }
 0x167   :  { %11688 = vst [vmem:[#allocation74_spill] sm:$0xff] %v9317_v1  ;;  %v1710_v12 = vrot.slane %v9317_v1, %v9096_v9  ;;  %v9330_v57 = vld [vmem:[%s11286_s0 + $0x9a] sm:$0x7f]  ;;  %v1849_v11 = vmul.f32 1e+30, %v8645_v24  ;;  %v6897_v17 = vld [vmem:[%s11289_s3 + $0x150] sm:$0xff]   ;;  %v729_v59 = vmax.f32 %v651_v51, %v9219_v56  ;;  %v9339_v26 = vadd.f32 %v1554_v47, %v1537_v36 }
 0x168   :  { %11689 = vst [vmem:[#allocation75_spill] sm:$0xff] %v9330_v57  ;;  %v1788_v28 = vrot.slane %v9330_v57, %v9096_v9  ;;  %v9344_v14 = vld [vmem:[%s11286_s0 + $0xa1] sm:$0x7f]  ;;  %v1927_v62 = vmul.f32 1e+30, %v8659_v49  ;;  %v9349_v24 = vadd.f32 %v1632_v27, %v1615_v6  ;;  %6778 = vmatpush3.bf16.msra.mxu0 %v6896_v10  ;;  %v6899_v10 = vld [vmem:[%s11289_s3 + $0x148] sm:$0xff]  }
 0x169   :  { %11690 = vst [vmem:[#allocation9_spill] sm:$0xff] %v9344_v14  ;;  %v1866_v40 = vrot.slane %v9344_v14, %v9096_v9  ;;  %v9354_v20 = vld [vmem:[%s11286_s0 + $0xa8] sm:$0x7f]  ;;  %v2005_v47 = vmul.f32 1e+30, %v8667_v53  ;;  %v807_v6 = vmax.f32 %v729_v59, %v9221_v29  ;;  %v9367_v27 = vadd.f32 %v1710_v12, %v1693_v33  ;;  %v6898_v14 = vld [vmem:[%s11289_s3 + $0x110] sm:$0xff]   ;;  %6779 = vmatprep.subr.bf16.mxu0 %v6897_v17 }
 0x16a   :  { %11691 = vst [vmem:[#allocation76_spill] sm:$0xff] %v9354_v20  ;;  %v1944_v56 = vrot.slane %v9354_v20, %v9096_v9  ;;  %v9362_v36 = vld [vmem:[%s11286_s0 + $0xaf] sm:$0x7f]  ;;  %v2083_v51 = vmul.f32 1e+30, %v8669_v16 }
 0x16b   :  { %11692 = vst [vmem:[#allocation77_spill] sm:$0xff] %v9362_v36  ;;  %v2022_v49 = vrot.slane %v9362_v36, %v9096_v9  ;;  %v9373_v20 = vld [vmem:[%s11286_s0 + $0xb6] sm:$0x7f]  ;;  %v9380_v36 = vadd.f32 %v1788_v28, %v1771_v5  ;;  %v9382_v29 = vadd.f32 %v1866_v40, %v1849_v11  ;;  %v2161_v33 = vmul.f32 1e+30, %v8671_v60 }
 0x16c   :  { %11693 = vst [vmem:[#allocation78_spill] sm:$0xff] %v9373_v20  ;;  %v2100_v53 = vrot.slane %v9373_v20, %v9096_v9  ;;  %v9388_v16 = vld [vmem:[%s11286_s0 + $0xbd] sm:$0x7f]  ;;  %v885_v5 = vmax.f32 %v807_v6, %v9234_v45  ;;  %v9396_v28 = vadd.f32 %v1944_v56, %v1927_v62  ;;  %v2239_v11 = vmul.f32 1e+30, %v8692_v48  ;;  %6780 = vmatpush3.bf16.msra.mxu0 %v6898_v14 }
 0x16d   :  { %11694 = vst [vmem:[#allocation79_spill] sm:$0xff] %v9388_v16  ;;  %v2178_v12 = vrot.slane %v9388_v16, %v9096_v9  ;;  %v9402_v60 = vld [vmem:[%s11286_s0 + $0xc4] sm:$0x7f]  ;;  %v9406_v40 = vadd.f32 %v2022_v49, %v2005_v47  ;;  %v2317_v16 = vmul.f32 1e+30, %v8694_v22  ;;  %6781 = vmatprep.subr.bf16.mxu0 %v6899_v10  ;;  %v2724_v10 = vrot.slane %v8750_v19, %v9096_v9 }
 0x16e   :  { %11695 = vst [vmem:[#allocation80_spill] sm:$0xff] %v9402_v60  ;;  %v2256_v59 = vrot.slane %v9402_v60, %v9096_v9  ;;  %v9408_v17 = vadd.f32 %v2100_v53, %v2083_v51  ;;  %v9414_v45 = vld [vmem:[%s11286_s0 + $0xcb] sm:$0x7f]  ;;  %v963_v62 = vmax.f32 %v885_v5, %v9244_v21  ;;  %v9424_v47 = vmul.f32 1e+30, %v8702_v58  ;;  %v6901_v14 = vld [vmem:[%s11289_s3 + $0x140] sm:$0xff]  }
 0x16f   :  { %11696 = vst [vmem:[#allocation81_spill] sm:$0xff] %v9414_v45  ;;  %v2334_v48 = vrot.slane %v9414_v45, %v9096_v9  ;;  %v9419_v56 = vadd.f32 %v2178_v12, %v2161_v33  ;;  %v6900_v22 = vld [vmem:[%s11289_s3 + $0x108] sm:$0xff]   ;;  %v9432_v49 = vld [vmem:[%s11286_s0 + $0xd2] sm:$0x7f]  ;;  %v9437_v51 = vmul.f32 1e+30, %v8728_v34  ;;  %v2568_v58 = vrot.slane %v8718_v25, %v9096_v9 }
 0x170   :  { %v9421_v6 = vadd.f32 %v2256_v59, %v2239_v11  ;;  %v2551_v53 = vmul.f32 1e+30, %v8730_v3  ;;  %v1041_v33 = vmax.f32 %v963_v62, %v9255_v15  ;;  %v2629_v5 = vmul.f32 1e+30, %v8745_v37  ;;  %v11698_v37 = vld [vmem:[#allocation12_spill] sm:$0xff]  ;;  %6782 = vmatpush3.bf16.msra.mxu0 %v6900_v22  ;;  %v11700_v19 = vld [vmem:[#allocation13_spill] sm:$0xff] }
 0x171   :  { %v9446_v12 = vadd.f32 %v2334_v48, %v2317_v16  ;;  %v2646_v34 = vrot.slane %v8735_v54, %v9096_v9  ;;  %v2707_v25 = vmul.f32 1e+30, %v8764_v2  ;;  %v11697_v16 = vld [vmem:[#allocation18_spill] sm:$0xff]  ;;  %v2802_v62 = vrot.slane %v11698_v37, %v9096_v9  ;;  %v6902_v54 = vld [vmem:[%s11289_s3 + $0x100] sm:$0xff]   ;;  %v11699_v2 = vld [vmem:[#allocation15_spill] sm:$0xff]  ;;  %6783 = vmatprep.subr.bf16.mxu0 %v6901_v14 }
 0x172   :  { %v9453_v11 = vadd.f32 %v2568_v58, %v2551_v53  ;;  %v1119_v59 = vmax.f32 %v1041_v33, %v9268_v32  ;;  %v2785_v48 = vmul.f32 1e+30, %v11697_v16  ;;  %v2863_v58 = vmul.f32 1e+30, %v11699_v2  ;;  %v11701_v32 = vld [vmem:[#allocation17_spill] sm:$0xff]  ;;  %v11705_v2 = vld [vmem:[#allocation28_spill] sm:$0xff] }
 0x173   :  { %v9459_v15 = vadd.f32 %v2646_v34, %v2629_v5  ;;  %v9467_v53 = vadd.f32 %v2724_v10, %v2707_v25  ;;  %v2880_v3 = vrot.slane %v11700_v19, %v9096_v9  ;;  %v2941_v33 = vmul.f32 1e+30, %v11701_v32  ;;  %v11702_v22 = vld [vmem:[#allocation21_spill] sm:$0xff]  ;;  %v11704_v25 = vld [vmem:[#allocation22_spill] sm:$0xff]  ;;  %v11706_v19 = vld [vmem:[#allocation19_spill] sm:$0xff] }
 0x174   :  { %v1197_v5 = vmax.f32 %v1119_v59, %v9289_v0  ;;  %v9474_v34 = vadd.f32 %v2802_v62, %v2785_v48  ;;  %v2958_v16 = vrot.slane %v11702_v22, %v9096_v9  ;;  %v11703_v37 = vld [vmem:[#allocation25_spill] sm:$0xff]  ;;  %v3036_v10 = vrot.slane %v11704_v25, %v9096_v9  ;;  %v11707_v59 = vld [vmem:[#allocation23_spill] sm:$0xff]  ;;  %v11708_v62 = vld [vmem:[#allocation20_spill] sm:$0xff]  ;;  %6784 = vmatpush3.bf16.msra.mxu0 %v6902_v54 }
 0x175   :  { %v3019_v21 = vmul.f32 1e+30, %v11703_v37  ;;  %v9479_v45 = vadd.f32 %v2880_v3, %v2863_v58  ;;  %v3097_v60 = vmul.f32 1e+30, %v11705_v2  ;;  %v3114_v32 = vrot.slane %v11706_v19, %v9096_v9  ;;  %v11709_v37 = vld [vmem:[#allocation24_spill] sm:$0xff]  ;;  %v11710_v2 = vld [vmem:[#allocation29_spill] sm:$0xff] }
 0x176   :  { %v1275_v14 = vmax.f32 %v1197_v5, %v9299_v8  ;;  %v9487_v0 = vadd.f32 %v2958_v16, %v2941_v33  ;;  %v3175_v48 = vmul.f32 1e+30, %v11707_v59  ;;  %v3192_v22 = vrot.slane %v11708_v62, %v9096_v9  ;;  %v11711_v33 = vld [vmem:[#allocation33_spill] sm:$0xff]  ;;  %v11712_v16 = vld [vmem:[#allocation32_spill] sm:$0xff] }
 0x177   :  { %v9492_v3 = vadd.f32 %v3036_v10, %v3019_v21  ;;  %v9494_v58 = vadd.f32 %v3114_v32, %v3097_v60  ;;  %v3253_v25 = vmul.f32 1e+30, %v11709_v37  ;;  %v3270_v20 = vrot.slane %v11710_v2, %v9096_v9  ;;  %v11713_v21 = vld [vmem:[#allocation36_spill] sm:$0xff]  ;;  %v11714_v60 = vld [vmem:[#allocation26_spill] sm:$0xff] }
 0x178   :  { %v1353_v19 = vmax.f32 %v1275_v14, %v9301_v7  ;;  %v9500_v8 = vadd.f32 %v3192_v22, %v3175_v48  ;;  %v3331_v5 = vmul.f32 1e+30, %v11711_v33  ;;  %v3348_v59 = vrot.slane %v11712_v16, %v9096_v9  ;;  %v11715_v32 = vld [vmem:[#allocation30_spill] sm:$0xff]  ;;  %v11716_v7 = vld [vmem:[#allocation27_spill] sm:$0xff]  ;;  %v11719_v16 = vld [vmem:[#allocation41_spill] sm:$0xff] }
 0x179   :  { %v9505_v62 = vadd.f32 %v3270_v20, %v3253_v25  ;;  %v3409_v54 = vmul.f32 1e+30, %v11713_v21  ;;  %v3426_v10 = vrot.slane %v11714_v60, %v9096_v9  ;;  %v3487_v37 = vmul.f32 1e+30, %v11715_v32  ;;  %v11717_v48 = vld [vmem:[#allocation31_spill] sm:$0xff]  ;;  %v11718_v20 = vld [vmem:[#allocation37_spill] sm:$0xff] }
 0x17a   :  { %v1431_v2 = vmax.f32 %v1353_v19, %v9311_v13  ;;  %v9512_v57 = vadd.f32 %v3348_v59, %v3331_v5  ;;  %v3504_v14 = vrot.slane %v11716_v7, %v9096_v9  ;;  %v3565_v22 = vmul.f32 1e+30, %v11717_v48  ;;  %v11720_v60 = vld [vmem:[#allocation40_spill] sm:$0xff]  ;;  %v11722_v59 = vld [vmem:[#allocation34_spill] sm:$0xff] }
 0x17b   :  { %v9517_v33 = vadd.f32 %v3426_v10, %v3409_v54  ;;  %v3582_v25 = vrot.slane %v11718_v20, %v9096_v9  ;;  %v3643_v21 = vmul.f32 1e+30, %v11719_v16  ;;  %v3660_v1 = vrot.slane %v11720_v60, %v9096_v9  ;;  %v11721_v19 = vld [vmem:[#allocation44_spill] sm:$0xff]  ;;  %v11724_v10 = vld [vmem:[#allocation38_spill] sm:$0xff]  ;;  %v11725_v16 = vld [vmem:[#allocation35_spill] sm:$0xff] }
 0x17c   :  { %v1509_v32 = vmax.f32 %v1431_v2, %v9324_v41  ;;  %v9525_v13 = vadd.f32 %v3504_v14, %v3487_v37  ;;  %v3721_v5 = vmul.f32 1e+30, %v11721_v19  ;;  %v3738_v7 = vrot.slane %v11722_v59, %v9096_v9  ;;  %v11726_v41 = vld [vmem:[#allocation39_spill] sm:$0xff]  ;;  %v11727_v2 = vld [vmem:[#allocation45_spill] sm:$0xff]  ;;  %v11731_v59 = vld [vmem:[#allocation52_spill] sm:$0xff] }
 0x17d   :  { %v9530_v48 = vadd.f32 %v3582_v25, %v3565_v22  ;;  %v9532_v54 = vadd.f32 %v3660_v1, %v3643_v21  ;;  %v3799_v20 = vmul.f32 1e+30, %v11724_v10  ;;  %v3816_v43 = vrot.slane %v11725_v16, %v9096_v9  ;;  %v11729_v22 = vld [vmem:[#allocation49_spill] sm:$0xff]  ;;  %v11730_v1 = vld [vmem:[#allocation48_spill] sm:$0xff] }
 0x17e   :  { %v1587_v60 = vmax.f32 %v1509_v32, %v9339_v26  ;;  %v9538_v46 = vadd.f32 %v3738_v7, %v3721_v5  ;;  %v3877_v37 = vmul.f32 1e+30, %v11726_v41  ;;  %v3894_v14 = vrot.slane %v11727_v2, %v9096_v9  ;;  %v11733_v26 = vld [vmem:[#allocation42_spill] sm:$0xff]  ;;  %v11737_v2 = vld [vmem:[#allocation47_spill] sm:$0xff] }
 0x17f   :  { %11723 = vst [vmem:[#allocation16_spill] sm:$0xff] %v9532_v54  ;;  %v9543_v19 = vadd.f32 %v3816_v43, %v3799_v20  ;;  %v3955_v25 = vmul.f32 1e+30, %v11729_v22  ;;  %v3972_v21 = vrot.slane %v11730_v1, %v9096_v9  ;;  %v4033_v10 = vmul.f32 1e+30, %v11731_v59  ;;  %v11734_v5 = vld [vmem:[#allocation46_spill] sm:$0xff] }
 0x180   :  { %v1665_v16 = vmax.f32 %v1587_v60, %v9349_v24  ;;  %v9550_v54 = vadd.f32 %v3894_v14, %v3877_v37  ;;  %v4050_v32 = vrot.slane %v11733_v26, %v9096_v9  ;;  %v4111_v7 = vmul.f32 1e+30, %v11734_v5  ;;  %v11736_v43 = vld [vmem:[#allocation43_spill] sm:$0xff]  ;;  %v11738_v1 = vld [vmem:[#allocation53_spill] sm:$0xff]  ;;  %v11740_v14 = vld [vmem:[#allocation50_spill] sm:$0xff] }
 0x181   :  { %11728 = vst [vmem:[#allocation18_spill] sm:$0xff] %v9543_v19  ;;  %v9555_v41 = vadd.f32 %v3972_v21, %v3955_v25  ;;  %v4128_v20 = vrot.slane %v11736_v43, %v9096_v9  ;;  %v4189_v22 = vmul.f32 1e+30, %v11737_v2  ;;  %v4206_v19 = vrot.slane %v11738_v1, %v9096_v9  ;;  %v11739_v60 = vld [vmem:[#allocation51_spill] sm:$0xff]  ;;  %v11742_v21 = vld [vmem:[#allocation54_spill] sm:$0xff]  ;;  %v11743_v2 = vld [vmem:[#allocation56_spill] sm:$0xff] }
 0x182   :  { %11732 = vst [vmem:[#allocation12_spill] sm:$0xff] %v9550_v54  ;;  %v1743_v59 = vmax.f32 %v1665_v16, %v9367_v27  ;;  %v9563_v24 = vadd.f32 %v4050_v32, %v4033_v10  ;;  %v4267_v37 = vmul.f32 1e+30, %v11739_v60  ;;  %v4284_v26 = vrot.slane %v11740_v14, %v9096_v9  ;;  %v11744_v27 = vld [vmem:[#allocation61_spill] sm:$0xff]  ;;  %v11745_v16 = vld [vmem:[#allocation59_spill] sm:$0xff]  ;;  %v11749_v14 = vld [vmem:[#allocation58_spill] sm:$0xff] }
 0x183   :  { %11735 = vst [vmem:[#allocation15_spill] sm:$0xff] %v9555_v41  ;;  %v9568_v5 = vadd.f32 %v4128_v20, %v4111_v7  ;;  %v9570_v25 = vadd.f32 %v4206_v19, %v4189_v22  ;;  %v4345_v43 = vmul.f32 1e+30, %v11742_v21  ;;  %v4362_v41 = vrot.slane %v11743_v2, %v9096_v9  ;;  %v11747_v7 = vld [vmem:[#allocation62_spill] sm:$0xff]  ;;  %v11748_v19 = vld [vmem:[#allocation55_spill] sm:$0xff] }
 0x184   :  { %v1821_v1 = vmax.f32 %v1743_v59, %v9380_v36  ;;  %v9576_v54 = vadd.f32 %v4284_v26, %v4267_v37  ;;  %v4423_v10 = vmul.f32 1e+30, %v11744_v27  ;;  %v4440_v32 = vrot.slane %v11745_v16, %v9096_v9  ;;  %v11750_v36 = vld [vmem:[#allocation57_spill] sm:$0xff]  ;;  %v11751_v37 = vld [vmem:[#allocation64_spill] sm:$0xff]  ;;  %v11753_v16 = vld [vmem:[#allocation10_spill] sm:$0xff] }
 0x185   :  { %11741 = vst [vmem:[#allocation13_spill] sm:$0xff] %v9570_v25  ;;  %v9581_v60 = vadd.f32 %v4362_v41, %v4345_v43  ;;  %v4501_v20 = vmul.f32 1e+30, %v11747_v7  ;;  %v4518_v22 = vrot.slane %v11748_v19, %v9096_v9  ;;  %v4579_v21 = vmul.f32 1e+30, %v11749_v14  ;;  %v11752_v41 = vld [vmem:[#allocation63_spill] sm:$0xff] }
 0x186   :  { %v1899_v2 = vmax.f32 %v1821_v1, %v9382_v29  ;;  %v9588_v25 = vadd.f32 %v4440_v32, %v4423_v10  ;;  %v4596_v59 = vrot.slane %v11750_v36, %v9096_v9  ;;  %v4657_v26 = vmul.f32 1e+30, %v11751_v37  ;;  %v11754_v19 = vld [vmem:[#allocation60_spill] sm:$0xff]  ;;  %v11755_v10 = vld [vmem:[#allocation7_spill] sm:$0xff] }
 0x187   :  { %11746 = vst [vmem:[#allocation17_spill] sm:$0xff] %v9581_v60  ;;  %v9593_v27 = vadd.f32 %v4518_v22, %v4501_v20  ;;  %v4674_v43 = vrot.slane %v11752_v41, %v9096_v9  ;;  %v4735_v7 = vmul.f32 1e+30, %v11753_v16  ;;  %v4752_v60 = vrot.slane %v11754_v19, %v9096_v9  ;;  %v36_v20 = vld [vmem:[%s11287_s1 + $0x10] sm:$0x77]  ;;  %v11756_v41 = vld [vmem:[#allocation65_spill] sm:$0xff] }
 0x188   :  { %v1977_v14 = vmax.f32 %v1899_v2, %v9396_v28  ;;  %v9601_v29 = vadd.f32 %v4596_v59, %v4579_v21  ;;  %v4813_v1 = vmul.f32 1e+30, %v9078_v55  ;;  %v4830_v32 = vrot.slane %v11755_v10, %v9096_v9  ;;  %v5903_v55 = vld [vmem:[%s11287_s1 + $0x2c] sm:$0x77] }
 0x189   :  { %v9609_v22 = vadd.f32 %v4674_v43, %v4657_v26  ;;  %v9611_v36 = vadd.f32 %v4752_v60, %v4735_v7  ;;  %v4891_v37 = vmul.f32 1e+30, %v9137_v44  ;;  %v4908_v28 = vrot.slane %v11756_v41, %v9096_v9  ;;  %v5915_v16 = vld [vmem:[%s11287_s1 + $0x48] sm:$0x77] }
 0x18a   :  { %v2055_v21 = vmax.f32 %v1977_v14, %v9406_v40  ;;  %v9620_v2 = vadd.f32 %v4830_v32, %v4813_v1  ;;  %v4969_v59 = vmul.f32 1e+30, %v9139_v61  ;;  %v4986_v26 = vrot.slane %v9090_v42, %v9096_v9 }
 0x18b   :  { %v9625_v60 = vadd.f32 %v4908_v28, %v4891_v37  ;;  %v42_v43 = vunpack.c.l.bf16 %v36_v20  ;;  %v43_v44 = vunpack.c.h.bf16 %v36_v20  ;;  %v11397_v40 = vmov 0.0   ;;  %v5927_v37 = vld [vmem:[%s11287_s1 + $0x64] sm:$0x77] }
 0x18c   :  { %11757 = vst [vmem:[#allocation21_spill] sm:$0xff] %v9620_v2  ;;  %v2133_v7 = vmax.f32 %v2055_v21, %v9408_v17  ;;  %v9631_v19 = vadd.f32 %v4986_v26, %v4969_v59  ;;  %6809 = vmatprep.subr.bf16.mxu1 %v11397_v40  ;;  %v9635_v61 = vsub.s32 5, %v11592_v31  ;;  %v119_v14 = vunpack.c.l.bf16 %v5903_v55  ;;  %6835 = vmatprep.subr.bf16.mxu0 %v11397_v40  ;;  %v11763_v21 = vld [vmem:[#allocation66_spill] sm:$0xff]  ;;  %v11764_v40 = vld [vmem:[#allocation67_spill] sm:$0xff] }
 0x18d   :  { %11758 = vst [vmem:[#allocation25_spill] sm:$0xff] %v9625_v60  ;;  %v11760_v42 = vrot.slane %v9432_v49, %v9096_v9  ;;  %v11761_v17 = vrot.slane %v8711_v39, %v9096_v9  ;;  %v5899_v32 = vadd.f32 -1.0, %v43_v44  ;;  %v120_v20 = vunpack.c.h.bf16 %v5903_v55 }
 0x18e   :  { %11759 = vst [vmem:[#allocation22_spill] sm:$0xff] %v9631_v19  ;;  %v2211_v41 = vmax.f32 %v2133_v7, %v9419_v56  ;;  %v9650_v28 = vadd.f32 -1.0, %v42_v43  ;;  %v84_v59 = vrot.slane %v11763_v21, %v9635_v61  ;;  %v197_v26 = vunpack.c.l.bf16 %v5915_v16 }
 0x18f   :  { %v2438_v1 = vadd.f32 %v11760_v42, %v9424_v47  ;;  %v2516_v10 = vadd.f32 %v11761_v17, %v9437_v51  ;;  %v58_v47 = vmul.f32 1e+30, %v5899_v32  ;;  %v5911_v42 = vadd.f32 -1.0, %v120_v20  ;;  %v5939_v51 = vld [vmem:[%s11287_s1 + $0x80] sm:$0x77]  ;;  %v11765_v32 = vld [vmem:[#allocation6_spill] sm:$0xff] }
 0x190   :  { %11762 = vst [vmem:[#allocation28_spill] sm:$0xff] %v9650_v28  ;;  %v162_v39 = vrot.slane %v11764_v40, %v9635_v61  ;;  %v198_v9 = vunpack.c.h.bf16 %v5915_v16  ;;  %v2289_v55 = vmax.f32 %v2211_v41, %v9421_v6  ;;  %v9660_v44 = vadd.f32 -1.0, %v119_v14  ;;  %v11766_v16 = vld [vmem:[#allocation68_spill] sm:$0xff] }
 0x191   :  { %v275_v56 = vunpack.c.l.bf16 %v5927_v37  ;;  %v276_v43 = vunpack.c.h.bf16 %v5927_v37  ;;  %v101_v7 = vadd.f32 %v84_v59, %v58_v47  ;;  %v136_v17 = vmul.f32 1e+30, %v5911_v42  ;;  %v5951_v37 = vld [vmem:[%s11287_s1 + $0x9c] sm:$0x77] }
 0x192   :  { %v5923_v21 = vadd.f32 -1.0, %v198_v9  ;;  %v240_v20 = vrot.slane %v11765_v32, %v9635_v61  ;;  %v2367_v31 = vmax.f32 %v2289_v55, %v9446_v12  ;;  %v318_v28 = vrot.slane %v11766_v16, %v9635_v61 }
 0x193   :  { %v5935_v40 = vadd.f32 -1.0, %v276_v43  ;;  %v353_v19 = vunpack.c.l.bf16 %v5939_v51  ;;  %v108_v60 = vmax.f32 %v101_v7, -1e+30  ;;  %v179_v2 = vadd.f32 %v162_v39, %v136_v17  ;;  %v5963_v39 = vld [vmem:[%s11287_s1 + $0xb8] sm:$0x77] }
 0x194   :  { %v214_v6 = vmul.f32 1e+30, %v5923_v21  ;;  %v354_v14 = vunpack.c.h.bf16 %v5939_v51  ;;  %v2445_v41 = vmax.f32 %v2367_v31, %v2438_v1  ;;  %v9670_v59 = vadd.f32 -1.0, %v197_v26  ;;  %v5975_v1 = vld [vmem:[%s11287_s1 + $0xd4] sm:$0x77] }
 0x195   :  { %v9672_v47 = vadd.f32 -1.0, %v275_v56  ;;  %v292_v42 = vmul.f32 1e+30, %v5935_v40  ;;  %v186_v12 = vmax.f32 %v108_v60, %v179_v2  ;;  %v396_v43 = vrot.slane %v9133_v63, %v9635_v61 }
 0x196   :  { %v257_v9 = vadd.f32 %v240_v20, %v214_v6  ;;  %v5947_v55 = vadd.f32 -1.0, %v354_v14  ;;  %v2523_v51 = vmax.f32 %v2445_v41, %v2516_v10  ;;  %v9679_v17 = vadd.f32 -1.0, %v353_v19  ;;  %v5987_v19 = vld [vmem:[%s11287_s1 + $0xf0] sm:$0x77] }
 0x197   :  { %v335_v7 = vadd.f32 %v318_v28, %v292_v42  ;;  %v432_v31 = vunpack.c.h.bf16 %v5951_v37  ;;  %v431_v60 = vunpack.c.l.bf16 %v5951_v37  ;;  %v474_v56 = vrot.slane %v9145_v50, %v9635_v61 }
 0x198   :  { %v264_v26 = vmax.f32 %v186_v12, %v257_v9  ;;  %v370_v2 = vmul.f32 1e+30, %v5947_v55  ;;  %v2601_v63 = vmax.f32 %v2523_v51, %v9453_v11  ;;  %v509_v32 = vunpack.c.l.bf16 %v5963_v39 }
 0x199   :  { %v5959_v21 = vadd.f32 -1.0, %v432_v31  ;;  %v510_v20 = vunpack.c.h.bf16 %v5963_v39  ;;  %v552_v40 = vrot.slane %v9153_v23, %v9635_v61  ;;  %v587_v16 = vunpack.c.l.bf16 %v5975_v1  ;;  %v5999_v23 = vld [vmem:[%s11287_s1 + $0x10c] sm:$0x77] }
 0x19a   :  { %v342_v10 = vmax.f32 %v264_v26, %v335_v7  ;;  %v413_v28 = vadd.f32 %v396_v43, %v370_v2  ;;  %v2679_v6 = vmax.f32 %v2601_v63, %v9459_v15  ;;  %v588_v50 = vunpack.c.h.bf16 %v5975_v1 }
 0x19b   :  { %v448_v14 = vmul.f32 1e+30, %v5959_v21  ;;  %v5971_v37 = vadd.f32 -1.0, %v510_v20  ;;  %v9693_v11 = vadd.f32 -1.0, %v431_v60  ;;  %v630_v42 = vrot.slane %v9161_v38, %v9635_v61  ;;  %v6011_v38 = vld [vmem:[%s11287_s1 + $0x128] sm:$0x77] }
 0x19c   :  { %v420_v41 = vmax.f32 %v342_v10, %v413_v28  ;;  %v665_v12 = vunpack.c.l.bf16 %v5987_v19  ;;  %v2757_v9 = vmax.f32 %v2679_v6, %v9467_v53  ;;  %v5983_v39 = vadd.f32 -1.0, %v588_v50  ;;  %v11768_v50 = vld [vmem:[#allocation11_spill] sm:$0xff] }
 0x19d   :  { %v491_v55 = vadd.f32 %v474_v56, %v448_v14  ;;  %v526_v43 = vmul.f32 1e+30, %v5971_v37  ;;  %v9701_v15 = vadd.f32 -1.0, %v509_v32  ;;  %v9703_v51 = vadd.f32 -1.0, %v587_v16  ;;  %v6023_v32 = vld [vmem:[%s11287_s1 + $0x144] sm:$0x77] }
 0x19e   :  { %v666_v7 = vunpack.c.h.bf16 %v5987_v19  ;;  %v9705_v31 = vadd.f32 -1.0, %v665_v12  ;;  %v2835_v53 = vmax.f32 %v2757_v9, %v9474_v34  ;;  %v604_v2 = vmul.f32 1e+30, %v5983_v39 }
 0x19f   :  { %v498_v1 = vmax.f32 %v420_v41, %v491_v55  ;;  %v569_v26 = vadd.f32 %v552_v40, %v526_v43  ;;  %v708_v56 = vrot.slane %v9169_v30, %v9635_v61  ;;  %v743_v63 = vunpack.c.l.bf16 %v5999_v23  ;;  %v11767_v40 = vld [vmem:[#allocation69_spill] sm:$0xff] }
 0x1a0   :  { %v5995_v60 = vadd.f32 -1.0, %v666_v7  ;;  %v744_v21 = vunpack.c.h.bf16 %v5999_v23  ;;  %v2913_v20 = vmax.f32 %v2835_v53, %v9479_v45  ;;  %v647_v10 = vadd.f32 %v630_v42, %v604_v2  ;;  %v6035_v42 = vld [vmem:[%s11287_s1 + $0x160] sm:$0x77] }
 0x1a1   :  { %v576_v19 = vmax.f32 %v498_v1, %v569_v26  ;;  %v821_v28 = vunpack.c.l.bf16 %v6011_v38  ;;  %v786_v6 = vrot.slane %v11767_v40, %v9635_v61  ;;  %v822_v14 = vunpack.c.h.bf16 %v6011_v38 }
 0x1a2   :  { %v682_v16 = vmul.f32 1e+30, %v5995_v60  ;;  %v6007_v34 = vadd.f32 -1.0, %v744_v21  ;;  %v2991_v37 = vmax.f32 %v2913_v20, %v9487_v0  ;;  %v864_v41 = vrot.slane %v11768_v50, %v9635_v61  ;;  %v11769_v0 = vld [vmem:[#allocation70_spill] sm:$0xff]  ;;  %v6047_v60 = vld [vmem:[%s11287_s1 + $0x17c] sm:$0x77] }
 0x1a3   :  { %v654_v30 = vmax.f32 %v576_v19, %v647_v10  ;;  %v899_v12 = vunpack.c.l.bf16 %v6023_v32  ;;  %v6019_v43 = vadd.f32 -1.0, %v822_v14  ;;  %v900_v45 = vunpack.c.h.bf16 %v6023_v32  ;;  %v6059_v32 = vld [vmem:[%s11287_s1 + $0x198] sm:$0x77] }
 0x1a4   :  { %v725_v9 = vadd.f32 %v708_v56, %v682_v16  ;;  %v760_v55 = vmul.f32 1e+30, %v6007_v34  ;;  %v3069_v39 = vmax.f32 %v2991_v37, %v9492_v3  ;;  %v9726_v23 = vadd.f32 -1.0, %v743_v63 }
 0x1a5   :  { %v9728_v7 = vadd.f32 -1.0, %v821_v28  ;;  %v942_v38 = vrot.slane %v11769_v0, %v9635_v61  ;;  %v838_v26 = vmul.f32 1e+30, %v6019_v43  ;;  %v6031_v2 = vadd.f32 -1.0, %v900_v45 }
 0x1a6   :  { %v732_v53 = vmax.f32 %v654_v30, %v725_v9  ;;  %v803_v1 = vadd.f32 %v786_v6, %v760_v55  ;;  %v3147_v56 = vmax.f32 %v3069_v39, %v9494_v58  ;;  %v9736_v21 = vadd.f32 -1.0, %v899_v12  ;;  %v6071_v58 = vld [vmem:[%s11287_s1 + $0x1b4] sm:$0x77] }
 0x1a7   :  { %v977_v3 = vunpack.c.l.bf16 %v6035_v42  ;;  %v978_v63 = vunpack.c.h.bf16 %v6035_v42  ;;  %v881_v19 = vadd.f32 %v864_v41, %v838_v26  ;;  %v916_v10 = vmul.f32 1e+30, %v6031_v2 }
 0x1a8   :  { %v810_v20 = vmax.f32 %v732_v53, %v803_v1  ;;  %v1020_v28 = vrot.slane %v9212_v35, %v9635_v61  ;;  %v3225_v16 = vmax.f32 %v3147_v56, %v9500_v8  ;;  %v1055_v40 = vunpack.c.l.bf16 %v6047_v60 }
 0x1a9   :  { %v6043_v34 = vadd.f32 -1.0, %v978_v63  ;;  %v1056_v6 = vunpack.c.h.bf16 %v6047_v60  ;;  %v959_v37 = vadd.f32 %v942_v38, %v916_v10  ;;  %v1098_v30 = vrot.slane %v9227_v18, %v9635_v61  ;;  %v6083_v18 = vld [vmem:[%s11287_s1 + $0x1d0] sm:$0x77] }
 0x1aa   :  { %v888_v14 = vmax.f32 %v810_v20, %v881_v19  ;;  %v1133_v50 = vunpack.c.l.bf16 %v6059_v32  ;;  %v3303_v41 = vmax.f32 %v3225_v16, %v9505_v62  ;;  %v1134_v35 = vunpack.c.h.bf16 %v6059_v32  ;;  %v6107_v19 = vld [vmem:[%s11287_s1 + $0x208] sm:$0x77] }
 0x1ab   :  { %v994_v12 = vmul.f32 1e+30, %v6043_v34  ;;  %v6055_v9 = vadd.f32 -1.0, %v1056_v6  ;;  %v9750_v8 = vadd.f32 -1.0, %v977_v3  ;;  %v1176_v43 = vrot.slane %v9240_v4, %v9635_v61  ;;  %v6095_v4 = vld [vmem:[%s11287_s1 + $0x1ec] sm:$0x77] }
 0x1ac   :  { %v966_v55 = vmax.f32 %v888_v14, %v959_v37  ;;  %v1211_v45 = vunpack.c.l.bf16 %v6071_v58  ;;  %v3381_v42 = vmax.f32 %v3303_v41, %v9512_v57  ;;  %v6067_v38 = vadd.f32 -1.0, %v1134_v35  ;;  %v11770_v6 = vld [vmem:[#allocation8_spill] sm:$0xff] }
 0x1ad   :  { %v1037_v39 = vadd.f32 %v1020_v28, %v994_v12  ;;  %v1072_v0 = vmul.f32 1e+30, %v6055_v9  ;;  %v9758_v62 = vadd.f32 -1.0, %v1055_v40  ;;  %v9760_v53 = vadd.f32 -1.0, %v1133_v50 }
 0x1ae   :  { %v1212_v1 = vunpack.c.h.bf16 %v6071_v58  ;;  %v9762_v26 = vadd.f32 -1.0, %v1211_v45  ;;  %v3459_v57 = vmax.f32 %v3381_v42, %v9517_v33  ;;  %v1150_v56 = vmul.f32 1e+30, %v6067_v38 }
 0x1af   :  { %v1044_v2 = vmax.f32 %v966_v55, %v1037_v39  ;;  %v1115_v60 = vadd.f32 %v1098_v30, %v1072_v0  ;;  %v1254_v63 = vrot.slane %v9250_v52, %v9635_v61  ;;  %v1289_v32 = vunpack.c.l.bf16 %v6083_v18  ;;  %v11771_v30 = vld [vmem:[#allocation71_spill] sm:$0xff]  ;;  %v6119_v55 = vld [vmem:[%s11287_s1 + $0x224] sm:$0x77] }
 0x1b0   :  { %v6079_v3 = vadd.f32 -1.0, %v1212_v1  ;;  %v1290_v20 = vunpack.c.h.bf16 %v6083_v18  ;;  %v3537_v10 = vmax.f32 %v3459_v57, %v9525_v13  ;;  %v1193_v16 = vadd.f32 %v1176_v43, %v1150_v56  ;;  %v11772_v43 = vld [vmem:[#allocation16_spill] sm:$0xff] }
 0x1b1   :  { %v1122_v28 = vmax.f32 %v1044_v2, %v1115_v60  ;;  %v1367_v34 = vunpack.c.l.bf16 %v6095_v4  ;;  %v1332_v58 = vrot.slane %v11770_v6, %v9635_v61  ;;  %v1368_v14 = vunpack.c.h.bf16 %v6095_v4  ;;  %v6131_v57 = vld [vmem:[%s11287_s1 + $0x240] sm:$0x77] }
 0x1b2   :  { %v1228_v40 = vmul.f32 1e+30, %v6079_v3  ;;  %v6091_v33 = vadd.f32 -1.0, %v1290_v20  ;;  %v3615_v37 = vmax.f32 %v3537_v10, %v9530_v48  ;;  %v1410_v50 = vrot.slane %v11771_v30, %v9635_v61  ;;  %v11773_v48 = vld [vmem:[#allocation14_spill] sm:$0xff]  ;;  %v11774_v10 = vld [vmem:[#allocation72_spill] sm:$0xff] }
 0x1b3   :  { %v1200_v52 = vmax.f32 %v1122_v28, %v1193_v16  ;;  %v1445_v41 = vunpack.c.l.bf16 %v6107_v19  ;;  %v6103_v35 = vadd.f32 -1.0, %v1368_v14  ;;  %v1446_v13 = vunpack.c.h.bf16 %v6107_v19  ;;  %v11775_v16 = vld [vmem:[#allocation18_spill] sm:$0xff] }
 0x1b4   :  { %v1271_v12 = vadd.f32 %v1254_v63, %v1228_v40  ;;  %v1306_v9 = vmul.f32 1e+30, %v6091_v33  ;;  %v3693_v45 = vmax.f32 %v3615_v37, %v11772_v43  ;;  %v9783_v42 = vadd.f32 -1.0, %v1289_v32  ;;  %v6143_v63 = vld [vmem:[%s11287_s1 + $0x25c] sm:$0x77]  ;;  %v11778_v43 = vld [vmem:[#allocation74_spill] sm:$0xff] }
 0x1b5   :  { %v9785_v39 = vadd.f32 -1.0, %v1367_v34  ;;  %v1488_v0 = vrot.slane %v11773_v48, %v9635_v61  ;;  %v1384_v1 = vmul.f32 1e+30, %v6103_v35  ;;  %v6115_v4 = vadd.f32 -1.0, %v1446_v13  ;;  %v11776_v37 = vld [vmem:[#allocation73_spill] sm:$0xff] }
 0x1b6   :  { %v1278_v38 = vmax.f32 %v1200_v52, %v1271_v12  ;;  %v1349_v18 = vadd.f32 %v1332_v58, %v1306_v9  ;;  %v3771_v2 = vmax.f32 %v3693_v45, %v9538_v46  ;;  %v9793_v60 = vadd.f32 -1.0, %v1445_v41  ;;  %v6155_v46 = vld [vmem:[%s11287_s1 + $0x278] sm:$0x77] }
 0x1b7   :  { %v1523_v56 = vunpack.c.l.bf16 %v6119_v55  ;;  %v1524_v3 = vunpack.c.h.bf16 %v6119_v55  ;;  %v1427_v20 = vadd.f32 %v1410_v50, %v1384_v1  ;;  %v1462_v19 = vmul.f32 1e+30, %v6115_v4  ;;  %v11777_v50 = vld [vmem:[#allocation12_spill] sm:$0xff] }
 0x1b8   :  { %v1356_v32 = vmax.f32 %v1278_v38, %v1349_v18  ;;  %v1566_v28 = vrot.slane %v11774_v10, %v9635_v61  ;;  %v3849_v34 = vmax.f32 %v3771_v2, %v11775_v16  ;;  %v1601_v33 = vunpack.c.l.bf16 %v6131_v57  ;;  %v11779_v38 = vld [vmem:[#allocation15_spill] sm:$0xff] }
 0x1b9   :  { %v6127_v40 = vadd.f32 -1.0, %v1524_v3  ;;  %v1602_v6 = vunpack.c.h.bf16 %v6131_v57  ;;  %v1505_v14 = vadd.f32 %v1488_v0, %v1462_v19  ;;  %v1644_v52 = vrot.slane %v11776_v37, %v9635_v61  ;;  %v6167_v57 = vld [vmem:[%s11287_s1 + $0x294] sm:$0x77] }
 0x1ba   :  { %v1434_v58 = vmax.f32 %v1356_v32, %v1427_v20  ;;  %v1679_v30 = vunpack.c.l.bf16 %v6143_v63  ;;  %v3927_v41 = vmax.f32 %v3849_v34, %v11777_v50  ;;  %v1680_v35 = vunpack.c.h.bf16 %v6143_v63  ;;  %v6179_v32 = vld [vmem:[%s11287_s1 + $0x2b0] sm:$0x77] }
 0x1bb   :  { %v1540_v12 = vmul.f32 1e+30, %v6127_v40  ;;  %v6139_v9 = vadd.f32 -1.0, %v1602_v6  ;;  %v9807_v55 = vadd.f32 -1.0, %v1523_v56  ;;  %v1722_v45 = vrot.slane %v11778_v43, %v9635_v61  ;;  %v11780_v34 = vld [vmem:[#allocation75_spill] sm:$0xff]  ;;  %v11783_v43 = vld [vmem:[#allocation76_spill] sm:$0xff] }
 0x1bc   :  { %v1512_v13 = vmax.f32 %v1434_v58, %v1505_v14  ;;  %v1757_v48 = vunpack.c.l.bf16 %v6155_v46  ;;  %v4005_v18 = vmax.f32 %v3927_v41, %v11779_v38  ;;  %v6151_v4 = vadd.f32 -1.0, %v1680_v35 }
 0x1bd   :  { %v1583_v1 = vadd.f32 %v1566_v28, %v1540_v12  ;;  %v1618_v0 = vmul.f32 1e+30, %v6139_v9  ;;  %v9815_v2 = vadd.f32 -1.0, %v1601_v33  ;;  %v9817_v3 = vadd.f32 -1.0, %v1679_v30  ;;  %v11782_v9 = vld [vmem:[#allocation13_spill] sm:$0xff] }
 0x1be   :  { %v1758_v63 = vunpack.c.h.bf16 %v6155_v46  ;;  %v9819_v56 = vadd.f32 -1.0, %v1757_v48  ;;  %v4083_v20 = vmax.f32 %v4005_v18, %v9563_v24  ;;  %v1696_v28 = vmul.f32 1e+30, %v6151_v4  ;;  %v6191_v46 = vld [vmem:[%s11287_s1 + $0x2cc] sm:$0x77] }
 0x1bf   :  { %v1590_v19 = vmax.f32 %v1512_v13, %v1583_v1  ;;  %v1661_v10 = vadd.f32 %v1644_v52, %v1618_v0  ;;  %v1800_v40 = vrot.slane %v11780_v34, %v9635_v61  ;;  %v1835_v33 = vunpack.c.l.bf16 %v6167_v57  ;;  %v11781_v52 = vld [vmem:[#allocation9_spill] sm:$0xff] }
 0x1c0   :  { %v6163_v16 = vadd.f32 -1.0, %v1758_v63  ;;  %v1836_v6 = vunpack.c.h.bf16 %v6167_v57  ;;  %v4161_v58 = vmax.f32 %v4083_v20, %v9568_v5  ;;  %v1739_v37 = vadd.f32 %v1722_v45, %v1696_v28  ;;  %v6203_v45 = vld [vmem:[%s11287_s1 + $0x2e8] sm:$0x77] }
 0x1c1   :  { %v1668_v14 = vmax.f32 %v1590_v19, %v1661_v10  ;;  %v1913_v30 = vunpack.c.l.bf16 %v6179_v32  ;;  %v1878_v41 = vrot.slane %v11781_v52, %v9635_v61  ;;  %v1914_v12 = vunpack.c.h.bf16 %v6179_v32  ;;  %v11784_v32 = vld [vmem:[#allocation77_spill] sm:$0xff] }
 0x1c2   :  { %v1774_v50 = vmul.f32 1e+30, %v6163_v16  ;;  %v6175_v24 = vadd.f32 -1.0, %v1836_v6  ;;  %v4239_v35 = vmax.f32 %v4161_v58, %v11782_v9  ;;  %v1956_v48 = vrot.slane %v11783_v43, %v9635_v61  ;;  %v6215_v34 = vld [vmem:[%s11287_s1 + $0x304] sm:$0x77] }
 0x1c3   :  { %v1746_v13 = vmax.f32 %v1668_v14, %v1739_v37  ;;  %v1991_v38 = vunpack.c.l.bf16 %v6191_v46  ;;  %v6187_v0 = vadd.f32 -1.0, %v1914_v12  ;;  %v1992_v5 = vunpack.c.h.bf16 %v6191_v46  ;;  %v6227_v58 = vld [vmem:[%s11287_s1 + $0x320] sm:$0x77] }
 0x1c4   :  { %v1817_v18 = vadd.f32 %v1800_v40, %v1774_v50  ;;  %v1852_v1 = vmul.f32 1e+30, %v6175_v24  ;;  %v4317_v4 = vmax.f32 %v4239_v35, %v9576_v54  ;;  %v9840_v57 = vadd.f32 -1.0, %v1835_v33  ;;  %v11785_v40 = vld [vmem:[#allocation17_spill] sm:$0xff]  ;;  %v11786_v50 = vld [vmem:[#allocation78_spill] sm:$0xff] }
 0x1c5   :  { %v9842_v63 = vadd.f32 -1.0, %v1913_v30  ;;  %v2034_v20 = vrot.slane %v11784_v32, %v9635_v61  ;;  %v1930_v28 = vmul.f32 1e+30, %v6187_v0  ;;  %v6199_v16 = vadd.f32 -1.0, %v1992_v5  ;;  %v6239_v35 = vld [vmem:[%s11287_s1 + $0x33c] sm:$0x77] }
 0x1c6   :  { %v1824_v19 = vmax.f32 %v1746_v13, %v1817_v18  ;;  %v1895_v10 = vadd.f32 %v1878_v41, %v1852_v1  ;;  %v4395_v6 = vmax.f32 %v4317_v4, %v11785_v40  ;;  %v9850_v46 = vadd.f32 -1.0, %v1991_v38  ;;  %v11787_v38 = vld [vmem:[#allocation79_spill] sm:$0xff]  ;;  %v11788_v32 = vld [vmem:[#allocation80_spill] sm:$0xff] }
 0x1c7   :  { %v2069_v54 = vunpack.c.l.bf16 %v6203_v45  ;;  %v2070_v33 = vunpack.c.h.bf16 %v6203_v45  ;;  %v1973_v37 = vadd.f32 %v1956_v48, %v1930_v28  ;;  %v2008_v30 = vmul.f32 1e+30, %v6199_v16  ;;  %v6251_v40 = vld [vmem:[%s11287_s1 + $0x358] sm:$0x77] }
 0x1c8   :  { %v1902_v14 = vmax.f32 %v1824_v19, %v1895_v10  ;;  %v2112_v24 = vrot.slane %v11786_v50, %v9635_v61  ;;  %v4473_v52 = vmax.f32 %v4395_v6, %v9588_v25  ;;  %v2147_v12 = vunpack.c.l.bf16 %v6215_v34 }
 0x1c9   :  { %v6211_v41 = vadd.f32 -1.0, %v2070_v33  ;;  %v2148_v9 = vunpack.c.h.bf16 %v6215_v34  ;;  %v2051_v43 = vadd.f32 %v2034_v20, %v2008_v30  ;;  %v2190_v18 = vrot.slane %v11787_v38, %v9635_v61 }
 0x1ca   :  { %v1980_v13 = vmax.f32 %v1902_v14, %v1973_v37  ;;  %v2225_v1 = vunpack.c.l.bf16 %v6227_v58  ;;  %v4551_v48 = vmax.f32 %v4473_v52, %v9593_v27  ;;  %v2226_v45 = vunpack.c.h.bf16 %v6227_v58 }
 0x1cb   :  { %v2086_v0 = vmul.f32 1e+30, %v6211_v41  ;;  %v6223_v5 = vadd.f32 -1.0, %v2148_v9  ;;  %v9864_v25 = vadd.f32 -1.0, %v2069_v54  ;;  %v2268_v19 = vrot.slane %v11788_v32, %v9635_v61  ;;  %v6275_v9 = vld [vmem:[%s11287_s1 + $0x390] sm:$0x77] }
 0x1cc   :  { %v2058_v4 = vmax.f32 %v1980_v13, %v2051_v43  ;;  %v2303_v10 = vunpack.c.l.bf16 %v6239_v35  ;;  %v4629_v28 = vmax.f32 %v4551_v48, %v9601_v29  ;;  %v6235_v34 = vadd.f32 -1.0, %v2226_v45  ;;  %v6263_v29 = vld [vmem:[%s11287_s1 + $0x374] sm:$0x77] }
 0x1cd   :  { %v2129_v16 = vadd.f32 %v2112_v24, %v2086_v0  ;;  %v2164_v20 = vmul.f32 1e+30, %v6223_v5  ;;  %v9872_v27 = vadd.f32 -1.0, %v2147_v12  ;;  %v9874_v6 = vadd.f32 -1.0, %v2225_v1  ;;  %v11789_v24 = vld [vmem:[#allocation81_spill] sm:$0xff] }
 0x1ce   :  { %v2304_v33 = vunpack.c.h.bf16 %v6239_v35  ;;  %v9876_v54 = vadd.f32 -1.0, %v2303_v10  ;;  %v4707_v58 = vmax.f32 %v4629_v28, %v9609_v22  ;;  %v2242_v30 = vmul.f32 1e+30, %v6235_v34  ;;  %v6287_v0 = vld [vmem:[%s11287_s1 + $0x3ac] sm:$0x77]  ;;  %v11790_v5 = vld [vmem:[#allocation21_spill] sm:$0xff] }
 0x1cf   :  { %v2136_v14 = vmax.f32 %v2058_v4, %v2129_v16  ;;  %v2207_v37 = vadd.f32 %v2190_v18, %v2164_v20  ;;  %v2346_v52 = vrot.slane %v11789_v24, %v9635_v61  ;;  %v2381_v41 = vunpack.c.l.bf16 %v6251_v40  ;;  %v11791_v20 = vld [vmem:[#allocation25_spill] sm:$0xff] }
 0x1d0   :  { %v6247_v50 = vadd.f32 -1.0, %v2304_v33  ;;  %v2382_v12 = vunpack.c.h.bf16 %v6251_v40  ;;  %v4785_v35 = vmax.f32 %v4707_v58, %v9611_v36  ;;  %v2285_v13 = vadd.f32 %v2268_v19, %v2242_v30  ;;  %v9897_v36 = vld [vmem:[%s11286_s0 + $0xd9] sm:$0x7f]  ;;  %v9907_v33 = vld [vmem:[%s11286_s0 + $0xe0] sm:$0x7f] }
 0x1d1   :  { %v2214_v22 = vmax.f32 %v2136_v14, %v2207_v37  ;;  %v2424_v43 = vrot.slane %v9432_v49, %v9635_v61  ;;  %v2459_v1 = vunpack.c.l.bf16 %v6263_v29  ;;  %v2460_v48 = vunpack.c.h.bf16 %v6263_v29  ;;  %v6299_v37 = vld [vmem:[%s11287_s1 + $0x3c8] sm:$0x77] }
 0x1d2   :  { %v2320_v38 = vmul.f32 1e+30, %v6247_v50  ;;  %v6259_v18 = vadd.f32 -1.0, %v2382_v12  ;;  %v4863_v45 = vmax.f32 %v4785_v35, %v11790_v5  ;;  %v2502_v32 = vrot.slane %v9897_v36, %v9635_v61 }
 0x1d3   :  { %v2292_v4 = vmax.f32 %v2214_v22, %v2285_v13  ;;  %v2537_v49 = vunpack.c.l.bf16 %v6275_v9  ;;  %v6271_v28 = vadd.f32 -1.0, %v2460_v48  ;;  %v2538_v16 = vunpack.c.h.bf16 %v6275_v9  ;;  %v6311_v48 = vld [vmem:[%s11287_s1 + $0x3e4] sm:$0x77] }
 0x1d4   :  { %v2363_v19 = vadd.f32 %v2346_v52, %v2320_v38  ;;  %v2398_v10 = vmul.f32 1e+30, %v6259_v18  ;;  %v4941_v34 = vmax.f32 %v4863_v45, %v11791_v20  ;;  %v9902_v40 = vadd.f32 -1.0, %v2381_v41  ;;  %v11792_v52 = vld [vmem:[#allocation22_spill] sm:$0xff] }
 0x1d5   :  { %v2580_v58 = vrot.slane %v9907_v33, %v9635_v61  ;;  %v2615_v14 = vunpack.c.l.bf16 %v6287_v0  ;;  %v2476_v50 = vmul.f32 1e+30, %v6271_v28  ;;  %v6283_v24 = vadd.f32 -1.0, %v2538_v16  ;;  %v6323_v16 = vld [vmem:[%s11287_s1 + $0x400] sm:$0x77] }
 0x1d6   :  { %v2370_v30 = vmax.f32 %v2292_v4, %v2363_v19  ;;  %v2441_v29 = vadd.f32 %v2424_v43, %v2398_v10  ;;  %v5019_v41 = vmax.f32 %v4941_v34, %v11792_v52  ;;  %v9915_v12 = vadd.f32 -1.0, %v2459_v1  ;;  %v9925_v43 = vld [vmem:[%s11286_s0 + $0xe7] sm:$0x7f]  ;;  %v9937_v10 = vld [vmem:[%s11286_s0 + $0xee] sm:$0x7f] }
 0x1d7   :  { %v9917_v9 = vadd.f32 -1.0, %v2537_v49  ;;  %v2616_v35 = vunpack.c.h.bf16 %v6287_v0  ;;  %v2519_v13 = vadd.f32 %v2502_v32, %v2476_v50  ;;  %v2554_v38 = vmul.f32 1e+30, %v6283_v24  ;;  %v6903_v0 = vld [vmem:[%s11289_s3 + $0x180] sm:$0xff]   ;;  %11793 = vst [vmem:[#allocation19_spill] sm:$0xff] %v9937_v10 }
 0x1d8   :  { %v2448_v22 = vmax.f32 %v2370_v30, %v2441_v29  ;;  %v2693_v18 = vunpack.c.l.bf16 %v6299_v37  ;;  %v5026_v5 = vmax.f32 %v5019_v41, 0.0  ;;  %v2658_v1 = vrot.slane %v9925_v43, %v9635_v61  ;;  %v9952_v24 = vld [vmem:[%s11286_s0 + $0xf5] sm:$0x7f] }
 0x1d9   :  { %v6295_v45 = vadd.f32 -1.0, %v2616_v35  ;;  %v2694_v4 = vunpack.c.h.bf16 %v6299_v37  ;;  %v2597_v49 = vadd.f32 %v2580_v58, %v2554_v38  ;;  %v9932_v19 = vadd.f32 -1.0, %v2615_v14  ;;  %v6335_v58 = vld [vmem:[%s11287_s1 + $0x41c] sm:$0x77]  ;;  %11794 = vst [vmem:[#allocation23_spill] sm:$0xff] %v9952_v24 }
 0x1da   :  { %v2526_v32 = vmax.f32 %v2448_v22, %v2519_v13  ;;  %v2736_v28 = vrot.slane %v9937_v10, %v9635_v61  ;;  %v5033_v20 = vpack.c.bf16 %v5026_v5, %v5026_v5  ;;  %v2772_v30 = vunpack.c.h.bf16 %v6311_v48  ;;  %v6347_v38 = vld [vmem:[%s11287_s1 + $0x438] sm:$0x77] }
 0x1db   :  { %v2632_v34 = vmul.f32 1e+30, %v6295_v45  ;;  %v6307_v37 = vadd.f32 -1.0, %v2694_v4  ;;  %v9947_v29 = vadd.f32 -1.0, %v2693_v18  ;;  %v2771_v50 = vunpack.c.l.bf16 %v6311_v48  ;;  %v9962_v48 = vld [vmem:[%s11286_s0 + $0xfc] sm:$0x7f] }
 0x1dc   :  { %v2604_v14 = vmax.f32 %v2526_v32, %v2597_v49  ;;  %v2814_v52 = vrot.slane %v9952_v24, %v9635_v61  ;;  %5514 = vmatmul.mubr.bf16.vlgmr.msra.gmra.mxu1 %v5033_v20  ;;  %v6319_v22 = vadd.f32 -1.0, %v2772_v30  ;;  %v2850_v13 = vunpack.c.h.bf16 %v6323_v16  ;;  %11795 = vst [vmem:[#allocation20_spill] sm:$0xff] %v9962_v48 }
 0x1dd   :  { %v2675_v41 = vadd.f32 %v2658_v1, %v2632_v34  ;;  %v2710_v35 = vmul.f32 1e+30, %v6307_v37  ;;  %6810 = vmatpush3.bf16.msra.mxu1 %v6903_v0  ;;  %v2849_v18 = vunpack.c.l.bf16 %v6323_v16  ;;  %v2892_v5 = vrot.slane %v9962_v48, %v9635_v61  ;;  %v9972_v16 = vld [vmem:[%s11286_s0 + $0x103] sm:$0x7f] }
 0x1de   :  { %v2927_v45 = vunpack.c.l.bf16 %v6335_v58  ;;  %v2928_v4 = vunpack.c.h.bf16 %v6335_v58  ;;  %v2788_v49 = vmul.f32 1e+30, %v6319_v22  ;;  %v6331_v20 = vadd.f32 -1.0, %v2850_v13  ;;  %11798 = vst [vmem:[#allocation29_spill] sm:$0xff] %v9972_v16 }
 0x1df   :  { %v2682_v1 = vmax.f32 %v2604_v14, %v2675_v41  ;;  %v2753_v32 = vadd.f32 %v2736_v28, %v2710_v35  ;;  %v11796_v34 = vmov 0.0   ;;  %v9967_v37 = vadd.f32 -1.0, %v2771_v50  ;;  %v6359_v28 = vld [vmem:[%s11287_s1 + $0x454] sm:$0x77] }
 0x1e0   :  { %6815 = vmatprep.subr.bf16.mxu1 %v11796_v34  ;;  %v6343_v0 = vadd.f32 -1.0, %v2928_v4  ;;  %v2970_v30 = vrot.slane %v9972_v16, %v9635_v61  ;;  %v3005_v48 = vunpack.c.l.bf16 %v6347_v38  ;;  %v2831_v14 = vadd.f32 %v2814_v52, %v2788_v49  ;;  %v9986_v4 = vld [vmem:[%s11286_s0 + $0x10a] sm:$0x7f]  ;;  %6811 = vmatprep.mubr.msk.bf16.mxu1 %vm7131_vm0, %v11796_v34 }
 0x1e1   :  { %11797 = vst [vmem:[#allocation24_spill] sm:$0xff] %v9967_v37  ;;  %v2760_v58 = vmax.f32 %v2682_v1, %v2753_v32  ;;  %v2866_v41 = vmul.f32 1e+30, %v6331_v20  ;;  %v3006_v35 = vunpack.c.h.bf16 %v6347_v38  ;;  %v9979_v50 = vadd.f32 -1.0, %v2849_v18  ;;  %11801 = vst [vmem:[#allocation36_spill] sm:$0xff] %v9986_v4 }
 0x1e2   :  { %v9981_v22 = vadd.f32 -1.0, %v2927_v45  ;;  %v2944_v13 = vmul.f32 1e+30, %v6343_v0  ;;  %v3048_v16 = vrot.slane %v9986_v4, %v9635_v61  ;;  %v6371_v1 = vld [vmem:[%s11287_s1 + $0x470] sm:$0x77]  ;;  %v3084_v18 = vunpack.c.h.bf16 %v6359_v28 }
 0x1e3   :  { %11799 = vst [vmem:[#allocation33_spill] sm:$0xff] %v9979_v50  ;;  %v2838_v52 = vmax.f32 %v2760_v58, %v2831_v14  ;;  %v2909_v32 = vadd.f32 %v2892_v5, %v2866_v41  ;;  %v6355_v38 = vadd.f32 -1.0, %v3006_v35  ;;  %v6383_v45 = vld [vmem:[%s11287_s1 + $0x48c] sm:$0x77]  ;;  %v9996_v20 = vadd.f32 -1.0, %v3005_v48 }
 0x1e4   :  { %11800 = vst [vmem:[#allocation32_spill] sm:$0xff] %v9981_v22  ;;  %v2987_v49 = vadd.f32 %v2970_v30, %v2944_v13  ;;  %v3083_v0 = vunpack.c.l.bf16 %v6359_v28  ;;  %v10001_v4 = vld [vmem:[%s11286_s0 + $0x111] sm:$0x7f]  ;;  %v6367_v14 = vadd.f32 -1.0, %v3084_v18  ;;  %v3162_v41 = vunpack.c.h.bf16 %v6371_v1  ;;  %v6395_v35 = vld [vmem:[%s11287_s1 + $0x4a8] sm:$0x77] }
 0x1e5   :  { %11802 = vst [vmem:[#allocation26_spill] sm:$0xff] %v9996_v20  ;;  %11803 = vst [vmem:[#allocation30_spill] sm:$0xff] %v10001_v4  ;;  %v3126_v22 = vrot.slane %v10001_v4, %v9635_v61  ;;  %v2916_v58 = vmax.f32 %v2838_v52, %v2909_v32  ;;  %v3022_v5 = vmul.f32 1e+30, %v6355_v38  ;;  %v3161_v30 = vunpack.c.l.bf16 %v6371_v1  ;;  %v10011_v48 = vld [vmem:[%s11286_s0 + $0x118] sm:$0x7f] }
 0x1e6   :  { %11804 = vst [vmem:[#allocation27_spill] sm:$0xff] %v10011_v48  ;;  %v3204_v28 = vrot.slane %v10011_v48, %v9635_v61  ;;  %v3239_v13 = vunpack.c.l.bf16 %v6383_v45  ;;  %v3240_v20 = vunpack.c.h.bf16 %v6383_v45  ;;  %v3100_v32 = vmul.f32 1e+30, %v6367_v14  ;;  %v10020_v1 = vld [vmem:[%s11286_s0 + $0x11f] sm:$0x7f] }
 0x1e7   :  { %v2994_v4 = vmax.f32 %v2916_v58, %v2987_v49  ;;  %v3065_v52 = vadd.f32 %v3048_v16, %v3022_v5  ;;  %v6379_v38 = vadd.f32 -1.0, %v3162_v41  ;;  %v10015_v18 = vadd.f32 -1.0, %v3083_v0  ;;  %11806 = vst [vmem:[#allocation37_spill] sm:$0xff] %v10020_v1  ;;  %v6407_v45 = vld [vmem:[%s11287_s1 + $0x4c4] sm:$0x77] }
 0x1e8   :  { %v6391_v50 = vadd.f32 -1.0, %v3240_v20  ;;  %v3282_v24 = vrot.slane %v10020_v1, %v9635_v61  ;;  %v3317_v37 = vunpack.c.l.bf16 %v6395_v35  ;;  %v3143_v16 = vadd.f32 %v3126_v22, %v3100_v32  ;;  %v10034_v41 = vld [vmem:[%s11286_s0 + $0x126] sm:$0x7f] }
 0x1e9   :  { %11805 = vst [vmem:[#allocation31_spill] sm:$0xff] %v10015_v18  ;;  %v3072_v49 = vmax.f32 %v2994_v4, %v3065_v52  ;;  %v3178_v58 = vmul.f32 1e+30, %v6379_v38  ;;  %v3318_v5 = vunpack.c.h.bf16 %v6395_v35  ;;  %v10027_v0 = vadd.f32 -1.0, %v3161_v30  ;;  %11809 = vst [vmem:[#allocation44_spill] sm:$0xff] %v10034_v41 }
 0x1ea   :  { %v10029_v20 = vadd.f32 -1.0, %v3239_v13  ;;  %v3256_v14 = vmul.f32 1e+30, %v6391_v50  ;;  %v3360_v1 = vrot.slane %v10034_v41, %v9635_v61  ;;  %v6419_v4 = vld [vmem:[%s11287_s1 + $0x4e0] sm:$0x77]  ;;  %v3396_v30 = vunpack.c.h.bf16 %v6407_v45 }
 0x1eb   :  { %11807 = vst [vmem:[#allocation41_spill] sm:$0xff] %v10027_v0  ;;  %v3150_v22 = vmax.f32 %v3072_v49, %v3143_v16  ;;  %v3221_v52 = vadd.f32 %v3204_v28, %v3178_v58  ;;  %v6403_v35 = vadd.f32 -1.0, %v3318_v5  ;;  %v6431_v50 = vld [vmem:[%s11287_s1 + $0x4fc] sm:$0x77]  ;;  %v10044_v32 = vadd.f32 -1.0, %v3317_v37 }
 0x1ec   :  { %11808 = vst [vmem:[#allocation40_spill] sm:$0xff] %v10029_v20  ;;  %v3299_v13 = vadd.f32 %v3282_v24, %v3256_v14  ;;  %v3395_v38 = vunpack.c.l.bf16 %v6407_v45  ;;  %v10049_v41 = vld [vmem:[%s11286_s0 + $0x12d] sm:$0x7f]  ;;  %v6415_v16 = vadd.f32 -1.0, %v3396_v30  ;;  %v3474_v58 = vunpack.c.h.bf16 %v6419_v4  ;;  %v6443_v5 = vld [vmem:[%s11287_s1 + $0x518] sm:$0x77] }
 0x1ed   :  { %11810 = vst [vmem:[#allocation34_spill] sm:$0xff] %v10044_v32  ;;  %11811 = vst [vmem:[#allocation38_spill] sm:$0xff] %v10049_v41  ;;  %v3438_v20 = vrot.slane %v10049_v41, %v9635_v61  ;;  %v3228_v49 = vmax.f32 %v3150_v22, %v3221_v52  ;;  %v3334_v28 = vmul.f32 1e+30, %v6403_v35  ;;  %v3473_v24 = vunpack.c.l.bf16 %v6419_v4  ;;  %v10059_v37 = vld [vmem:[%s11286_s0 + $0x134] sm:$0x7f] }
 0x1ee   :  { %11812 = vst [vmem:[#allocation35_spill] sm:$0xff] %v10059_v37  ;;  %v3516_v45 = vrot.slane %v10059_v37, %v9635_v61  ;;  %v3551_v14 = vunpack.c.l.bf16 %v6431_v50  ;;  %v3552_v32 = vunpack.c.h.bf16 %v6431_v50  ;;  %v3412_v52 = vmul.f32 1e+30, %v6415_v16  ;;  %v10068_v4 = vld [vmem:[%s11286_s0 + $0x13b] sm:$0x7f] }
 0x1ef   :  { %v3306_v41 = vmax.f32 %v3228_v49, %v3299_v13  ;;  %v3377_v22 = vadd.f32 %v3360_v1, %v3334_v28  ;;  %v6427_v35 = vadd.f32 -1.0, %v3474_v58  ;;  %v10063_v30 = vadd.f32 -1.0, %v3395_v38  ;;  %11814 = vst [vmem:[#allocation45_spill] sm:$0xff] %v10068_v4  ;;  %v6455_v50 = vld [vmem:[%s11287_s1 + $0x534] sm:$0x77] }
 0x1f0   :  { %v6439_v48 = vadd.f32 -1.0, %v3552_v32  ;;  %v3594_v0 = vrot.slane %v10068_v4, %v9635_v61  ;;  %v3629_v18 = vunpack.c.l.bf16 %v6443_v5  ;;  %v3455_v1 = vadd.f32 %v3438_v20, %v3412_v52  ;;  %v10082_v58 = vld [vmem:[%s11286_s0 + $0x142] sm:$0x7f] }
 0x1f1   :  { %11813 = vst [vmem:[#allocation39_spill] sm:$0xff] %v10063_v30  ;;  %v3384_v13 = vmax.f32 %v3306_v41, %v3377_v22  ;;  %v3490_v49 = vmul.f32 1e+30, %v6427_v35  ;;  %v3630_v28 = vunpack.c.h.bf16 %v6443_v5  ;;  %v10075_v38 = vadd.f32 -1.0, %v3473_v24  ;;  %11817 = vst [vmem:[#allocation52_spill] sm:$0xff] %v10082_v58 }
 0x1f2   :  { %v10077_v32 = vadd.f32 -1.0, %v3551_v14  ;;  %v3568_v16 = vmul.f32 1e+30, %v6439_v48  ;;  %v3672_v4 = vrot.slane %v10082_v58, %v9635_v61  ;;  %v6467_v41 = vld [vmem:[%s11287_s1 + $0x550] sm:$0x77]  ;;  %v3708_v24 = vunpack.c.h.bf16 %v6455_v50 }
 0x1f3   :  { %11815 = vst [vmem:[#allocation49_spill] sm:$0xff] %v10075_v38  ;;  %v3462_v20 = vmax.f32 %v3384_v13, %v3455_v1  ;;  %v3533_v22 = vadd.f32 %v3516_v45, %v3490_v49  ;;  %v6451_v5 = vadd.f32 -1.0, %v3630_v28  ;;  %v6479_v48 = vld [vmem:[%s11287_s1 + $0x56c] sm:$0x77]  ;;  %v10092_v52 = vadd.f32 -1.0, %v3629_v18 }
 0x1f4   :  { %11816 = vst [vmem:[#allocation48_spill] sm:$0xff] %v10077_v32  ;;  %v3611_v14 = vadd.f32 %v3594_v0, %v3568_v16  ;;  %v3707_v35 = vunpack.c.l.bf16 %v6455_v50  ;;  %v10097_v58 = vld [vmem:[%s11286_s0 + $0x149] sm:$0x7f]  ;;  %v6463_v1 = vadd.f32 -1.0, %v3708_v24  ;;  %v3786_v49 = vunpack.c.h.bf16 %v6467_v41  ;;  %v10107_v18 = vld [vmem:[%s11286_s0 + $0x150] sm:$0x7f] }
 0x1f5   :  { %11818 = vst [vmem:[#allocation42_spill] sm:$0xff] %v10092_v52  ;;  %11819 = vst [vmem:[#allocation46_spill] sm:$0xff] %v10097_v58  ;;  %v3750_v32 = vrot.slane %v10097_v58, %v9635_v61  ;;  %v3540_v13 = vmax.f32 %v3462_v20, %v3533_v22  ;;  %v3646_v45 = vmul.f32 1e+30, %v6451_v5  ;;  %v6491_v28 = vld [vmem:[%s11287_s1 + $0x588] sm:$0x77]  ;;  %v3785_v0 = vunpack.c.l.bf16 %v6467_v41 }
 0x1f6   :  { %11820 = vst [vmem:[#allocation43_spill] sm:$0xff] %v10107_v18  ;;  %v3828_v50 = vrot.slane %v10107_v18, %v9635_v61  ;;  %v3863_v16 = vunpack.c.l.bf16 %v6479_v48  ;;  %v3864_v52 = vunpack.c.h.bf16 %v6479_v48  ;;  %v3724_v22 = vmul.f32 1e+30, %v6463_v1  ;;  %v10116_v41 = vld [vmem:[%s11286_s0 + $0x157] sm:$0x7f] }
 0x1f7   :  { %v3618_v58 = vmax.f32 %v3540_v13, %v3611_v14  ;;  %v3689_v20 = vadd.f32 %v3672_v4, %v3646_v45  ;;  %v6475_v5 = vadd.f32 -1.0, %v3786_v49  ;;  %v10111_v24 = vadd.f32 -1.0, %v3707_v35  ;;  %11822 = vst [vmem:[#allocation53_spill] sm:$0xff] %v10116_v41  ;;  %v6503_v48 = vld [vmem:[%s11287_s1 + $0x5a4] sm:$0x77] }
 0x1f8   :  { %v6487_v37 = vadd.f32 -1.0, %v3864_v52  ;;  %v3906_v38 = vrot.slane %v10116_v41, %v9635_v61  ;;  %v3941_v30 = vunpack.c.l.bf16 %v6491_v28  ;;  %v3767_v4 = vadd.f32 %v3750_v32, %v3724_v22  ;;  %v10130_v49 = vld [vmem:[%s11286_s0 + $0x15e] sm:$0x7f] }
 0x1f9   :  { %11821 = vst [vmem:[#allocation47_spill] sm:$0xff] %v10111_v24  ;;  %v3696_v14 = vmax.f32 %v3618_v58, %v3689_v20  ;;  %v3802_v13 = vmul.f32 1e+30, %v6475_v5  ;;  %v3942_v45 = vunpack.c.h.bf16 %v6491_v28  ;;  %v10123_v35 = vadd.f32 -1.0, %v3785_v0  ;;  %11825 = vst [vmem:[#allocation54_spill] sm:$0xff] %v10130_v49 }
 0x1fa   :  { %v10125_v52 = vadd.f32 -1.0, %v3863_v16  ;;  %v3880_v1 = vmul.f32 1e+30, %v6487_v37  ;;  %v3984_v41 = vrot.slane %v10130_v49, %v9635_v61  ;;  %v6515_v58 = vld [vmem:[%s11287_s1 + $0x5c0] sm:$0x77]  ;;  %v4020_v0 = vunpack.c.h.bf16 %v6503_v48 }
 0x1fb   :  { %11823 = vst [vmem:[#allocation51_spill] sm:$0xff] %v10123_v35  ;;  %v3774_v32 = vmax.f32 %v3696_v14, %v3767_v4  ;;  %v3845_v20 = vadd.f32 %v3828_v50, %v3802_v13  ;;  %v6499_v28 = vadd.f32 -1.0, %v3942_v45  ;;  %v6527_v37 = vld [vmem:[%s11287_s1 + $0x5dc] sm:$0x77]  ;;  %v10140_v22 = vadd.f32 -1.0, %v3941_v30 }
 0x1fc   :  { %11824 = vst [vmem:[#allocation50_spill] sm:$0xff] %v10125_v52  ;;  %v3923_v16 = vadd.f32 %v3906_v38, %v3880_v1  ;;  %v4019_v5 = vunpack.c.l.bf16 %v6503_v48  ;;  %v10145_v49 = vld [vmem:[%s11286_s0 + $0x165] sm:$0x7f]  ;;  %v6511_v4 = vadd.f32 -1.0, %v4020_v0  ;;  %v4098_v13 = vunpack.c.h.bf16 %v6515_v58  ;;  %v6539_v45 = vld [vmem:[%s11287_s1 + $0x5f8] sm:$0x77] }
 0x1fd   :  { %11826 = vst [vmem:[#allocation56_spill] sm:$0xff] %v10140_v22  ;;  %11827 = vst [vmem:[#allocation61_spill] sm:$0xff] %v10145_v49  ;;  %v4062_v52 = vrot.slane %v10145_v49, %v9635_v61  ;;  %v3852_v14 = vmax.f32 %v3774_v32, %v3845_v20  ;;  %v3958_v50 = vmul.f32 1e+30, %v6499_v28  ;;  %v4097_v38 = vunpack.c.l.bf16 %v6515_v58  ;;  %v10155_v30 = vld [vmem:[%s11286_s0 + $0x16c] sm:$0x7f] }
 0x1fe   :  { %11828 = vst [vmem:[#allocation59_spill] sm:$0xff] %v10155_v30  ;;  %v4140_v48 = vrot.slane %v10155_v30, %v9635_v61  ;;  %v4175_v1 = vunpack.c.l.bf16 %v6527_v37  ;;  %v4176_v22 = vunpack.c.h.bf16 %v6527_v37  ;;  %v4036_v20 = vmul.f32 1e+30, %v6511_v4  ;;  %v10164_v58 = vld [vmem:[%s11286_s0 + $0x173] sm:$0x7f] }
 0x1ff   :  { %v3930_v49 = vmax.f32 %v3852_v14, %v3923_v16  ;;  %v4001_v32 = vadd.f32 %v3984_v41, %v3958_v50  ;;  %v6523_v28 = vadd.f32 -1.0, %v4098_v13  ;;  %v10159_v0 = vadd.f32 -1.0, %v4019_v5  ;;  %11830 = vst [vmem:[#allocation55_spill] sm:$0xff] %v10164_v58  ;;  %v6551_v37 = vld [vmem:[%s11287_s1 + $0x614] sm:$0x77] }
 0x200   :  { %v6535_v18 = vadd.f32 -1.0, %v4176_v22  ;;  %v4218_v35 = vrot.slane %v10164_v58, %v9635_v61  ;;  %v4253_v24 = vunpack.c.l.bf16 %v6539_v45  ;;  %v4079_v41 = vadd.f32 %v4062_v52, %v4036_v20  ;;  %v10178_v13 = vld [vmem:[%s11286_s0 + $0x17a] sm:$0x7f] }
 0x201   :  { %11829 = vst [vmem:[#allocation62_spill] sm:$0xff] %v10159_v0  ;;  %v4008_v16 = vmax.f32 %v3930_v49, %v4001_v32  ;;  %v4114_v14 = vmul.f32 1e+30, %v6523_v28  ;;  %v4254_v50 = vunpack.c.h.bf16 %v6539_v45  ;;  %v10171_v5 = vadd.f32 -1.0, %v4097_v38  ;;  %11833 = vst [vmem:[#allocation64_spill] sm:$0xff] %v10178_v13 }
 0x202   :  { %v10173_v22 = vadd.f32 -1.0, %v4175_v1  ;;  %v4192_v4 = vmul.f32 1e+30, %v6535_v18  ;;  %v4296_v58 = vrot.slane %v10178_v13, %v9635_v61  ;;  %v6563_v49 = vld [vmem:[%s11287_s1 + $0x630] sm:$0x77]  ;;  %v4332_v38 = vunpack.c.h.bf16 %v6551_v37 }
 0x203   :  { %11831 = vst [vmem:[#allocation58_spill] sm:$0xff] %v10171_v5  ;;  %v4086_v52 = vmax.f32 %v4008_v16, %v4079_v41  ;;  %v4157_v32 = vadd.f32 %v4140_v48, %v4114_v14  ;;  %v6547_v45 = vadd.f32 -1.0, %v4254_v50  ;;  %v6575_v18 = vld [vmem:[%s11287_s1 + $0x64c] sm:$0x77]  ;;  %v10188_v20 = vadd.f32 -1.0, %v4253_v24 }
 0x204   :  { %11832 = vst [vmem:[#allocation57_spill] sm:$0xff] %v10173_v22  ;;  %v4235_v1 = vadd.f32 %v4218_v35, %v4192_v4  ;;  %v4331_v28 = vunpack.c.l.bf16 %v6551_v37  ;;  %v10193_v13 = vld [vmem:[%s11286_s0 + $0x181] sm:$0x7f]  ;;  %v6559_v41 = vadd.f32 -1.0, %v4332_v38  ;;  %v4410_v14 = vunpack.c.h.bf16 %v6563_v49  ;;  %v6587_v50 = vld [vmem:[%s11287_s1 + $0x668] sm:$0x77] }
 0x205   :  { %11834 = vst [vmem:[#allocation63_spill] sm:$0xff] %v10188_v20  ;;  %11835 = vst [vmem:[#allocation10_spill] sm:$0xff] %v10193_v13  ;;  %v4374_v22 = vrot.slane %v10193_v13, %v9635_v61  ;;  %v4164_v16 = vmax.f32 %v4086_v52, %v4157_v32  ;;  %v4270_v48 = vmul.f32 1e+30, %v6547_v45  ;;  %v4409_v35 = vunpack.c.l.bf16 %v6563_v49  ;;  %v10203_v24 = vld [vmem:[%s11286_s0 + $0x188] sm:$0x7f] }
 0x206   :  { %11836 = vst [vmem:[#allocation60_spill] sm:$0xff] %v10203_v24  ;;  %v4452_v37 = vrot.slane %v10203_v24, %v9635_v61  ;;  %v4487_v4 = vunpack.c.l.bf16 %v6575_v18  ;;  %v4488_v20 = vunpack.c.h.bf16 %v6575_v18  ;;  %v4348_v32 = vmul.f32 1e+30, %v6559_v41  ;;  %v10212_v49 = vld [vmem:[%s11286_s0 + $0x18f] sm:$0x7f] }
 0x207   :  { %v4242_v13 = vmax.f32 %v4164_v16, %v4235_v1  ;;  %v4313_v52 = vadd.f32 %v4296_v58, %v4270_v48  ;;  %v6571_v45 = vadd.f32 -1.0, %v4410_v14  ;;  %v10207_v38 = vadd.f32 -1.0, %v4331_v28  ;;  %11838 = vst [vmem:[#allocation65_spill] sm:$0xff] %v10212_v49  ;;  %v6599_v18 = vld [vmem:[%s11287_s1 + $0x684] sm:$0x77] }
 0x208   :  { %v6583_v30 = vadd.f32 -1.0, %v4488_v20  ;;  %v4530_v5 = vrot.slane %v10212_v49, %v9635_v61  ;;  %v4565_v0 = vunpack.c.l.bf16 %v6587_v50  ;;  %v4391_v58 = vadd.f32 %v4374_v22, %v4348_v32  ;;  %v10226_v14 = vld [vmem:[%s11286_s0 + $0x196] sm:$0x7f] }
 0x209   :  { %11837 = vst [vmem:[#allocation7_spill] sm:$0xff] %v10207_v38  ;;  %v4320_v1 = vmax.f32 %v4242_v13, %v4313_v52  ;;  %v4426_v16 = vmul.f32 1e+30, %v6571_v45  ;;  %v4566_v48 = vunpack.c.h.bf16 %v6587_v50  ;;  %v10219_v28 = vadd.f32 -1.0, %v4409_v35  ;;  %11841 = vst [vmem:[#allocation6_spill] sm:$0xff] %v10226_v14 }
 0x20a   :  { %v10221_v20 = vadd.f32 -1.0, %v4487_v4  ;;  %v4504_v41 = vmul.f32 1e+30, %v6583_v30  ;;  %v4608_v49 = vrot.slane %v10226_v14, %v9635_v61  ;;  %v6611_v13 = vld [vmem:[%s11287_s1 + $0x6a0] sm:$0x77]  ;;  %v4644_v35 = vunpack.c.h.bf16 %v6599_v18 }
 0x20b   :  { %11839 = vst [vmem:[#allocation66_spill] sm:$0xff] %v10219_v28  ;;  %v4398_v22 = vmax.f32 %v4320_v1, %v4391_v58  ;;  %v4469_v52 = vadd.f32 %v4452_v37, %v4426_v16  ;;  %v6595_v50 = vadd.f32 -1.0, %v4566_v48  ;;  %v6623_v30 = vld [vmem:[%s11287_s1 + $0x6bc] sm:$0x77]  ;;  %v10236_v32 = vadd.f32 -1.0, %v4565_v0 }
 0x20c   :  { %11840 = vst [vmem:[#allocation67_spill] sm:$0xff] %v10221_v20  ;;  %v4547_v4 = vadd.f32 %v4530_v5, %v4504_v41  ;;  %v4643_v45 = vunpack.c.l.bf16 %v6599_v18  ;;  %v10241_v14 = vld [vmem:[%s11286_s0 + $0x19d] sm:$0x7f]  ;;  %v6607_v58 = vadd.f32 -1.0, %v4644_v35  ;;  %v4722_v16 = vunpack.c.h.bf16 %v6611_v13  ;;  %v10251_v0 = vld [vmem:[%s11286_s0 + $0x1a4] sm:$0x7f] }
 0x20d   :  { %11842 = vst [vmem:[#allocation68_spill] sm:$0xff] %v10236_v32  ;;  %11843 = vst [vmem:[#allocation69_spill] sm:$0xff] %v10241_v14  ;;  %v4686_v20 = vrot.slane %v10241_v14, %v9635_v61  ;;  %v4476_v1 = vmax.f32 %v4398_v22, %v4469_v52  ;;  %v4582_v37 = vmul.f32 1e+30, %v6595_v50  ;;  %v6635_v48 = vld [vmem:[%s11287_s1 + $0x6d8] sm:$0x77]  ;;  %v4721_v5 = vunpack.c.l.bf16 %v6611_v13 }
 0x20e   :  { %11844 = vst [vmem:[#allocation11_spill] sm:$0xff] %v10251_v0  ;;  %v4764_v18 = vrot.slane %v10251_v0, %v9635_v61  ;;  %v4799_v41 = vunpack.c.l.bf16 %v6623_v30  ;;  %v4800_v32 = vunpack.c.h.bf16 %v6623_v30  ;;  %v4660_v52 = vmul.f32 1e+30, %v6607_v58  ;;  %v10260_v13 = vld [vmem:[%s11286_s0 + $0x1ab] sm:$0x7f] }
 0x20f   :  { %v4554_v14 = vmax.f32 %v4476_v1, %v4547_v4  ;;  %v4625_v22 = vadd.f32 %v4608_v49, %v4582_v37  ;;  %v6619_v50 = vadd.f32 -1.0, %v4722_v16  ;;  %v10255_v35 = vadd.f32 -1.0, %v4643_v45  ;;  %11846 = vst [vmem:[#allocation8_spill] sm:$0xff] %v10260_v13  ;;  %v6647_v30 = vld [vmem:[%s11287_s1 + $0x6f4] sm:$0x77] }
 0x210   :  { %v6631_v24 = vadd.f32 -1.0, %v4800_v32  ;;  %v4842_v28 = vrot.slane %v10260_v13, %v9635_v61  ;;  %v4877_v38 = vunpack.c.l.bf16 %v6635_v48  ;;  %v4703_v49 = vadd.f32 %v4686_v20, %v4660_v52  ;;  %v10274_v16 = vld [vmem:[%s11286_s0 + $0x1b2] sm:$0x7f] }
 0x211   :  { %11845 = vst [vmem:[#allocation70_spill] sm:$0xff] %v10255_v35  ;;  %v4632_v4 = vmax.f32 %v4554_v14, %v4625_v22  ;;  %v4738_v1 = vmul.f32 1e+30, %v6619_v50  ;;  %v4878_v37 = vunpack.c.h.bf16 %v6635_v48  ;;  %v10267_v45 = vadd.f32 -1.0, %v4721_v5  ;;  %v10283_v48 = vld [vmem:[%s11286_s0 + $0x1b9] sm:$0x7f] }
 0x212   :  { %v10269_v32 = vadd.f32 -1.0, %v4799_v41  ;;  %v4816_v58 = vmul.f32 1e+30, %v6631_v24  ;;  %v4920_v13 = vrot.slane %v10274_v16, %v9635_v61  ;;  %v4956_v14 = vunpack.c.h.bf16 %v6647_v30  ;;  %11847 = vst [vmem:[#allocation71_spill] sm:$0xff] %v10283_v48 }
 0x213   :  { %v4710_v0 = vmax.f32 %v4632_v4, %v4703_v49  ;;  %v4781_v35 = vadd.f32 %v4764_v18, %v4738_v1  ;;  %v6643_v10 = vadd.f32 -1.0, %v4878_v37  ;;  %v10278_v22 = vadd.f32 -1.0, %v4877_v38  ;;  %v11848_v18 = vld [vmem:[#allocation28_spill] sm:$0xff]  ;;  %v11849_v38 = vld [vmem:[#allocation5_spill] sm:$0xff] }
 0x214   :  { %v4859_v20 = vadd.f32 %v4842_v28, %v4816_v58  ;;  %v4998_v24 = vrot.slane %v10283_v48, %v9635_v61  ;;  %v6655_v52 = vadd.f32 -1.0, %v4956_v14  ;;  %v57_v50 = vmul.f32 1e+30, %v11848_v18  ;;  %v10325_v14 = vld [vmem:[%s11286_s0 + $0x15] sm:$0x7f] }
 0x215   :  { %v4788_v5 = vmax.f32 %v4710_v0, %v4781_v35  ;;  %v4894_v41 = vmul.f32 1e+30, %v6643_v10  ;;  %v4955_v28 = vunpack.c.l.bf16 %v6647_v30  ;;  %v10291_v4 = vsub.s32 4, %v11849_v38  ;;  %v10299_v0 = vld [vmem:[%s11287_s1 + $0x18] sm:$0x7]  ;;  %11853 = vst [vmem:[#allocation18_spill] sm:$0xff] %v10325_v14 }
 0x216   :  { %v135_v49 = vmul.f32 1e+30, %v9660_v44  ;;  %v213_v1 = vmul.f32 1e+30, %v9670_v59  ;;  %v4972_v61 = vmul.f32 1e+30, %v6655_v52 }
 0x217   :  { %v4866_v37 = vmax.f32 %v4788_v5, %v4859_v20  ;;  %v4937_v58 = vadd.f32 %v4920_v13, %v4894_v41  ;;  %v291_v10 = vmul.f32 1e+30, %v9672_v47  ;;  %v10304_v35 = vld [vmem:[%s11286_s0] sm:$0x7f]  ;;  %v10311_v59 = vld [vmem:[%s11286_s0 + $0x7] sm:$0x7f]  ;;  %v314_v20 = vrot.slane %v10325_v14, %v10291_v4 }
 0x218   :  { %11850 = vst [vmem:[#allocation16_spill] sm:$0xff] %v10304_v35  ;;  %v80_v44 = vrot.slane %v10304_v35, %v10291_v4  ;;  %11851 = vst [vmem:[#allocation14_spill] sm:$0xff] %v10311_v59  ;;  %v158_v47 = vrot.slane %v10311_v59, %v10291_v4  ;;  %v10318_v13 = vld [vmem:[%s11286_s0 + $0xe] sm:$0x7f]  ;;  %v5015_v41 = vadd.f32 %v4998_v24, %v4972_v61  ;;  %v369_v52 = vmul.f32 1e+30, %v9679_v17 }
 0x219   :  { %11852 = vst [vmem:[#allocation72_spill] sm:$0xff] %v10318_v13  ;;  %v236_v30 = vrot.slane %v10318_v13, %v10291_v4  ;;  %v4944_v5 = vmax.f32 %v4866_v37, %v4937_v58  ;;  %v10333_v18 = vld [vmem:[%s11286_s0 + $0x1c] sm:$0x7f]  ;;  %v10337_v13 = vadd.f32 -1.0, %v4955_v28  ;;  %v447_v24 = vmul.f32 1e+30, %v9693_v11 }
 0x21a   :  { %v392_v34 = vrot.slane %v10333_v18, %v10291_v4  ;;  %v100_v59 = vadd.f32 %v80_v44, %v57_v50  ;;  %v178_v35 = vadd.f32 %v158_v47, %v135_v49  ;;  %v10344_v17 = vld [vmem:[%s11286_s0 + $0x23] sm:$0x7f]  ;;  %v334_v61 = vadd.f32 %v314_v20, %v291_v10  ;;  %v10352_v50 = vld [vmem:[%s11286_s0 + $0x2a] sm:$0x7f]  ;;  %v10360_v47 = vld [vmem:[%s11286_s0 + $0x31] sm:$0x7f] }
 0x21b   :  { %v5022_v48 = vmax.f32 %v4944_v5, %v5015_v41  ;;  %v256_v14 = vadd.f32 %v236_v30, %v213_v1  ;;  %v470_v37 = vrot.slane %v10344_v17, %v10291_v4  ;;  %v525_v28 = vmul.f32 1e+30, %v9701_v15  ;;  %v10368_v20 = vld [vmem:[%s11286_s0 + $0x38] sm:$0x7f]  ;;  %v10376_v5 = vld [vmem:[%s11286_s0 + $0x3f] sm:$0x7f] }
 0x21c   :  { %v107_v58 = vmax.f32 %v100_v59, -1e+30  ;;  %v548_v11 = vrot.slane %v10352_v50, %v10291_v4  ;;  %v412_v1 = vadd.f32 %v392_v34, %v369_v52  ;;  %v603_v44 = vmul.f32 1e+30, %v9703_v51 }
 0x21d   :  { %v5029_v49 = vmax.f32 %v5022_v48, 0.0  ;;  %v626_v15 = vrot.slane %v10360_v47, %v10291_v4  ;;  %v490_v59 = vadd.f32 %v470_v37, %v447_v24  ;;  %v681_v30 = vmul.f32 1e+30, %v9705_v31  ;;  %v10384_v24 = vld [vmem:[%s11286_s0 + $0x46] sm:$0x7f] }
 0x21e   :  { %v185_v10 = vmax.f32 %v107_v58, %v178_v35  ;;  %v704_v51 = vrot.slane %v10368_v20, %v10291_v4  ;;  %v759_v48 = vmul.f32 1e+30, %v9726_v23  ;;  %v782_v35 = vrot.slane %v10376_v5, %v10291_v4 }
 0x21f   :  { %v5036_v34 = vpack.c.bf16 %v5029_v49, %v5029_v49  ;;  %v837_v31 = vmul.f32 1e+30, %v9728_v7  ;;  %v568_v52 = vadd.f32 %v548_v11, %v525_v28  ;;  %v860_v23 = vrot.slane %v10384_v24, %v10291_v4  ;;  %v10392_v49 = vld [vmem:[%s11286_s0 + $0x4d] sm:$0x7f]  ;;  %v10400_v28 = vld [vmem:[%s11286_s0 + $0x54] sm:$0x7f] }
 0x220   :  { %v263_v41 = vmax.f32 %v185_v10, %v256_v14  ;;  %v915_v37 = vmul.f32 1e+30, %v9736_v21  ;;  %v646_v58 = vadd.f32 %v626_v15, %v603_v44  ;;  %11854 = vst [vmem:[#allocation73_spill] sm:$0xff] %v10392_v49  ;;  %v938_v7 = vrot.slane %v10392_v49, %v10291_v4  ;;  %v10408_v10 = vld [vmem:[%s11286_s0 + $0x5b] sm:$0x7f] }
 0x221   :  { %5553 = vmatprep.mubr.bf16.mxu0 %v5036_v34  ;;  %v993_v14 = vmul.f32 1e+30, %v9750_v8  ;;  %v1016_v21 = vrot.slane %v10400_v28, %v10291_v4  ;;  %v724_v44 = vadd.f32 %v704_v51, %v681_v30  ;;  %v1071_v15 = vmul.f32 1e+30, %v9758_v62 }
 0x222   :  { %v341_v11 = vmax.f32 %v263_v41, %v334_v61  ;;  %v1094_v8 = vrot.slane %v10408_v10, %v10291_v4  ;;  %v802_v34 = vadd.f32 %v782_v35, %v759_v48  ;;  %v10412_v38 = vadd.f32 %v860_v23, %v837_v31  ;;  %v10418_v61 = vld [vmem:[%s11286_s0 + $0x62] sm:$0x7f]  ;;  %v10428_v48 = vld [vmem:[%s11286_s0 + $0x69] sm:$0x7f] }
 0x223   :  { %v1149_v49 = vmul.f32 1e+30, %v9760_v53  ;;  %v1172_v62 = vrot.slane %v10418_v61, %v10291_v4  ;;  %v10422_v51 = vadd.f32 %v938_v7, %v915_v37  ;;  %v1227_v41 = vmul.f32 1e+30, %v9762_v26  ;;  %11855 = vst [vmem:[#allocation12_spill] sm:$0xff] %v10428_v48 }
 0x224   :  { %v419_v30 = vmax.f32 %v341_v11, %v412_v1  ;;  %v1250_v53 = vrot.slane %v10428_v48, %v10291_v4  ;;  %v10432_v35 = vadd.f32 %v1016_v21, %v993_v14  ;;  %v1305_v31 = vmul.f32 1e+30, %v9783_v42  ;;  %v10438_v1 = vld [vmem:[%s11286_s0 + $0x70] sm:$0x7f]  ;;  %v10448_v14 = vld [vmem:[%s11286_s0 + $0x77] sm:$0x7f] }
 0x225   :  { %11856 = vst [vmem:[#allocation74_spill] sm:$0xff] %v10438_v1  ;;  %v1328_v26 = vrot.slane %v10438_v1, %v10291_v4  ;;  %v1383_v23 = vmul.f32 1e+30, %v9785_v39  ;;  %v10443_v7 = vadd.f32 %v1094_v8, %v1071_v15  ;;  %11857 = vst [vmem:[#allocation15_spill] sm:$0xff] %v10448_v14  ;;  %v1406_v42 = vrot.slane %v10448_v14, %v10291_v4  ;;  %v10458_v1 = vld [vmem:[%s11286_s0 + $0x7e] sm:$0x7f] }
 0x226   :  { %v497_v37 = vmax.f32 %v419_v30, %v490_v59  ;;  %v1461_v21 = vmul.f32 1e+30, %v9793_v60  ;;  %v10453_v11 = vadd.f32 %v1172_v62, %v1149_v49  ;;  %11858 = vst [vmem:[#allocation75_spill] sm:$0xff] %v10458_v1  ;;  %v1484_v39 = vrot.slane %v10458_v1, %v10291_v4  ;;  %v10466_v15 = vld [vmem:[%s11286_s0 + $0x85] sm:$0x7f] }
 0x227   :  { %v1539_v59 = vmul.f32 1e+30, %v9807_v55  ;;  %11859 = vst [vmem:[#allocation9_spill] sm:$0xff] %v10466_v15  ;;  %v1562_v60 = vrot.slane %v10466_v15, %v10291_v4  ;;  %v10470_v8 = vadd.f32 %v1250_v53, %v1227_v41  ;;  %v1617_v62 = vmul.f32 1e+30, %v9815_v2 }
 0x228   :  { %v575_v49 = vmax.f32 %v497_v37, %v568_v52  ;;  %v10476_v30 = vld [vmem:[%s11286_s0 + $0x8c] sm:$0x7f]  ;;  %v10480_v1 = vadd.f32 %v1328_v26, %v1305_v31  ;;  %v10482_v14 = vadd.f32 %v1406_v42, %v1383_v23  ;;  %v1695_v48 = vmul.f32 1e+30, %v9817_v3  ;;  %v10488_v52 = vld [vmem:[%s11286_s0 + $0x93] sm:$0x7f] }
 0x229   :  { %11860 = vst [vmem:[#allocation13_spill] sm:$0xff] %v10476_v30  ;;  %v1640_v55 = vrot.slane %v10476_v30, %v10291_v4  ;;  %11861 = vst [vmem:[#allocation76_spill] sm:$0xff] %v10488_v52  ;;  %v1718_v2 = vrot.slane %v10488_v52, %v10291_v4  ;;  %v10492_v53 = vadd.f32 %v1484_v39, %v1461_v21  ;;  %v1773_v37 = vmul.f32 1e+30, %v9819_v56  ;;  %v10498_v31 = vld [vmem:[%s11286_s0 + $0x9a] sm:$0x7f] }
 0x22a   :  { %v653_v41 = vmax.f32 %v575_v49, %v646_v58  ;;  %11862 = vst [vmem:[#allocation77_spill] sm:$0xff] %v10498_v31  ;;  %v1796_v3 = vrot.slane %v10498_v31, %v10291_v4  ;;  %v10502_v26 = vadd.f32 %v1562_v60, %v1539_v59  ;;  %v1851_v23 = vmul.f32 1e+30, %v9840_v57  ;;  %v10508_v58 = vld [vmem:[%s11286_s0 + $0xa1] sm:$0x7f] }
 0x22b   :  { %11863 = vst [vmem:[#allocation17_spill] sm:$0xff] %v10508_v58  ;;  %v1874_v56 = vrot.slane %v10508_v58, %v10291_v4  ;;  %v1929_v42 = vmul.f32 1e+30, %v9842_v63  ;;  %v10513_v39 = vadd.f32 %v1640_v55, %v1617_v62  ;;  %v10518_v59 = vld [vmem:[%s11286_s0 + $0xa8] sm:$0x7f]  ;;  %v10523_v49 = vadd.f32 %v1718_v2, %v1695_v48 }
 0x22c   :  { %v731_v21 = vmax.f32 %v653_v41, %v724_v44  ;;  %11864 = vst [vmem:[#allocation78_spill] sm:$0xff] %v10518_v59  ;;  %v1952_v57 = vrot.slane %v10518_v59, %v10291_v4  ;;  %v2007_v60 = vmul.f32 1e+30, %v9850_v46  ;;  %v10528_v58 = vld [vmem:[%s11286_s0 + $0xaf] sm:$0x7f]  ;;  %v10540_v55 = vadd.f32 %v1796_v3, %v1773_v37 }
 0x22d   :  { %11865 = vst [vmem:[#allocation79_spill] sm:$0xff] %v10528_v58  ;;  %v2030_v63 = vrot.slane %v10528_v58, %v10291_v4  ;;  %v2085_v44 = vmul.f32 1e+30, %v9864_v25  ;;  %v10536_v62 = vld [vmem:[%s11286_s0 + $0xb6] sm:$0x7f]  ;;  %v10550_v58 = vadd.f32 %v1874_v56, %v1851_v23 }
 0x22e   :  { %11866 = vst [vmem:[#allocation80_spill] sm:$0xff] %v10536_v62  ;;  %v2108_v46 = vrot.slane %v10536_v62, %v10291_v4  ;;  %v809_v48 = vmax.f32 %v731_v21, %v802_v34  ;;  %v2163_v2 = vmul.f32 1e+30, %v9872_v27  ;;  %v10546_v41 = vld [vmem:[%s11286_s0 + $0xbd] sm:$0x7f]  ;;  %v10552_v59 = vadd.f32 %v1952_v57, %v1929_v42 }
 0x22f   :  { %11867 = vst [vmem:[#allocation81_spill] sm:$0xff] %v10546_v41  ;;  %v2186_v25 = vrot.slane %v10546_v41, %v10291_v4  ;;  %v2241_v31 = vmul.f32 1e+30, %v9874_v6  ;;  %v10558_v34 = vld [vmem:[%s11286_s0 + $0xc4] sm:$0x7f]  ;;  %v10563_v3 = vadd.f32 %v2030_v63, %v2007_v60 }
 0x230   :  { %11868 = vst [vmem:[#allocation21_spill] sm:$0xff] %v10558_v34  ;;  %v2264_v27 = vrot.slane %v10558_v34, %v10291_v4  ;;  %v887_v37 = vmax.f32 %v809_v48, %v10412_v38  ;;  %v2319_v21 = vmul.f32 1e+30, %v9876_v54  ;;  %v10569_v23 = vld [vmem:[%s11286_s0 + $0xcb] sm:$0x7f]  ;;  %v10573_v56 = vadd.f32 %v2108_v46, %v2085_v44 }
 0x231   :  { %11869 = vst [vmem:[#allocation25_spill] sm:$0xff] %v10569_v23  ;;  %v2342_v6 = vrot.slane %v10569_v23, %v10291_v4  ;;  %v10575_v42 = vadd.f32 %v2186_v25, %v2163_v2  ;;  %v10580_v38 = vmul.f32 1e+30, %v9902_v40  ;;  %v10586_v54 = vld [vmem:[%s11286_s0 + $0xd2] sm:$0x7f]  ;;  %v2576_v40 = vrot.slane %v9907_v33, %v10291_v4  ;;  %v11871_v33 = vld [vmem:[#allocation24_spill] sm:$0xff] }
 0x232   :  { %v10577_v57 = vadd.f32 %v2264_v27, %v2241_v31  ;;  %v965_v60 = vmax.f32 %v887_v37, %v10422_v51  ;;  %v10591_v44 = vmul.f32 1e+30, %v9915_v12  ;;  %v2553_v46 = vmul.f32 1e+30, %v9917_v9  ;;  %v11870_v27 = vld [vmem:[#allocation19_spill] sm:$0xff] }
 0x233   :  { %v10594_v31 = vadd.f32 %v2342_v6, %v2319_v21  ;;  %v2631_v51 = vmul.f32 1e+30, %v9932_v19  ;;  %v2654_v48 = vrot.slane %v9925_v43, %v10291_v4  ;;  %v2709_v12 = vmul.f32 1e+30, %v9947_v29  ;;  %v11872_v19 = vld [vmem:[#allocation23_spill] sm:$0xff]  ;;  %v11874_v29 = vld [vmem:[#allocation20_spill] sm:$0xff] }
 0x234   :  { %v1043_v2 = vmax.f32 %v965_v60, %v10432_v35  ;;  %v2732_v9 = vrot.slane %v11870_v27, %v10291_v4  ;;  %v10607_v37 = vadd.f32 %v2576_v40, %v2553_v46  ;;  %v2787_v6 = vmul.f32 1e+30, %v11871_v33  ;;  %v11873_v60 = vld [vmem:[#allocation33_spill] sm:$0xff]  ;;  %v11875_v46 = vld [vmem:[#allocation32_spill] sm:$0xff]  ;;  %v11877_v27 = vld [vmem:[#allocation26_spill] sm:$0xff] }
 0x235   :  { %v10609_v21 = vadd.f32 %v2654_v48, %v2631_v51  ;;  %v2810_v63 = vrot.slane %v11872_v19, %v10291_v4  ;;  %v2865_v25 = vmul.f32 1e+30, %v11873_v60  ;;  %v2888_v23 = vrot.slane %v11874_v29, %v10291_v4  ;;  %v11876_v51 = vld [vmem:[#allocation29_spill] sm:$0xff] }
 0x236   :  { %v1121_v43 = vmax.f32 %v1043_v2, %v10443_v7  ;;  %v10615_v35 = vadd.f32 %v2732_v9, %v2709_v12  ;;  %v2943_v40 = vmul.f32 1e+30, %v11875_v46  ;;  %v2966_v48 = vrot.slane %v11876_v51, %v10291_v4  ;;  %v11878_v7 = vld [vmem:[#allocation36_spill] sm:$0xff]  ;;  %v11879_v12 = vld [vmem:[#allocation31_spill] sm:$0xff]  ;;  %v11881_v29 = vld [vmem:[#allocation41_spill] sm:$0xff] }
 0x237   :  { %v10620_v34 = vadd.f32 %v2810_v63, %v2787_v6  ;;  %v3021_v33 = vmul.f32 1e+30, %v11877_v27  ;;  %v10627_v41 = vadd.f32 %v2888_v23, %v2865_v25  ;;  %v3044_v2 = vrot.slane %v11878_v7, %v10291_v4  ;;  %v11880_v63 = vld [vmem:[#allocation30_spill] sm:$0xff]  ;;  %v11882_v51 = vld [vmem:[#allocation27_spill] sm:$0xff]  ;;  %v11883_v23 = vld [vmem:[#allocation40_spill] sm:$0xff] }
 0x238   :  { %v1199_v19 = vmax.f32 %v1121_v43, %v10453_v11  ;;  %v3099_v9 = vmul.f32 1e+30, %v11879_v12  ;;  %v10632_v60 = vadd.f32 %v2966_v48, %v2943_v40  ;;  %v3122_v6 = vrot.slane %v11880_v63, %v10291_v4  ;;  %v11884_v43 = vld [vmem:[#allocation37_spill] sm:$0xff]  ;;  %v11885_v48 = vld [vmem:[#allocation34_spill] sm:$0xff] }
 0x239   :  { %v3177_v46 = vmul.f32 1e+30, %v11881_v29  ;;  %v3200_v62 = vrot.slane %v11882_v51, %v10291_v4  ;;  %v10640_v11 = vadd.f32 %v3044_v2, %v3021_v33  ;;  %v3255_v25 = vmul.f32 1e+30, %v11883_v23  ;;  %v11886_v29 = vld [vmem:[#allocation44_spill] sm:$0xff] }
 0x23a   :  { %v1277_v27 = vmax.f32 %v1199_v19, %v10470_v8  ;;  %v3278_v7 = vrot.slane %v11884_v43, %v10291_v4  ;;  %v10645_v12 = vadd.f32 %v3122_v6, %v3099_v9  ;;  %v3333_v63 = vmul.f32 1e+30, %v11885_v48  ;;  %v11887_v8 = vld [vmem:[#allocation39_spill] sm:$0xff]  ;;  %v11888_v19 = vld [vmem:[#allocation38_spill] sm:$0xff]  ;;  %v11890_v9 = vld [vmem:[#allocation49_spill] sm:$0xff] }
 0x23b   :  { %v10647_v40 = vadd.f32 %v3200_v62, %v3177_v46  ;;  %v3356_v52 = vrot.slane %v11886_v29, %v10291_v4  ;;  %v3411_v33 = vmul.f32 1e+30, %v11887_v8  ;;  %v3434_v2 = vrot.slane %v11888_v19, %v10291_v4  ;;  %v11891_v62 = vld [vmem:[#allocation35_spill] sm:$0xff]  ;;  %v11892_v43 = vld [vmem:[#allocation48_spill] sm:$0xff] }
 0x23c   :  { %v1355_v51 = vmax.f32 %v1277_v27, %v10480_v1  ;;  %v10653_v30 = vadd.f32 %v3278_v7, %v3255_v25  ;;  %v3489_v6 = vmul.f32 1e+30, %v11890_v9  ;;  %v3512_v46 = vrot.slane %v11891_v62, %v10291_v4  ;;  %v11894_v1 = vld [vmem:[#allocation45_spill] sm:$0xff]  ;;  %v11895_v25 = vld [vmem:[#allocation42_spill] sm:$0xff]  ;;  %v11898_v19 = vld [vmem:[#allocation47_spill] sm:$0xff] }
 0x23d   :  { %v10658_v23 = vadd.f32 %v3356_v52, %v3333_v63  ;;  %v3567_v48 = vmul.f32 1e+30, %v11892_v43  ;;  %v10665_v15 = vadd.f32 %v3434_v2, %v3411_v33  ;;  %v3590_v27 = vrot.slane %v11894_v1, %v10291_v4  ;;  %v11897_v52 = vld [vmem:[#allocation52_spill] sm:$0xff]  ;;  %v11899_v62 = vld [vmem:[#allocation46_spill] sm:$0xff]  ;;  %v11901_v2 = vld [vmem:[#allocation43_spill] sm:$0xff] }
 0x23e   :  { %v1433_v29 = vmax.f32 %v1355_v51, %v10482_v14  ;;  %v3645_v7 = vmul.f32 1e+30, %v11895_v25  ;;  %v10670_v8 = vadd.f32 %v3512_v46, %v3489_v6  ;;  %v3668_v63 = vrot.slane %v11897_v52, %v10291_v4  ;;  %v11900_v51 = vld [vmem:[#allocation51_spill] sm:$0xff]  ;;  %v11903_v46 = vld [vmem:[#allocation50_spill] sm:$0xff] }
 0x23f   :  { %11889 = vst [vmem:[#allocation22_spill] sm:$0xff] %v10658_v23  ;;  %11893 = vst [vmem:[#allocation28_spill] sm:$0xff] %v10665_v15  ;;  %v3723_v9 = vmul.f32 1e+30, %v11898_v19  ;;  %v3746_v23 = vrot.slane %v11899_v62, %v10291_v4  ;;  %v10678_v14 = vadd.f32 %v3590_v27, %v3567_v48  ;;  %v3801_v33 = vmul.f32 1e+30, %v11900_v51 }
 0x240   :  { %11896 = vst [vmem:[#allocation19_spill] sm:$0xff] %v10670_v8  ;;  %v1511_v43 = vmax.f32 %v1433_v29, %v10492_v53  ;;  %v3824_v1 = vrot.slane %v11901_v2, %v10291_v4  ;;  %v10683_v25 = vadd.f32 %v3668_v63, %v3645_v7  ;;  %v3879_v52 = vmul.f32 1e+30, %v11903_v46  ;;  %v11904_v19 = vld [vmem:[#allocation53_spill] sm:$0xff]  ;;  %v11905_v53 = vld [vmem:[#allocation56_spill] sm:$0xff]  ;;  %v11906_v29 = vld [vmem:[#allocation54_spill] sm:$0xff] }
 0x241   :  { %v10685_v6 = vadd.f32 %v3746_v23, %v3723_v9  ;;  %v3902_v8 = vrot.slane %v11904_v19, %v10291_v4  ;;  %v3957_v48 = vmul.f32 1e+30, %v11905_v53  ;;  %v3980_v27 = vrot.slane %v11906_v29, %v10291_v4  ;;  %v11908_v7 = vld [vmem:[#allocation62_spill] sm:$0xff]  ;;  %v11909_v23 = vld [vmem:[#allocation61_spill] sm:$0xff]  ;;  %v11916_v29 = vld [vmem:[#allocation63_spill] sm:$0xff] }
 0x242   :  { %v1589_v62 = vmax.f32 %v1511_v43, %v10502_v26  ;;  %v10691_v15 = vadd.f32 %v3824_v1, %v3801_v33  ;;  %v4035_v63 = vmul.f32 1e+30, %v11908_v7  ;;  %v4058_v9 = vrot.slane %v11909_v23, %v10291_v4  ;;  %v11910_v2 = vld [vmem:[#allocation58_spill] sm:$0xff]  ;;  %v11912_v26 = vld [vmem:[#allocation59_spill] sm:$0xff]  ;;  %v11913_v33 = vld [vmem:[#allocation57_spill] sm:$0xff] }
 0x243   :  { %11902 = vst [vmem:[#allocation24_spill] sm:$0xff] %v10685_v6  ;;  %v10696_v51 = vadd.f32 %v3902_v8, %v3879_v52  ;;  %v4113_v46 = vmul.f32 1e+30, %v11910_v2  ;;  %v10703_v6 = vadd.f32 %v3980_v27, %v3957_v48  ;;  %v4136_v43 = vrot.slane %v11912_v26, %v10291_v4  ;;  %v11915_v8 = vld [vmem:[#allocation55_spill] sm:$0xff]  ;;  %v11917_v23 = vld [vmem:[#allocation64_spill] sm:$0xff]  ;;  %v11919_v27 = vld [vmem:[#allocation10_spill] sm:$0xff] }
 0x244   :  { %v1667_v19 = vmax.f32 %v1589_v62, %v10513_v39  ;;  %v4191_v1 = vmul.f32 1e+30, %v11913_v33  ;;  %v10708_v53 = vadd.f32 %v4058_v9, %v4035_v63  ;;  %v4214_v52 = vrot.slane %v11915_v8, %v10291_v4  ;;  %v11918_v62 = vld [vmem:[#allocation7_spill] sm:$0xff]  ;;  %v11921_v9 = vld [vmem:[#allocation66_spill] sm:$0xff] }
 0x245   :  { %11907 = vst [vmem:[#allocation23_spill] sm:$0xff] %v10696_v51  ;;  %11911 = vst [vmem:[#allocation33_spill] sm:$0xff] %v10703_v6  ;;  %v4269_v7 = vmul.f32 1e+30, %v11916_v29  ;;  %v4292_v51 = vrot.slane %v11917_v23, %v10291_v4  ;;  %v10716_v39 = vadd.f32 %v4136_v43, %v4113_v46  ;;  %v4347_v48 = vmul.f32 1e+30, %v11918_v62 }
 0x246   :  { %11914 = vst [vmem:[#allocation20_spill] sm:$0xff] %v10708_v53  ;;  %v1745_v2 = vmax.f32 %v1667_v19, %v10523_v49  ;;  %v4370_v26 = vrot.slane %v11919_v27, %v10291_v4  ;;  %v10721_v33 = vadd.f32 %v4214_v52, %v4191_v1  ;;  %v4425_v8 = vmul.f32 1e+30, %v11921_v9  ;;  %v11922_v29 = vld [vmem:[#allocation60_spill] sm:$0xff]  ;;  %v11923_v49 = vld [vmem:[#allocation67_spill] sm:$0xff]  ;;  %v11924_v19 = vld [vmem:[#allocation65_spill] sm:$0xff] }
 0x247   :  { %v10723_v63 = vadd.f32 %v4292_v51, %v4269_v7  ;;  %v4448_v53 = vrot.slane %v11922_v29, %v10291_v4  ;;  %v4503_v46 = vmul.f32 1e+30, %v11923_v49  ;;  %v4526_v43 = vrot.slane %v11924_v19, %v10291_v4  ;;  %v11925_v1 = vld [vmem:[#allocation68_spill] sm:$0xff]  ;;  %v11926_v51 = vld [vmem:[#allocation6_spill] sm:$0xff] }
 0x248   :  { %v1823_v23 = vmax.f32 %v1745_v2, %v10540_v55  ;;  %v10729_v6 = vadd.f32 %v4370_v26, %v4347_v48  ;;  %v4581_v52 = vmul.f32 1e+30, %v11925_v1  ;;  %v4604_v7 = vrot.slane %v11926_v51, %v10291_v4  ;;  %v11927_v27 = vld [vmem:[#allocation70_spill] sm:$0xff]  ;;  %v11928_v55 = vld [vmem:[#allocation69_spill] sm:$0xff]  ;;  %v11930_v19 = vld [vmem:[#allocation8_spill] sm:$0xff] }
 0x249   :  { %11920 = vst [vmem:[#allocation32_spill] sm:$0xff] %v10723_v63  ;;  %v10734_v62 = vadd.f32 %v4448_v53, %v4425_v8  ;;  %v4659_v9 = vmul.f32 1e+30, %v11927_v27  ;;  %v10741_v63 = vadd.f32 %v4526_v43, %v4503_v46  ;;  %v4682_v2 = vrot.slane %v11928_v55, %v10291_v4  ;;  %v11929_v53 = vld [vmem:[#allocation11_spill] sm:$0xff] }
 0x24a   :  { %v1901_v29 = vmax.f32 %v1823_v23, %v10550_v58  ;;  %v4737_v48 = vmul.f32 1e+30, %v10267_v45  ;;  %v10746_v26 = vadd.f32 %v4604_v7, %v4581_v52  ;;  %v4760_v8 = vrot.slane %v11929_v53, %v10291_v4  ;;  %v5904_v58 = vld [vmem:[%s11287_s1 + $0x34] sm:$0x7]  ;;  %v5928_v52 = vld [vmem:[%s11287_s1 + $0x6c] sm:$0x7] }
 0x24b   :  { %v4815_v49 = vmul.f32 1e+30, %v10269_v32  ;;  %v4838_v1 = vrot.slane %v11930_v19, %v10291_v4  ;;  %v10757_v46 = vadd.f32 %v4682_v2, %v4659_v9  ;;  %v4893_v45 = vmul.f32 1e+30, %v10278_v22  ;;  %v5916_v32 = vld [vmem:[%s11287_s1 + $0x50] sm:$0x7] }
 0x24c   :  { %v1979_v23 = vmax.f32 %v1901_v29, %v10552_v59  ;;  %v4916_v43 = vrot.slane %v10274_v16, %v10291_v4  ;;  %v10768_v51 = vadd.f32 %v4760_v8, %v4737_v48  ;;  %v4971_v59 = vmul.f32 1e+30, %v10337_v13  ;;  %v11931_v27 = vld [vmem:[#allocation71_spill] sm:$0xff]  ;;  %v11934_v2 = vld [vmem:[#allocation5_spill] sm:$0xff] }
 0x24d   :  { %v10770_v7 = vadd.f32 %v4838_v1, %v4815_v49  ;;  %v4994_v22 = vrot.slane %v11931_v27, %v10291_v4  ;;  %v11933_v29 = vunpack.c.l.bf16 %v10299_v0  ;;  %v10781_v53 = vsub.s32 6, %v11934_v2  ;;  %v5940_v13 = vld [vmem:[%s11287_s1 + $0x88] sm:$0x7] }
 0x24e   :  { %v2057_v9 = vmax.f32 %v1979_v23, %v10563_v3  ;;  %v10776_v16 = vadd.f32 %v4916_v43, %v4893_v45  ;;  %v121_v48 = vunpack.c.l.bf16 %v5904_v58  ;;  %v199_v8 = vunpack.c.l.bf16 %v5916_v32  ;;  %v11936_v23 = vld [vmem:[#allocation16_spill] sm:$0xff]  ;;  %v11937_v0 = vld [vmem:[#allocation14_spill] sm:$0xff] }
 0x24f   :  { %v5900_v55 = vadd.f32 -1.0, %v11933_v29  ;;  %v10783_v19 = vadd.f32 %v4994_v22, %v4971_v59  ;;  %v277_v49 = vunpack.c.l.bf16 %v5928_v52  ;;  %v88_v45 = vrot.slane %v11936_v23, %v10781_v53  ;;  %v11938_v59 = vld [vmem:[#allocation72_spill] sm:$0xff]  ;;  %v5952_v52 = vld [vmem:[%s11287_s1 + $0xa4] sm:$0x7] }
 0x250   :  { %11932 = vst [vmem:[#allocation29_spill] sm:$0xff] %v10776_v16  ;;  %v2135_v1 = vmax.f32 %v2057_v9, %v10573_v56  ;;  %v166_v43 = vrot.slane %v11937_v0, %v10781_v53  ;;  %v5912_v27 = vadd.f32 -1.0, %v121_v48  ;;  %v5924_v29 = vadd.f32 -1.0, %v199_v8  ;;  %v5964_v48 = vld [vmem:[%s11287_s1 + $0xc0] sm:$0x7]  ;;  %v11940_v0 = vld [vmem:[#allocation18_spill] sm:$0xff] }
 0x251   :  { %11935 = vst [vmem:[#allocation26_spill] sm:$0xff] %v10783_v19  ;;  %v59_v3 = vmul.f32 1e+30, %v5900_v55  ;;  %v244_v58 = vrot.slane %v11938_v59, %v10781_v53  ;;  %v5936_v32 = vadd.f32 -1.0, %v277_v49  ;;  %v11939_v56 = vrot.slane %v10586_v54, %v10291_v4 }
 0x252   :  { %v2213_v22 = vmax.f32 %v2135_v1, %v10575_v42  ;;  %v355_v2 = vunpack.c.l.bf16 %v5940_v13  ;;  %v137_v8 = vmul.f32 1e+30, %v5912_v27  ;;  %v215_v23 = vmul.f32 1e+30, %v5924_v29 }
 0x253   :  { %v2440_v9 = vadd.f32 %v11939_v56, %v10580_v38  ;;  %v102_v55 = vadd.f32 %v88_v45, %v59_v3  ;;  %v293_v49 = vmul.f32 1e+30, %v5936_v32  ;;  %v322_v59 = vrot.slane %v11940_v0, %v10781_v53  ;;  %v5976_v38 = vld [vmem:[%s11287_s1 + $0xdc] sm:$0x7] }
 0x254   :  { %v2291_v19 = vmax.f32 %v2213_v22, %v10577_v57  ;;  %v5948_v1 = vadd.f32 -1.0, %v355_v2  ;;  %v433_v16 = vunpack.c.l.bf16 %v5952_v52  ;;  %v11941_v13 = vrot.slane %v9897_v36, %v10291_v4  ;;  %v5988_v52 = vld [vmem:[%s11287_s1 + $0xf8] sm:$0x7] }
 0x255   :  { %v109_v42 = vmax.f32 %v102_v55, -1e+30  ;;  %v180_v45 = vadd.f32 %v166_v43, %v137_v8  ;;  %v258_v27 = vadd.f32 %v244_v58, %v215_v23  ;;  %v400_v29 = vrot.slane %v10333_v18, %v10781_v53  ;;  %v6012_v23 = vld [vmem:[%s11287_s1 + $0x130] sm:$0x7] }
 0x256   :  { %v2518_v3 = vadd.f32 %v11941_v13, %v10591_v44  ;;  %v2369_v32 = vmax.f32 %v2291_v19, %v10594_v31  ;;  %v371_v57 = vmul.f32 1e+30, %v5948_v1  ;;  %v5960_v22 = vadd.f32 -1.0, %v433_v16  ;;  %v6000_v44 = vld [vmem:[%s11287_s1 + $0x114] sm:$0x7] }
 0x257   :  { %v511_v56 = vunpack.c.l.bf16 %v5964_v48  ;;  %v187_v55 = vmax.f32 %v109_v42, %v180_v45  ;;  %v336_v2 = vadd.f32 %v322_v59, %v293_v49  ;;  %v478_v36 = vrot.slane %v10344_v17, %v10781_v53  ;;  %v10832_v17 = vpop.f32.mrf.mxu0  ;;  %v6024_v13 = vld [vmem:[%s11287_s1 + $0x14c] sm:$0x7] }
 0x258   :  { %v589_v4 = vunpack.c.l.bf16 %v5976_v38  ;;  %v2447_v18 = vmax.f32 %v2369_v32, %v2440_v9  ;;  %v449_v43 = vmul.f32 1e+30, %v5960_v22  ;;  %v556_v16 = vrot.slane %v10352_v50, %v10781_v53 }
 0x259   :  { %v5972_v31 = vadd.f32 -1.0, %v511_v56  ;;  %v265_v19 = vmax.f32 %v187_v55, %v258_v27  ;;  %v414_v58 = vadd.f32 %v400_v29, %v371_v57  ;;  %v667_v8 = vunpack.c.l.bf16 %v5988_v52  ;;  %v10839_v45 = vpop.f32.mrf.mxu0 }
 0x25a   :  { %v5984_v48 = vadd.f32 -1.0, %v589_v4  ;;  %v2525_v49 = vmax.f32 %v2447_v18, %v2518_v3  ;;  %v634_v9 = vrot.slane %v10360_v47, %v10781_v53  ;;  %v745_v59 = vunpack.c.l.bf16 %v6000_v44  ;;  %v6036_v47 = vld [vmem:[%s11287_s1 + $0x168] sm:$0x7] }
 0x25b   :  { %v527_v0 = vmul.f32 1e+30, %v5972_v31  ;;  %v343_v42 = vmax.f32 %v265_v19, %v336_v2  ;;  %v492_v1 = vadd.f32 %v478_v36, %v449_v43  ;;  %v5996_v50 = vadd.f32 -1.0, %v667_v8  ;;  %v6744_v55 = vpop.f32.mrf.mxu0 }
 0x25c   :  { %v605_v38 = vmul.f32 1e+30, %v5984_v48  ;;  %v2603_v27 = vmax.f32 %v2525_v49, %v10607_v37  ;;  %v712_v3 = vrot.slane %v10368_v20, %v10781_v53  ;;  %v6008_v29 = vadd.f32 -1.0, %v745_v59  ;;  %v6048_v20 = vld [vmem:[%s11287_s1 + $0x184] sm:$0x7] }
 0x25d   :  { %v823_v32 = vunpack.c.l.bf16 %v6012_v23  ;;  %v421_v57 = vmax.f32 %v343_v42, %v414_v58  ;;  %v570_v22 = vadd.f32 %v556_v16, %v527_v0  ;;  %v683_v56 = vmul.f32 1e+30, %v5996_v50  ;;  %v6745_v31 = vpop.f32.mrf.mxu0  ;;  %v6072_v0 = vld [vmem:[%s11287_s1 + $0x1bc] sm:$0x7]  ;;  %v11942_v59 = vld [vmem:[#allocation73_spill] sm:$0xff] }
 0x25e   :  { %v790_v52 = vrot.slane %v10376_v5, %v10781_v53  ;;  %v2681_v2 = vmax.f32 %v2603_v27, %v10609_v21  ;;  %v761_v36 = vmul.f32 1e+30, %v6008_v29  ;;  %v901_v4 = vunpack.c.l.bf16 %v6024_v13  ;;  %v6060_v21 = vld [vmem:[%s11287_s1 + $0x1a0] sm:$0x7]  ;;  %v6084_v13 = vld [vmem:[%s11287_s1 + $0x1d8] sm:$0x7] }
 0x25f   :  { %v6020_v37 = vadd.f32 -1.0, %v823_v32  ;;  %v499_v44 = vmax.f32 %v421_v57, %v492_v1  ;;  %v648_v18 = vadd.f32 %v634_v9, %v605_v38  ;;  %v979_v43 = vunpack.c.l.bf16 %v6036_v47 }
 0x260   :  { %v2759_v16 = vmax.f32 %v2681_v2, %v10615_v35  ;;  %v726_v19 = vadd.f32 %v712_v3, %v683_v56  ;;  %v868_v5 = vrot.slane %v10384_v24, %v10781_v53  ;;  %v6032_v58 = vadd.f32 -1.0, %v901_v4 }
 0x261   :  { %v577_v48 = vmax.f32 %v499_v44, %v570_v22  ;;  %v839_v8 = vmul.f32 1e+30, %v6020_v37  ;;  %v6044_v23 = vadd.f32 -1.0, %v979_v43  ;;  %v1057_v49 = vunpack.c.l.bf16 %v6048_v20  ;;  %v6096_v22 = vld [vmem:[%s11287_s1 + $0x1f4] sm:$0x7] }
 0x262   :  { %v2837_v9 = vmax.f32 %v2759_v16, %v10620_v34  ;;  %v804_v35 = vadd.f32 %v790_v52, %v761_v36  ;;  %v946_v42 = vrot.slane %v11942_v59, %v10781_v53  ;;  %v917_v1 = vmul.f32 1e+30, %v6032_v58 }
 0x263   :  { %v655_v24 = vmax.f32 %v577_v48, %v648_v18  ;;  %v6056_v38 = vadd.f32 -1.0, %v1057_v49  ;;  %v1135_v50 = vunpack.c.l.bf16 %v6060_v21  ;;  %v1024_v3 = vrot.slane %v10400_v28, %v10781_v53 }
 0x264   :  { %v2915_v27 = vmax.f32 %v2837_v9, %v10627_v41  ;;  %v1213_v29 = vunpack.c.l.bf16 %v6072_v0  ;;  %v882_v34 = vadd.f32 %v868_v5, %v839_v8  ;;  %v995_v47 = vmul.f32 1e+30, %v6044_v23  ;;  %v6108_v41 = vld [vmem:[%s11287_s1 + $0x210] sm:$0x7]  ;;  %v11943_v5 = vld [vmem:[#allocation12_spill] sm:$0xff] }
 0x265   :  { %v733_v32 = vmax.f32 %v655_v24, %v726_v19  ;;  %v6068_v57 = vadd.f32 -1.0, %v1135_v50  ;;  %v1102_v52 = vrot.slane %v10408_v10, %v10781_v53  ;;  %v1291_v55 = vunpack.c.l.bf16 %v6084_v13  ;;  %v6120_v10 = vld [vmem:[%s11287_s1 + $0x22c] sm:$0x7]  ;;  %v11945_v13 = vld [vmem:[#allocation15_spill] sm:$0xff] }
 0x266   :  { %v2993_v56 = vmax.f32 %v2915_v27, %v10632_v60  ;;  %v960_v2 = vadd.f32 %v946_v42, %v917_v1  ;;  %v1073_v36 = vmul.f32 1e+30, %v6056_v38  ;;  %v6080_v37 = vadd.f32 -1.0, %v1213_v29  ;;  %v11944_v9 = vld [vmem:[#allocation74_spill] sm:$0xff] }
 0x267   :  { %v811_v28 = vmax.f32 %v733_v32, %v804_v35  ;;  %v1180_v20 = vrot.slane %v10418_v61, %v10781_v53  ;;  %v6092_v44 = vadd.f32 -1.0, %v1291_v55  ;;  %v1369_v18 = vunpack.c.l.bf16 %v6096_v22  ;;  %v6132_v61 = vld [vmem:[%s11287_s1 + $0x248] sm:$0x7] }
 0x268   :  { %v3071_v4 = vmax.f32 %v2993_v56, %v10640_v11  ;;  %v1038_v43 = vadd.f32 %v1024_v3, %v995_v47  ;;  %v1151_v31 = vmul.f32 1e+30, %v6068_v57  ;;  %v1447_v16 = vunpack.c.l.bf16 %v6108_v41  ;;  %v11946_v47 = vld [vmem:[#allocation22_spill] sm:$0xff]  ;;  %v11947_v56 = vld [vmem:[#allocation75_spill] sm:$0xff] }
 0x269   :  { %v889_v60 = vmax.f32 %v811_v28, %v882_v34  ;;  %v1258_v58 = vrot.slane %v11943_v5, %v10781_v53  ;;  %v6104_v21 = vadd.f32 -1.0, %v1369_v18  ;;  %v1116_v48 = vadd.f32 %v1102_v52, %v1073_v36  ;;  %v6180_v36 = vld [vmem:[%s11287_s1 + $0x2b8] sm:$0x7] }
 0x26a   :  { %v3149_v19 = vmax.f32 %v3071_v4, %v10645_v12  ;;  %v1229_v8 = vmul.f32 1e+30, %v6080_v37  ;;  %v1525_v23 = vunpack.c.l.bf16 %v6120_v10  ;;  %v1307_v0 = vmul.f32 1e+30, %v6092_v44  ;;  %v6144_v12 = vld [vmem:[%s11287_s1 + $0x264] sm:$0x7] }
 0x26b   :  { %v967_v11 = vmax.f32 %v889_v60, %v960_v2  ;;  %v1336_v35 = vrot.slane %v11944_v9, %v10781_v53  ;;  %v1194_v42 = vadd.f32 %v1180_v20, %v1151_v31  ;;  %v6116_v24 = vadd.f32 -1.0, %v1447_v16  ;;  %v11948_v37 = vld [vmem:[#allocation28_spill] sm:$0xff]  ;;  %v11949_v44 = vld [vmem:[#allocation9_spill] sm:$0xff]  ;;  %v6192_v16 = vld [vmem:[%s11287_s1 + $0x2d4] sm:$0x7] }
 0x26c   :  { %v3227_v49 = vmax.f32 %v3149_v19, %v10647_v40  ;;  %v1603_v1 = vunpack.c.l.bf16 %v6132_v61  ;;  %v1385_v50 = vmul.f32 1e+30, %v6104_v21  ;;  %v1414_v27 = vrot.slane %v11945_v13, %v10781_v53  ;;  %v6156_v40 = vld [vmem:[%s11287_s1 + $0x280] sm:$0x7]  ;;  %v11950_v19 = vld [vmem:[#allocation19_spill] sm:$0xff] }
 0x26d   :  { %v1045_v59 = vmax.f32 %v967_v11, %v1038_v43  ;;  %v1272_v29 = vadd.f32 %v1258_v58, %v1229_v8  ;;  %v6128_v32 = vadd.f32 -1.0, %v1525_v23  ;;  %v1681_v34 = vunpack.c.l.bf16 %v6144_v12  ;;  %v11951_v58 = vld [vmem:[#allocation13_spill] sm:$0xff]  ;;  %v6204_v12 = vld [vmem:[%s11287_s1 + $0x2f0] sm:$0x7] }
 0x26e   :  { %v3305_v38 = vmax.f32 %v3227_v49, %v10653_v30  ;;  %v1350_v22 = vadd.f32 %v1336_v35, %v1307_v0  ;;  %v1492_v52 = vrot.slane %v11947_v56, %v10781_v53  ;;  %v6168_v30 = vld [vmem:[%s11287_s1 + $0x29c] sm:$0x7]  ;;  %v1463_v41 = vmul.f32 1e+30, %v6116_v24 }
 0x26f   :  { %v1123_v3 = vmax.f32 %v1045_v59, %v1116_v48  ;;  %v6140_v28 = vadd.f32 -1.0, %v1603_v1  ;;  %v1759_v2 = vunpack.c.l.bf16 %v6156_v40  ;;  %v1428_v20 = vadd.f32 %v1414_v27, %v1385_v50  ;;  %v11952_v0 = vld [vmem:[#allocation76_spill] sm:$0xff]  ;;  %v11953_v50 = vld [vmem:[#allocation77_spill] sm:$0xff] }
 0x270   :  { %v3383_v57 = vmax.f32 %v3305_v38, %v11946_v47  ;;  %v1570_v18 = vrot.slane %v11949_v44, %v10781_v53  ;;  %v1541_v60 = vmul.f32 1e+30, %v6128_v32  ;;  %v6152_v43 = vadd.f32 -1.0, %v1681_v34  ;;  %v11954_v34 = vld [vmem:[#allocation24_spill] sm:$0xff] }
 0x271   :  { %v1201_v55 = vmax.f32 %v1123_v3, %v1194_v42  ;;  %v1837_v31 = vunpack.c.l.bf16 %v6168_v30  ;;  %v1648_v21 = vrot.slane %v11951_v58, %v10781_v53  ;;  %v1915_v61 = vunpack.c.l.bf16 %v6180_v36  ;;  %v11956_v36 = vld [vmem:[#allocation78_spill] sm:$0xff] }
 0x272   :  { %v3461_v4 = vmax.f32 %v3383_v57, %v11948_v37  ;;  %v1506_v48 = vadd.f32 %v1492_v52, %v1463_v41  ;;  %v1619_v8 = vmul.f32 1e+30, %v6140_v28  ;;  %v6164_v23 = vadd.f32 -1.0, %v1759_v2  ;;  %v11955_v57 = vld [vmem:[#allocation17_spill] sm:$0xff] }
 0x273   :  { %v1279_v10 = vmax.f32 %v1201_v55, %v1272_v29  ;;  %v1726_v9 = vrot.slane %v11952_v0, %v10781_v53  ;;  %v1993_v35 = vunpack.c.l.bf16 %v6192_v16  ;;  %v1584_v42 = vadd.f32 %v1570_v18, %v1541_v60  ;;  %v11957_v60 = vld [vmem:[#allocation23_spill] sm:$0xff]  ;;  %v6264_v0 = vld [vmem:[%s11287_s1 + $0x37c] sm:$0x7] }
 0x274   :  { %v3539_v5 = vmax.f32 %v3461_v4, %v11950_v19  ;;  %v1697_v24 = vmul.f32 1e+30, %v6152_v43  ;;  %v6176_v1 = vadd.f32 -1.0, %v1837_v31  ;;  %v1804_v13 = vrot.slane %v11953_v50, %v10781_v53  ;;  %v6240_v4 = vld [vmem:[%s11287_s1 + $0x344] sm:$0x7]  ;;  %v11958_v16 = vld [vmem:[#allocation79_spill] sm:$0xff] }
 0x275   :  { %v1357_v11 = vmax.f32 %v1279_v10, %v1350_v22  ;;  %v6188_v27 = vadd.f32 -1.0, %v1915_v61  ;;  %v1662_v3 = vadd.f32 %v1648_v21, %v1619_v8  ;;  %v1775_v29 = vmul.f32 1e+30, %v6164_v23  ;;  %v11960_v23 = vld [vmem:[#allocation80_spill] sm:$0xff]  ;;  %v11962_v50 = vld [vmem:[#allocation81_spill] sm:$0xff] }
 0x276   :  { %v3617_v49 = vmax.f32 %v3539_v5, %v10678_v14  ;;  %v6216_v14 = vld [vmem:[%s11287_s1 + $0x30c] sm:$0x7]  ;;  %v2071_v32 = vunpack.c.l.bf16 %v6204_v12  ;;  %v1882_v22 = vrot.slane %v11955_v57, %v10781_v53  ;;  %v6200_v56 = vadd.f32 -1.0, %v1993_v35 }
 0x277   :  { %v1435_v59 = vmax.f32 %v1357_v11, %v1428_v20  ;;  %v1740_v30 = vadd.f32 %v1726_v9, %v1697_v24  ;;  %v1853_v55 = vmul.f32 1e+30, %v6176_v1  ;;  %v2149_v41 = vunpack.c.l.bf16 %v6216_v14  ;;  %v11959_v11 = vld [vmem:[#allocation33_spill] sm:$0xff]  ;;  %v11961_v24 = vld [vmem:[#allocation20_spill] sm:$0xff] }
 0x278   :  { %v3695_v38 = vmax.f32 %v3617_v49, %v10683_v25  ;;  %v6228_v25 = vld [vmem:[%s11287_s1 + $0x328] sm:$0x7]  ;;  %v1931_v2 = vmul.f32 1e+30, %v6188_v27  ;;  %v1960_v37 = vrot.slane %v11956_v36, %v10781_v53  ;;  %v1818_v44 = vadd.f32 %v1804_v13, %v1775_v29  ;;  %v6288_v29 = vld [vmem:[%s11287_s1 + $0x3b4] sm:$0x7] }
 0x279   :  { %v1513_v40 = vmax.f32 %v1435_v59, %v1506_v48  ;;  %v6212_v18 = vadd.f32 -1.0, %v2071_v32  ;;  %v2227_v10 = vunpack.c.l.bf16 %v6228_v25  ;;  %v2009_v31 = vmul.f32 1e+30, %v6200_v56 }
 0x27a   :  { %v3773_v47 = vmax.f32 %v3695_v38, %v11954_v34  ;;  %v2038_v19 = vrot.slane %v11958_v16, %v10781_v53  ;;  %v1896_v58 = vadd.f32 %v1882_v22, %v1853_v55  ;;  %v6224_v21 = vadd.f32 -1.0, %v2149_v41  ;;  %v11963_v34 = vld [vmem:[#allocation21_spill] sm:$0xff] }
 0x27b   :  { %v1591_v52 = vmax.f32 %v1513_v40, %v1584_v42  ;;  %v2305_v61 = vunpack.c.l.bf16 %v6240_v4  ;;  %v1974_v8 = vadd.f32 %v1960_v37, %v1931_v2  ;;  %v2116_v49 = vrot.slane %v11960_v23, %v10781_v53  ;;  %v6276_v42 = vld [vmem:[%s11287_s1 + $0x398] sm:$0x7]  ;;  %v11964_v55 = vld [vmem:[#allocation25_spill] sm:$0xff]  ;;  %v6300_v2 = vld [vmem:[%s11287_s1 + $0x3d0] sm:$0x7] }
 0x27c   :  { %v3851_v28 = vmax.f32 %v3773_v47, %v10691_v15  ;;  %v6252_v15 = vld [vmem:[%s11287_s1 + $0x360] sm:$0x7]  ;;  %v2087_v35 = vmul.f32 1e+30, %v6212_v18  ;;  %v6236_v12 = vadd.f32 -1.0, %v2227_v10  ;;  %v2052_v38 = vadd.f32 %v2038_v19, %v2009_v31 }
 0x27d   :  { %v1669_v20 = vmax.f32 %v1591_v52, %v1662_v3  ;;  %v2383_v59 = vunpack.c.l.bf16 %v6252_v15  ;;  %v2194_v13 = vrot.slane %v11962_v50, %v10781_v53  ;;  %v2165_v14 = vmul.f32 1e+30, %v6224_v21  ;;  %v7075_v15 = vld [vmem:[%s11286_s0 + $0xd9] sm:$0x7f] }
 0x27e   :  { %v3929_v43 = vmax.f32 %v3851_v28, %v11957_v60  ;;  %v6248_v40 = vadd.f32 -1.0, %v2305_v61  ;;  %v2461_v3 = vunpack.c.l.bf16 %v6264_v0  ;;  %v2272_v47 = vrot.slane %v11963_v34, %v10781_v53  ;;  %v6336_v0 = vld [vmem:[%s11287_s1 + $0x424] sm:$0x7] }
 0x27f   :  { %v1747_v5 = vmax.f32 %v1669_v20, %v1740_v30  ;;  %v2539_v57 = vunpack.c.l.bf16 %v6276_v42  ;;  %v2130_v56 = vadd.f32 %v2116_v49, %v2087_v35  ;;  %v2243_v25 = vmul.f32 1e+30, %v6236_v12  ;;  %v11965_v20 = vld [vmem:[#allocation32_spill] sm:$0xff] }
 0x280   :  { %v4007_v48 = vmax.f32 %v3929_v43, %v11959_v11  ;;  %v6260_v52 = vadd.f32 -1.0, %v2383_v59  ;;  %v2350_v41 = vrot.slane %v11964_v55, %v10781_v53  ;;  %v2617_v28 = vunpack.c.l.bf16 %v6288_v29 }
 0x281   :  { %v1825_v9 = vmax.f32 %v1747_v5, %v1818_v44  ;;  %v2321_v37 = vmul.f32 1e+30, %v6248_v40  ;;  %v6272_v4 = vadd.f32 -1.0, %v2461_v3  ;;  %v2428_v18 = vrot.slane %v10586_v54, %v10781_v53  ;;  %v6324_v54 = vld [vmem:[%s11287_s1 + $0x408] sm:$0x7] }
 0x282   :  { %v4085_v1 = vmax.f32 %v4007_v48, %v11961_v24  ;;  %v6284_v10 = vadd.f32 -1.0, %v2539_v57  ;;  %v2286_v43 = vadd.f32 %v2272_v47, %v2243_v25  ;;  %v2399_v31 = vmul.f32 1e+30, %v6260_v52  ;;  %v7079_v52 = vld [vmem:[%s11286_s0 + $0xf5] sm:$0x7f] }
 0x283   :  { %v1903_v27 = vmax.f32 %v1825_v9, %v1896_v58  ;;  %v2695_v16 = vunpack.c.l.bf16 %v6300_v2  ;;  %v2506_v5 = vrot.slane %v7075_v15, %v10781_v53  ;;  %v6296_v58 = vadd.f32 -1.0, %v2617_v28 }
 0x284   :  { %v4163_v32 = vmax.f32 %v4085_v1, %v10716_v39  ;;  %v2208_v39 = vadd.f32 %v2194_v13, %v2165_v14  ;;  %v2364_v61 = vadd.f32 %v2350_v41, %v2321_v37  ;;  %v2477_v11 = vmul.f32 1e+30, %v6272_v4 }
 0x285   :  { %v1981_v22 = vmax.f32 %v1903_v27, %v1974_v8  ;;  %v2555_v23 = vmul.f32 1e+30, %v6284_v10  ;;  %v2442_v35 = vadd.f32 %v2428_v18, %v2399_v31  ;;  %v6308_v12 = vadd.f32 -1.0, %v2695_v16  ;;  %v6396_v31 = vld [vmem:[%s11287_s1 + $0x4b0] sm:$0x7] }
 0x286   :  { %v4241_v30 = vmax.f32 %v4163_v32, %v10721_v33  ;;  %v6312_v33 = vld [vmem:[%s11287_s1 + $0x3ec] sm:$0x7]  ;;  %v2851_v59 = vunpack.c.l.bf16 %v6324_v54  ;;  %v2633_v24 = vmul.f32 1e+30, %v6296_v58  ;;  %v2520_v13 = vadd.f32 %v2506_v5, %v2477_v11  ;;  %v6360_v32 = vld [vmem:[%s11287_s1 + $0x45c] sm:$0x7] }
 0x287   :  { %v2059_v36 = vmax.f32 %v1981_v22, %v2052_v38  ;;  %v2773_v48 = vunpack.c.l.bf16 %v6312_v33  ;;  %v6348_v38 = vld [vmem:[%s11287_s1 + $0x440] sm:$0x7]  ;;  %v2929_v14 = vunpack.c.l.bf16 %v6336_v0  ;;  %v2711_v47 = vmul.f32 1e+30, %v6308_v12  ;;  %v6408_v11 = vld [vmem:[%s11287_s1 + $0x4cc] sm:$0x7] }
 0x288   :  { %v4319_v44 = vmax.f32 %v4241_v30, %v11965_v20  ;;  %v6332_v57 = vadd.f32 -1.0, %v2851_v59  ;;  %v3007_v22 = vunpack.c.l.bf16 %v6348_v38  ;;  %v2818_v30 = vrot.slane %v7079_v52, %v10781_v53  ;;  %v11966_v58 = vld [vmem:[#allocation29_spill] sm:$0xff] }
 0x289   :  { %v2137_v60 = vmax.f32 %v2059_v36, %v2130_v56  ;;  %v6320_v27 = vadd.f32 -1.0, %v2773_v48  ;;  %v6372_v56 = vld [vmem:[%s11287_s1 + $0x478] sm:$0x7]  ;;  %v6344_v28 = vadd.f32 -1.0, %v2929_v14  ;;  %v3085_v2 = vunpack.c.l.bf16 %v6360_v32  ;;  %v6384_v36 = vld [vmem:[%s11287_s1 + $0x494] sm:$0x7] }
 0x28a   :  { %v4397_v19 = vmax.f32 %v4319_v44, %v10729_v6  ;;  %v7076_v6 = vld [vmem:[%s11286_s0 + $0xe0] sm:$0x7f]  ;;  %v3163_v4 = vunpack.c.l.bf16 %v6372_v56  ;;  %v2867_v18 = vmul.f32 1e+30, %v6332_v57  ;;  %v6356_v10 = vadd.f32 -1.0, %v3007_v22 }
 0x28b   :  { %v2215_v21 = vmax.f32 %v2137_v60, %v2208_v39  ;;  %v2584_v49 = vrot.slane %v7076_v6, %v10781_v53  ;;  %v2789_v41 = vmul.f32 1e+30, %v6320_v27  ;;  %v7081_v60 = vld [vmem:[%s11286_s0 + $0x103] sm:$0x7f]  ;;  %v2945_v15 = vmul.f32 1e+30, %v6344_v28 }
 0x28c   :  { %v4475_v8 = vmax.f32 %v4397_v19, %v10734_v62  ;;  %v7077_v62 = vld [vmem:[%s11286_s0 + $0xe7] sm:$0x7f]  ;;  %v6368_v5 = vadd.f32 -1.0, %v3085_v2  ;;  %v3319_v6 = vunpack.c.l.bf16 %v6396_v31  ;;  %v6432_v14 = vld [vmem:[%s11287_s1 + $0x504] sm:$0x7] }
 0x28d   :  { %v2293_v9 = vmax.f32 %v2215_v21, %v2286_v43  ;;  %v2662_v1 = vrot.slane %v7077_v62, %v10781_v53  ;;  %v2598_v3 = vadd.f32 %v2584_v49, %v2555_v23  ;;  %v2974_v43 = vrot.slane %v7081_v60, %v10781_v53  ;;  %v11967_v49 = vld [vmem:[#allocation26_spill] sm:$0xff]  ;;  %v7085_v57 = vld [vmem:[%s11286_s0 + $0x11f] sm:$0x7f] }
 0x28e   :  { %v4553_v42 = vmax.f32 %v4475_v8, %v10741_v63  ;;  %v7078_v63 = vld [vmem:[%s11286_s0 + $0xee] sm:$0x7f]  ;;  %v2832_v19 = vadd.f32 %v2818_v30, %v2789_v41  ;;  %v3023_v23 = vmul.f32 1e+30, %v6356_v10  ;;  %v6420_v59 = vld [vmem:[%s11287_s1 + $0x4e8] sm:$0x7]  ;;  %v3286_v22 = vrot.slane %v7085_v57, %v10781_v53 }
 0x28f   :  { %v2371_v50 = vmax.f32 %v2293_v9, %v2364_v61  ;;  %v2740_v29 = vrot.slane %v7078_v63, %v10781_v53  ;;  %v2676_v25 = vadd.f32 %v2662_v1, %v2633_v24  ;;  %v6380_v61 = vadd.f32 -1.0, %v3163_v4  ;;  %v7083_v9 = vld [vmem:[%s11286_s0 + $0x111] sm:$0x7f]  ;;  %v6444_v56 = vld [vmem:[%s11287_s1 + $0x520] sm:$0x7] }
 0x290   :  { %v4631_v40 = vmax.f32 %v4553_v42, %v10746_v26  ;;  %v2988_v24 = vadd.f32 %v2974_v43, %v2945_v15  ;;  %v3101_v62 = vmul.f32 1e+30, %v6368_v5  ;;  %v3397_v1 = vunpack.c.l.bf16 %v6408_v11  ;;  %v7086_v28 = vld [vmem:[%s11286_s0 + $0x126] sm:$0x7f]  ;;  %v7088_v5 = vld [vmem:[%s11286_s0 + $0x134] sm:$0x7f] }
 0x291   :  { %v2449_v34 = vmax.f32 %v2371_v50, %v2442_v35  ;;  %v2754_v44 = vadd.f32 %v2740_v29, %v2711_v47  ;;  %v3130_v35 = vrot.slane %v7083_v9, %v10781_v53  ;;  %v3179_v50 = vmul.f32 1e+30, %v6380_v61  ;;  %v7092_v57 = vld [vmem:[%s11286_s0 + $0x150] sm:$0x7f] }
 0x292   :  { %v4709_v26 = vmax.f32 %v4631_v40, %v10757_v46  ;;  %v7080_v46 = vld [vmem:[%s11286_s0 + $0xfc] sm:$0x7f]  ;;  %v6404_v63 = vadd.f32 -1.0, %v3319_v6  ;;  %v3475_v29 = vunpack.c.l.bf16 %v6420_v59  ;;  %v6416_v52 = vadd.f32 -1.0, %v3397_v1  ;;  %v6492_v6 = vld [vmem:[%s11287_s1 + $0x590] sm:$0x7] }
 0x293   :  { %v2527_v55 = vmax.f32 %v2449_v34, %v2520_v13  ;;  %v2896_v37 = vrot.slane %v7080_v46, %v10781_v53  ;;  %v7084_v13 = vld [vmem:[%s11286_s0 + $0x118] sm:$0x7f]  ;;  %v3553_v30 = vunpack.c.l.bf16 %v6432_v14  ;;  %v3364_v2 = vrot.slane %v7086_v28, %v10781_v53 }
 0x294   :  { %v4787_v39 = vmax.f32 %v4709_v26, %v10768_v51  ;;  %v3241_v51 = vunpack.c.l.bf16 %v6384_v36  ;;  %v3208_v27 = vrot.slane %v7084_v13, %v10781_v53  ;;  %v6456_v36 = vld [vmem:[%s11287_s1 + $0x53c] sm:$0x7]  ;;  %v3335_v46 = vmul.f32 1e+30, %v6404_v63  ;;  %v7091_v13 = vld [vmem:[%s11286_s0 + $0x149] sm:$0x7f] }
 0x295   :  { %v2605_v20 = vmax.f32 %v2527_v55, %v2598_v3  ;;  %v2910_v8 = vadd.f32 %v2896_v37, %v2867_v18  ;;  %v6428_v37 = vadd.f32 -1.0, %v3475_v29  ;;  %v3631_v4 = vunpack.c.l.bf16 %v6444_v56  ;;  %v6528_v56 = vld [vmem:[%s11287_s1 + $0x5e4] sm:$0x7]  ;;  %v7093_v28 = vld [vmem:[%s11286_s0 + $0x157] sm:$0x7f] }
 0x296   :  { %v4865_v33 = vmax.f32 %v4787_v39, %v10770_v7  ;;  %v7082_v7 = vld [vmem:[%s11286_s0 + $0x10a] sm:$0x7f]  ;;  %v6392_v12 = vadd.f32 -1.0, %v3241_v51  ;;  %v3222_v41 = vadd.f32 %v3208_v27, %v3179_v50  ;;  %v11968_v18 = vmov 0.0  }
 0x297   :  { %v2683_v16 = vmax.f32 %v2605_v20, %v2676_v25  ;;  %v3052_v21 = vrot.slane %v7082_v7, %v10781_v53  ;;  %v3144_v25 = vadd.f32 %v3130_v35, %v3101_v62  ;;  %v6468_v20 = vld [vmem:[%s11287_s1 + $0x558] sm:$0x7]  ;;  %v3413_v51 = vmul.f32 1e+30, %v6416_v52 }
 0x298   :  { %v4943_v54 = vmax.f32 %v4865_v33, %v11966_v58  ;;  %v3257_v47 = vmul.f32 1e+30, %v6392_v12  ;;  %v7087_v33 = vld [vmem:[%s11286_s0 + $0x12d] sm:$0x7f]  ;;  %v6440_v31 = vadd.f32 -1.0, %v3553_v30  ;;  %v3520_v58 = vrot.slane %v7088_v5, %v10781_v53 }
 0x299   :  { %v2761_v48 = vmax.f32 %v2683_v16, %v2754_v44  ;;  %v3066_v3 = vadd.f32 %v3052_v21, %v3023_v23  ;;  %v3442_v60 = vrot.slane %v7087_v33, %v10781_v53  ;;  %v3709_v16 = vunpack.c.l.bf16 %v6456_v36  ;;  %v7090_v12 = vld [vmem:[%s11286_s0 + $0x142] sm:$0x7f]  ;;  %v6552_v33 = vld [vmem:[%s11287_s1 + $0x61c] sm:$0x7] }
 0x29a   :  { %v5021_v0 = vmax.f32 %v4943_v54, %v11967_v49  ;;  %v3300_v10 = vadd.f32 %v3286_v22, %v3257_v47  ;;  %v3787_v54 = vunpack.c.l.bf16 %v6468_v20  ;;  %v3378_v21 = vadd.f32 %v3364_v2, %v3335_v46  ;;  %v6540_v36 = vld [vmem:[%s11287_s1 + $0x600] sm:$0x7] }
 0x29b   :  { %v2839_v42 = vmax.f32 %v2761_v48, %v2832_v19  ;;  %v6480_v19 = vld [vmem:[%s11287_s1 + $0x574] sm:$0x7]  ;;  %v3491_v61 = vmul.f32 1e+30, %v6428_v37  ;;  %v6452_v11 = vadd.f32 -1.0, %v3631_v4  ;;  %v6464_v35 = vadd.f32 -1.0, %v3709_v16 }
 0x29c   :  { %v5028_v38 = vmax.f32 %v5021_v0, 0.0  ;;  %v11061_v32 = vpop.f32.mrf.mxu1  ;;  %v7089_v48 = vld [vmem:[%s11286_s0 + $0x13b] sm:$0x7f]  ;;  %v3865_v23 = vunpack.c.l.bf16 %v6480_v19  ;;  %v3456_v0 = vadd.f32 %v3442_v60, %v3413_v51  ;;  %v3569_v9 = vmul.f32 1e+30, %v6440_v31 }
 0x29d   :  { %v2917_v40 = vmax.f32 %v2839_v42, %v2910_v8  ;;  %v3598_v8 = vrot.slane %v7089_v48, %v10781_v53  ;;  %v3676_v59 = vrot.slane %v7090_v12, %v10781_v53  ;;  %v6476_v42 = vadd.f32 -1.0, %v3787_v54  ;;  %v6564_v16 = vld [vmem:[%s11287_s1 + $0x638] sm:$0x7] }
 0x29e   :  { %v5035_v34 = vpack.c.bf16 %v5028_v38, %v5028_v38  ;;  %v11070_v55 = vpop.f32.mrf.mxu1  ;;  %v3534_v1 = vadd.f32 %v3520_v58, %v3491_v61  ;;  %v3647_v38 = vmul.f32 1e+30, %v6452_v11  ;;  %v3943_v50 = vunpack.c.l.bf16 %v6492_v6  ;;  %v6576_v61 = vld [vmem:[%s11287_s1 + $0x654] sm:$0x7]  ;;  %v7096_v11 = vld [vmem:[%s11286_s0 + $0x16c] sm:$0x7f] }
 0x29f   :  { %v2995_v26 = vmax.f32 %v2917_v40, %v2988_v24  ;;  %v6504_v24 = vld [vmem:[%s11287_s1 + $0x5ac] sm:$0x7]  ;;  %v3754_v27 = vrot.slane %v7091_v13, %v10781_v53  ;;  %v6488_v14 = vadd.f32 -1.0, %v3865_v23  ;;  %v6516_v40 = vld [vmem:[%s11287_s1 + $0x5c8] sm:$0x7]  ;;  %v3612_v63 = vadd.f32 %v3598_v8, %v3569_v9 }
 0x2a0   :  { %5554 = vmatmul.mubr.bf16.vlgmr.msra.gmra.mxu0 %v5035_v34  ;;  %v6766_v44 = vpop.f32.mrf.mxu1  ;;  %v3725_v29 = vmul.f32 1e+30, %v6464_v35  ;;  %v4021_v34 = vunpack.c.l.bf16 %v6504_v24  ;;  %v3803_v47 = vmul.f32 1e+30, %v6476_v42  ;;  %v3832_v22 = vrot.slane %v7092_v57, %v10781_v53  ;;  %v7097_v35 = vld [vmem:[%s11286_s0 + $0x173] sm:$0x7f] }
 0x2a1   :  { %v3073_v39 = vmax.f32 %v2995_v26, %v3066_v3  ;;  %6843 = vmatprep.mubr.msk.bf16.mxu0 %vm7131_vm0, %v11968_v18  ;;  %v6500_v52 = vadd.f32 -1.0, %v3943_v50  ;;  %v4099_v30 = vunpack.c.l.bf16 %v6516_v40  ;;  %v3910_v2 = vrot.slane %v7093_v28, %v10781_v53  ;;  %v7094_v44 = vld [vmem:[%s11286_s0 + $0x15e] sm:$0x7f]  ;;  %v6588_v42 = vld [vmem:[%s11287_s1 + $0x670] sm:$0x7] }
 0x2a2   :  { %v6767_v15 = vpop.f32.mrf.mxu1  ;;  %v3768_v46 = vadd.f32 %v3754_v27, %v3725_v29  ;;  %v6512_v37 = vadd.f32 -1.0, %v4021_v34  ;;  %v4177_v4 = vunpack.c.l.bf16 %v6528_v56  ;;  %v3846_v20 = vadd.f32 %v3832_v22, %v3803_v47  ;;  %v6600_v13 = vld [vmem:[%s11287_s1 + $0x68c] sm:$0x7]  ;;  %v6612_v47 = vld [vmem:[%s11287_s1 + $0x6a8] sm:$0x7] }
 0x2a3   :  { %v3151_v43 = vmax.f32 %v3073_v39, %v3144_v25  ;;  %v3690_v25 = vadd.f32 %v3676_v59, %v3647_v38  ;;  %v6524_v51 = vadd.f32 -1.0, %v4099_v30  ;;  %v4255_v31 = vunpack.c.l.bf16 %v6540_v36  ;;  %v7095_v15 = vld [vmem:[%s11286_s0 + $0x165] sm:$0x7f] }
 0x2a4   :  { %v4066_v5 = vrot.slane %v7095_v15, %v10781_v53  ;;  %v4037_v54 = vmul.f32 1e+30, %v6512_v37  ;;  %v4144_v48 = vrot.slane %v7096_v11, %v10781_v53  ;;  %v4411_v8 = vunpack.c.l.bf16 %v6564_v16  ;;  %v7101_v37 = vld [vmem:[%s11286_s0 + $0x18f] sm:$0x7f]  ;;  %v6648_v16 = vld [vmem:[%s11287_s1 + $0x6fc] sm:$0x7] }
 0x2a5   :  { %v3229_v7 = vmax.f32 %v3151_v43, %v3222_v41  ;;  %v3881_v41 = vmul.f32 1e+30, %v6488_v14  ;;  %v3959_v43 = vmul.f32 1e+30, %v6500_v52  ;;  %v11153_v23 = vadd.f32 %v11070_v55, %v11061_v32  ;;  %v7098_v55 = vld [vmem:[%s11286_s0 + $0x17a] sm:$0x7f] }
 0x2a6   :  { %v6548_v9 = vadd.f32 -1.0, %v4255_v31  ;;  %v4222_v12 = vrot.slane %v7097_v35, %v10781_v53  ;;  %v4489_v59 = vunpack.c.l.bf16 %v6576_v61  ;;  %v4300_v38 = vrot.slane %v7098_v55, %v10781_v53  ;;  %v7100_v52 = vld [vmem:[%s11286_s0 + $0x188] sm:$0x7f] }
 0x2a7   :  { %v3307_v49 = vmax.f32 %v3229_v7, %v3300_v10  ;;  %v3988_v10 = vrot.slane %v7094_v44, %v10781_v53  ;;  %v3924_v19 = vadd.f32 %v3910_v2, %v3881_v41  ;;  %v6536_v7 = vadd.f32 -1.0, %v4177_v4  ;;  %v6624_v41 = vld [vmem:[%s11287_s1 + $0x6c4] sm:$0x7] }
 0x2a8   :  { %v6572_v50 = vadd.f32 -1.0, %v4411_v8  ;;  %v4271_v40 = vmul.f32 1e+30, %v6548_v9  ;;  %v6584_v34 = vadd.f32 -1.0, %v4489_v59  ;;  %v4456_v30 = vrot.slane %v7100_v52, %v10781_v53  ;;  %v7105_v59 = vld [vmem:[%s11286_s0 + $0x1ab] sm:$0x7f] }
 0x2a9   :  { %v3385_v62 = vmax.f32 %v3307_v49, %v3378_v21  ;;  %v4333_v21 = vunpack.c.l.bf16 %v6552_v33  ;;  %v4002_v49 = vadd.f32 %v3988_v10, %v3959_v43  ;;  %v4534_v4 = vrot.slane %v7101_v37, %v10781_v53  ;;  %v6904_v52 = vld [vmem:[%s11291_s5 + $0x38] sm:$0xff]  }
 0x2aa   :  { %v4314_v2 = vadd.f32 %v4300_v38, %v4271_v40  ;;  %v4957_v8 = vunpack.c.l.bf16 %v6648_v16  ;;  %v6912_v37 = vld [vmem:[%s11293_s7 + $0x18] sm:$0xff]  }
 0x2ab   :  { %v3463_v3 = vmax.f32 %v3385_v62, %v3456_v0  ;;  %v4115_v0 = vmul.f32 1e+30, %v6524_v51  ;;  %v4080_v62 = vadd.f32 %v4066_v5, %v4037_v54  ;;  %v6560_v32 = vadd.f32 -1.0, %v4333_v21  ;;  %v7102_v51 = vld [vmem:[%s11286_s0 + $0x196] sm:$0x7f]  ;;  %6836 = vmatpush3.bf16.msra.mxu0 %v6912_v37 }
 0x2ac   :  { %v4612_v31 = vrot.slane %v7102_v51, %v10781_v53  ;;  %6837 = vmatprep.subr.bf16.mxu0 %v11968_v18 }
 0x2ad   :  { %v3541_v26 = vmax.f32 %v3463_v3, %v3534_v1  ;;  %v4193_v1 = vmul.f32 1e+30, %v6536_v7  ;;  %v4158_v14 = vadd.f32 %v4144_v48, %v4115_v0  ;;  %v4567_v3 = vunpack.c.l.bf16 %v6588_v42  ;;  %v7103_v7 = vld [vmem:[%s11286_s0 + $0x19d] sm:$0x7f] }
 0x2ae   :  { %v4349_v56 = vmul.f32 1e+30, %v6560_v32  ;;  %v4690_v21 = vrot.slane %v7103_v7, %v10781_v53  ;;  %v4846_v42 = vrot.slane %v7105_v59, %v10781_v53  ;;  %v6656_v32 = vadd.f32 -1.0, %v4957_v8  ;;  %v5799_v59 = vld [vmem:[%s11288_s2] sm:$0x3] }
 0x2af   :  { %v3619_v39 = vmax.f32 %v3541_v26, %v3612_v63  ;;  %v7099_v63 = vld [vmem:[%s11286_s0 + $0x181] sm:$0x7f]  ;;  %v4236_v22 = vadd.f32 %v4222_v12, %v4193_v1  ;;  %v4645_v26 = vunpack.c.l.bf16 %v6600_v13  ;;  %v6596_v36 = vadd.f32 -1.0, %v4567_v3  ;;  %v7106_v13 = vld [vmem:[%s11286_s0 + $0x1b2] sm:$0x7f] }
 0x2b0   :  { %v4378_v29 = vrot.slane %v7099_v63, %v10781_v53  ;;  %v4973_v3 = vmul.f32 1e+30, %v6656_v32  ;;  %v7107_v63 = vld [vmem:[%s11286_s0 + $0x1b9] sm:$0x7f] }
 0x2b1   :  { %v3697_v60 = vmax.f32 %v3619_v39, %v3690_v25  ;;  %v4427_v25 = vmul.f32 1e+30, %v6572_v50  ;;  %v4723_v39 = vunpack.c.l.bf16 %v6612_v47  ;;  %v6608_v33 = vadd.f32 -1.0, %v4645_v26 }
 0x2b2   :  { %v4392_v10 = vadd.f32 %v4378_v29, %v4349_v56  ;;  %v4583_v15 = vmul.f32 1e+30, %v6596_v36  ;;  %v5002_v29 = vrot.slane %v7107_v63, %v10781_v53  ;;  %v6909_v36 = vld [vmem:[%s11291_s5 + $0x10] sm:$0xff]  }
 0x2b3   :  { %v3775_v58 = vmax.f32 %v3697_v60, %v3768_v46  ;;  %v4505_v46 = vmul.f32 1e+30, %v6584_v34  ;;  %v4801_v60 = vunpack.c.l.bf16 %v6624_v41  ;;  %v4470_v43 = vadd.f32 %v4456_v30, %v4427_v25  ;;  %v6905_v41 = vld [vmem:[%s11291_s5 + $0x30] sm:$0xff]  }
 0x2b4   :  { %v6620_v5 = vadd.f32 -1.0, %v4723_v39  ;;  %v4661_v11 = vmul.f32 1e+30, %v6608_v33  ;;  %v4626_v9 = vadd.f32 %v4612_v31, %v4583_v15  ;;  %v6910_v39 = vld [vmem:[%s11291_s5 + $0x8] sm:$0xff]  }
 0x2b5   :  { %v3853_v6 = vmax.f32 %v3775_v58, %v3846_v20  ;;  %v6636_v20 = vld [vmem:[%s11287_s1 + $0x6e0] sm:$0x7]  ;;  %v4548_v54 = vadd.f32 %v4534_v4, %v4505_v46  ;;  %v6632_v48 = vadd.f32 -1.0, %v4801_v60  ;;  %v6913_v4 = vld [vmem:[%s11293_s7 + $0x10] sm:$0xff]   ;;  %v6743_v60 = vadd.f32 %v10839_v45, %v10832_v17  ;;  %v6914_v17 = vld [vmem:[%s11293_s7 + $0x8] sm:$0xff]  }
 0x2b6   :  { %v4879_v58 = vunpack.c.l.bf16 %v6636_v20  ;;  %v4739_v35 = vmul.f32 1e+30, %v6620_v5  ;;  %v6911_v46 = vld [vmem:[%s11291_s5] sm:$0xff]   ;;  %6838 = vmatpush3.bf16.msra.mxu0 %v6913_v4 }
 0x2b7   :  { %v3931_v24 = vmax.f32 %v3853_v6, %v3924_v19  ;;  %v7104_v6 = vld [vmem:[%s11286_s0 + $0x1a4] sm:$0x7f]  ;;  %v4817_v1 = vmul.f32 1e+30, %v6632_v48  ;;  %6839 = vmatprep.subr.bf16.mxu0 %v11968_v18 }
 0x2b8   :  { %v6644_v12 = vadd.f32 -1.0, %v4879_v58  ;;  %v6915_v45 = vld [vmem:[%s11293_s7] sm:$0xff]  }
 0x2b9   :  { %v4009_v27 = vmax.f32 %v3931_v24, %v4002_v49  ;;  %v4768_v49 = vrot.slane %v7104_v6, %v10781_v53  ;;  %v4860_v40 = vadd.f32 %v4846_v42, %v4817_v1 }
 0x2ba   :  { %v4895_v50 = vmul.f32 1e+30, %v6644_v12  ;;  %6840 = vmatpush3.bf16.msra.mxu0 %v6914_v17 }
 0x2bb   :  { %v4087_v57 = vmax.f32 %v4009_v27, %v4080_v62  ;;  %v4704_v62 = vadd.f32 %v4690_v21, %v4661_v11  ;;  %v4782_v38 = vadd.f32 %v4768_v49, %v4739_v35  ;;  %v4924_v27 = vrot.slane %v7106_v13, %v10781_v53  ;;  %v6906_v53 = vld [vmem:[%s11291_s5 + $0x28] sm:$0xff]   ;;  %6841 = vmatprep.subr.bf16.mxu0 %v11968_v18  ;;  %v6717_v35 = vld [vmem:[%s11294_s8] ss:$0 sm:$0xff] }
 0x2bd   :  { %v4165_v28 = vmax.f32 %v4087_v57, %v4158_v14  ;;  %v4938_v47 = vadd.f32 %v4924_v27, %v4895_v50 }
 0x2be   :  { %6842 = vmatpush3.bf16.msra.mxu0 %v6915_v45 }
 0x2bf   :  { %v4243_v44 = vmax.f32 %v4165_v28, %v4236_v22  ;;  %v5016_v22 = vadd.f32 %v5002_v29, %v4973_v3  ;;  %v6907_v28 = vld [vmem:[%s11291_s5 + $0x20] sm:$0xff]  }
 0x2c1   :  { %v4321_v19 = vmax.f32 %v4243_v44, %v4314_v2  ;;  %v6908_v2 = vld [vmem:[%s11291_s5 + $0x18] sm:$0xff]  }
 0x2c3   :  { %v4399_v61 = vmax.f32 %v4321_v19, %v4392_v10 }
 0x2c5   :  { %v4477_v0 = vmax.f32 %v4399_v61, %v4470_v43  ;;  %v6657_v43 = vld [vmem:[%s11290_s4] ss:$0 sm:$0xff] }
 0x2c6   :  { %v5476_v51 = vadd.f32 %v6743_v60, %v6657_v43 }
 0x2c7   :  { %v4555_v24 = vmax.f32 %v4477_v0, %v4548_v54 }
 0x2c8   :  { %v5516_v16 = vadd.f32 %v11153_v23, %v5476_v51  ;;  %v6708_v23 = vld [vmem:[%s11292_s6] ss:$0 sm:$0xff]  ;;  %s7132_s6 = smov [#allocation2]  }
 0x2c9   :  { %v4633_v55 = vmax.f32 %v4555_v24, %v4626_v9  ;;  %s5886_s25 = sshll.u32 %s7132_s6, 4  ;;  %s5887_s25 = int_to_ptr.vmem [resolvable:$true] %s5886_s25 }
 0x2ca   :  { %s7108_s8 = scalar_lea.vmem %s5887_s25, 32  ;;  %p7113_p1 = scmp.lt.s32.totalorder %s5887_s25, %s5887_s25 }
 0x2cb   :  { %v4711_v14 = vmax.f32 %v4633_v55, %v4704_v62  ;;  %p7109_p0 = scmp.ne.s32.totalorder %s5887_s25, %s7108_s8  ;;  %p7114_p2 = scmp.lt.s32.totalorder %s7108_s8, %s7108_s8 }
 0x2cd   :  { %v4789_v34 = vmax.f32 %v4711_v14, %v4782_v38  ;;  %p7115_p3 = por %p7114_p2, %p7113_p1 }
 0x2cf   :  { %v4867_v57 = vmax.f32 %v4789_v34, %v4860_v40  ;;  %p7116_p4 = pnand %p7115_p3, %p7109_p0 }
 0x2d1   :  { %v4945_v56 = vmax.f32 %v4867_v57, %v4938_v47 }
 0x2d3   :  { %v5023_v26 = vmax.f32 %v4945_v56, %v5016_v22 }
 0x2d5   :  { %v5030_v25 = vmax.f32 %v5023_v26, 0.0 }
 0x2d7   :  { %v5037_v30 = vpack.c.bf16 %v5030_v25, %v5030_v25 }
 0x2d9   :  { %6812 = vmatmul.mubr.msk.bf16.vlgmr.msra.gmra.mxu1 %vm5437_vm1, %v5037_v30 }
 0x2da   :  { %6816 = vmatpush3.bf16.msra.mxu1 %v6904_v52  ;;  %6831 = vmatprep.mubr.msk.bf16.mxu1 %vm7131_vm0, %v11968_v18 }
 0x2db   :  { %6817 = vmatprep.subr.bf16.mxu1 %v11968_v18 }
 0x2de   :  { %6818 = vmatpush3.bf16.msra.mxu1 %v6905_v41 }
 0x2df   :  { %6819 = vmatprep.subr.bf16.mxu1 %v11968_v18 }
 0x2e2   :  { %6820 = vmatpush3.bf16.msra.mxu1 %v6906_v53 }
 0x2e3   :  { %6821 = vmatprep.subr.bf16.mxu1 %v11968_v18 }
 0x2e6   :  { %6822 = vmatpush3.bf16.msra.mxu1 %v6907_v28 }
 0x2e7   :  { %6823 = vmatprep.subr.bf16.mxu1 %v11968_v18 }
 0x2ea   :  { %6824 = vmatpush3.bf16.msra.mxu1 %v6908_v2 }
 0x2eb   :  { %6825 = vmatprep.subr.bf16.mxu1 %v11968_v18 }
 0x2ee   :  { %6826 = vmatpush3.bf16.msra.mxu1 %v6909_v36 }
 0x2ef   :  { %6827 = vmatprep.subr.bf16.mxu1 %v11968_v18 }
 0x2f2   :  { %6828 = vmatpush3.bf16.msra.mxu1 %v6910_v39 }
 0x2f3   :  { %6829 = vmatprep.subr.bf16.mxu1 %v11968_v18 }
 0x2f6   :  { %6830 = vmatpush3.bf16.msra.mxu1 %v6911_v46 }
 0x2f7   :  { %6847 = vmatprep.subr.mxu1 %v11968_v18 }
 0x360   :  { %v6785_v20 = vpop.f32.mrf.mxu0 }
 0x362   :  { %v6786_v44 = vpop.f32.mrf.mxu0 }
 0x363   :  { %v6787_v31 = vadd.f32 %v6786_v44, %v6785_v20 }
 0x364   :  { %v6788_v10 = vpop.f32.mrf.mxu0 }
 0x365   :  { %v5556_v19 = vadd.f32 %v6787_v31, %v5516_v16 }
 0x366   :  { %v6789_v33 = vpop.f32.mrf.mxu0 }
 0x399   :  { %v5595_v15 = vpop.f32.mrf.mxu1 }
 0x39a   :  { %v5596_v5 = vadd.f32 %v5595_v15, %v5556_v19 }
 0x39b   :  { %v6813_v58 = vpop.f32.mrf.mxu1 }
 0x39c   :  { %v5601_v54 = vmax.f32 %v5596_v5, 0.0 }
 0x39d   :  { %v5598_v7 = vpop.f32.mrf.mxu1 }
 0x39e   :  { %v5602_v21 = vpack.c.bf16 %v5601_v54, %v5601_v54 }
 0x39f   :  { %v6814_v61 = vpop.f32.mrf.mxu1 }
 0x3a0   :  { %6832 = vmatmul.mubr.bf16.vlgmr.msra.gmra.mxu1 %v5602_v21 }
 0x3a1   :  { %6849 = vmatprep.mubr.msk.f32.mxu1 %vm7131_vm0, %v11968_v18 }
 0x460   :  { %v5708_v11 = vpop.f32.mrf.mxu1 }
 0x461   :  { %v5709_v48 = vadd.f32 %v6708_v23, %v5708_v11 }
 0x462   :  { %v6833_v8 = vpop.f32.mrf.mxu1 }
 0x463   :  { %v5714_v6 = vmax.f32 %v5709_v48, 0.0 }
 0x464   :  { %v5711_v49 = vpop.f32.mrf.mxu1 }
 0x465   :  { %v5715_v0 = vpack.c.bf16 %v5714_v6, %v5714_v6 }
 0x466   :  { %v6834_v9 = vpop.f32.mrf.mxu1 }
 0x467   :  { %6844 = vmatmul.mubr.msk.bf16.vlgmr.msra.gmra.mxu0 %vm5755_vm2, %v5715_v0 }
 0x527   :  { %v5793_v12 = vpop.f32.mrf.mxu0 }
 0x528   :  { %v5794_v18 = vadd.f32 %v6717_v35, %v5793_v12 }
 0x529   :  { %v6845_v42 = vpop.f32.mrf.mxu0 }
 0x52a   :  { %6848 = vmatpush3.msk.msra.mxu1 %vm5804_vm3, %v5794_v18 }
 0x52b   :  { %v5796_v24 = vpop.f32.mrf.mxu0  ;;  %6850 = vmatmul.mubr.msk.f32.vlgmr.msra.gmra.mxu1 %vm5800_vm4, %v5799_v59 }
 0x52d   :  { %v6846_v62 = vpop.f32.mrf.mxu0 }
 0x5eb   :  { %v5874_v1 = vpop.f32.mrf.mxu1 }
 0x5ec   :  { %5879 = vst.msk [vmem:[#allocation2] sm:$0x3] %vm5878_vm5, %v5874_v1 }
 0x5ed   :  { %v6851_v32 = vpop.f32.mrf.mxu1 }
 0x5ee   :  { %7119 = shalt.err (!%p7116_p4)
}
 0x5ef   :  { %5889 = dma.vmem_to_hbm [thread:$0]  %s5887_s25, 32, %s11295_s9, [#allocation3]  }
 0x5f0   :  { %7128 = dma.done.wait [#allocation3], 32  }
 0x5f1   :  { %7129 = vsyncadd [#allocation3], 4294967264 }
 0x5f2   :  { %5893 = vsyncpa [#allocation3], 1 }

</bundles_post_ra>
